<compile_context>
chip_gen: v7x
topology: tpu7x:2x2x1
jax: 0.10.0
libtpu: 0.0.40
codegen_flags: <defaults>
</compile_context>

<pallas_src>
import functools

import jax
import jax.numpy as jnp
from jax import lax
from jax.experimental import pallas as pl
from jax.experimental.pallas import tpu as pltpu


def _lstm_policy_kernel(x_ref,
                        wih0_ref, whh0f_ref, whh0b_ref, b0_ref,        # layer 0 (VMEM)
                        wih1_hbm, whh1f_hbm, whh1b_hbm, b1_ref,        # layer 1 (big W in HBM)
                        wfc_hbm, bfc_ref,                               # FC (W in HBM)
                        probs_ref, hn_ref, cn_ref,
                        gx_ref, l0_ref,
                        wih1_s, whh1f_s, whh1b_s, wfc_s, sems,
                        *, T, Bp, H, D):
    """Whole 2-layer bidirectional LSTM forward + FC + softmax in one kernel invocation."""
    f32 = jnp.float32

    # ---- Kick off async prefetch of layer-1 / FC weights (ordered by first use) so the
    #      HBM->VMEM traffic hides behind the layer-0 projection + recurrence.
    cp_wih1 = pltpu.make_async_copy(wih1_hbm, wih1_s, sems.at[0])
    cp_whhf = pltpu.make_async_copy(whh1f_hbm, whh1f_s, sems.at[1])
    cp_whhb = pltpu.make_async_copy(whh1b_hbm, whh1b_s, sems.at[2])
    cp_wfc = pltpu.make_async_copy(wfc_hbm, wfc_s, sems.at[3])
    cp_wih1.start()
    cp_whhf.start()
    cp_whhb.start()
    cp_wfc.start()

    def sig(v):
        # sigmoid(x) == 0.5*(tanh(x/2)+1): 1 EUP push instead of exp + reciprocal.
        return 0.5 * jnp.tanh(0.5 * v) + 0.5

    def cell(pre, h, c, whh_ref):
        # pre = precomputed x @ W_ih + b   (Bp, 4H); only h @ W_hh is on the serial path.
        gates = pre + jnp.dot(h, whh_ref[...], preferred_element_type=f32)
        i_g = sig(gates[:, 0 * H:1 * H])
        f_g = sig(gates[:, 1 * H:2 * H])
        g_g = jnp.tanh(gates[:, 2 * H:3 * H])
        o_g = sig(gates[:, 3 * H:4 * H])
        c_new = f_g * c + i_g * g_g
        h_new = o_g * jnp.tanh(c_new)
        return h_new, c_new

    def cell0(pre):
        # First step from zero state: gates == pre (no h@W_hh matmul) and f_g * 0 drops out.
        i_g = sig(pre[:, 0 * H:1 * H])
        g_g = jnp.tanh(pre[:, 2 * H:3 * H])
        o_g = sig(pre[:, 3 * H:4 * H])
        c_new = i_g * g_g
        h_new = o_g * jnp.tanh(c_new)
        return h_new, c_new

    # ---- Layer 0: input projection for all timesteps & both directions in ONE matmul.
    gx_ref[...] = (jnp.dot(x_ref[...], wih0_ref[...], preferred_element_type=f32)
                   + b0_ref[...])                      # (T*Bp, 8H)

    def step0(t, carry):
        h_f, c_f, h_b, c_b = carry
        rf = pl.multiple_of(t * Bp, Bp)                # fwd reads timestep t
        rb = pl.multiple_of((T - 1 - t) * Bp, Bp)      # bwd reads timestep T-1-t
        h_f, c_f = cell(gx_ref[pl.ds(rf, Bp), 0:4 * H], h_f, c_f, whh0f_ref)
        h_b, c_b = cell(gx_ref[pl.ds(rb, Bp), 4 * H:8 * H], h_b, c_b, whh0b_ref)
        l0_ref[pl.ds(rf, Bp), 0:H] = h_f
        l0_ref[pl.ds(rb, Bp), H:2 * H] = h_b
        return h_f, c_f, h_b, c_b

    z = jnp.zeros((Bp, H), f32)
    h0f, c0f, h0b, c0b = lax.fori_loop(0, T, step0, (z, z, z, z), unroll=True)
    hn_ref[0, :, :] = h0f
    cn_ref[0, :, :] = c0f
    hn_ref[1, :, :] = h0b
    cn_ref[1, :, :] = c0b

    # ---- Layer 1: input projection over all layer-0 outputs in ONE matmul (reuse gx scratch).
    cp_wih1.wait()                                     # prefetched behind layer-0 work
    gx_ref[...] = (jnp.dot(l0_ref[...], wih1_s[...], preferred_element_type=f32)
                   + b1_ref[...])                      # (T*Bp, 8H)

    # Recurrent weights for layer 1 (prefetched behind layer-0 work + the projection above).
    cp_whhf.wait()
    cp_whhb.wait()

    # Peeled t = 0 step (both directions start from zero state).  The backward cell's output
    # here is the bwd hidden at timestep T-1 -> exactly the half the FC consumes.
    h1f, c1f = cell0(gx_ref[pl.ds(0, Bp), 0:4 * H])
    h1b, c1b = cell0(gx_ref[pl.ds((T - 1) * Bp, Bp), 4 * H:8 * H])
    h1b_last = h1b

    def step1(t, carry):
        h_f, c_f, h_b, c_b = carry
        rf = pl.multiple_of(t * Bp, Bp)
        rb = pl.multiple_of((T - 1 - t) * Bp, Bp)
        h_f, c_f = cell(gx_ref[pl.ds(rf, Bp), 0:4 * H], h_f, c_f, whh1f_s)
        h_b, c_b = cell(gx_ref[pl.ds(rb, Bp), 4 * H:8 * H], h_b, c_b, whh1b_s)
        return h_f, c_f, h_b, c_b

    h1f, c1f, h1b, c1b = lax.fori_loop(1, T, step1, (h1f, c1f, h1b, c1b), unroll=True)
    hn_ref[2, :, :] = h1f
    cn_ref[2, :, :] = c1f
    hn_ref[3, :, :] = h1b
    cn_ref[3, :, :] = c1b

    # ---- FC (lane-padded to 128 columns, K=256 single matmul) + softmax.
    cp_wfc.wait()
    last = jnp.concatenate([h1f, h1b_last], axis=1)    # (Bp, 2H) lane-concat of two tiles
    logits = (jnp.dot(last, wfc_s[...], preferred_element_type=f32)
              + bfc_ref[...])                          # pad cols carry -1e30 bias -> exp == 0
    m = jnp.max(logits, axis=-1, keepdims=True)
    e = jnp.exp(logits - m)
    s = jnp.sum(e, axis=-1, keepdims=True)
    r = pl.reciprocal(s, approx=True)                  # EUP slot
    r = r * (2.0 - s * r)                              # one Newton step -> ~f32 accuracy
    probs_ref[...] = e * r


def init_params(key, frame_dim=128, hidden_dim=128, num_layers=2):
    """Deterministic init mimicking PyTorch LSTM/Linear default U(-1/sqrt(n), 1/sqrt(n))."""
    H = hidden_dim
    k = 1.0 / float(jnp.sqrt(jnp.float32(H)))
    keys = jax.random.split(key, 4 * 2 * num_layers + 2)
    ki = iter(range(len(keys)))
    cells = []
    for layer in range(num_layers):
        in_dim = frame_dim if layer == 0 else 2 * H
        for _direction in range(2):
            wih = jax.random.uniform(keys[next(ki)], (4 * H, in_dim), jnp.float32, -k, k)
            whh = jax.random.uniform(keys[next(ki)], (4 * H, H), jnp.float32, -k, k)
            bih = jax.random.uniform(keys[next(ki)], (4 * H,), jnp.float32, -k, k)
            bhh = jax.random.uniform(keys[next(ki)], (4 * H,), jnp.float32, -k, k)
            # Pre-transpose weights; fold the two biases together.
            cells.append((wih.T, whh.T, (bih + bhh)[None, :]))
    kfc = 1.0 / float(jnp.sqrt(jnp.float32(2 * H)))
    fc_w = jax.random.uniform(keys[next(ki)], (4, 2 * H), jnp.float32, -kfc, kfc)
    fc_b = jax.random.uniform(keys[next(ki)], (4,), jnp.float32, -kfc, kfc)
    return cells, fc_w.T, fc_b[None, :]


def policy_network_forward(x, params, hidden_dim):
    """x: [B, T, frame_dim] float32. Returns (probs [B,4], (h_n, c_n) each [4,B,H])."""
    cells, fc_w_t, fc_b = params
    B, T, D = x.shape
    H = hidden_dim
    Bp = ((B + 7) // 8) * 8                 # pad batch to sublane multiple (rows independent)
    NPAD = 128                              # lane-dense padded FC output width

    x_pad = jnp.zeros((Bp, T, D), jnp.float32).at[:B].set(x.astype(jnp.float32))
    x_tm = jnp.transpose(x_pad, (1, 0, 2)).reshape(T * Bp, D)   # time-major, flattened rows

    (w00, u00, b00), (w01, u01, b01), (w10, u10, b10), (w11, u11, b11) = cells
    wih0 = jnp.concatenate([w00, w01], axis=1)   # (D,  8H)  fwd cols 0:4H, bwd cols 4H:8H
    b0 = jnp.concatenate([b00, b01], axis=1)     # (1,  8H)
    wih1 = jnp.concatenate([w10, w11], axis=1)   # (2H, 8H)
    b1 = jnp.concatenate([b10, b11], axis=1)     # (1,  8H)

    # Lane-pad the FC: zero weight columns, -1e30 bias in pad columns => padded probs == 0.
    wfc_p = jnp.zeros((2 * H, NPAD), jnp.float32).at[:, :4].set(fc_w_t)
    bfc_p = jnp.full((1, NPAD), -1e30, jnp.float32).at[:, :4].set(fc_b)

    vmem = pl.BlockSpec(memory_space=pltpu.MemorySpace.VMEM)
    hbm = pl.BlockSpec(memory_space=pl.ANY)       # big layer-1/FC weights: prefetched in-kernel

    inputs = [x_tm, wih0, u00, u01, b0,           # VMEM: needed immediately
              wih1, u10, u11, b1, wfc_p, bfc_p]   # wih1/u10/u11/wfc_p stay in HBM (pl.ANY)
    in_specs = [vmem, vmem, vmem, vmem, vmem,
                hbm, hbm, hbm, vmem, hbm, vmem]

    kernel = functools.partial(_lstm_policy_kernel, T=T, Bp=Bp, H=H, D=D)

    probs, hn, cn = pl.pallas_call(
        kernel,
        out_shape=(jax.ShapeDtypeStruct((Bp, NPAD), jnp.float32),
                   jax.ShapeDtypeStruct((4, Bp, H), jnp.float32),
                   jax.ShapeDtypeStruct((4, Bp, H), jnp.float32)),
        in_specs=in_specs,
        out_specs=(vmem, vmem, vmem),
        scratch_shapes=[pltpu.VMEM((T * Bp, 8 * H), jnp.float32),   # precomputed gate scratch
                        pltpu.VMEM((T * Bp, 2 * H), jnp.float32),   # layer-0 outputs
                        pltpu.VMEM((2 * H, 8 * H), jnp.float32),    # wih1 landing buffer
                        pltpu.VMEM((H, 4 * H), jnp.float32),        # whh1 fwd landing buffer
                        pltpu.VMEM((H, 4 * H), jnp.float32),        # whh1 bwd landing buffer
                        pltpu.VMEM((2 * H, NPAD), jnp.float32),     # fc weight landing buffer
                        pltpu.SemaphoreType.DMA((4,))],             # one sem per prefetch DMA
    )(*inputs)

    return probs[:B, :4], (hn[:, :B], cn[:, :B])


def reference_forward(x, params, hidden_dim):
    """Pure-JAX reference of the PyTorch forward (for correctness checking)."""
    cells, fc_w_t, fc_b = params
    H = hidden_dim
    B, T, D = x.shape

    def run_dir(inp, wih_t, whh_t, b, reverse):
        seq = inp[:, ::-1, :] if reverse else inp

        def step(carry, x_t):
            h, c = carry
            gates = x_t @ wih_t + h @ whh_t + b
            i = jax.nn.sigmoid(gates[:, :H])
            f = jax.nn.sigmoid(gates[:, H:2 * H])
            g = jnp.tanh(gates[:, 2 * H:3 * H])
            o = jax.nn.sigmoid(gates[:, 3 * H:])
            c = f * c + i * g
            h = o * jnp.tanh(c)
            return (h, c), h

        init = (jnp.zeros((B, H), jnp.float32), jnp.zeros((B, H), jnp.float32))
        (hf, cf), hs = lax.scan(step, init, jnp.transpose(seq, (1, 0, 2)))
        hs = jnp.transpose(hs, (1, 0, 2))
        if reverse:
            hs = hs[:, ::-1, :]
        return hs, hf, cf

    layer_in = x.astype(jnp.float32)
    hns, cns = [], []
    for layer in range(2):
        outs = []
        for d in range(2):
            wih_t, whh_t, b = cells[layer * 2 + d]
            hs, hf, cf = run_dir(layer_in, wih_t, whh_t, b, reverse=(d == 1))
            outs.append(hs)
            hns.append(hf)
            cns.append(cf)
        layer_in = jnp.concatenate(outs, axis=-1)
    last = layer_in[:, -1, :]
    logits = last @ fc_w_t + fc_b
    probs = jax.nn.softmax(logits, axis=-1)
    return probs, (jnp.stack(hns), jnp.stack(cns))


if __name__ == "__main__":
    frame_dim, hidden_dim = 128, 128
    B, T = 2, 8

    key = jax.random.PRNGKey(0)
    pkey, xkey = jax.random.split(key)
    params = init_params(pkey, frame_dim=frame_dim, hidden_dim=hidden_dim, num_layers=2)
    x = jax.random.normal(xkey, (B, T, frame_dim), jnp.float32)

    probs, (hn, cn) = policy_network_forward(x, params, hidden_dim)
    jax.block_until_ready((probs, hn, cn))

    assert probs.shape == (B, 4)
    assert hn.shape == (4, B, hidden_dim) and cn.shape == (4, B, hidden_dim)
    assert bool(jnp.all(jnp.isfinite(probs)))
    assert bool(jnp.allclose(jnp.sum(probs, axis=-1), 1.0, atol=1e-5))

    probs_ref, (hn_ref, cn_ref) = reference_forward(x, params, hidden_dim)
    assert bool(jnp.allclose(probs, probs_ref, atol=1e-4, rtol=1e-4))
    assert bool(jnp.allclose(hn, hn_ref, atol=1e-4, rtol=1e-4))
    assert bool(jnp.allclose(cn, cn_ref, atol=1e-4, rtol=1e-4))

    print("KERNEL_OK")
</pallas_src>

<mosaic_0001>
module attributes {stable_mosaic.version = 11 : i64} {
  func.func @_lstm_policy_kernel(%arg0: memref<64x128xf32, #tpu.memory_space<vmem>>, %arg1: memref<128x1024xf32, #tpu.memory_space<vmem>>, %arg2: memref<128x512xf32, #tpu.memory_space<vmem>>, %arg3: memref<128x512xf32, #tpu.memory_space<vmem>>, %arg4: memref<1x1024xf32, #tpu.memory_space<vmem>>, %arg5: memref<256x1024xf32, #tpu.memory_space<any>>, %arg6: memref<128x512xf32, #tpu.memory_space<any>>, %arg7: memref<128x512xf32, #tpu.memory_space<any>>, %arg8: memref<1x1024xf32, #tpu.memory_space<vmem>>, %arg9: memref<256x128xf32, #tpu.memory_space<any>>, %arg10: memref<1x128xf32, #tpu.memory_space<vmem>>, %arg11: memref<8x128xf32, #tpu.memory_space<vmem>>, %arg12: memref<4x8x128xf32, #tpu.memory_space<vmem>>, %arg13: memref<4x8x128xf32, #tpu.memory_space<vmem>>, %arg14: memref<64x1024xf32, #tpu.memory_space<vmem>>, %arg15: memref<64x256xf32, #tpu.memory_space<vmem>>, %arg16: memref<256x1024xf32, #tpu.memory_space<vmem>>, %arg17: memref<128x512xf32, #tpu.memory_space<vmem>>, %arg18: memref<128x512xf32, #tpu.memory_space<vmem>>, %arg19: memref<256x128xf32, #tpu.memory_space<vmem>>, %arg20: memref<4x!tpu.dma_semaphore, #tpu.memory_space<semaphore_mem>>) attributes {dimension_semantics = [], scalar_prefetch = 0 : i64, scratch_operands = 7 : i64, tpu.core_type = #tpu.core_type<tc>} {
    %c0_i32 = arith.constant 0 : i32
    %0 = tpu.memref_slice %arg20[%c0_i32] : memref<4x!tpu.dma_semaphore, #tpu.memory_space<semaphore_mem>> -> memref<1x!tpu.dma_semaphore, #tpu.memory_space<semaphore_mem>>
    %1 = tpu.memref_squeeze %0 : memref<1x!tpu.dma_semaphore, #tpu.memory_space<semaphore_mem>> -> memref<!tpu.dma_semaphore, #tpu.memory_space<semaphore_mem>>
    tpu.enqueue_dma source(%arg5 : memref<256x1024xf32, #tpu.memory_space<any>>) target(%arg16 : memref<256x1024xf32, #tpu.memory_space<vmem>>) target_semaphore(%1 : memref<!tpu.dma_semaphore, #tpu.memory_space<semaphore_mem>>)
    %c1_i32 = arith.constant 1 : i32
    %2 = tpu.memref_slice %arg20[%c1_i32] : memref<4x!tpu.dma_semaphore, #tpu.memory_space<semaphore_mem>> -> memref<1x!tpu.dma_semaphore, #tpu.memory_space<semaphore_mem>>
    %3 = tpu.memref_squeeze %2 : memref<1x!tpu.dma_semaphore, #tpu.memory_space<semaphore_mem>> -> memref<!tpu.dma_semaphore, #tpu.memory_space<semaphore_mem>>
    tpu.enqueue_dma source(%arg6 : memref<128x512xf32, #tpu.memory_space<any>>) target(%arg17 : memref<128x512xf32, #tpu.memory_space<vmem>>) target_semaphore(%3 : memref<!tpu.dma_semaphore, #tpu.memory_space<semaphore_mem>>)
    %c2_i32 = arith.constant 2 : i32
    %4 = tpu.memref_slice %arg20[%c2_i32] : memref<4x!tpu.dma_semaphore, #tpu.memory_space<semaphore_mem>> -> memref<1x!tpu.dma_semaphore, #tpu.memory_space<semaphore_mem>>
    %5 = tpu.memref_squeeze %4 : memref<1x!tpu.dma_semaphore, #tpu.memory_space<semaphore_mem>> -> memref<!tpu.dma_semaphore, #tpu.memory_space<semaphore_mem>>
    tpu.enqueue_dma source(%arg7 : memref<128x512xf32, #tpu.memory_space<any>>) target(%arg18 : memref<128x512xf32, #tpu.memory_space<vmem>>) target_semaphore(%5 : memref<!tpu.dma_semaphore, #tpu.memory_space<semaphore_mem>>)
    %c3_i32 = arith.constant 3 : i32
    %6 = tpu.memref_slice %arg20[%c3_i32] : memref<4x!tpu.dma_semaphore, #tpu.memory_space<semaphore_mem>> -> memref<1x!tpu.dma_semaphore, #tpu.memory_space<semaphore_mem>>
    %7 = tpu.memref_squeeze %6 : memref<1x!tpu.dma_semaphore, #tpu.memory_space<semaphore_mem>> -> memref<!tpu.dma_semaphore, #tpu.memory_space<semaphore_mem>>
    tpu.enqueue_dma source(%arg9 : memref<256x128xf32, #tpu.memory_space<any>>) target(%arg19 : memref<256x128xf32, #tpu.memory_space<vmem>>) target_semaphore(%7 : memref<!tpu.dma_semaphore, #tpu.memory_space<semaphore_mem>>)
    %c0 = arith.constant 0 : index
    %c0_0 = arith.constant 0 : index
    %8 = vector.load %arg0[%c0, %c0_0] : memref<64x128xf32, #tpu.memory_space<vmem>>, vector<64x128xf32>
    %c0_1 = arith.constant 0 : index
    %c0_2 = arith.constant 0 : index
    %9 = vector.load %arg1[%c0_1, %c0_2] : memref<128x1024xf32, #tpu.memory_space<vmem>>, vector<128x1024xf32>
    %cst = arith.constant dense<0.000000e+00> : vector<64x1024xf32>
    %10 = tpu.matmul %8, %9, %cst {dimension_numbers = #tpu.dot_dimension_numbers<[1], [0], [0], [1], [0, 0, 1, 1], [], []>} : vector<64x128xf32>, vector<128x1024xf32>, vector<64x1024xf32> -> vector<64x1024xf32>
    %c0_3 = arith.constant 0 : index
    %c0_4 = arith.constant 0 : index
    %11 = vector.load %arg4[%c0_3, %c0_4] : memref<1x1024xf32, #tpu.memory_space<vmem>>, vector<1x1024xf32>
    %12 = vector.broadcast %11 : vector<1x1024xf32> to vector<64x1024xf32>
    %13 = arith.addf %10, %12 : vector<64x1024xf32>
    %c0_5 = arith.constant 0 : index
    %c0_6 = arith.constant 0 : index
    %14 = vector.load %arg14[%c0_5, %c0_6] : memref<64x1024xf32, #tpu.memory_space<vmem>>, vector<64x1024xf32>
    tpu.vector_store %arg14[%c0_5, %c0_6], %13 {strides = array<i32>} : memref<64x1024xf32, #tpu.memory_space<vmem>>, vector<64x1024xf32>,
    %cst_7 = arith.constant 0.000000e+00 : f32
    %15 = vector.broadcast %cst_7 : f32 to vector<8x128xf32>
    %c0_i32_8 = arith.constant 0 : i32
    %c8_i32 = arith.constant 8 : i32
    %16 = arith.muli %c0_i32_8, %c8_i32 : i32
    %17 = tpu.assume_multiple %16, 8 : i32
    %c7_i32 = arith.constant 7 : i32
    %18 = arith.subi %c7_i32, %c0_i32_8 : i32
    %c8_i32_9 = arith.constant 8 : i32
    %19 = arith.muli %18, %c8_i32_9 : i32
    %20 = tpu.assume_multiple %19, 8 : i32
    %21 = arith.index_cast %17 : i32 to index
    %c0_10 = arith.constant 0 : index
    %22 = vector.load %arg14[%21, %c0_10] : memref<64x1024xf32, #tpu.memory_space<vmem>>, vector<8x512xf32>
    %c0_11 = arith.constant 0 : index
    %c0_12 = arith.constant 0 : index
    %23 = vector.load %arg2[%c0_11, %c0_12] : memref<128x512xf32, #tpu.memory_space<vmem>>, vector<128x512xf32>
    %cst_13 = arith.constant dense<0.000000e+00> : vector<8x512xf32>
    %24 = tpu.matmul %15, %23, %cst_13 {dimension_numbers = #tpu.dot_dimension_numbers<[1], [0], [0], [1], [0, 0, 1, 1], [], []>} : vector<8x128xf32>, vector<128x512xf32>, vector<8x512xf32> -> vector<8x512xf32>
    %25 = arith.addf %22, %24 : vector<8x512xf32>
    %26 = vector.extract_strided_slice %25 {offsets = [0, 0], sizes = [8, 128], strides = [1, 1]} : vector<8x512xf32> to vector<8x128xf32>
    %cst_14 = arith.constant 5.000000e-01 : f32
    %27 = vector.broadcast %cst_14 : f32 to vector<8x128xf32>
    %28 = arith.mulf %27, %26 : vector<8x128xf32>
    %29 = math.tanh %28 : vector<8x128xf32>
    %cst_15 = arith.constant 5.000000e-01 : f32
    %30 = vector.broadcast %cst_15 : f32 to vector<8x128xf32>
    %31 = arith.mulf %30, %29 : vector<8x128xf32>
    %cst_16 = arith.constant 5.000000e-01 : f32
    %32 = vector.broadcast %cst_16 : f32 to vector<8x128xf32>
    %33 = arith.addf %31, %32 : vector<8x128xf32>
    %34 = vector.extract_strided_slice %25 {offsets = [0, 128], sizes = [8, 128], strides = [1, 1]} : vector<8x512xf32> to vector<8x128xf32>
    %cst_17 = arith.constant 5.000000e-01 : f32
    %35 = vector.broadcast %cst_17 : f32 to vector<8x128xf32>
    %36 = arith.mulf %35, %34 : vector<8x128xf32>
    %37 = math.tanh %36 : vector<8x128xf32>
    %cst_18 = arith.constant 5.000000e-01 : f32
    %38 = vector.broadcast %cst_18 : f32 to vector<8x128xf32>
    %39 = arith.mulf %38, %37 : vector<8x128xf32>
    %cst_19 = arith.constant 5.000000e-01 : f32
    %40 = vector.broadcast %cst_19 : f32 to vector<8x128xf32>
    %41 = arith.addf %39, %40 : vector<8x128xf32>
    %42 = vector.extract_strided_slice %25 {offsets = [0, 256], sizes = [8, 128], strides = [1, 1]} : vector<8x512xf32> to vector<8x128xf32>
    %43 = math.tanh %42 : vector<8x128xf32>
    %44 = vector.extract_strided_slice %25 {offsets = [0, 384], sizes = [8, 128], strides = [1, 1]} : vector<8x512xf32> to vector<8x128xf32>
    %cst_20 = arith.constant 5.000000e-01 : f32
    %45 = vector.broadcast %cst_20 : f32 to vector<8x128xf32>
    %46 = arith.mulf %45, %44 : vector<8x128xf32>
    %47 = math.tanh %46 : vector<8x128xf32>
    %cst_21 = arith.constant 5.000000e-01 : f32
    %48 = vector.broadcast %cst_21 : f32 to vector<8x128xf32>
    %49 = arith.mulf %48, %47 : vector<8x128xf32>
    %cst_22 = arith.constant 5.000000e-01 : f32
    %50 = vector.broadcast %cst_22 : f32 to vector<8x128xf32>
    %51 = arith.addf %49, %50 : vector<8x128xf32>
    %52 = arith.mulf %41, %15 : vector<8x128xf32>
    %53 = arith.mulf %33, %43 : vector<8x128xf32>
    %54 = arith.addf %52, %53 : vector<8x128xf32>
    %55 = math.tanh %54 : vector<8x128xf32>
    %56 = arith.mulf %51, %55 : vector<8x128xf32>
    %57 = arith.index_cast %20 : i32 to index
    %c512 = arith.constant 512 : index
    %58 = vector.load %arg14[%57, %c512] : memref<64x1024xf32, #tpu.memory_space<vmem>>, vector<8x512xf32>
    %c0_23 = arith.constant 0 : index
    %c0_24 = arith.constant 0 : index
    %59 = vector.load %arg3[%c0_23, %c0_24] : memref<128x512xf32, #tpu.memory_space<vmem>>, vector<128x512xf32>
    %cst_25 = arith.constant dense<0.000000e+00> : vector<8x512xf32>
    %60 = tpu.matmul %15, %59, %cst_25 {dimension_numbers = #tpu.dot_dimension_numbers<[1], [0], [0], [1], [0, 0, 1, 1], [], []>} : vector<8x128xf32>, vector<128x512xf32>, vector<8x512xf32> -> vector<8x512xf32>
    %61 = arith.addf %58, %60 : vector<8x512xf32>
    %62 = vector.extract_strided_slice %61 {offsets = [0, 0], sizes = [8, 128], strides = [1, 1]} : vector<8x512xf32> to vector<8x128xf32>
    %cst_26 = arith.constant 5.000000e-01 : f32
    %63 = vector.broadcast %cst_26 : f32 to vector<8x128xf32>
    %64 = arith.mulf %63, %62 : vector<8x128xf32>
    %65 = math.tanh %64 : vector<8x128xf32>
    %cst_27 = arith.constant 5.000000e-01 : f32
    %66 = vector.broadcast %cst_27 : f32 to vector<8x128xf32>
    %67 = arith.mulf %66, %65 : vector<8x128xf32>
    %cst_28 = arith.constant 5.000000e-01 : f32
    %68 = vector.broadcast %cst_28 : f32 to vector<8x128xf32>
    %69 = arith.addf %67, %68 : vector<8x128xf32>
    %70 = vector.extract_strided_slice %61 {offsets = [0, 128], sizes = [8, 128], strides = [1, 1]} : vector<8x512xf32> to vector<8x128xf32>
    %cst_29 = arith.constant 5.000000e-01 : f32
    %71 = vector.broadcast %cst_29 : f32 to vector<8x128xf32>
    %72 = arith.mulf %71, %70 : vector<8x128xf32>
    %73 = math.tanh %72 : vector<8x128xf32>
    %cst_30 = arith.constant 5.000000e-01 : f32
    %74 = vector.broadcast %cst_30 : f32 to vector<8x128xf32>
    %75 = arith.mulf %74, %73 : vector<8x128xf32>
    %cst_31 = arith.constant 5.000000e-01 : f32
    %76 = vector.broadcast %cst_31 : f32 to vector<8x128xf32>
    %77 = arith.addf %75, %76 : vector<8x128xf32>
    %78 = vector.extract_strided_slice %61 {offsets = [0, 256], sizes = [8, 128], strides = [1, 1]} : vector<8x512xf32> to vector<8x128xf32>
    %79 = math.tanh %78 : vector<8x128xf32>
    %80 = vector.extract_strided_slice %61 {offsets = [0, 384], sizes = [8, 128], strides = [1, 1]} : vector<8x512xf32> to vector<8x128xf32>
    %cst_32 = arith.constant 5.000000e-01 : f32
    %81 = vector.broadcast %cst_32 : f32 to vector<8x128xf32>
    %82 = arith.mulf %81, %80 : vector<8x128xf32>
    %83 = math.tanh %82 : vector<8x128xf32>
    %cst_33 = arith.constant 5.000000e-01 : f32
    %84 = vector.broadcast %cst_33 : f32 to vector<8x128xf32>
    %85 = arith.mulf %84, %83 : vector<8x128xf32>
    %cst_34 = arith.constant 5.000000e-01 : f32
    %86 = vector.broadcast %cst_34 : f32 to vector<8x128xf32>
    %87 = arith.addf %85, %86 : vector<8x128xf32>
    %88 = arith.mulf %77, %15 : vector<8x128xf32>
    %89 = arith.mulf %69, %79 : vector<8x128xf32>
    %90 = arith.addf %88, %89 : vector<8x128xf32>
    %91 = math.tanh %90 : vector<8x128xf32>
    %92 = arith.mulf %87, %91 : vector<8x128xf32>
    %93 = arith.index_cast %17 : i32 to index
    %c0_35 = arith.constant 0 : index
    %94 = vector.load %arg15[%93, %c0_35] : memref<64x256xf32, #tpu.memory_space<vmem>>, vector<8x128xf32>
    tpu.vector_store %arg15[%93, %c0_35], %56 {strides = array<i32>} : memref<64x256xf32, #tpu.memory_space<vmem>>, vector<8x128xf32>,
    %95 = arith.index_cast %20 : i32 to index
    %c128 = arith.constant 128 : index
    %96 = vector.load %arg15[%95, %c128] : memref<64x256xf32, #tpu.memory_space<vmem>>, vector<8x128xf32>
    tpu.vector_store %arg15[%95, %c128], %92 {strides = array<i32>} : memref<64x256xf32, #tpu.memory_space<vmem>>, vector<8x128xf32>,
    %c1_i32_36 = arith.constant 1 : i32
    %c8_i32_37 = arith.constant 8 : i32
    %97 = arith.muli %c1_i32_36, %c8_i32_37 : i32
    %98 = tpu.assume_multiple %97, 8 : i32
    %c7_i32_38 = arith.constant 7 : i32
    %99 = arith.subi %c7_i32_38, %c1_i32_36 : i32
    %c8_i32_39 = arith.constant 8 : i32
    %100 = arith.muli %99, %c8_i32_39 : i32
    %101 = tpu.assume_multiple %100, 8 : i32
    %102 = arith.index_cast %98 : i32 to index
    %c0_40 = arith.constant 0 : index
    %103 = vector.load %arg14[%102, %c0_40] : memref<64x1024xf32, #tpu.memory_space<vmem>>, vector<8x512xf32>
    %c0_41 = arith.constant 0 : index
    %c0_42 = arith.constant 0 : index
    %104 = vector.load %arg2[%c0_41, %c0_42] : memref<128x512xf32, #tpu.memory_space<vmem>>, vector<128x512xf32>
    %cst_43 = arith.constant dense<0.000000e+00> : vector<8x512xf32>
    %105 = tpu.matmul %56, %104, %cst_43 {dimension_numbers = #tpu.dot_dimension_numbers<[1], [0], [0], [1], [0, 0, 1, 1], [], []>} : vector<8x128xf32>, vector<128x512xf32>, vector<8x512xf32> -> vector<8x512xf32>
    %106 = arith.addf %103, %105 : vector<8x512xf32>
    %107 = vector.extract_strided_slice %106 {offsets = [0, 0], sizes = [8, 128], strides = [1, 1]} : vector<8x512xf32> to vector<8x128xf32>
    %cst_44 = arith.constant 5.000000e-01 : f32
    %108 = vector.broadcast %cst_44 : f32 to vector<8x128xf32>
    %109 = arith.mulf %108, %107 : vector<8x128xf32>
    %110 = math.tanh %109 : vector<8x128xf32>
    %cst_45 = arith.constant 5.000000e-01 : f32
    %111 = vector.broadcast %cst_45 : f32 to vector<8x128xf32>
    %112 = arith.mulf %111, %110 : vector<8x128xf32>
    %cst_46 = arith.constant 5.000000e-01 : f32
    %113 = vector.broadcast %cst_46 : f32 to vector<8x128xf32>
    %114 = arith.addf %112, %113 : vector<8x128xf32>
    %115 = vector.extract_strided_slice %106 {offsets = [0, 128], sizes = [8, 128], strides = [1, 1]} : vector<8x512xf32> to vector<8x128xf32>
    %cst_47 = arith.constant 5.000000e-01 : f32
    %116 = vector.broadcast %cst_47 : f32 to vector<8x128xf32>
    %117 = arith.mulf %116, %115 : vector<8x128xf32>
    %118 = math.tanh %117 : vector<8x128xf32>
    %cst_48 = arith.constant 5.000000e-01 : f32
    %119 = vector.broadcast %cst_48 : f32 to vector<8x128xf32>
    %120 = arith.mulf %119, %118 : vector<8x128xf32>
    %cst_49 = arith.constant 5.000000e-01 : f32
    %121 = vector.broadcast %cst_49 : f32 to vector<8x128xf32>
    %122 = arith.addf %120, %121 : vector<8x128xf32>
    %123 = vector.extract_strided_slice %106 {offsets = [0, 256], sizes = [8, 128], strides = [1, 1]} : vector<8x512xf32> to vector<8x128xf32>
    %124 = math.tanh %123 : vector<8x128xf32>
    %125 = vector.extract_strided_slice %106 {offsets = [0, 384], sizes = [8, 128], strides = [1, 1]} : vector<8x512xf32> to vector<8x128xf32>
    %cst_50 = arith.constant 5.000000e-01 : f32
    %126 = vector.broadcast %cst_50 : f32 to vector<8x128xf32>
    %127 = arith.mulf %126, %125 : vector<8x128xf32>
    %128 = math.tanh %127 : vector<8x128xf32>
    %cst_51 = arith.constant 5.000000e-01 : f32
    %129 = vector.broadcast %cst_51 : f32 to vector<8x128xf32>
    %130 = arith.mulf %129, %128 : vector<8x128xf32>
    %cst_52 = arith.constant 5.000000e-01 : f32
    %131 = vector.broadcast %cst_52 : f32 to vector<8x128xf32>
    %132 = arith.addf %130, %131 : vector<8x128xf32>
    %133 = arith.mulf %122, %54 : vector<8x128xf32>
    %134 = arith.mulf %114, %124 : vector<8x128xf32>
    %135 = arith.addf %133, %134 : vector<8x128xf32>
    %136 = math.tanh %135 : vector<8x128xf32>
    %137 = arith.mulf %132, %136 : vector<8x128xf32>
    %138 = arith.index_cast %101 : i32 to index
    %c512_53 = arith.constant 512 : index
    %139 = vector.load %arg14[%138, %c512_53] : memref<64x1024xf32, #tpu.memory_space<vmem>>, vector<8x512xf32>
    %c0_54 = arith.constant 0 : index
    %c0_55 = arith.constant 0 : index
    %140 = vector.load %arg3[%c0_54, %c0_55] : memref<128x512xf32, #tpu.memory_space<vmem>>, vector<128x512xf32>
    %cst_56 = arith.constant dense<0.000000e+00> : vector<8x512xf32>
    %141 = tpu.matmul %92, %140, %cst_56 {dimension_numbers = #tpu.dot_dimension_numbers<[1], [0], [0], [1], [0, 0, 1, 1], [], []>} : vector<8x128xf32>, vector<128x512xf32>, vector<8x512xf32> -> vector<8x512xf32>
    %142 = arith.addf %139, %141 : vector<8x512xf32>
    %143 = vector.extract_strided_slice %142 {offsets = [0, 0], sizes = [8, 128], strides = [1, 1]} : vector<8x512xf32> to vector<8x128xf32>
    %cst_57 = arith.constant 5.000000e-01 : f32
    %144 = vector.broadcast %cst_57 : f32 to vector<8x128xf32>
    %145 = arith.mulf %144, %143 : vector<8x128xf32>
    %146 = math.tanh %145 : vector<8x128xf32>
    %cst_58 = arith.constant 5.000000e-01 : f32
    %147 = vector.broadcast %cst_58 : f32 to vector<8x128xf32>
    %148 = arith.mulf %147, %146 : vector<8x128xf32>
    %cst_59 = arith.constant 5.000000e-01 : f32
    %149 = vector.broadcast %cst_59 : f32 to vector<8x128xf32>
    %150 = arith.addf %148, %149 : vector<8x128xf32>
    %151 = vector.extract_strided_slice %142 {offsets = [0, 128], sizes = [8, 128], strides = [1, 1]} : vector<8x512xf32> to vector<8x128xf32>
    %cst_60 = arith.constant 5.000000e-01 : f32
    %152 = vector.broadcast %cst_60 : f32 to vector<8x128xf32>
    %153 = arith.mulf %152, %151 : vector<8x128xf32>
    %154 = math.tanh %153 : vector<8x128xf32>
    %cst_61 = arith.constant 5.000000e-01 : f32
    %155 = vector.broadcast %cst_61 : f32 to vector<8x128xf32>
    %156 = arith.mulf %155, %154 : vector<8x128xf32>
    %cst_62 = arith.constant 5.000000e-01 : f32
    %157 = vector.broadcast %cst_62 : f32 to vector<8x128xf32>
    %158 = arith.addf %156, %157 : vector<8x128xf32>
    %159 = vector.extract_strided_slice %142 {offsets = [0, 256], sizes = [8, 128], strides = [1, 1]} : vector<8x512xf32> to vector<8x128xf32>
    %160 = math.tanh %159 : vector<8x128xf32>
    %161 = vector.extract_strided_slice %142 {offsets = [0, 384], sizes = [8, 128], strides = [1, 1]} : vector<8x512xf32> to vector<8x128xf32>
    %cst_63 = arith.constant 5.000000e-01 : f32
    %162 = vector.broadcast %cst_63 : f32 to vector<8x128xf32>
    %163 = arith.mulf %162, %161 : vector<8x128xf32>
    %164 = math.tanh %163 : vector<8x128xf32>
    %cst_64 = arith.constant 5.000000e-01 : f32
    %165 = vector.broadcast %cst_64 : f32 to vector<8x128xf32>
    %166 = arith.mulf %165, %164 : vector<8x128xf32>
    %cst_65 = arith.constant 5.000000e-01 : f32
    %167 = vector.broadcast %cst_65 : f32 to vector<8x128xf32>
    %168 = arith.addf %166, %167 : vector<8x128xf32>
    %169 = arith.mulf %158, %90 : vector<8x128xf32>
    %170 = arith.mulf %150, %160 : vector<8x128xf32>
    %171 = arith.addf %169, %170 : vector<8x128xf32>
    %172 = math.tanh %171 : vector<8x128xf32>
    %173 = arith.mulf %168, %172 : vector<8x128xf32>
    %174 = arith.index_cast %98 : i32 to index
    %c0_66 = arith.constant 0 : index
    %175 = vector.load %arg15[%174, %c0_66] : memref<64x256xf32, #tpu.memory_space<vmem>>, vector<8x128xf32>
    tpu.vector_store %arg15[%174, %c0_66], %137 {strides = array<i32>} : memref<64x256xf32, #tpu.memory_space<vmem>>, vector<8x128xf32>,
    %176 = arith.index_cast %101 : i32 to index
    %c128_67 = arith.constant 128 : index
    %177 = vector.load %arg15[%176, %c128_67] : memref<64x256xf32, #tpu.memory_space<vmem>>, vector<8x128xf32>
    tpu.vector_store %arg15[%176, %c128_67], %173 {strides = array<i32>} : memref<64x256xf32, #tpu.memory_space<vmem>>, vector<8x128xf32>,
    %c2_i32_68 = arith.constant 2 : i32
    %c8_i32_69 = arith.constant 8 : i32
    %178 = arith.muli %c2_i32_68, %c8_i32_69 : i32
    %179 = tpu.assume_multiple %178, 8 : i32
    %c7_i32_70 = arith.constant 7 : i32
    %180 = arith.subi %c7_i32_70, %c2_i32_68 : i32
    %c8_i32_71 = arith.constant 8 : i32
    %181 = arith.muli %180, %c8_i32_71 : i32
    %182 = tpu.assume_multiple %181, 8 : i32
    %183 = arith.index_cast %179 : i32 to index
    %c0_72 = arith.constant 0 : index
    %184 = vector.load %arg14[%183, %c0_72] : memref<64x1024xf32, #tpu.memory_space<vmem>>, vector<8x512xf32>
    %c0_73 = arith.constant 0 : index
    %c0_74 = arith.constant 0 : index
    %185 = vector.load %arg2[%c0_73, %c0_74] : memref<128x512xf32, #tpu.memory_space<vmem>>, vector<128x512xf32>
    %cst_75 = arith.constant dense<0.000000e+00> : vector<8x512xf32>
    %186 = tpu.matmul %137, %185, %cst_75 {dimension_numbers = #tpu.dot_dimension_numbers<[1], [0], [0], [1], [0, 0, 1, 1], [], []>} : vector<8x128xf32>, vector<128x512xf32>, vector<8x512xf32> -> vector<8x512xf32>
    %187 = arith.addf %184, %186 : vector<8x512xf32>
    %188 = vector.extract_strided_slice %187 {offsets = [0, 0], sizes = [8, 128], strides = [1, 1]} : vector<8x512xf32> to vector<8x128xf32>
    %cst_76 = arith.constant 5.000000e-01 : f32
    %189 = vector.broadcast %cst_76 : f32 to vector<8x128xf32>
    %190 = arith.mulf %189, %188 : vector<8x128xf32>
    %191 = math.tanh %190 : vector<8x128xf32>
    %cst_77 = arith.constant 5.000000e-01 : f32
    %192 = vector.broadcast %cst_77 : f32 to vector<8x128xf32>
    %193 = arith.mulf %192, %191 : vector<8x128xf32>
    %cst_78 = arith.constant 5.000000e-01 : f32
    %194 = vector.broadcast %cst_78 : f32 to vector<8x128xf32>
    %195 = arith.addf %193, %194 : vector<8x128xf32>
    %196 = vector.extract_strided_slice %187 {offsets = [0, 128], sizes = [8, 128], strides = [1, 1]} : vector<8x512xf32> to vector<8x128xf32>
    %cst_79 = arith.constant 5.000000e-01 : f32
    %197 = vector.broadcast %cst_79 : f32 to vector<8x128xf32>
    %198 = arith.mulf %197, %196 : vector<8x128xf32>
    %199 = math.tanh %198 : vector<8x128xf32>
    %cst_80 = arith.constant 5.000000e-01 : f32
    %200 = vector.broadcast %cst_80 : f32 to vector<8x128xf32>
    %201 = arith.mulf %200, %199 : vector<8x128xf32>
    %cst_81 = arith.constant 5.000000e-01 : f32
    %202 = vector.broadcast %cst_81 : f32 to vector<8x128xf32>
    %203 = arith.addf %201, %202 : vector<8x128xf32>
    %204 = vector.extract_strided_slice %187 {offsets = [0, 256], sizes = [8, 128], strides = [1, 1]} : vector<8x512xf32> to vector<8x128xf32>
    %205 = math.tanh %204 : vector<8x128xf32>
    %206 = vector.extract_strided_slice %187 {offsets = [0, 384], sizes = [8, 128], strides = [1, 1]} : vector<8x512xf32> to vector<8x128xf32>
    %cst_82 = arith.constant 5.000000e-01 : f32
    %207 = vector.broadcast %cst_82 : f32 to vector<8x128xf32>
    %208 = arith.mulf %207, %206 : vector<8x128xf32>
    %209 = math.tanh %208 : vector<8x128xf32>
    %cst_83 = arith.constant 5.000000e-01 : f32
    %210 = vector.broadcast %cst_83 : f32 to vector<8x128xf32>
    %211 = arith.mulf %210, %209 : vector<8x128xf32>
    %cst_84 = arith.constant 5.000000e-01 : f32
    %212 = vector.broadcast %cst_84 : f32 to vector<8x128xf32>
    %213 = arith.addf %211, %212 : vector<8x128xf32>
    %214 = arith.mulf %203, %135 : vector<8x128xf32>
    %215 = arith.mulf %195, %205 : vector<8x128xf32>
    %216 = arith.addf %214, %215 : vector<8x128xf32>
    %217 = math.tanh %216 : vector<8x128xf32>
    %218 = arith.mulf %213, %217 : vector<8x128xf32>
    %219 = arith.index_cast %182 : i32 to index
    %c512_85 = arith.constant 512 : index
    %220 = vector.load %arg14[%219, %c512_85] : memref<64x1024xf32, #tpu.memory_space<vmem>>, vector<8x512xf32>
    %c0_86 = arith.constant 0 : index
    %c0_87 = arith.constant 0 : index
    %221 = vector.load %arg3[%c0_86, %c0_87] : memref<128x512xf32, #tpu.memory_space<vmem>>, vector<128x512xf32>
    %cst_88 = arith.constant dense<0.000000e+00> : vector<8x512xf32>
    %222 = tpu.matmul %173, %221, %cst_88 {dimension_numbers = #tpu.dot_dimension_numbers<[1], [0], [0], [1], [0, 0, 1, 1], [], []>} : vector<8x128xf32>, vector<128x512xf32>, vector<8x512xf32> -> vector<8x512xf32>
    %223 = arith.addf %220, %222 : vector<8x512xf32>
    %224 = vector.extract_strided_slice %223 {offsets = [0, 0], sizes = [8, 128], strides = [1, 1]} : vector<8x512xf32> to vector<8x128xf32>
    %cst_89 = arith.constant 5.000000e-01 : f32
    %225 = vector.broadcast %cst_89 : f32 to vector<8x128xf32>
    %226 = arith.mulf %225, %224 : vector<8x128xf32>
    %227 = math.tanh %226 : vector<8x128xf32>
    %cst_90 = arith.constant 5.000000e-01 : f32
    %228 = vector.broadcast %cst_90 : f32 to vector<8x128xf32>
    %229 = arith.mulf %228, %227 : vector<8x128xf32>
    %cst_91 = arith.constant 5.000000e-01 : f32
    %230 = vector.broadcast %cst_91 : f32 to vector<8x128xf32>
    %231 = arith.addf %229, %230 : vector<8x128xf32>
    %232 = vector.extract_strided_slice %223 {offsets = [0, 128], sizes = [8, 128], strides = [1, 1]} : vector<8x512xf32> to vector<8x128xf32>
    %cst_92 = arith.constant 5.000000e-01 : f32
    %233 = vector.broadcast %cst_92 : f32 to vector<8x128xf32>
    %234 = arith.mulf %233, %232 : vector<8x128xf32>
    %235 = math.tanh %234 : vector<8x128xf32>
    %cst_93 = arith.constant 5.000000e-01 : f32
    %236 = vector.broadcast %cst_93 : f32 to vector<8x128xf32>
    %237 = arith.mulf %236, %235 : vector<8x128xf32>
    %cst_94 = arith.constant 5.000000e-01 : f32
    %238 = vector.broadcast %cst_94 : f32 to vector<8x128xf32>
    %239 = arith.addf %237, %238 : vector<8x128xf32>
    %240 = vector.extract_strided_slice %223 {offsets = [0, 256], sizes = [8, 128], strides = [1, 1]} : vector<8x512xf32> to vector<8x128xf32>
    %241 = math.tanh %240 : vector<8x128xf32>
    %242 = vector.extract_strided_slice %223 {offsets = [0, 384], sizes = [8, 128], strides = [1, 1]} : vector<8x512xf32> to vector<8x128xf32>
    %cst_95 = arith.constant 5.000000e-01 : f32
    %243 = vector.broadcast %cst_95 : f32 to vector<8x128xf32>
    %244 = arith.mulf %243, %242 : vector<8x128xf32>
    %245 = math.tanh %244 : vector<8x128xf32>
    %cst_96 = arith.constant 5.000000e-01 : f32
    %246 = vector.broadcast %cst_96 : f32 to vector<8x128xf32>
    %247 = arith.mulf %246, %245 : vector<8x128xf32>
    %cst_97 = arith.constant 5.000000e-01 : f32
    %248 = vector.broadcast %cst_97 : f32 to vector<8x128xf32>
    %249 = arith.addf %247, %248 : vector<8x128xf32>
    %250 = arith.mulf %239, %171 : vector<8x128xf32>
    %251 = arith.mulf %231, %241 : vector<8x128xf32>
    %252 = arith.addf %250, %251 : vector<8x128xf32>
    %253 = math.tanh %252 : vector<8x128xf32>
    %254 = arith.mulf %249, %253 : vector<8x128xf32>
    %255 = arith.index_cast %179 : i32 to index
    %c0_98 = arith.constant 0 : index
    %256 = vector.load %arg15[%255, %c0_98] : memref<64x256xf32, #tpu.memory_space<vmem>>, vector<8x128xf32>
    tpu.vector_store %arg15[%255, %c0_98], %218 {strides = array<i32>} : memref<64x256xf32, #tpu.memory_space<vmem>>, vector<8x128xf32>,
    %257 = arith.index_cast %182 : i32 to index
    %c128_99 = arith.constant 128 : index
    %258 = vector.load %arg15[%257, %c128_99] : memref<64x256xf32, #tpu.memory_space<vmem>>, vector<8x128xf32>
    tpu.vector_store %arg15[%257, %c128_99], %254 {strides = array<i32>} : memref<64x256xf32, #tpu.memory_space<vmem>>, vector<8x128xf32>,
    %c3_i32_100 = arith.constant 3 : i32
    %c8_i32_101 = arith.constant 8 : i32
    %259 = arith.muli %c3_i32_100, %c8_i32_101 : i32
    %260 = tpu.assume_multiple %259, 8 : i32
    %c7_i32_102 = arith.constant 7 : i32
    %261 = arith.subi %c7_i32_102, %c3_i32_100 : i32
    %c8_i32_103 = arith.constant 8 : i32
    %262 = arith.muli %261, %c8_i32_103 : i32
    %263 = tpu.assume_multiple %262, 8 : i32
    %264 = arith.index_cast %260 : i32 to index
    %c0_104 = arith.constant 0 : index
    %265 = vector.load %arg14[%264, %c0_104] : memref<64x1024xf32, #tpu.memory_space<vmem>>, vector<8x512xf32>
    %c0_105 = arith.constant 0 : index
    %c0_106 = arith.constant 0 : index
    %266 = vector.load %arg2[%c0_105, %c0_106] : memref<128x512xf32, #tpu.memory_space<vmem>>, vector<128x512xf32>
    %cst_107 = arith.constant dense<0.000000e+00> : vector<8x512xf32>
    %267 = tpu.matmul %218, %266, %cst_107 {dimension_numbers = #tpu.dot_dimension_numbers<[1], [0], [0], [1], [0, 0, 1, 1], [], []>} : vector<8x128xf32>, vector<128x512xf32>, vector<8x512xf32> -> vector<8x512xf32>
    %268 = arith.addf %265, %267 : vector<8x512xf32>
    %269 = vector.extract_strided_slice %268 {offsets = [0, 0], sizes = [8, 128], strides = [1, 1]} : vector<8x512xf32> to vector<8x128xf32>
    %cst_108 = arith.constant 5.000000e-01 : f32
    %270 = vector.broadcast %cst_108 : f32 to vector<8x128xf32>
    %271 = arith.mulf %270, %269 : vector<8x128xf32>
    %272 = math.tanh %271 : vector<8x128xf32>
    %cst_109 = arith.constant 5.000000e-01 : f32
    %273 = vector.broadcast %cst_109 : f32 to vector<8x128xf32>
    %274 = arith.mulf %273, %272 : vector<8x128xf32>
    %cst_110 = arith.constant 5.000000e-01 : f32
    %275 = vector.broadcast %cst_110 : f32 to vector<8x128xf32>
    %276 = arith.addf %274, %275 : vector<8x128xf32>
    %277 = vector.extract_strided_slice %268 {offsets = [0, 128], sizes = [8, 128], strides = [1, 1]} : vector<8x512xf32> to vector<8x128xf32>
    %cst_111 = arith.constant 5.000000e-01 : f32
    %278 = vector.broadcast %cst_111 : f32 to vector<8x128xf32>
    %279 = arith.mulf %278, %277 : vector<8x128xf32>
    %280 = math.tanh %279 : vector<8x128xf32>
    %cst_112 = arith.constant 5.000000e-01 : f32
    %281 = vector.broadcast %cst_112 : f32 to vector<8x128xf32>
    %282 = arith.mulf %281, %280 : vector<8x128xf32>
    %cst_113 = arith.constant 5.000000e-01 : f32
    %283 = vector.broadcast %cst_113 : f32 to vector<8x128xf32>
    %284 = arith.addf %282, %283 : vector<8x128xf32>
    %285 = vector.extract_strided_slice %268 {offsets = [0, 256], sizes = [8, 128], strides = [1, 1]} : vector<8x512xf32> to vector<8x128xf32>
    %286 = math.tanh %285 : vector<8x128xf32>
    %287 = vector.extract_strided_slice %268 {offsets = [0, 384], sizes = [8, 128], strides = [1, 1]} : vector<8x512xf32> to vector<8x128xf32>
    %cst_114 = arith.constant 5.000000e-01 : f32
    %288 = vector.broadcast %cst_114 : f32 to vector<8x128xf32>
    %289 = arith.mulf %288, %287 : vector<8x128xf32>
    %290 = math.tanh %289 : vector<8x128xf32>
    %cst_115 = arith.constant 5.000000e-01 : f32
    %291 = vector.broadcast %cst_115 : f32 to vector<8x128xf32>
    %292 = arith.mulf %291, %290 : vector<8x128xf32>
    %cst_116 = arith.constant 5.000000e-01 : f32
    %293 = vector.broadcast %cst_116 : f32 to vector<8x128xf32>
    %294 = arith.addf %292, %293 : vector<8x128xf32>
    %295 = arith.mulf %284, %216 : vector<8x128xf32>
    %296 = arith.mulf %276, %286 : vector<8x128xf32>
    %297 = arith.addf %295, %296 : vector<8x128xf32>
    %298 = math.tanh %297 : vector<8x128xf32>
    %299 = arith.mulf %294, %298 : vector<8x128xf32>
    %300 = arith.index_cast %263 : i32 to index
    %c512_117 = arith.constant 512 : index
    %301 = vector.load %arg14[%300, %c512_117] : memref<64x1024xf32, #tpu.memory_space<vmem>>, vector<8x512xf32>
    %c0_118 = arith.constant 0 : index
    %c0_119 = arith.constant 0 : index
    %302 = vector.load %arg3[%c0_118, %c0_119] : memref<128x512xf32, #tpu.memory_space<vmem>>, vector<128x512xf32>
    %cst_120 = arith.constant dense<0.000000e+00> : vector<8x512xf32>
    %303 = tpu.matmul %254, %302, %cst_120 {dimension_numbers = #tpu.dot_dimension_numbers<[1], [0], [0], [1], [0, 0, 1, 1], [], []>} : vector<8x128xf32>, vector<128x512xf32>, vector<8x512xf32> -> vector<8x512xf32>
    %304 = arith.addf %301, %303 : vector<8x512xf32>
    %305 = vector.extract_strided_slice %304 {offsets = [0, 0], sizes = [8, 128], strides = [1, 1]} : vector<8x512xf32> to vector<8x128xf32>
    %cst_121 = arith.constant 5.000000e-01 : f32
    %306 = vector.broadcast %cst_121 : f32 to vector<8x128xf32>
    %307 = arith.mulf %306, %305 : vector<8x128xf32>
    %308 = math.tanh %307 : vector<8x128xf32>
    %cst_122 = arith.constant 5.000000e-01 : f32
    %309 = vector.broadcast %cst_122 : f32 to vector<8x128xf32>
    %310 = arith.mulf %309, %308 : vector<8x128xf32>
    %cst_123 = arith.constant 5.000000e-01 : f32
    %311 = vector.broadcast %cst_123 : f32 to vector<8x128xf32>
    %312 = arith.addf %310, %311 : vector<8x128xf32>
    %313 = vector.extract_strided_slice %304 {offsets = [0, 128], sizes = [8, 128], strides = [1, 1]} : vector<8x512xf32> to vector<8x128xf32>
    %cst_124 = arith.constant 5.000000e-01 : f32
    %314 = vector.broadcast %cst_124 : f32 to vector<8x128xf32>
    %315 = arith.mulf %314, %313 : vector<8x128xf32>
    %316 = math.tanh %315 : vector<8x128xf32>
    %cst_125 = arith.constant 5.000000e-01 : f32
    %317 = vector.broadcast %cst_125 : f32 to vector<8x128xf32>
    %318 = arith.mulf %317, %316 : vector<8x128xf32>
    %cst_126 = arith.constant 5.000000e-01 : f32
    %319 = vector.broadcast %cst_126 : f32 to vector<8x128xf32>
    %320 = arith.addf %318, %319 : vector<8x128xf32>
    %321 = vector.extract_strided_slice %304 {offsets = [0, 256], sizes = [8, 128], strides = [1, 1]} : vector<8x512xf32> to vector<8x128xf32>
    %322 = math.tanh %321 : vector<8x128xf32>
    %323 = vector.extract_strided_slice %304 {offsets = [0, 384], sizes = [8, 128], strides = [1, 1]} : vector<8x512xf32> to vector<8x128xf32>
    %cst_127 = arith.constant 5.000000e-01 : f32
    %324 = vector.broadcast %cst_127 : f32 to vector<8x128xf32>
    %325 = arith.mulf %324, %323 : vector<8x128xf32>
    %326 = math.tanh %325 : vector<8x128xf32>
    %cst_128 = arith.constant 5.000000e-01 : f32
    %327 = vector.broadcast %cst_128 : f32 to vector<8x128xf32>
    %328 = arith.mulf %327, %326 : vector<8x128xf32>
    %cst_129 = arith.constant 5.000000e-01 : f32
    %329 = vector.broadcast %cst_129 : f32 to vector<8x128xf32>
    %330 = arith.addf %328, %329 : vector<8x128xf32>
    %331 = arith.mulf %320, %252 : vector<8x128xf32>
    %332 = arith.mulf %312, %322 : vector<8x128xf32>
    %333 = arith.addf %331, %332 : vector<8x128xf32>
    %334 = math.tanh %333 : vector<8x128xf32>
    %335 = arith.mulf %330, %334 : vector<8x128xf32>
    %336 = arith.index_cast %260 : i32 to index
    %c0_130 = arith.constant 0 : index
    %337 = vector.load %arg15[%336, %c0_130] : memref<64x256xf32, #tpu.memory_space<vmem>>, vector<8x128xf32>
    tpu.vector_store %arg15[%336, %c0_130], %299 {strides = array<i32>} : memref<64x256xf32, #tpu.memory_space<vmem>>, vector<8x128xf32>,
    %338 = arith.index_cast %263 : i32 to index
    %c128_131 = arith.constant 128 : index
    %339 = vector.load %arg15[%338, %c128_131] : memref<64x256xf32, #tpu.memory_space<vmem>>, vector<8x128xf32>
    tpu.vector_store %arg15[%338, %c128_131], %335 {strides = array<i32>} : memref<64x256xf32, #tpu.memory_space<vmem>>, vector<8x128xf32>,
    %c4_i32 = arith.constant 4 : i32
    %c8_i32_132 = arith.constant 8 : i32
    %340 = arith.muli %c4_i32, %c8_i32_132 : i32
    %341 = tpu.assume_multiple %340, 8 : i32
    %c7_i32_133 = arith.constant 7 : i32
    %342 = arith.subi %c7_i32_133, %c4_i32 : i32
    %c8_i32_134 = arith.constant 8 : i32
    %343 = arith.muli %342, %c8_i32_134 : i32
    %344 = tpu.assume_multiple %343, 8 : i32
    %345 = arith.index_cast %341 : i32 to index
    %c0_135 = arith.constant 0 : index
    %346 = vector.load %arg14[%345, %c0_135] : memref<64x1024xf32, #tpu.memory_space<vmem>>, vector<8x512xf32>
    %c0_136 = arith.constant 0 : index
    %c0_137 = arith.constant 0 : index
    %347 = vector.load %arg2[%c0_136, %c0_137] : memref<128x512xf32, #tpu.memory_space<vmem>>, vector<128x512xf32>
    %cst_138 = arith.constant dense<0.000000e+00> : vector<8x512xf32>
    %348 = tpu.matmul %299, %347, %cst_138 {dimension_numbers = #tpu.dot_dimension_numbers<[1], [0], [0], [1], [0, 0, 1, 1], [], []>} : vector<8x128xf32>, vector<128x512xf32>, vector<8x512xf32> -> vector<8x512xf32>
    %349 = arith.addf %346, %348 : vector<8x512xf32>
    %350 = vector.extract_strided_slice %349 {offsets = [0, 0], sizes = [8, 128], strides = [1, 1]} : vector<8x512xf32> to vector<8x128xf32>
    %cst_139 = arith.constant 5.000000e-01 : f32
    %351 = vector.broadcast %cst_139 : f32 to vector<8x128xf32>
    %352 = arith.mulf %351, %350 : vector<8x128xf32>
    %353 = math.tanh %352 : vector<8x128xf32>
    %cst_140 = arith.constant 5.000000e-01 : f32
    %354 = vector.broadcast %cst_140 : f32 to vector<8x128xf32>
    %355 = arith.mulf %354, %353 : vector<8x128xf32>
    %cst_141 = arith.constant 5.000000e-01 : f32
    %356 = vector.broadcast %cst_141 : f32 to vector<8x128xf32>
    %357 = arith.addf %355, %356 : vector<8x128xf32>
    %358 = vector.extract_strided_slice %349 {offsets = [0, 128], sizes = [8, 128], strides = [1, 1]} : vector<8x512xf32> to vector<8x128xf32>
    %cst_142 = arith.constant 5.000000e-01 : f32
    %359 = vector.broadcast %cst_142 : f32 to vector<8x128xf32>
    %360 = arith.mulf %359, %358 : vector<8x128xf32>
    %361 = math.tanh %360 : vector<8x128xf32>
    %cst_143 = arith.constant 5.000000e-01 : f32
    %362 = vector.broadcast %cst_143 : f32 to vector<8x128xf32>
    %363 = arith.mulf %362, %361 : vector<8x128xf32>
    %cst_144 = arith.constant 5.000000e-01 : f32
    %364 = vector.broadcast %cst_144 : f32 to vector<8x128xf32>
    %365 = arith.addf %363, %364 : vector<8x128xf32>
    %366 = vector.extract_strided_slice %349 {offsets = [0, 256], sizes = [8, 128], strides = [1, 1]} : vector<8x512xf32> to vector<8x128xf32>
    %367 = math.tanh %366 : vector<8x128xf32>
    %368 = vector.extract_strided_slice %349 {offsets = [0, 384], sizes = [8, 128], strides = [1, 1]} : vector<8x512xf32> to vector<8x128xf32>
    %cst_145 = arith.constant 5.000000e-01 : f32
    %369 = vector.broadcast %cst_145 : f32 to vector<8x128xf32>
    %370 = arith.mulf %369, %368 : vector<8x128xf32>
    %371 = math.tanh %370 : vector<8x128xf32>
    %cst_146 = arith.constant 5.000000e-01 : f32
    %372 = vector.broadcast %cst_146 : f32 to vector<8x128xf32>
    %373 = arith.mulf %372, %371 : vector<8x128xf32>
    %cst_147 = arith.constant 5.000000e-01 : f32
    %374 = vector.broadcast %cst_147 : f32 to vector<8x128xf32>
    %375 = arith.addf %373, %374 : vector<8x128xf32>
    %376 = arith.mulf %365, %297 : vector<8x128xf32>
    %377 = arith.mulf %357, %367 : vector<8x128xf32>
    %378 = arith.addf %376, %377 : vector<8x128xf32>
    %379 = math.tanh %378 : vector<8x128xf32>
    %380 = arith.mulf %375, %379 : vector<8x128xf32>
    %381 = arith.index_cast %344 : i32 to index
    %c512_148 = arith.constant 512 : index
    %382 = vector.load %arg14[%381, %c512_148] : memref<64x1024xf32, #tpu.memory_space<vmem>>, vector<8x512xf32>
    %c0_149 = arith.constant 0 : index
    %c0_150 = arith.constant 0 : index
    %383 = vector.load %arg3[%c0_149, %c0_150] : memref<128x512xf32, #tpu.memory_space<vmem>>, vector<128x512xf32>
    %cst_151 = arith.constant dense<0.000000e+00> : vector<8x512xf32>
    %384 = tpu.matmul %335, %383, %cst_151 {dimension_numbers = #tpu.dot_dimension_numbers<[1], [0], [0], [1], [0, 0, 1, 1], [], []>} : vector<8x128xf32>, vector<128x512xf32>, vector<8x512xf32> -> vector<8x512xf32>
    %385 = arith.addf %382, %384 : vector<8x512xf32>
    %386 = vector.extract_strided_slice %385 {offsets = [0, 0], sizes = [8, 128], strides = [1, 1]} : vector<8x512xf32> to vector<8x128xf32>
    %cst_152 = arith.constant 5.000000e-01 : f32
    %387 = vector.broadcast %cst_152 : f32 to vector<8x128xf32>
    %388 = arith.mulf %387, %386 : vector<8x128xf32>
    %389 = math.tanh %388 : vector<8x128xf32>
    %cst_153 = arith.constant 5.000000e-01 : f32
    %390 = vector.broadcast %cst_153 : f32 to vector<8x128xf32>
    %391 = arith.mulf %390, %389 : vector<8x128xf32>
    %cst_154 = arith.constant 5.000000e-01 : f32
    %392 = vector.broadcast %cst_154 : f32 to vector<8x128xf32>
    %393 = arith.addf %391, %392 : vector<8x128xf32>
    %394 = vector.extract_strided_slice %385 {offsets = [0, 128], sizes = [8, 128], strides = [1, 1]} : vector<8x512xf32> to vector<8x128xf32>
    %cst_155 = arith.constant 5.000000e-01 : f32
    %395 = vector.broadcast %cst_155 : f32 to vector<8x128xf32>
    %396 = arith.mulf %395, %394 : vector<8x128xf32>
    %397 = math.tanh %396 : vector<8x128xf32>
    %cst_156 = arith.constant 5.000000e-01 : f32
    %398 = vector.broadcast %cst_156 : f32 to vector<8x128xf32>
    %399 = arith.mulf %398, %397 : vector<8x128xf32>
    %cst_157 = arith.constant 5.000000e-01 : f32
    %400 = vector.broadcast %cst_157 : f32 to vector<8x128xf32>
    %401 = arith.addf %399, %400 : vector<8x128xf32>
    %402 = vector.extract_strided_slice %385 {offsets = [0, 256], sizes = [8, 128], strides = [1, 1]} : vector<8x512xf32> to vector<8x128xf32>
    %403 = math.tanh %402 : vector<8x128xf32>
    %404 = vector.extract_strided_slice %385 {offsets = [0, 384], sizes = [8, 128], strides = [1, 1]} : vector<8x512xf32> to vector<8x128xf32>
    %cst_158 = arith.constant 5.000000e-01 : f32
    %405 = vector.broadcast %cst_158 : f32 to vector<8x128xf32>
    %406 = arith.mulf %405, %404 : vector<8x128xf32>
    %407 = math.tanh %406 : vector<8x128xf32>
    %cst_159 = arith.constant 5.000000e-01 : f32
    %408 = vector.broadcast %cst_159 : f32 to vector<8x128xf32>
    %409 = arith.mulf %408, %407 : vector<8x128xf32>
    %cst_160 = arith.constant 5.000000e-01 : f32
    %410 = vector.broadcast %cst_160 : f32 to vector<8x128xf32>
    %411 = arith.addf %409, %410 : vector<8x128xf32>
    %412 = arith.mulf %401, %333 : vector<8x128xf32>
    %413 = arith.mulf %393, %403 : vector<8x128xf32>
    %414 = arith.addf %412, %413 : vector<8x128xf32>
    %415 = math.tanh %414 : vector<8x128xf32>
    %416 = arith.mulf %411, %415 : vector<8x128xf32>
    %417 = arith.index_cast %341 : i32 to index
    %c0_161 = arith.constant 0 : index
    %418 = vector.load %arg15[%417, %c0_161] : memref<64x256xf32, #tpu.memory_space<vmem>>, vector<8x128xf32>
    tpu.vector_store %arg15[%417, %c0_161], %380 {strides = array<i32>} : memref<64x256xf32, #tpu.memory_space<vmem>>, vector<8x128xf32>,
    %419 = arith.index_cast %344 : i32 to index
    %c128_162 = arith.constant 128 : index
    %420 = vector.load %arg15[%419, %c128_162] : memref<64x256xf32, #tpu.memory_space<vmem>>, vector<8x128xf32>
    tpu.vector_store %arg15[%419, %c128_162], %416 {strides = array<i32>} : memref<64x256xf32, #tpu.memory_space<vmem>>, vector<8x128xf32>,
    %c5_i32 = arith.constant 5 : i32
    %c8_i32_163 = arith.constant 8 : i32
    %421 = arith.muli %c5_i32, %c8_i32_163 : i32
    %422 = tpu.assume_multiple %421, 8 : i32
    %c7_i32_164 = arith.constant 7 : i32
    %423 = arith.subi %c7_i32_164, %c5_i32 : i32
    %c8_i32_165 = arith.constant 8 : i32
    %424 = arith.muli %423, %c8_i32_165 : i32
    %425 = tpu.assume_multiple %424, 8 : i32
    %426 = arith.index_cast %422 : i32 to index
    %c0_166 = arith.constant 0 : index
    %427 = vector.load %arg14[%426, %c0_166] : memref<64x1024xf32, #tpu.memory_space<vmem>>, vector<8x512xf32>
    %c0_167 = arith.constant 0 : index
    %c0_168 = arith.constant 0 : index
    %428 = vector.load %arg2[%c0_167, %c0_168] : memref<128x512xf32, #tpu.memory_space<vmem>>, vector<128x512xf32>
    %cst_169 = arith.constant dense<0.000000e+00> : vector<8x512xf32>
    %429 = tpu.matmul %380, %428, %cst_169 {dimension_numbers = #tpu.dot_dimension_numbers<[1], [0], [0], [1], [0, 0, 1, 1], [], []>} : vector<8x128xf32>, vector<128x512xf32>, vector<8x512xf32> -> vector<8x512xf32>
    %430 = arith.addf %427, %429 : vector<8x512xf32>
    %431 = vector.extract_strided_slice %430 {offsets = [0, 0], sizes = [8, 128], strides = [1, 1]} : vector<8x512xf32> to vector<8x128xf32>
    %cst_170 = arith.constant 5.000000e-01 : f32
    %432 = vector.broadcast %cst_170 : f32 to vector<8x128xf32>
    %433 = arith.mulf %432, %431 : vector<8x128xf32>
    %434 = math.tanh %433 : vector<8x128xf32>
    %cst_171 = arith.constant 5.000000e-01 : f32
    %435 = vector.broadcast %cst_171 : f32 to vector<8x128xf32>
    %436 = arith.mulf %435, %434 : vector<8x128xf32>
    %cst_172 = arith.constant 5.000000e-01 : f32
    %437 = vector.broadcast %cst_172 : f32 to vector<8x128xf32>
    %438 = arith.addf %436, %437 : vector<8x128xf32>
    %439 = vector.extract_strided_slice %430 {offsets = [0, 128], sizes = [8, 128], strides = [1, 1]} : vector<8x512xf32> to vector<8x128xf32>
    %cst_173 = arith.constant 5.000000e-01 : f32
    %440 = vector.broadcast %cst_173 : f32 to vector<8x128xf32>
    %441 = arith.mulf %440, %439 : vector<8x128xf32>
    %442 = math.tanh %441 : vector<8x128xf32>
    %cst_174 = arith.constant 5.000000e-01 : f32
    %443 = vector.broadcast %cst_174 : f32 to vector<8x128xf32>
    %444 = arith.mulf %443, %442 : vector<8x128xf32>
    %cst_175 = arith.constant 5.000000e-01 : f32
    %445 = vector.broadcast %cst_175 : f32 to vector<8x128xf32>
    %446 = arith.addf %444, %445 : vector<8x128xf32>
    %447 = vector.extract_strided_slice %430 {offsets = [0, 256], sizes = [8, 128], strides = [1, 1]} : vector<8x512xf32> to vector<8x128xf32>
    %448 = math.tanh %447 : vector<8x128xf32>
    %449 = vector.extract_strided_slice %430 {offsets = [0, 384], sizes = [8, 128], strides = [1, 1]} : vector<8x512xf32> to vector<8x128xf32>
    %cst_176 = arith.constant 5.000000e-01 : f32
    %450 = vector.broadcast %cst_176 : f32 to vector<8x128xf32>
    %451 = arith.mulf %450, %449 : vector<8x128xf32>
    %452 = math.tanh %451 : vector<8x128xf32>
    %cst_177 = arith.constant 5.000000e-01 : f32
    %453 = vector.broadcast %cst_177 : f32 to vector<8x128xf32>
    %454 = arith.mulf %453, %452 : vector<8x128xf32>
    %cst_178 = arith.constant 5.000000e-01 : f32
    %455 = vector.broadcast %cst_178 : f32 to vector<8x128xf32>
    %456 = arith.addf %454, %455 : vector<8x128xf32>
    %457 = arith.mulf %446, %378 : vector<8x128xf32>
    %458 = arith.mulf %438, %448 : vector<8x128xf32>
    %459 = arith.addf %457, %458 : vector<8x128xf32>
    %460 = math.tanh %459 : vector<8x128xf32>
    %461 = arith.mulf %456, %460 : vector<8x128xf32>
    %462 = arith.index_cast %425 : i32 to index
    %c512_179 = arith.constant 512 : index
    %463 = vector.load %arg14[%462, %c512_179] : memref<64x1024xf32, #tpu.memory_space<vmem>>, vector<8x512xf32>
    %c0_180 = arith.constant 0 : index
    %c0_181 = arith.constant 0 : index
    %464 = vector.load %arg3[%c0_180, %c0_181] : memref<128x512xf32, #tpu.memory_space<vmem>>, vector<128x512xf32>
    %cst_182 = arith.constant dense<0.000000e+00> : vector<8x512xf32>
    %465 = tpu.matmul %416, %464, %cst_182 {dimension_numbers = #tpu.dot_dimension_numbers<[1], [0], [0], [1], [0, 0, 1, 1], [], []>} : vector<8x128xf32>, vector<128x512xf32>, vector<8x512xf32> -> vector<8x512xf32>
    %466 = arith.addf %463, %465 : vector<8x512xf32>
    %467 = vector.extract_strided_slice %466 {offsets = [0, 0], sizes = [8, 128], strides = [1, 1]} : vector<8x512xf32> to vector<8x128xf32>
    %cst_183 = arith.constant 5.000000e-01 : f32
    %468 = vector.broadcast %cst_183 : f32 to vector<8x128xf32>
    %469 = arith.mulf %468, %467 : vector<8x128xf32>
    %470 = math.tanh %469 : vector<8x128xf32>
    %cst_184 = arith.constant 5.000000e-01 : f32
    %471 = vector.broadcast %cst_184 : f32 to vector<8x128xf32>
    %472 = arith.mulf %471, %470 : vector<8x128xf32>
    %cst_185 = arith.constant 5.000000e-01 : f32
    %473 = vector.broadcast %cst_185 : f32 to vector<8x128xf32>
    %474 = arith.addf %472, %473 : vector<8x128xf32>
    %475 = vector.extract_strided_slice %466 {offsets = [0, 128], sizes = [8, 128], strides = [1, 1]} : vector<8x512xf32> to vector<8x128xf32>
    %cst_186 = arith.constant 5.000000e-01 : f32
    %476 = vector.broadcast %cst_186 : f32 to vector<8x128xf32>
    %477 = arith.mulf %476, %475 : vector<8x128xf32>
    %478 = math.tanh %477 : vector<8x128xf32>
    %cst_187 = arith.constant 5.000000e-01 : f32
    %479 = vector.broadcast %cst_187 : f32 to vector<8x128xf32>
    %480 = arith.mulf %479, %478 : vector<8x128xf32>
    %cst_188 = arith.constant 5.000000e-01 : f32
    %481 = vector.broadcast %cst_188 : f32 to vector<8x128xf32>
    %482 = arith.addf %480, %481 : vector<8x128xf32>
    %483 = vector.extract_strided_slice %466 {offsets = [0, 256], sizes = [8, 128], strides = [1, 1]} : vector<8x512xf32> to vector<8x128xf32>
    %484 = math.tanh %483 : vector<8x128xf32>
    %485 = vector.extract_strided_slice %466 {offsets = [0, 384], sizes = [8, 128], strides = [1, 1]} : vector<8x512xf32> to vector<8x128xf32>
    %cst_189 = arith.constant 5.000000e-01 : f32
    %486 = vector.broadcast %cst_189 : f32 to vector<8x128xf32>
    %487 = arith.mulf %486, %485 : vector<8x128xf32>
    %488 = math.tanh %487 : vector<8x128xf32>
    %cst_190 = arith.constant 5.000000e-01 : f32
    %489 = vector.broadcast %cst_190 : f32 to vector<8x128xf32>
    %490 = arith.mulf %489, %488 : vector<8x128xf32>
    %cst_191 = arith.constant 5.000000e-01 : f32
    %491 = vector.broadcast %cst_191 : f32 to vector<8x128xf32>
    %492 = arith.addf %490, %491 : vector<8x128xf32>
    %493 = arith.mulf %482, %414 : vector<8x128xf32>
    %494 = arith.mulf %474, %484 : vector<8x128xf32>
    %495 = arith.addf %493, %494 : vector<8x128xf32>
    %496 = math.tanh %495 : vector<8x128xf32>
    %497 = arith.mulf %492, %496 : vector<8x128xf32>
    %498 = arith.index_cast %422 : i32 to index
    %c0_192 = arith.constant 0 : index
    %499 = vector.load %arg15[%498, %c0_192] : memref<64x256xf32, #tpu.memory_space<vmem>>, vector<8x128xf32>
    tpu.vector_store %arg15[%498, %c0_192], %461 {strides = array<i32>} : memref<64x256xf32, #tpu.memory_space<vmem>>, vector<8x128xf32>,
    %500 = arith.index_cast %425 : i32 to index
    %c128_193 = arith.constant 128 : index
    %501 = vector.load %arg15[%500, %c128_193] : memref<64x256xf32, #tpu.memory_space<vmem>>, vector<8x128xf32>
    tpu.vector_store %arg15[%500, %c128_193], %497 {strides = array<i32>} : memref<64x256xf32, #tpu.memory_space<vmem>>, vector<8x128xf32>,
    %c6_i32 = arith.constant 6 : i32
    %c8_i32_194 = arith.constant 8 : i32
    %502 = arith.muli %c6_i32, %c8_i32_194 : i32
    %503 = tpu.assume_multiple %502, 8 : i32
    %c7_i32_195 = arith.constant 7 : i32
    %504 = arith.subi %c7_i32_195, %c6_i32 : i32
    %c8_i32_196 = arith.constant 8 : i32
    %505 = arith.muli %504, %c8_i32_196 : i32
    %506 = tpu.assume_multiple %505, 8 : i32
    %507 = arith.index_cast %503 : i32 to index
    %c0_197 = arith.constant 0 : index
    %508 = vector.load %arg14[%507, %c0_197] : memref<64x1024xf32, #tpu.memory_space<vmem>>, vector<8x512xf32>
    %c0_198 = arith.constant 0 : index
    %c0_199 = arith.constant 0 : index
    %509 = vector.load %arg2[%c0_198, %c0_199] : memref<128x512xf32, #tpu.memory_space<vmem>>, vector<128x512xf32>
    %cst_200 = arith.constant dense<0.000000e+00> : vector<8x512xf32>
    %510 = tpu.matmul %461, %509, %cst_200 {dimension_numbers = #tpu.dot_dimension_numbers<[1], [0], [0], [1], [0, 0, 1, 1], [], []>} : vector<8x128xf32>, vector<128x512xf32>, vector<8x512xf32> -> vector<8x512xf32>
    %511 = arith.addf %508, %510 : vector<8x512xf32>
    %512 = vector.extract_strided_slice %511 {offsets = [0, 0], sizes = [8, 128], strides = [1, 1]} : vector<8x512xf32> to vector<8x128xf32>
    %cst_201 = arith.constant 5.000000e-01 : f32
    %513 = vector.broadcast %cst_201 : f32 to vector<8x128xf32>
    %514 = arith.mulf %513, %512 : vector<8x128xf32>
    %515 = math.tanh %514 : vector<8x128xf32>
    %cst_202 = arith.constant 5.000000e-01 : f32
    %516 = vector.broadcast %cst_202 : f32 to vector<8x128xf32>
    %517 = arith.mulf %516, %515 : vector<8x128xf32>
    %cst_203 = arith.constant 5.000000e-01 : f32
    %518 = vector.broadcast %cst_203 : f32 to vector<8x128xf32>
    %519 = arith.addf %517, %518 : vector<8x128xf32>
    %520 = vector.extract_strided_slice %511 {offsets = [0, 128], sizes = [8, 128], strides = [1, 1]} : vector<8x512xf32> to vector<8x128xf32>
    %cst_204 = arith.constant 5.000000e-01 : f32
    %521 = vector.broadcast %cst_204 : f32 to vector<8x128xf32>
    %522 = arith.mulf %521, %520 : vector<8x128xf32>
    %523 = math.tanh %522 : vector<8x128xf32>
    %cst_205 = arith.constant 5.000000e-01 : f32
    %524 = vector.broadcast %cst_205 : f32 to vector<8x128xf32>
    %525 = arith.mulf %524, %523 : vector<8x128xf32>
    %cst_206 = arith.constant 5.000000e-01 : f32
    %526 = vector.broadcast %cst_206 : f32 to vector<8x128xf32>
    %527 = arith.addf %525, %526 : vector<8x128xf32>
    %528 = vector.extract_strided_slice %511 {offsets = [0, 256], sizes = [8, 128], strides = [1, 1]} : vector<8x512xf32> to vector<8x128xf32>
    %529 = math.tanh %528 : vector<8x128xf32>
    %530 = vector.extract_strided_slice %511 {offsets = [0, 384], sizes = [8, 128], strides = [1, 1]} : vector<8x512xf32> to vector<8x128xf32>
    %cst_207 = arith.constant 5.000000e-01 : f32
    %531 = vector.broadcast %cst_207 : f32 to vector<8x128xf32>
    %532 = arith.mulf %531, %530 : vector<8x128xf32>
    %533 = math.tanh %532 : vector<8x128xf32>
    %cst_208 = arith.constant 5.000000e-01 : f32
    %534 = vector.broadcast %cst_208 : f32 to vector<8x128xf32>
    %535 = arith.mulf %534, %533 : vector<8x128xf32>
    %cst_209 = arith.constant 5.000000e-01 : f32
    %536 = vector.broadcast %cst_209 : f32 to vector<8x128xf32>
    %537 = arith.addf %535, %536 : vector<8x128xf32>
    %538 = arith.mulf %527, %459 : vector<8x128xf32>
    %539 = arith.mulf %519, %529 : vector<8x128xf32>
    %540 = arith.addf %538, %539 : vector<8x128xf32>
    %541 = math.tanh %540 : vector<8x128xf32>
    %542 = arith.mulf %537, %541 : vector<8x128xf32>
    %543 = arith.index_cast %506 : i32 to index
    %c512_210 = arith.constant 512 : index
    %544 = vector.load %arg14[%543, %c512_210] : memref<64x1024xf32, #tpu.memory_space<vmem>>, vector<8x512xf32>
    %c0_211 = arith.constant 0 : index
    %c0_212 = arith.constant 0 : index
    %545 = vector.load %arg3[%c0_211, %c0_212] : memref<128x512xf32, #tpu.memory_space<vmem>>, vector<128x512xf32>
    %cst_213 = arith.constant dense<0.000000e+00> : vector<8x512xf32>
    %546 = tpu.matmul %497, %545, %cst_213 {dimension_numbers = #tpu.dot_dimension_numbers<[1], [0], [0], [1], [0, 0, 1, 1], [], []>} : vector<8x128xf32>, vector<128x512xf32>, vector<8x512xf32> -> vector<8x512xf32>
    %547 = arith.addf %544, %546 : vector<8x512xf32>
    %548 = vector.extract_strided_slice %547 {offsets = [0, 0], sizes = [8, 128], strides = [1, 1]} : vector<8x512xf32> to vector<8x128xf32>
    %cst_214 = arith.constant 5.000000e-01 : f32
    %549 = vector.broadcast %cst_214 : f32 to vector<8x128xf32>
    %550 = arith.mulf %549, %548 : vector<8x128xf32>
    %551 = math.tanh %550 : vector<8x128xf32>
    %cst_215 = arith.constant 5.000000e-01 : f32
    %552 = vector.broadcast %cst_215 : f32 to vector<8x128xf32>
    %553 = arith.mulf %552, %551 : vector<8x128xf32>
    %cst_216 = arith.constant 5.000000e-01 : f32
    %554 = vector.broadcast %cst_216 : f32 to vector<8x128xf32>
    %555 = arith.addf %553, %554 : vector<8x128xf32>
    %556 = vector.extract_strided_slice %547 {offsets = [0, 128], sizes = [8, 128], strides = [1, 1]} : vector<8x512xf32> to vector<8x128xf32>
    %cst_217 = arith.constant 5.000000e-01 : f32
    %557 = vector.broadcast %cst_217 : f32 to vector<8x128xf32>
    %558 = arith.mulf %557, %556 : vector<8x128xf32>
    %559 = math.tanh %558 : vector<8x128xf32>
    %cst_218 = arith.constant 5.000000e-01 : f32
    %560 = vector.broadcast %cst_218 : f32 to vector<8x128xf32>
    %561 = arith.mulf %560, %559 : vector<8x128xf32>
    %cst_219 = arith.constant 5.000000e-01 : f32
    %562 = vector.broadcast %cst_219 : f32 to vector<8x128xf32>
    %563 = arith.addf %561, %562 : vector<8x128xf32>
    %564 = vector.extract_strided_slice %547 {offsets = [0, 256], sizes = [8, 128], strides = [1, 1]} : vector<8x512xf32> to vector<8x128xf32>
    %565 = math.tanh %564 : vector<8x128xf32>
    %566 = vector.extract_strided_slice %547 {offsets = [0, 384], sizes = [8, 128], strides = [1, 1]} : vector<8x512xf32> to vector<8x128xf32>
    %cst_220 = arith.constant 5.000000e-01 : f32
    %567 = vector.broadcast %cst_220 : f32 to vector<8x128xf32>
    %568 = arith.mulf %567, %566 : vector<8x128xf32>
    %569 = math.tanh %568 : vector<8x128xf32>
    %cst_221 = arith.constant 5.000000e-01 : f32
    %570 = vector.broadcast %cst_221 : f32 to vector<8x128xf32>
    %571 = arith.mulf %570, %569 : vector<8x128xf32>
    %cst_222 = arith.constant 5.000000e-01 : f32
    %572 = vector.broadcast %cst_222 : f32 to vector<8x128xf32>
    %573 = arith.addf %571, %572 : vector<8x128xf32>
    %574 = arith.mulf %563, %495 : vector<8x128xf32>
    %575 = arith.mulf %555, %565 : vector<8x128xf32>
    %576 = arith.addf %574, %575 : vector<8x128xf32>
    %577 = math.tanh %576 : vector<8x128xf32>
    %578 = arith.mulf %573, %577 : vector<8x128xf32>
    %579 = arith.index_cast %503 : i32 to index
    %c0_223 = arith.constant 0 : index
    %580 = vector.load %arg15[%579, %c0_223] : memref<64x256xf32, #tpu.memory_space<vmem>>, vector<8x128xf32>
    tpu.vector_store %arg15[%579, %c0_223], %542 {strides = array<i32>} : memref<64x256xf32, #tpu.memory_space<vmem>>, vector<8x128xf32>,
    %581 = arith.index_cast %506 : i32 to index
    %c128_224 = arith.constant 128 : index
    %582 = vector.load %arg15[%581, %c128_224] : memref<64x256xf32, #tpu.memory_space<vmem>>, vector<8x128xf32>
    tpu.vector_store %arg15[%581, %c128_224], %578 {strides = array<i32>} : memref<64x256xf32, #tpu.memory_space<vmem>>, vector<8x128xf32>,
    %c7_i32_225 = arith.constant 7 : i32
    %c8_i32_226 = arith.constant 8 : i32
    %583 = arith.muli %c7_i32_225, %c8_i32_226 : i32
    %584 = tpu.assume_multiple %583, 8 : i32
    %c7_i32_227 = arith.constant 7 : i32
    %585 = arith.subi %c7_i32_227, %c7_i32_225 : i32
    %c8_i32_228 = arith.constant 8 : i32
    %586 = arith.muli %585, %c8_i32_228 : i32
    %587 = tpu.assume_multiple %586, 8 : i32
    %588 = arith.index_cast %584 : i32 to index
    %c0_229 = arith.constant 0 : index
    %589 = vector.load %arg14[%588, %c0_229] : memref<64x1024xf32, #tpu.memory_space<vmem>>, vector<8x512xf32>
    %c0_230 = arith.constant 0 : index
    %c0_231 = arith.constant 0 : index
    %590 = vector.load %arg2[%c0_230, %c0_231] : memref<128x512xf32, #tpu.memory_space<vmem>>, vector<128x512xf32>
    %cst_232 = arith.constant dense<0.000000e+00> : vector<8x512xf32>
    %591 = tpu.matmul %542, %590, %cst_232 {dimension_numbers = #tpu.dot_dimension_numbers<[1], [0], [0], [1], [0, 0, 1, 1], [], []>} : vector<8x128xf32>, vector<128x512xf32>, vector<8x512xf32> -> vector<8x512xf32>
    %592 = arith.addf %589, %591 : vector<8x512xf32>
    %593 = vector.extract_strided_slice %592 {offsets = [0, 0], sizes = [8, 128], strides = [1, 1]} : vector<8x512xf32> to vector<8x128xf32>
    %cst_233 = arith.constant 5.000000e-01 : f32
    %594 = vector.broadcast %cst_233 : f32 to vector<8x128xf32>
    %595 = arith.mulf %594, %593 : vector<8x128xf32>
    %596 = math.tanh %595 : vector<8x128xf32>
    %cst_234 = arith.constant 5.000000e-01 : f32
    %597 = vector.broadcast %cst_234 : f32 to vector<8x128xf32>
    %598 = arith.mulf %597, %596 : vector<8x128xf32>
    %cst_235 = arith.constant 5.000000e-01 : f32
    %599 = vector.broadcast %cst_235 : f32 to vector<8x128xf32>
    %600 = arith.addf %598, %599 : vector<8x128xf32>
    %601 = vector.extract_strided_slice %592 {offsets = [0, 128], sizes = [8, 128], strides = [1, 1]} : vector<8x512xf32> to vector<8x128xf32>
    %cst_236 = arith.constant 5.000000e-01 : f32
    %602 = vector.broadcast %cst_236 : f32 to vector<8x128xf32>
    %603 = arith.mulf %602, %601 : vector<8x128xf32>
    %604 = math.tanh %603 : vector<8x128xf32>
    %cst_237 = arith.constant 5.000000e-01 : f32
    %605 = vector.broadcast %cst_237 : f32 to vector<8x128xf32>
    %606 = arith.mulf %605, %604 : vector<8x128xf32>
    %cst_238 = arith.constant 5.000000e-01 : f32
    %607 = vector.broadcast %cst_238 : f32 to vector<8x128xf32>
    %608 = arith.addf %606, %607 : vector<8x128xf32>
    %609 = vector.extract_strided_slice %592 {offsets = [0, 256], sizes = [8, 128], strides = [1, 1]} : vector<8x512xf32> to vector<8x128xf32>
    %610 = math.tanh %609 : vector<8x128xf32>
    %611 = vector.extract_strided_slice %592 {offsets = [0, 384], sizes = [8, 128], strides = [1, 1]} : vector<8x512xf32> to vector<8x128xf32>
    %cst_239 = arith.constant 5.000000e-01 : f32
    %612 = vector.broadcast %cst_239 : f32 to vector<8x128xf32>
    %613 = arith.mulf %612, %611 : vector<8x128xf32>
    %614 = math.tanh %613 : vector<8x128xf32>
    %cst_240 = arith.constant 5.000000e-01 : f32
    %615 = vector.broadcast %cst_240 : f32 to vector<8x128xf32>
    %616 = arith.mulf %615, %614 : vector<8x128xf32>
    %cst_241 = arith.constant 5.000000e-01 : f32
    %617 = vector.broadcast %cst_241 : f32 to vector<8x128xf32>
    %618 = arith.addf %616, %617 : vector<8x128xf32>
    %619 = arith.mulf %608, %540 : vector<8x128xf32>
    %620 = arith.mulf %600, %610 : vector<8x128xf32>
    %621 = arith.addf %619, %620 : vector<8x128xf32>
    %622 = math.tanh %621 : vector<8x128xf32>
    %623 = arith.mulf %618, %622 : vector<8x128xf32>
    %624 = arith.index_cast %587 : i32 to index
    %c512_242 = arith.constant 512 : index
    %625 = vector.load %arg14[%624, %c512_242] : memref<64x1024xf32, #tpu.memory_space<vmem>>, vector<8x512xf32>
    %c0_243 = arith.constant 0 : index
    %c0_244 = arith.constant 0 : index
    %626 = vector.load %arg3[%c0_243, %c0_244] : memref<128x512xf32, #tpu.memory_space<vmem>>, vector<128x512xf32>
    %cst_245 = arith.constant dense<0.000000e+00> : vector<8x512xf32>
    %627 = tpu.matmul %578, %626, %cst_245 {dimension_numbers = #tpu.dot_dimension_numbers<[1], [0], [0], [1], [0, 0, 1, 1], [], []>} : vector<8x128xf32>, vector<128x512xf32>, vector<8x512xf32> -> vector<8x512xf32>
    %628 = arith.addf %625, %627 : vector<8x512xf32>
    %629 = vector.extract_strided_slice %628 {offsets = [0, 0], sizes = [8, 128], strides = [1, 1]} : vector<8x512xf32> to vector<8x128xf32>
    %cst_246 = arith.constant 5.000000e-01 : f32
    %630 = vector.broadcast %cst_246 : f32 to vector<8x128xf32>
    %631 = arith.mulf %630, %629 : vector<8x128xf32>
    %632 = math.tanh %631 : vector<8x128xf32>
    %cst_247 = arith.constant 5.000000e-01 : f32
    %633 = vector.broadcast %cst_247 : f32 to vector<8x128xf32>
    %634 = arith.mulf %633, %632 : vector<8x128xf32>
    %cst_248 = arith.constant 5.000000e-01 : f32
    %635 = vector.broadcast %cst_248 : f32 to vector<8x128xf32>
    %636 = arith.addf %634, %635 : vector<8x128xf32>
    %637 = vector.extract_strided_slice %628 {offsets = [0, 128], sizes = [8, 128], strides = [1, 1]} : vector<8x512xf32> to vector<8x128xf32>
    %cst_249 = arith.constant 5.000000e-01 : f32
    %638 = vector.broadcast %cst_249 : f32 to vector<8x128xf32>
    %639 = arith.mulf %638, %637 : vector<8x128xf32>
    %640 = math.tanh %639 : vector<8x128xf32>
    %cst_250 = arith.constant 5.000000e-01 : f32
    %641 = vector.broadcast %cst_250 : f32 to vector<8x128xf32>
    %642 = arith.mulf %641, %640 : vector<8x128xf32>
    %cst_251 = arith.constant 5.000000e-01 : f32
    %643 = vector.broadcast %cst_251 : f32 to vector<8x128xf32>
    %644 = arith.addf %642, %643 : vector<8x128xf32>
    %645 = vector.extract_strided_slice %628 {offsets = [0, 256], sizes = [8, 128], strides = [1, 1]} : vector<8x512xf32> to vector<8x128xf32>
    %646 = math.tanh %645 : vector<8x128xf32>
    %647 = vector.extract_strided_slice %628 {offsets = [0, 384], sizes = [8, 128], strides = [1, 1]} : vector<8x512xf32> to vector<8x128xf32>
    %cst_252 = arith.constant 5.000000e-01 : f32
    %648 = vector.broadcast %cst_252 : f32 to vector<8x128xf32>
    %649 = arith.mulf %648, %647 : vector<8x128xf32>
    %650 = math.tanh %649 : vector<8x128xf32>
    %cst_253 = arith.constant 5.000000e-01 : f32
    %651 = vector.broadcast %cst_253 : f32 to vector<8x128xf32>
    %652 = arith.mulf %651, %650 : vector<8x128xf32>
    %cst_254 = arith.constant 5.000000e-01 : f32
    %653 = vector.broadcast %cst_254 : f32 to vector<8x128xf32>
    %654 = arith.addf %652, %653 : vector<8x128xf32>
    %655 = arith.mulf %644, %576 : vector<8x128xf32>
    %656 = arith.mulf %636, %646 : vector<8x128xf32>
    %657 = arith.addf %655, %656 : vector<8x128xf32>
    %658 = math.tanh %657 : vector<8x128xf32>
    %659 = arith.mulf %654, %658 : vector<8x128xf32>
    %660 = arith.index_cast %584 : i32 to index
    %c0_255 = arith.constant 0 : index
    %661 = vector.load %arg15[%660, %c0_255] : memref<64x256xf32, #tpu.memory_space<vmem>>, vector<8x128xf32>
    tpu.vector_store %arg15[%660, %c0_255], %623 {strides = array<i32>} : memref<64x256xf32, #tpu.memory_space<vmem>>, vector<8x128xf32>,
    %662 = arith.index_cast %587 : i32 to index
    %c128_256 = arith.constant 128 : index
    %663 = vector.load %arg15[%662, %c128_256] : memref<64x256xf32, #tpu.memory_space<vmem>>, vector<8x128xf32>
    tpu.vector_store %arg15[%662, %c128_256], %659 {strides = array<i32>} : memref<64x256xf32, #tpu.memory_space<vmem>>, vector<8x128xf32>,
    %c8_i32_257 = arith.constant 8 : i32
    %c0_258 = arith.constant 0 : index
    %c0_259 = arith.constant 0 : index
    %c0_260 = arith.constant 0 : index
    %664 = vector.load %arg12[%c0_258, %c0_259, %c0_260] : memref<4x8x128xf32, #tpu.memory_space<vmem>>, vector<1x8x128xf32>
    %665 = vector.shape_cast %664 : vector<1x8x128xf32> to vector<8x128xf32>
    %666 = vector.shape_cast %623 : vector<8x128xf32> to vector<1x8x128xf32>
    tpu.vector_store %arg12[%c0_258, %c0_259, %c0_260], %666 {strides = array<i32>} : memref<4x8x128xf32, #tpu.memory_space<vmem>>, vector<1x8x128xf32>,
    %c0_261 = arith.constant 0 : index
    %c0_262 = arith.constant 0 : index
    %c0_263 = arith.constant 0 : index
    %667 = vector.load %arg13[%c0_261, %c0_262, %c0_263] : memref<4x8x128xf32, #tpu.memory_space<vmem>>, vector<1x8x128xf32>
    %668 = vector.shape_cast %667 : vector<1x8x128xf32> to vector<8x128xf32>
    %669 = vector.shape_cast %621 : vector<8x128xf32> to vector<1x8x128xf32>
    tpu.vector_store %arg13[%c0_261, %c0_262, %c0_263], %669 {strides = array<i32>} : memref<4x8x128xf32, #tpu.memory_space<vmem>>, vector<1x8x128xf32>,
    %c1 = arith.constant 1 : index
    %c0_264 = arith.constant 0 : index
    %c0_265 = arith.constant 0 : index
    %670 = vector.load %arg12[%c1, %c0_264, %c0_265] : memref<4x8x128xf32, #tpu.memory_space<vmem>>, vector<1x8x128xf32>
    %671 = vector.shape_cast %670 : vector<1x8x128xf32> to vector<8x128xf32>
    %672 = vector.shape_cast %659 : vector<8x128xf32> to vector<1x8x128xf32>
    tpu.vector_store %arg12[%c1, %c0_264, %c0_265], %672 {strides = array<i32>} : memref<4x8x128xf32, #tpu.memory_space<vmem>>, vector<1x8x128xf32>,
    %c1_266 = arith.constant 1 : index
    %c0_267 = arith.constant 0 : index
    %c0_268 = arith.constant 0 : index
    %673 = vector.load %arg13[%c1_266, %c0_267, %c0_268] : memref<4x8x128xf32, #tpu.memory_space<vmem>>, vector<1x8x128xf32>
    %674 = vector.shape_cast %673 : vector<1x8x128xf32> to vector<8x128xf32>
    %675 = vector.shape_cast %657 : vector<8x128xf32> to vector<1x8x128xf32>
    tpu.vector_store %arg13[%c1_266, %c0_267, %c0_268], %675 {strides = array<i32>} : memref<4x8x128xf32, #tpu.memory_space<vmem>>, vector<1x8x128xf32>,
    %c0_i32_269 = arith.constant 0 : i32
    %676 = tpu.memref_slice %arg20[%c0_i32_269] : memref<4x!tpu.dma_semaphore, #tpu.memory_space<semaphore_mem>> -> memref<1x!tpu.dma_semaphore, #tpu.memory_space<semaphore_mem>>
    %677 = tpu.memref_squeeze %676 : memref<1x!tpu.dma_semaphore, #tpu.memory_space<semaphore_mem>> -> memref<!tpu.dma_semaphore, #tpu.memory_space<semaphore_mem>>
    tpu.wait_dma2 semaphore(%677 : memref<!tpu.dma_semaphore, #tpu.memory_space<semaphore_mem>>) src(%arg5 : memref<256x1024xf32, #tpu.memory_space<any>>) dst(%arg16 : memref<256x1024xf32, #tpu.memory_space<vmem>>)
    %c0_270 = arith.constant 0 : index
    %c0_271 = arith.constant 0 : index
    %678 = vector.load %arg15[%c0_270, %c0_271] : memref<64x256xf32, #tpu.memory_space<vmem>>, vector<64x256xf32>
    %c0_272 = arith.constant 0 : index
    %c0_273 = arith.constant 0 : index
    %679 = vector.load %arg16[%c0_272, %c0_273] : memref<256x1024xf32, #tpu.memory_space<vmem>>, vector<256x1024xf32>
    %cst_274 = arith.constant dense<0.000000e+00> : vector<64x1024xf32>
    %680 = tpu.matmul %678, %679, %cst_274 {dimension_numbers = #tpu.dot_dimension_numbers<[1], [0], [0], [1], [0, 0, 1, 1], [], []>} : vector<64x256xf32>, vector<256x1024xf32>, vector<64x1024xf32> -> vector<64x1024xf32>
    %c0_275 = arith.constant 0 : index
    %c0_276 = arith.constant 0 : index
    %681 = vector.load %arg8[%c0_275, %c0_276] : memref<1x1024xf32, #tpu.memory_space<vmem>>, vector<1x1024xf32>
    %682 = vector.broadcast %681 : vector<1x1024xf32> to vector<64x1024xf32>
    %683 = arith.addf %680, %682 : vector<64x1024xf32>
    %c0_277 = arith.constant 0 : index
    %c0_278 = arith.constant 0 : index
    %684 = vector.load %arg14[%c0_277, %c0_278] : memref<64x1024xf32, #tpu.memory_space<vmem>>, vector<64x1024xf32>
    tpu.vector_store %arg14[%c0_277, %c0_278], %683 {strides = array<i32>} : memref<64x1024xf32, #tpu.memory_space<vmem>>, vector<64x1024xf32>,
    %c1_i32_279 = arith.constant 1 : i32
    %685 = tpu.memref_slice %arg20[%c1_i32_279] : memref<4x!tpu.dma_semaphore, #tpu.memory_space<semaphore_mem>> -> memref<1x!tpu.dma_semaphore, #tpu.memory_space<semaphore_mem>>
    %686 = tpu.memref_squeeze %685 : memref<1x!tpu.dma_semaphore, #tpu.memory_space<semaphore_mem>> -> memref<!tpu.dma_semaphore, #tpu.memory_space<semaphore_mem>>
    tpu.wait_dma2 semaphore(%686 : memref<!tpu.dma_semaphore, #tpu.memory_space<semaphore_mem>>) src(%arg6 : memref<128x512xf32, #tpu.memory_space<any>>) dst(%arg17 : memref<128x512xf32, #tpu.memory_space<vmem>>)
    %c2_i32_280 = arith.constant 2 : i32
    %687 = tpu.memref_slice %arg20[%c2_i32_280] : memref<4x!tpu.dma_semaphore, #tpu.memory_space<semaphore_mem>> -> memref<1x!tpu.dma_semaphore, #tpu.memory_space<semaphore_mem>>
    %688 = tpu.memref_squeeze %687 : memref<1x!tpu.dma_semaphore, #tpu.memory_space<semaphore_mem>> -> memref<!tpu.dma_semaphore, #tpu.memory_space<semaphore_mem>>
    tpu.wait_dma2 semaphore(%688 : memref<!tpu.dma_semaphore, #tpu.memory_space<semaphore_mem>>) src(%arg7 : memref<128x512xf32, #tpu.memory_space<any>>) dst(%arg18 : memref<128x512xf32, #tpu.memory_space<vmem>>)
    %c0_281 = arith.constant 0 : index
    %c0_282 = arith.constant 0 : index
    %689 = vector.load %arg14[%c0_281, %c0_282] : memref<64x1024xf32, #tpu.memory_space<vmem>>, vector<8x512xf32>
    %690 = vector.extract_strided_slice %689 {offsets = [0, 0], sizes = [8, 128], strides = [1, 1]} : vector<8x512xf32> to vector<8x128xf32>
    %cst_283 = arith.constant 5.000000e-01 : f32
    %691 = vector.broadcast %cst_283 : f32 to vector<8x128xf32>
    %692 = arith.mulf %691, %690 : vector<8x128xf32>
    %693 = math.tanh %692 : vector<8x128xf32>
    %cst_284 = arith.constant 5.000000e-01 : f32
    %694 = vector.broadcast %cst_284 : f32 to vector<8x128xf32>
    %695 = arith.mulf %694, %693 : vector<8x128xf32>
    %cst_285 = arith.constant 5.000000e-01 : f32
    %696 = vector.broadcast %cst_285 : f32 to vector<8x128xf32>
    %697 = arith.addf %695, %696 : vector<8x128xf32>
    %698 = vector.extract_strided_slice %689 {offsets = [0, 256], sizes = [8, 128], strides = [1, 1]} : vector<8x512xf32> to vector<8x128xf32>
    %699 = math.tanh %698 : vector<8x128xf32>
    %700 = vector.extract_strided_slice %689 {offsets = [0, 384], sizes = [8, 128], strides = [1, 1]} : vector<8x512xf32> to vector<8x128xf32>
    %cst_286 = arith.constant 5.000000e-01 : f32
    %701 = vector.broadcast %cst_286 : f32 to vector<8x128xf32>
    %702 = arith.mulf %701, %700 : vector<8x128xf32>
    %703 = math.tanh %702 : vector<8x128xf32>
    %cst_287 = arith.constant 5.000000e-01 : f32
    %704 = vector.broadcast %cst_287 : f32 to vector<8x128xf32>
    %705 = arith.mulf %704, %703 : vector<8x128xf32>
    %cst_288 = arith.constant 5.000000e-01 : f32
    %706 = vector.broadcast %cst_288 : f32 to vector<8x128xf32>
    %707 = arith.addf %705, %706 : vector<8x128xf32>
    %708 = arith.mulf %697, %699 : vector<8x128xf32>
    %709 = math.tanh %708 : vector<8x128xf32>
    %710 = arith.mulf %707, %709 : vector<8x128xf32>
    %c56 = arith.constant 56 : index
    %c512_289 = arith.constant 512 : index
    %711 = vector.load %arg14[%c56, %c512_289] : memref<64x1024xf32, #tpu.memory_space<vmem>>, vector<8x512xf32>
    %712 = vector.extract_strided_slice %711 {offsets = [0, 0], sizes = [8, 128], strides = [1, 1]} : vector<8x512xf32> to vector<8x128xf32>
    %cst_290 = arith.constant 5.000000e-01 : f32
    %713 = vector.broadcast %cst_290 : f32 to vector<8x128xf32>
    %714 = arith.mulf %713, %712 : vector<8x128xf32>
    %715 = math.tanh %714 : vector<8x128xf32>
    %cst_291 = arith.constant 5.000000e-01 : f32
    %716 = vector.broadcast %cst_291 : f32 to vector<8x128xf32>
    %717 = arith.mulf %716, %715 : vector<8x128xf32>
    %cst_292 = arith.constant 5.000000e-01 : f32
    %718 = vector.broadcast %cst_292 : f32 to vector<8x128xf32>
    %719 = arith.addf %717, %718 : vector<8x128xf32>
    %720 = vector.extract_strided_slice %711 {offsets = [0, 256], sizes = [8, 128], strides = [1, 1]} : vector<8x512xf32> to vector<8x128xf32>
    %721 = math.tanh %720 : vector<8x128xf32>
    %722 = vector.extract_strided_slice %711 {offsets = [0, 384], sizes = [8, 128], strides = [1, 1]} : vector<8x512xf32> to vector<8x128xf32>
    %cst_293 = arith.constant 5.000000e-01 : f32
    %723 = vector.broadcast %cst_293 : f32 to vector<8x128xf32>
    %724 = arith.mulf %723, %722 : vector<8x128xf32>
    %725 = math.tanh %724 : vector<8x128xf32>
    %cst_294 = arith.constant 5.000000e-01 : f32
    %726 = vector.broadcast %cst_294 : f32 to vector<8x128xf32>
    %727 = arith.mulf %726, %725 : vector<8x128xf32>
    %cst_295 = arith.constant 5.000000e-01 : f32
    %728 = vector.broadcast %cst_295 : f32 to vector<8x128xf32>
    %729 = arith.addf %727, %728 : vector<8x128xf32>
    %730 = arith.mulf %719, %721 : vector<8x128xf32>
    %731 = math.tanh %730 : vector<8x128xf32>
    %732 = arith.mulf %729, %731 : vector<8x128xf32>
    %c1_i32_296 = arith.constant 1 : i32
    %c8_i32_297 = arith.constant 8 : i32
    %733 = arith.muli %c1_i32_296, %c8_i32_297 : i32
    %734 = tpu.assume_multiple %733, 8 : i32
    %c7_i32_298 = arith.constant 7 : i32
    %735 = arith.subi %c7_i32_298, %c1_i32_296 : i32
    %c8_i32_299 = arith.constant 8 : i32
    %736 = arith.muli %735, %c8_i32_299 : i32
    %737 = tpu.assume_multiple %736, 8 : i32
    %738 = arith.index_cast %734 : i32 to index
    %c0_300 = arith.constant 0 : index
    %739 = vector.load %arg14[%738, %c0_300] : memref<64x1024xf32, #tpu.memory_space<vmem>>, vector<8x512xf32>
    %c0_301 = arith.constant 0 : index
    %c0_302 = arith.constant 0 : index
    %740 = vector.load %arg17[%c0_301, %c0_302] : memref<128x512xf32, #tpu.memory_space<vmem>>, vector<128x512xf32>
    %cst_303 = arith.constant dense<0.000000e+00> : vector<8x512xf32>
    %741 = tpu.matmul %710, %740, %cst_303 {dimension_numbers = #tpu.dot_dimension_numbers<[1], [0], [0], [1], [0, 0, 1, 1], [], []>} : vector<8x128xf32>, vector<128x512xf32>, vector<8x512xf32> -> vector<8x512xf32>
    %742 = arith.addf %739, %741 : vector<8x512xf32>
    %743 = vector.extract_strided_slice %742 {offsets = [0, 0], sizes = [8, 128], strides = [1, 1]} : vector<8x512xf32> to vector<8x128xf32>
    %cst_304 = arith.constant 5.000000e-01 : f32
    %744 = vector.broadcast %cst_304 : f32 to vector<8x128xf32>
    %745 = arith.mulf %744, %743 : vector<8x128xf32>
    %746 = math.tanh %745 : vector<8x128xf32>
    %cst_305 = arith.constant 5.000000e-01 : f32
    %747 = vector.broadcast %cst_305 : f32 to vector<8x128xf32>
    %748 = arith.mulf %747, %746 : vector<8x128xf32>
    %cst_306 = arith.constant 5.000000e-01 : f32
    %749 = vector.broadcast %cst_306 : f32 to vector<8x128xf32>
    %750 = arith.addf %748, %749 : vector<8x128xf32>
    %751 = vector.extract_strided_slice %742 {offsets = [0, 128], sizes = [8, 128], strides = [1, 1]} : vector<8x512xf32> to vector<8x128xf32>
    %cst_307 = arith.constant 5.000000e-01 : f32
    %752 = vector.broadcast %cst_307 : f32 to vector<8x128xf32>
    %753 = arith.mulf %752, %751 : vector<8x128xf32>
    %754 = math.tanh %753 : vector<8x128xf32>
    %cst_308 = arith.constant 5.000000e-01 : f32
    %755 = vector.broadcast %cst_308 : f32 to vector<8x128xf32>
    %756 = arith.mulf %755, %754 : vector<8x128xf32>
    %cst_309 = arith.constant 5.000000e-01 : f32
    %757 = vector.broadcast %cst_309 : f32 to vector<8x128xf32>
    %758 = arith.addf %756, %757 : vector<8x128xf32>
    %759 = vector.extract_strided_slice %742 {offsets = [0, 256], sizes = [8, 128], strides = [1, 1]} : vector<8x512xf32> to vector<8x128xf32>
    %760 = math.tanh %759 : vector<8x128xf32>
    %761 = vector.extract_strided_slice %742 {offsets = [0, 384], sizes = [8, 128], strides = [1, 1]} : vector<8x512xf32> to vector<8x128xf32>
    %cst_310 = arith.constant 5.000000e-01 : f32
    %762 = vector.broadcast %cst_310 : f32 to vector<8x128xf32>
    %763 = arith.mulf %762, %761 : vector<8x128xf32>
    %764 = math.tanh %763 : vector<8x128xf32>
    %cst_311 = arith.constant 5.000000e-01 : f32
    %765 = vector.broadcast %cst_311 : f32 to vector<8x128xf32>
    %766 = arith.mulf %765, %764 : vector<8x128xf32>
    %cst_312 = arith.constant 5.000000e-01 : f32
    %767 = vector.broadcast %cst_312 : f32 to vector<8x128xf32>
    %768 = arith.addf %766, %767 : vector<8x128xf32>
    %769 = arith.mulf %758, %708 : vector<8x128xf32>
    %770 = arith.mulf %750, %760 : vector<8x128xf32>
    %771 = arith.addf %769, %770 : vector<8x128xf32>
    %772 = math.tanh %771 : vector<8x128xf32>
    %773 = arith.mulf %768, %772 : vector<8x128xf32>
    %774 = arith.index_cast %737 : i32 to index
    %c512_313 = arith.constant 512 : index
    %775 = vector.load %arg14[%774, %c512_313] : memref<64x1024xf32, #tpu.memory_space<vmem>>, vector<8x512xf32>
    %c0_314 = arith.constant 0 : index
    %c0_315 = arith.constant 0 : index
    %776 = vector.load %arg18[%c0_314, %c0_315] : memref<128x512xf32, #tpu.memory_space<vmem>>, vector<128x512xf32>
    %cst_316 = arith.constant dense<0.000000e+00> : vector<8x512xf32>
    %777 = tpu.matmul %732, %776, %cst_316 {dimension_numbers = #tpu.dot_dimension_numbers<[1], [0], [0], [1], [0, 0, 1, 1], [], []>} : vector<8x128xf32>, vector<128x512xf32>, vector<8x512xf32> -> vector<8x512xf32>
    %778 = arith.addf %775, %777 : vector<8x512xf32>
    %779 = vector.extract_strided_slice %778 {offsets = [0, 0], sizes = [8, 128], strides = [1, 1]} : vector<8x512xf32> to vector<8x128xf32>
    %cst_317 = arith.constant 5.000000e-01 : f32
    %780 = vector.broadcast %cst_317 : f32 to vector<8x128xf32>
    %781 = arith.mulf %780, %779 : vector<8x128xf32>
    %782 = math.tanh %781 : vector<8x128xf32>
    %cst_318 = arith.constant 5.000000e-01 : f32
    %783 = vector.broadcast %cst_318 : f32 to vector<8x128xf32>
    %784 = arith.mulf %783, %782 : vector<8x128xf32>
    %cst_319 = arith.constant 5.000000e-01 : f32
    %785 = vector.broadcast %cst_319 : f32 to vector<8x128xf32>
    %786 = arith.addf %784, %785 : vector<8x128xf32>
    %787 = vector.extract_strided_slice %778 {offsets = [0, 128], sizes = [8, 128], strides = [1, 1]} : vector<8x512xf32> to vector<8x128xf32>
    %cst_320 = arith.constant 5.000000e-01 : f32
    %788 = vector.broadcast %cst_320 : f32 to vector<8x128xf32>
    %789 = arith.mulf %788, %787 : vector<8x128xf32>
    %790 = math.tanh %789 : vector<8x128xf32>
    %cst_321 = arith.constant 5.000000e-01 : f32
    %791 = vector.broadcast %cst_321 : f32 to vector<8x128xf32>
    %792 = arith.mulf %791, %790 : vector<8x128xf32>
    %cst_322 = arith.constant 5.000000e-01 : f32
    %793 = vector.broadcast %cst_322 : f32 to vector<8x128xf32>
    %794 = arith.addf %792, %793 : vector<8x128xf32>
    %795 = vector.extract_strided_slice %778 {offsets = [0, 256], sizes = [8, 128], strides = [1, 1]} : vector<8x512xf32> to vector<8x128xf32>
    %796 = math.tanh %795 : vector<8x128xf32>
    %797 = vector.extract_strided_slice %778 {offsets = [0, 384], sizes = [8, 128], strides = [1, 1]} : vector<8x512xf32> to vector<8x128xf32>
    %cst_323 = arith.constant 5.000000e-01 : f32
    %798 = vector.broadcast %cst_323 : f32 to vector<8x128xf32>
    %799 = arith.mulf %798, %797 : vector<8x128xf32>
    %800 = math.tanh %799 : vector<8x128xf32>
    %cst_324 = arith.constant 5.000000e-01 : f32
    %801 = vector.broadcast %cst_324 : f32 to vector<8x128xf32>
    %802 = arith.mulf %801, %800 : vector<8x128xf32>
    %cst_325 = arith.constant 5.000000e-01 : f32
    %803 = vector.broadcast %cst_325 : f32 to vector<8x128xf32>
    %804 = arith.addf %802, %803 : vector<8x128xf32>
    %805 = arith.mulf %794, %730 : vector<8x128xf32>
    %806 = arith.mulf %786, %796 : vector<8x128xf32>
    %807 = arith.addf %805, %806 : vector<8x128xf32>
    %808 = math.tanh %807 : vector<8x128xf32>
    %809 = arith.mulf %804, %808 : vector<8x128xf32>
    %c2_i32_326 = arith.constant 2 : i32
    %c8_i32_327 = arith.constant 8 : i32
    %810 = arith.muli %c2_i32_326, %c8_i32_327 : i32
    %811 = tpu.assume_multiple %810, 8 : i32
    %c7_i32_328 = arith.constant 7 : i32
    %812 = arith.subi %c7_i32_328, %c2_i32_326 : i32
    %c8_i32_329 = arith.constant 8 : i32
    %813 = arith.muli %812, %c8_i32_329 : i32
    %814 = tpu.assume_multiple %813, 8 : i32
    %815 = arith.index_cast %811 : i32 to index
    %c0_330 = arith.constant 0 : index
    %816 = vector.load %arg14[%815, %c0_330] : memref<64x1024xf32, #tpu.memory_space<vmem>>, vector<8x512xf32>
    %c0_331 = arith.constant 0 : index
    %c0_332 = arith.constant 0 : index
    %817 = vector.load %arg17[%c0_331, %c0_332] : memref<128x512xf32, #tpu.memory_space<vmem>>, vector<128x512xf32>
    %cst_333 = arith.constant dense<0.000000e+00> : vector<8x512xf32>
    %818 = tpu.matmul %773, %817, %cst_333 {dimension_numbers = #tpu.dot_dimension_numbers<[1], [0], [0], [1], [0, 0, 1, 1], [], []>} : vector<8x128xf32>, vector<128x512xf32>, vector<8x512xf32> -> vector<8x512xf32>
    %819 = arith.addf %816, %818 : vector<8x512xf32>
    %820 = vector.extract_strided_slice %819 {offsets = [0, 0], sizes = [8, 128], strides = [1, 1]} : vector<8x512xf32> to vector<8x128xf32>
    %cst_334 = arith.constant 5.000000e-01 : f32
    %821 = vector.broadcast %cst_334 : f32 to vector<8x128xf32>
    %822 = arith.mulf %821, %820 : vector<8x128xf32>
    %823 = math.tanh %822 : vector<8x128xf32>
    %cst_335 = arith.constant 5.000000e-01 : f32
    %824 = vector.broadcast %cst_335 : f32 to vector<8x128xf32>
    %825 = arith.mulf %824, %823 : vector<8x128xf32>
    %cst_336 = arith.constant 5.000000e-01 : f32
    %826 = vector.broadcast %cst_336 : f32 to vector<8x128xf32>
    %827 = arith.addf %825, %826 : vector<8x128xf32>
    %828 = vector.extract_strided_slice %819 {offsets = [0, 128], sizes = [8, 128], strides = [1, 1]} : vector<8x512xf32> to vector<8x128xf32>
    %cst_337 = arith.constant 5.000000e-01 : f32
    %829 = vector.broadcast %cst_337 : f32 to vector<8x128xf32>
    %830 = arith.mulf %829, %828 : vector<8x128xf32>
    %831 = math.tanh %830 : vector<8x128xf32>
    %cst_338 = arith.constant 5.000000e-01 : f32
    %832 = vector.broadcast %cst_338 : f32 to vector<8x128xf32>
    %833 = arith.mulf %832, %831 : vector<8x128xf32>
    %cst_339 = arith.constant 5.000000e-01 : f32
    %834 = vector.broadcast %cst_339 : f32 to vector<8x128xf32>
    %835 = arith.addf %833, %834 : vector<8x128xf32>
    %836 = vector.extract_strided_slice %819 {offsets = [0, 256], sizes = [8, 128], strides = [1, 1]} : vector<8x512xf32> to vector<8x128xf32>
    %837 = math.tanh %836 : vector<8x128xf32>
    %838 = vector.extract_strided_slice %819 {offsets = [0, 384], sizes = [8, 128], strides = [1, 1]} : vector<8x512xf32> to vector<8x128xf32>
    %cst_340 = arith.constant 5.000000e-01 : f32
    %839 = vector.broadcast %cst_340 : f32 to vector<8x128xf32>
    %840 = arith.mulf %839, %838 : vector<8x128xf32>
    %841 = math.tanh %840 : vector<8x128xf32>
    %cst_341 = arith.constant 5.000000e-01 : f32
    %842 = vector.broadcast %cst_341 : f32 to vector<8x128xf32>
    %843 = arith.mulf %842, %841 : vector<8x128xf32>
    %cst_342 = arith.constant 5.000000e-01 : f32
    %844 = vector.broadcast %cst_342 : f32 to vector<8x128xf32>
    %845 = arith.addf %843, %844 : vector<8x128xf32>
    %846 = arith.mulf %835, %771 : vector<8x128xf32>
    %847 = arith.mulf %827, %837 : vector<8x128xf32>
    %848 = arith.addf %846, %847 : vector<8x128xf32>
    %849 = math.tanh %848 : vector<8x128xf32>
    %850 = arith.mulf %845, %849 : vector<8x128xf32>
    %851 = arith.index_cast %814 : i32 to index
    %c512_343 = arith.constant 512 : index
    %852 = vector.load %arg14[%851, %c512_343] : memref<64x1024xf32, #tpu.memory_space<vmem>>, vector<8x512xf32>
    %c0_344 = arith.constant 0 : index
    %c0_345 = arith.constant 0 : index
    %853 = vector.load %arg18[%c0_344, %c0_345] : memref<128x512xf32, #tpu.memory_space<vmem>>, vector<128x512xf32>
    %cst_346 = arith.constant dense<0.000000e+00> : vector<8x512xf32>
    %854 = tpu.matmul %809, %853, %cst_346 {dimension_numbers = #tpu.dot_dimension_numbers<[1], [0], [0], [1], [0, 0, 1, 1], [], []>} : vector<8x128xf32>, vector<128x512xf32>, vector<8x512xf32> -> vector<8x512xf32>
    %855 = arith.addf %852, %854 : vector<8x512xf32>
    %856 = vector.extract_strided_slice %855 {offsets = [0, 0], sizes = [8, 128], strides = [1, 1]} : vector<8x512xf32> to vector<8x128xf32>
    %cst_347 = arith.constant 5.000000e-01 : f32
    %857 = vector.broadcast %cst_347 : f32 to vector<8x128xf32>
    %858 = arith.mulf %857, %856 : vector<8x128xf32>
    %859 = math.tanh %858 : vector<8x128xf32>
    %cst_348 = arith.constant 5.000000e-01 : f32
    %860 = vector.broadcast %cst_348 : f32 to vector<8x128xf32>
    %861 = arith.mulf %860, %859 : vector<8x128xf32>
    %cst_349 = arith.constant 5.000000e-01 : f32
    %862 = vector.broadcast %cst_349 : f32 to vector<8x128xf32>
    %863 = arith.addf %861, %862 : vector<8x128xf32>
    %864 = vector.extract_strided_slice %855 {offsets = [0, 128], sizes = [8, 128], strides = [1, 1]} : vector<8x512xf32> to vector<8x128xf32>
    %cst_350 = arith.constant 5.000000e-01 : f32
    %865 = vector.broadcast %cst_350 : f32 to vector<8x128xf32>
    %866 = arith.mulf %865, %864 : vector<8x128xf32>
    %867 = math.tanh %866 : vector<8x128xf32>
    %cst_351 = arith.constant 5.000000e-01 : f32
    %868 = vector.broadcast %cst_351 : f32 to vector<8x128xf32>
    %869 = arith.mulf %868, %867 : vector<8x128xf32>
    %cst_352 = arith.constant 5.000000e-01 : f32
    %870 = vector.broadcast %cst_352 : f32 to vector<8x128xf32>
    %871 = arith.addf %869, %870 : vector<8x128xf32>
    %872 = vector.extract_strided_slice %855 {offsets = [0, 256], sizes = [8, 128], strides = [1, 1]} : vector<8x512xf32> to vector<8x128xf32>
    %873 = math.tanh %872 : vector<8x128xf32>
    %874 = vector.extract_strided_slice %855 {offsets = [0, 384], sizes = [8, 128], strides = [1, 1]} : vector<8x512xf32> to vector<8x128xf32>
    %cst_353 = arith.constant 5.000000e-01 : f32
    %875 = vector.broadcast %cst_353 : f32 to vector<8x128xf32>
    %876 = arith.mulf %875, %874 : vector<8x128xf32>
    %877 = math.tanh %876 : vector<8x128xf32>
    %cst_354 = arith.constant 5.000000e-01 : f32
    %878 = vector.broadcast %cst_354 : f32 to vector<8x128xf32>
    %879 = arith.mulf %878, %877 : vector<8x128xf32>
    %cst_355 = arith.constant 5.000000e-01 : f32
    %880 = vector.broadcast %cst_355 : f32 to vector<8x128xf32>
    %881 = arith.addf %879, %880 : vector<8x128xf32>
    %882 = arith.mulf %871, %807 : vector<8x128xf32>
    %883 = arith.mulf %863, %873 : vector<8x128xf32>
    %884 = arith.addf %882, %883 : vector<8x128xf32>
    %885 = math.tanh %884 : vector<8x128xf32>
    %886 = arith.mulf %881, %885 : vector<8x128xf32>
    %c3_i32_356 = arith.constant 3 : i32
    %c8_i32_357 = arith.constant 8 : i32
    %887 = arith.muli %c3_i32_356, %c8_i32_357 : i32
    %888 = tpu.assume_multiple %887, 8 : i32
    %c7_i32_358 = arith.constant 7 : i32
    %889 = arith.subi %c7_i32_358, %c3_i32_356 : i32
    %c8_i32_359 = arith.constant 8 : i32
    %890 = arith.muli %889, %c8_i32_359 : i32
    %891 = tpu.assume_multiple %890, 8 : i32
    %892 = arith.index_cast %888 : i32 to index
    %c0_360 = arith.constant 0 : index
    %893 = vector.load %arg14[%892, %c0_360] : memref<64x1024xf32, #tpu.memory_space<vmem>>, vector<8x512xf32>
    %c0_361 = arith.constant 0 : index
    %c0_362 = arith.constant 0 : index
    %894 = vector.load %arg17[%c0_361, %c0_362] : memref<128x512xf32, #tpu.memory_space<vmem>>, vector<128x512xf32>
    %cst_363 = arith.constant dense<0.000000e+00> : vector<8x512xf32>
    %895 = tpu.matmul %850, %894, %cst_363 {dimension_numbers = #tpu.dot_dimension_numbers<[1], [0], [0], [1], [0, 0, 1, 1], [], []>} : vector<8x128xf32>, vector<128x512xf32>, vector<8x512xf32> -> vector<8x512xf32>
    %896 = arith.addf %893, %895 : vector<8x512xf32>
    %897 = vector.extract_strided_slice %896 {offsets = [0, 0], sizes = [8, 128], strides = [1, 1]} : vector<8x512xf32> to vector<8x128xf32>
    %cst_364 = arith.constant 5.000000e-01 : f32
    %898 = vector.broadcast %cst_364 : f32 to vector<8x128xf32>
    %899 = arith.mulf %898, %897 : vector<8x128xf32>
    %900 = math.tanh %899 : vector<8x128xf32>
    %cst_365 = arith.constant 5.000000e-01 : f32
    %901 = vector.broadcast %cst_365 : f32 to vector<8x128xf32>
    %902 = arith.mulf %901, %900 : vector<8x128xf32>
    %cst_366 = arith.constant 5.000000e-01 : f32
    %903 = vector.broadcast %cst_366 : f32 to vector<8x128xf32>
    %904 = arith.addf %902, %903 : vector<8x128xf32>
    %905 = vector.extract_strided_slice %896 {offsets = [0, 128], sizes = [8, 128], strides = [1, 1]} : vector<8x512xf32> to vector<8x128xf32>
    %cst_367 = arith.constant 5.000000e-01 : f32
    %906 = vector.broadcast %cst_367 : f32 to vector<8x128xf32>
    %907 = arith.mulf %906, %905 : vector<8x128xf32>
    %908 = math.tanh %907 : vector<8x128xf32>
    %cst_368 = arith.constant 5.000000e-01 : f32
    %909 = vector.broadcast %cst_368 : f32 to vector<8x128xf32>
    %910 = arith.mulf %909, %908 : vector<8x128xf32>
    %cst_369 = arith.constant 5.000000e-01 : f32
    %911 = vector.broadcast %cst_369 : f32 to vector<8x128xf32>
    %912 = arith.addf %910, %911 : vector<8x128xf32>
    %913 = vector.extract_strided_slice %896 {offsets = [0, 256], sizes = [8, 128], strides = [1, 1]} : vector<8x512xf32> to vector<8x128xf32>
    %914 = math.tanh %913 : vector<8x128xf32>
    %915 = vector.extract_strided_slice %896 {offsets = [0, 384], sizes = [8, 128], strides = [1, 1]} : vector<8x512xf32> to vector<8x128xf32>
    %cst_370 = arith.constant 5.000000e-01 : f32
    %916 = vector.broadcast %cst_370 : f32 to vector<8x128xf32>
    %917 = arith.mulf %916, %915 : vector<8x128xf32>
    %918 = math.tanh %917 : vector<8x128xf32>
    %cst_371 = arith.constant 5.000000e-01 : f32
    %919 = vector.broadcast %cst_371 : f32 to vector<8x128xf32>
    %920 = arith.mulf %919, %918 : vector<8x128xf32>
    %cst_372 = arith.constant 5.000000e-01 : f32
    %921 = vector.broadcast %cst_372 : f32 to vector<8x128xf32>
    %922 = arith.addf %920, %921 : vector<8x128xf32>
    %923 = arith.mulf %912, %848 : vector<8x128xf32>
    %924 = arith.mulf %904, %914 : vector<8x128xf32>
    %925 = arith.addf %923, %924 : vector<8x128xf32>
    %926 = math.tanh %925 : vector<8x128xf32>
    %927 = arith.mulf %922, %926 : vector<8x128xf32>
    %928 = arith.index_cast %891 : i32 to index
    %c512_373 = arith.constant 512 : index
    %929 = vector.load %arg14[%928, %c512_373] : memref<64x1024xf32, #tpu.memory_space<vmem>>, vector<8x512xf32>
    %c0_374 = arith.constant 0 : index
    %c0_375 = arith.constant 0 : index
    %930 = vector.load %arg18[%c0_374, %c0_375] : memref<128x512xf32, #tpu.memory_space<vmem>>, vector<128x512xf32>
    %cst_376 = arith.constant dense<0.000000e+00> : vector<8x512xf32>
    %931 = tpu.matmul %886, %930, %cst_376 {dimension_numbers = #tpu.dot_dimension_numbers<[1], [0], [0], [1], [0, 0, 1, 1], [], []>} : vector<8x128xf32>, vector<128x512xf32>, vector<8x512xf32> -> vector<8x512xf32>
    %932 = arith.addf %929, %931 : vector<8x512xf32>
    %933 = vector.extract_strided_slice %932 {offsets = [0, 0], sizes = [8, 128], strides = [1, 1]} : vector<8x512xf32> to vector<8x128xf32>
    %cst_377 = arith.constant 5.000000e-01 : f32
    %934 = vector.broadcast %cst_377 : f32 to vector<8x128xf32>
    %935 = arith.mulf %934, %933 : vector<8x128xf32>
    %936 = math.tanh %935 : vector<8x128xf32>
    %cst_378 = arith.constant 5.000000e-01 : f32
    %937 = vector.broadcast %cst_378 : f32 to vector<8x128xf32>
    %938 = arith.mulf %937, %936 : vector<8x128xf32>
    %cst_379 = arith.constant 5.000000e-01 : f32
    %939 = vector.broadcast %cst_379 : f32 to vector<8x128xf32>
    %940 = arith.addf %938, %939 : vector<8x128xf32>
    %941 = vector.extract_strided_slice %932 {offsets = [0, 128], sizes = [8, 128], strides = [1, 1]} : vector<8x512xf32> to vector<8x128xf32>
    %cst_380 = arith.constant 5.000000e-01 : f32
    %942 = vector.broadcast %cst_380 : f32 to vector<8x128xf32>
    %943 = arith.mulf %942, %941 : vector<8x128xf32>
    %944 = math.tanh %943 : vector<8x128xf32>
    %cst_381 = arith.constant 5.000000e-01 : f32
    %945 = vector.broadcast %cst_381 : f32 to vector<8x128xf32>
    %946 = arith.mulf %945, %944 : vector<8x128xf32>
    %cst_382 = arith.constant 5.000000e-01 : f32
    %947 = vector.broadcast %cst_382 : f32 to vector<8x128xf32>
    %948 = arith.addf %946, %947 : vector<8x128xf32>
    %949 = vector.extract_strided_slice %932 {offsets = [0, 256], sizes = [8, 128], strides = [1, 1]} : vector<8x512xf32> to vector<8x128xf32>
    %950 = math.tanh %949 : vector<8x128xf32>
    %951 = vector.extract_strided_slice %932 {offsets = [0, 384], sizes = [8, 128], strides = [1, 1]} : vector<8x512xf32> to vector<8x128xf32>
    %cst_383 = arith.constant 5.000000e-01 : f32
    %952 = vector.broadcast %cst_383 : f32 to vector<8x128xf32>
    %953 = arith.mulf %952, %951 : vector<8x128xf32>
    %954 = math.tanh %953 : vector<8x128xf32>
    %cst_384 = arith.constant 5.000000e-01 : f32
    %955 = vector.broadcast %cst_384 : f32 to vector<8x128xf32>
    %956 = arith.mulf %955, %954 : vector<8x128xf32>
    %cst_385 = arith.constant 5.000000e-01 : f32
    %957 = vector.broadcast %cst_385 : f32 to vector<8x128xf32>
    %958 = arith.addf %956, %957 : vector<8x128xf32>
    %959 = arith.mulf %948, %884 : vector<8x128xf32>
    %960 = arith.mulf %940, %950 : vector<8x128xf32>
    %961 = arith.addf %959, %960 : vector<8x128xf32>
    %962 = math.tanh %961 : vector<8x128xf32>
    %963 = arith.mulf %958, %962 : vector<8x128xf32>
    %c4_i32_386 = arith.constant 4 : i32
    %c8_i32_387 = arith.constant 8 : i32
    %964 = arith.muli %c4_i32_386, %c8_i32_387 : i32
    %965 = tpu.assume_multiple %964, 8 : i32
    %c7_i32_388 = arith.constant 7 : i32
    %966 = arith.subi %c7_i32_388, %c4_i32_386 : i32
    %c8_i32_389 = arith.constant 8 : i32
    %967 = arith.muli %966, %c8_i32_389 : i32
    %968 = tpu.assume_multiple %967, 8 : i32
    %969 = arith.index_cast %965 : i32 to index
    %c0_390 = arith.constant 0 : index
    %970 = vector.load %arg14[%969, %c0_390] : memref<64x1024xf32, #tpu.memory_space<vmem>>, vector<8x512xf32>
    %c0_391 = arith.constant 0 : index
    %c0_392 = arith.constant 0 : index
    %971 = vector.load %arg17[%c0_391, %c0_392] : memref<128x512xf32, #tpu.memory_space<vmem>>, vector<128x512xf32>
    %cst_393 = arith.constant dense<0.000000e+00> : vector<8x512xf32>
    %972 = tpu.matmul %927, %971, %cst_393 {dimension_numbers = #tpu.dot_dimension_numbers<[1], [0], [0], [1], [0, 0, 1, 1], [], []>} : vector<8x128xf32>, vector<128x512xf32>, vector<8x512xf32> -> vector<8x512xf32>
    %973 = arith.addf %970, %972 : vector<8x512xf32>
    %974 = vector.extract_strided_slice %973 {offsets = [0, 0], sizes = [8, 128], strides = [1, 1]} : vector<8x512xf32> to vector<8x128xf32>
    %cst_394 = arith.constant 5.000000e-01 : f32
    %975 = vector.broadcast %cst_394 : f32 to vector<8x128xf32>
    %976 = arith.mulf %975, %974 : vector<8x128xf32>
    %977 = math.tanh %976 : vector<8x128xf32>
    %cst_395 = arith.constant 5.000000e-01 : f32
    %978 = vector.broadcast %cst_395 : f32 to vector<8x128xf32>
    %979 = arith.mulf %978, %977 : vector<8x128xf32>
    %cst_396 = arith.constant 5.000000e-01 : f32
    %980 = vector.broadcast %cst_396 : f32 to vector<8x128xf32>
    %981 = arith.addf %979, %980 : vector<8x128xf32>
    %982 = vector.extract_strided_slice %973 {offsets = [0, 128], sizes = [8, 128], strides = [1, 1]} : vector<8x512xf32> to vector<8x128xf32>
    %cst_397 = arith.constant 5.000000e-01 : f32
    %983 = vector.broadcast %cst_397 : f32 to vector<8x128xf32>
    %984 = arith.mulf %983, %982 : vector<8x128xf32>
    %985 = math.tanh %984 : vector<8x128xf32>
    %cst_398 = arith.constant 5.000000e-01 : f32
    %986 = vector.broadcast %cst_398 : f32 to vector<8x128xf32>
    %987 = arith.mulf %986, %985 : vector<8x128xf32>
    %cst_399 = arith.constant 5.000000e-01 : f32
    %988 = vector.broadcast %cst_399 : f32 to vector<8x128xf32>
    %989 = arith.addf %987, %988 : vector<8x128xf32>
    %990 = vector.extract_strided_slice %973 {offsets = [0, 256], sizes = [8, 128], strides = [1, 1]} : vector<8x512xf32> to vector<8x128xf32>
    %991 = math.tanh %990 : vector<8x128xf32>
    %992 = vector.extract_strided_slice %973 {offsets = [0, 384], sizes = [8, 128], strides = [1, 1]} : vector<8x512xf32> to vector<8x128xf32>
    %cst_400 = arith.constant 5.000000e-01 : f32
    %993 = vector.broadcast %cst_400 : f32 to vector<8x128xf32>
    %994 = arith.mulf %993, %992 : vector<8x128xf32>
    %995 = math.tanh %994 : vector<8x128xf32>
    %cst_401 = arith.constant 5.000000e-01 : f32
    %996 = vector.broadcast %cst_401 : f32 to vector<8x128xf32>
    %997 = arith.mulf %996, %995 : vector<8x128xf32>
    %cst_402 = arith.constant 5.000000e-01 : f32
    %998 = vector.broadcast %cst_402 : f32 to vector<8x128xf32>
    %999 = arith.addf %997, %998 : vector<8x128xf32>
    %1000 = arith.mulf %989, %925 : vector<8x128xf32>
    %1001 = arith.mulf %981, %991 : vector<8x128xf32>
    %1002 = arith.addf %1000, %1001 : vector<8x128xf32>
    %1003 = math.tanh %1002 : vector<8x128xf32>
    %1004 = arith.mulf %999, %1003 : vector<8x128xf32>
    %1005 = arith.index_cast %968 : i32 to index
    %c512_403 = arith.constant 512 : index
    %1006 = vector.load %arg14[%1005, %c512_403] : memref<64x1024xf32, #tpu.memory_space<vmem>>, vector<8x512xf32>
    %c0_404 = arith.constant 0 : index
    %c0_405 = arith.constant 0 : index
    %1007 = vector.load %arg18[%c0_404, %c0_405] : memref<128x512xf32, #tpu.memory_space<vmem>>, vector<128x512xf32>
    %cst_406 = arith.constant dense<0.000000e+00> : vector<8x512xf32>
    %1008 = tpu.matmul %963, %1007, %cst_406 {dimension_numbers = #tpu.dot_dimension_numbers<[1], [0], [0], [1], [0, 0, 1, 1], [], []>} : vector<8x128xf32>, vector<128x512xf32>, vector<8x512xf32> -> vector<8x512xf32>
    %1009 = arith.addf %1006, %1008 : vector<8x512xf32>
    %1010 = vector.extract_strided_slice %1009 {offsets = [0, 0], sizes = [8, 128], strides = [1, 1]} : vector<8x512xf32> to vector<8x128xf32>
    %cst_407 = arith.constant 5.000000e-01 : f32
    %1011 = vector.broadcast %cst_407 : f32 to vector<8x128xf32>
    %1012 = arith.mulf %1011, %1010 : vector<8x128xf32>
    %1013 = math.tanh %1012 : vector<8x128xf32>
    %cst_408 = arith.constant 5.000000e-01 : f32
    %1014 = vector.broadcast %cst_408 : f32 to vector<8x128xf32>
    %1015 = arith.mulf %1014, %1013 : vector<8x128xf32>
    %cst_409 = arith.constant 5.000000e-01 : f32
    %1016 = vector.broadcast %cst_409 : f32 to vector<8x128xf32>
    %1017 = arith.addf %1015, %1016 : vector<8x128xf32>
    %1018 = vector.extract_strided_slice %1009 {offsets = [0, 128], sizes = [8, 128], strides = [1, 1]} : vector<8x512xf32> to vector<8x128xf32>
    %cst_410 = arith.constant 5.000000e-01 : f32
    %1019 = vector.broadcast %cst_410 : f32 to vector<8x128xf32>
    %1020 = arith.mulf %1019, %1018 : vector<8x128xf32>
    %1021 = math.tanh %1020 : vector<8x128xf32>
    %cst_411 = arith.constant 5.000000e-01 : f32
    %1022 = vector.broadcast %cst_411 : f32 to vector<8x128xf32>
    %1023 = arith.mulf %1022, %1021 : vector<8x128xf32>
    %cst_412 = arith.constant 5.000000e-01 : f32
    %1024 = vector.broadcast %cst_412 : f32 to vector<8x128xf32>
    %1025 = arith.addf %1023, %1024 : vector<8x128xf32>
    %1026 = vector.extract_strided_slice %1009 {offsets = [0, 256], sizes = [8, 128], strides = [1, 1]} : vector<8x512xf32> to vector<8x128xf32>
    %1027 = math.tanh %1026 : vector<8x128xf32>
    %1028 = vector.extract_strided_slice %1009 {offsets = [0, 384], sizes = [8, 128], strides = [1, 1]} : vector<8x512xf32> to vector<8x128xf32>
    %cst_413 = arith.constant 5.000000e-01 : f32
    %1029 = vector.broadcast %cst_413 : f32 to vector<8x128xf32>
    %1030 = arith.mulf %1029, %1028 : vector<8x128xf32>
    %1031 = math.tanh %1030 : vector<8x128xf32>
    %cst_414 = arith.constant 5.000000e-01 : f32
    %1032 = vector.broadcast %cst_414 : f32 to vector<8x128xf32>
    %1033 = arith.mulf %1032, %1031 : vector<8x128xf32>
    %cst_415 = arith.constant 5.000000e-01 : f32
    %1034 = vector.broadcast %cst_415 : f32 to vector<8x128xf32>
    %1035 = arith.addf %1033, %1034 : vector<8x128xf32>
    %1036 = arith.mulf %1025, %961 : vector<8x128xf32>
    %1037 = arith.mulf %1017, %1027 : vector<8x128xf32>
    %1038 = arith.addf %1036, %1037 : vector<8x128xf32>
    %1039 = math.tanh %1038 : vector<8x128xf32>
    %1040 = arith.mulf %1035, %1039 : vector<8x128xf32>
    %c5_i32_416 = arith.constant 5 : i32
    %c8_i32_417 = arith.constant 8 : i32
    %1041 = arith.muli %c5_i32_416, %c8_i32_417 : i32
    %1042 = tpu.assume_multiple %1041, 8 : i32
    %c7_i32_418 = arith.constant 7 : i32
    %1043 = arith.subi %c7_i32_418, %c5_i32_416 : i32
    %c8_i32_419 = arith.constant 8 : i32
    %1044 = arith.muli %1043, %c8_i32_419 : i32
    %1045 = tpu.assume_multiple %1044, 8 : i32
    %1046 = arith.index_cast %1042 : i32 to index
    %c0_420 = arith.constant 0 : index
    %1047 = vector.load %arg14[%1046, %c0_420] : memref<64x1024xf32, #tpu.memory_space<vmem>>, vector<8x512xf32>
    %c0_421 = arith.constant 0 : index
    %c0_422 = arith.constant 0 : index
    %1048 = vector.load %arg17[%c0_421, %c0_422] : memref<128x512xf32, #tpu.memory_space<vmem>>, vector<128x512xf32>
    %cst_423 = arith.constant dense<0.000000e+00> : vector<8x512xf32>
    %1049 = tpu.matmul %1004, %1048, %cst_423 {dimension_numbers = #tpu.dot_dimension_numbers<[1], [0], [0], [1], [0, 0, 1, 1], [], []>} : vector<8x128xf32>, vector<128x512xf32>, vector<8x512xf32> -> vector<8x512xf32>
    %1050 = arith.addf %1047, %1049 : vector<8x512xf32>
    %1051 = vector.extract_strided_slice %1050 {offsets = [0, 0], sizes = [8, 128], strides = [1, 1]} : vector<8x512xf32> to vector<8x128xf32>
    %cst_424 = arith.constant 5.000000e-01 : f32
    %1052 = vector.broadcast %cst_424 : f32 to vector<8x128xf32>
    %1053 = arith.mulf %1052, %1051 : vector<8x128xf32>
    %1054 = math.tanh %1053 : vector<8x128xf32>
    %cst_425 = arith.constant 5.000000e-01 : f32
    %1055 = vector.broadcast %cst_425 : f32 to vector<8x128xf32>
    %1056 = arith.mulf %1055, %1054 : vector<8x128xf32>
    %cst_426 = arith.constant 5.000000e-01 : f32
    %1057 = vector.broadcast %cst_426 : f32 to vector<8x128xf32>
    %1058 = arith.addf %1056, %1057 : vector<8x128xf32>
    %1059 = vector.extract_strided_slice %1050 {offsets = [0, 128], sizes = [8, 128], strides = [1, 1]} : vector<8x512xf32> to vector<8x128xf32>
    %cst_427 = arith.constant 5.000000e-01 : f32
    %1060 = vector.broadcast %cst_427 : f32 to vector<8x128xf32>
    %1061 = arith.mulf %1060, %1059 : vector<8x128xf32>
    %1062 = math.tanh %1061 : vector<8x128xf32>
    %cst_428 = arith.constant 5.000000e-01 : f32
    %1063 = vector.broadcast %cst_428 : f32 to vector<8x128xf32>
    %1064 = arith.mulf %1063, %1062 : vector<8x128xf32>
    %cst_429 = arith.constant 5.000000e-01 : f32
    %1065 = vector.broadcast %cst_429 : f32 to vector<8x128xf32>
    %1066 = arith.addf %1064, %1065 : vector<8x128xf32>
    %1067 = vector.extract_strided_slice %1050 {offsets = [0, 256], sizes = [8, 128], strides = [1, 1]} : vector<8x512xf32> to vector<8x128xf32>
    %1068 = math.tanh %1067 : vector<8x128xf32>
    %1069 = vector.extract_strided_slice %1050 {offsets = [0, 384], sizes = [8, 128], strides = [1, 1]} : vector<8x512xf32> to vector<8x128xf32>
    %cst_430 = arith.constant 5.000000e-01 : f32
    %1070 = vector.broadcast %cst_430 : f32 to vector<8x128xf32>
    %1071 = arith.mulf %1070, %1069 : vector<8x128xf32>
    %1072 = math.tanh %1071 : vector<8x128xf32>
    %cst_431 = arith.constant 5.000000e-01 : f32
    %1073 = vector.broadcast %cst_431 : f32 to vector<8x128xf32>
    %1074 = arith.mulf %1073, %1072 : vector<8x128xf32>
    %cst_432 = arith.constant 5.000000e-01 : f32
    %1075 = vector.broadcast %cst_432 : f32 to vector<8x128xf32>
    %1076 = arith.addf %1074, %1075 : vector<8x128xf32>
    %1077 = arith.mulf %1066, %1002 : vector<8x128xf32>
    %1078 = arith.mulf %1058, %1068 : vector<8x128xf32>
    %1079 = arith.addf %1077, %1078 : vector<8x128xf32>
    %1080 = math.tanh %1079 : vector<8x128xf32>
    %1081 = arith.mulf %1076, %1080 : vector<8x128xf32>
    %1082 = arith.index_cast %1045 : i32 to index
    %c512_433 = arith.constant 512 : index
    %1083 = vector.load %arg14[%1082, %c512_433] : memref<64x1024xf32, #tpu.memory_space<vmem>>, vector<8x512xf32>
    %c0_434 = arith.constant 0 : index
    %c0_435 = arith.constant 0 : index
    %1084 = vector.load %arg18[%c0_434, %c0_435] : memref<128x512xf32, #tpu.memory_space<vmem>>, vector<128x512xf32>
    %cst_436 = arith.constant dense<0.000000e+00> : vector<8x512xf32>
    %1085 = tpu.matmul %1040, %1084, %cst_436 {dimension_numbers = #tpu.dot_dimension_numbers<[1], [0], [0], [1], [0, 0, 1, 1], [], []>} : vector<8x128xf32>, vector<128x512xf32>, vector<8x512xf32> -> vector<8x512xf32>
    %1086 = arith.addf %1083, %1085 : vector<8x512xf32>
    %1087 = vector.extract_strided_slice %1086 {offsets = [0, 0], sizes = [8, 128], strides = [1, 1]} : vector<8x512xf32> to vector<8x128xf32>
    %cst_437 = arith.constant 5.000000e-01 : f32
    %1088 = vector.broadcast %cst_437 : f32 to vector<8x128xf32>
    %1089 = arith.mulf %1088, %1087 : vector<8x128xf32>
    %1090 = math.tanh %1089 : vector<8x128xf32>
    %cst_438 = arith.constant 5.000000e-01 : f32
    %1091 = vector.broadcast %cst_438 : f32 to vector<8x128xf32>
    %1092 = arith.mulf %1091, %1090 : vector<8x128xf32>
    %cst_439 = arith.constant 5.000000e-01 : f32
    %1093 = vector.broadcast %cst_439 : f32 to vector<8x128xf32>
    %1094 = arith.addf %1092, %1093 : vector<8x128xf32>
    %1095 = vector.extract_strided_slice %1086 {offsets = [0, 128], sizes = [8, 128], strides = [1, 1]} : vector<8x512xf32> to vector<8x128xf32>
    %cst_440 = arith.constant 5.000000e-01 : f32
    %1096 = vector.broadcast %cst_440 : f32 to vector<8x128xf32>
    %1097 = arith.mulf %1096, %1095 : vector<8x128xf32>
    %1098 = math.tanh %1097 : vector<8x128xf32>
    %cst_441 = arith.constant 5.000000e-01 : f32
    %1099 = vector.broadcast %cst_441 : f32 to vector<8x128xf32>
    %1100 = arith.mulf %1099, %1098 : vector<8x128xf32>
    %cst_442 = arith.constant 5.000000e-01 : f32
    %1101 = vector.broadcast %cst_442 : f32 to vector<8x128xf32>
    %1102 = arith.addf %1100, %1101 : vector<8x128xf32>
    %1103 = vector.extract_strided_slice %1086 {offsets = [0, 256], sizes = [8, 128], strides = [1, 1]} : vector<8x512xf32> to vector<8x128xf32>
    %1104 = math.tanh %1103 : vector<8x128xf32>
    %1105 = vector.extract_strided_slice %1086 {offsets = [0, 384], sizes = [8, 128], strides = [1, 1]} : vector<8x512xf32> to vector<8x128xf32>
    %cst_443 = arith.constant 5.000000e-01 : f32
    %1106 = vector.broadcast %cst_443 : f32 to vector<8x128xf32>
    %1107 = arith.mulf %1106, %1105 : vector<8x128xf32>
    %1108 = math.tanh %1107 : vector<8x128xf32>
    %cst_444 = arith.constant 5.000000e-01 : f32
    %1109 = vector.broadcast %cst_444 : f32 to vector<8x128xf32>
    %1110 = arith.mulf %1109, %1108 : vector<8x128xf32>
    %cst_445 = arith.constant 5.000000e-01 : f32
    %1111 = vector.broadcast %cst_445 : f32 to vector<8x128xf32>
    %1112 = arith.addf %1110, %1111 : vector<8x128xf32>
    %1113 = arith.mulf %1102, %1038 : vector<8x128xf32>
    %1114 = arith.mulf %1094, %1104 : vector<8x128xf32>
    %1115 = arith.addf %1113, %1114 : vector<8x128xf32>
    %1116 = math.tanh %1115 : vector<8x128xf32>
    %1117 = arith.mulf %1112, %1116 : vector<8x128xf32>
    %c6_i32_446 = arith.constant 6 : i32
    %c8_i32_447 = arith.constant 8 : i32
    %1118 = arith.muli %c6_i32_446, %c8_i32_447 : i32
    %1119 = tpu.assume_multiple %1118, 8 : i32
    %c7_i32_448 = arith.constant 7 : i32
    %1120 = arith.subi %c7_i32_448, %c6_i32_446 : i32
    %c8_i32_449 = arith.constant 8 : i32
    %1121 = arith.muli %1120, %c8_i32_449 : i32
    %1122 = tpu.assume_multiple %1121, 8 : i32
    %1123 = arith.index_cast %1119 : i32 to index
    %c0_450 = arith.constant 0 : index
    %1124 = vector.load %arg14[%1123, %c0_450] : memref<64x1024xf32, #tpu.memory_space<vmem>>, vector<8x512xf32>
    %c0_451 = arith.constant 0 : index
    %c0_452 = arith.constant 0 : index
    %1125 = vector.load %arg17[%c0_451, %c0_452] : memref<128x512xf32, #tpu.memory_space<vmem>>, vector<128x512xf32>
    %cst_453 = arith.constant dense<0.000000e+00> : vector<8x512xf32>
    %1126 = tpu.matmul %1081, %1125, %cst_453 {dimension_numbers = #tpu.dot_dimension_numbers<[1], [0], [0], [1], [0, 0, 1, 1], [], []>} : vector<8x128xf32>, vector<128x512xf32>, vector<8x512xf32> -> vector<8x512xf32>
    %1127 = arith.addf %1124, %1126 : vector<8x512xf32>
    %1128 = vector.extract_strided_slice %1127 {offsets = [0, 0], sizes = [8, 128], strides = [1, 1]} : vector<8x512xf32> to vector<8x128xf32>
    %cst_454 = arith.constant 5.000000e-01 : f32
    %1129 = vector.broadcast %cst_454 : f32 to vector<8x128xf32>
    %1130 = arith.mulf %1129, %1128 : vector<8x128xf32>
    %1131 = math.tanh %1130 : vector<8x128xf32>
    %cst_455 = arith.constant 5.000000e-01 : f32
    %1132 = vector.broadcast %cst_455 : f32 to vector<8x128xf32>
    %1133 = arith.mulf %1132, %1131 : vector<8x128xf32>
    %cst_456 = arith.constant 5.000000e-01 : f32
    %1134 = vector.broadcast %cst_456 : f32 to vector<8x128xf32>
    %1135 = arith.addf %1133, %1134 : vector<8x128xf32>
    %1136 = vector.extract_strided_slice %1127 {offsets = [0, 128], sizes = [8, 128], strides = [1, 1]} : vector<8x512xf32> to vector<8x128xf32>
    %cst_457 = arith.constant 5.000000e-01 : f32
    %1137 = vector.broadcast %cst_457 : f32 to vector<8x128xf32>
    %1138 = arith.mulf %1137, %1136 : vector<8x128xf32>
    %1139 = math.tanh %1138 : vector<8x128xf32>
    %cst_458 = arith.constant 5.000000e-01 : f32
    %1140 = vector.broadcast %cst_458 : f32 to vector<8x128xf32>
    %1141 = arith.mulf %1140, %1139 : vector<8x128xf32>
    %cst_459 = arith.constant 5.000000e-01 : f32
    %1142 = vector.broadcast %cst_459 : f32 to vector<8x128xf32>
    %1143 = arith.addf %1141, %1142 : vector<8x128xf32>
    %1144 = vector.extract_strided_slice %1127 {offsets = [0, 256], sizes = [8, 128], strides = [1, 1]} : vector<8x512xf32> to vector<8x128xf32>
    %1145 = math.tanh %1144 : vector<8x128xf32>
    %1146 = vector.extract_strided_slice %1127 {offsets = [0, 384], sizes = [8, 128], strides = [1, 1]} : vector<8x512xf32> to vector<8x128xf32>
    %cst_460 = arith.constant 5.000000e-01 : f32
    %1147 = vector.broadcast %cst_460 : f32 to vector<8x128xf32>
    %1148 = arith.mulf %1147, %1146 : vector<8x128xf32>
    %1149 = math.tanh %1148 : vector<8x128xf32>
    %cst_461 = arith.constant 5.000000e-01 : f32
    %1150 = vector.broadcast %cst_461 : f32 to vector<8x128xf32>
    %1151 = arith.mulf %1150, %1149 : vector<8x128xf32>
    %cst_462 = arith.constant 5.000000e-01 : f32
    %1152 = vector.broadcast %cst_462 : f32 to vector<8x128xf32>
    %1153 = arith.addf %1151, %1152 : vector<8x128xf32>
    %1154 = arith.mulf %1143, %1079 : vector<8x128xf32>
    %1155 = arith.mulf %1135, %1145 : vector<8x128xf32>
    %1156 = arith.addf %1154, %1155 : vector<8x128xf32>
    %1157 = math.tanh %1156 : vector<8x128xf32>
    %1158 = arith.mulf %1153, %1157 : vector<8x128xf32>
    %1159 = arith.index_cast %1122 : i32 to index
    %c512_463 = arith.constant 512 : index
    %1160 = vector.load %arg14[%1159, %c512_463] : memref<64x1024xf32, #tpu.memory_space<vmem>>, vector<8x512xf32>
    %c0_464 = arith.constant 0 : index
    %c0_465 = arith.constant 0 : index
    %1161 = vector.load %arg18[%c0_464, %c0_465] : memref<128x512xf32, #tpu.memory_space<vmem>>, vector<128x512xf32>
    %cst_466 = arith.constant dense<0.000000e+00> : vector<8x512xf32>
    %1162 = tpu.matmul %1117, %1161, %cst_466 {dimension_numbers = #tpu.dot_dimension_numbers<[1], [0], [0], [1], [0, 0, 1, 1], [], []>} : vector<8x128xf32>, vector<128x512xf32>, vector<8x512xf32> -> vector<8x512xf32>
    %1163 = arith.addf %1160, %1162 : vector<8x512xf32>
    %1164 = vector.extract_strided_slice %1163 {offsets = [0, 0], sizes = [8, 128], strides = [1, 1]} : vector<8x512xf32> to vector<8x128xf32>
    %cst_467 = arith.constant 5.000000e-01 : f32
    %1165 = vector.broadcast %cst_467 : f32 to vector<8x128xf32>
    %1166 = arith.mulf %1165, %1164 : vector<8x128xf32>
    %1167 = math.tanh %1166 : vector<8x128xf32>
    %cst_468 = arith.constant 5.000000e-01 : f32
    %1168 = vector.broadcast %cst_468 : f32 to vector<8x128xf32>
    %1169 = arith.mulf %1168, %1167 : vector<8x128xf32>
    %cst_469 = arith.constant 5.000000e-01 : f32
    %1170 = vector.broadcast %cst_469 : f32 to vector<8x128xf32>
    %1171 = arith.addf %1169, %1170 : vector<8x128xf32>
    %1172 = vector.extract_strided_slice %1163 {offsets = [0, 128], sizes = [8, 128], strides = [1, 1]} : vector<8x512xf32> to vector<8x128xf32>
    %cst_470 = arith.constant 5.000000e-01 : f32
    %1173 = vector.broadcast %cst_470 : f32 to vector<8x128xf32>
    %1174 = arith.mulf %1173, %1172 : vector<8x128xf32>
    %1175 = math.tanh %1174 : vector<8x128xf32>
    %cst_471 = arith.constant 5.000000e-01 : f32
    %1176 = vector.broadcast %cst_471 : f32 to vector<8x128xf32>
    %1177 = arith.mulf %1176, %1175 : vector<8x128xf32>
    %cst_472 = arith.constant 5.000000e-01 : f32
    %1178 = vector.broadcast %cst_472 : f32 to vector<8x128xf32>
    %1179 = arith.addf %1177, %1178 : vector<8x128xf32>
    %1180 = vector.extract_strided_slice %1163 {offsets = [0, 256], sizes = [8, 128], strides = [1, 1]} : vector<8x512xf32> to vector<8x128xf32>
    %1181 = math.tanh %1180 : vector<8x128xf32>
    %1182 = vector.extract_strided_slice %1163 {offsets = [0, 384], sizes = [8, 128], strides = [1, 1]} : vector<8x512xf32> to vector<8x128xf32>
    %cst_473 = arith.constant 5.000000e-01 : f32
    %1183 = vector.broadcast %cst_473 : f32 to vector<8x128xf32>
    %1184 = arith.mulf %1183, %1182 : vector<8x128xf32>
    %1185 = math.tanh %1184 : vector<8x128xf32>
    %cst_474 = arith.constant 5.000000e-01 : f32
    %1186 = vector.broadcast %cst_474 : f32 to vector<8x128xf32>
    %1187 = arith.mulf %1186, %1185 : vector<8x128xf32>
    %cst_475 = arith.constant 5.000000e-01 : f32
    %1188 = vector.broadcast %cst_475 : f32 to vector<8x128xf32>
    %1189 = arith.addf %1187, %1188 : vector<8x128xf32>
    %1190 = arith.mulf %1179, %1115 : vector<8x128xf32>
    %1191 = arith.mulf %1171, %1181 : vector<8x128xf32>
    %1192 = arith.addf %1190, %1191 : vector<8x128xf32>
    %1193 = math.tanh %1192 : vector<8x128xf32>
    %1194 = arith.mulf %1189, %1193 : vector<8x128xf32>
    %c7_i32_476 = arith.constant 7 : i32
    %c8_i32_477 = arith.constant 8 : i32
    %1195 = arith.muli %c7_i32_476, %c8_i32_477 : i32
    %1196 = tpu.assume_multiple %1195, 8 : i32
    %c7_i32_478 = arith.constant 7 : i32
    %1197 = arith.subi %c7_i32_478, %c7_i32_476 : i32
    %c8_i32_479 = arith.constant 8 : i32
    %1198 = arith.muli %1197, %c8_i32_479 : i32
    %1199 = tpu.assume_multiple %1198, 8 : i32
    %1200 = arith.index_cast %1196 : i32 to index
    %c0_480 = arith.constant 0 : index
    %1201 = vector.load %arg14[%1200, %c0_480] : memref<64x1024xf32, #tpu.memory_space<vmem>>, vector<8x512xf32>
    %c0_481 = arith.constant 0 : index
    %c0_482 = arith.constant 0 : index
    %1202 = vector.load %arg17[%c0_481, %c0_482] : memref<128x512xf32, #tpu.memory_space<vmem>>, vector<128x512xf32>
    %cst_483 = arith.constant dense<0.000000e+00> : vector<8x512xf32>
    %1203 = tpu.matmul %1158, %1202, %cst_483 {dimension_numbers = #tpu.dot_dimension_numbers<[1], [0], [0], [1], [0, 0, 1, 1], [], []>} : vector<8x128xf32>, vector<128x512xf32>, vector<8x512xf32> -> vector<8x512xf32>
    %1204 = arith.addf %1201, %1203 : vector<8x512xf32>
    %1205 = vector.extract_strided_slice %1204 {offsets = [0, 0], sizes = [8, 128], strides = [1, 1]} : vector<8x512xf32> to vector<8x128xf32>
    %cst_484 = arith.constant 5.000000e-01 : f32
    %1206 = vector.broadcast %cst_484 : f32 to vector<8x128xf32>
    %1207 = arith.mulf %1206, %1205 : vector<8x128xf32>
    %1208 = math.tanh %1207 : vector<8x128xf32>
    %cst_485 = arith.constant 5.000000e-01 : f32
    %1209 = vector.broadcast %cst_485 : f32 to vector<8x128xf32>
    %1210 = arith.mulf %1209, %1208 : vector<8x128xf32>
    %cst_486 = arith.constant 5.000000e-01 : f32
    %1211 = vector.broadcast %cst_486 : f32 to vector<8x128xf32>
    %1212 = arith.addf %1210, %1211 : vector<8x128xf32>
    %1213 = vector.extract_strided_slice %1204 {offsets = [0, 128], sizes = [8, 128], strides = [1, 1]} : vector<8x512xf32> to vector<8x128xf32>
    %cst_487 = arith.constant 5.000000e-01 : f32
    %1214 = vector.broadcast %cst_487 : f32 to vector<8x128xf32>
    %1215 = arith.mulf %1214, %1213 : vector<8x128xf32>
    %1216 = math.tanh %1215 : vector<8x128xf32>
    %cst_488 = arith.constant 5.000000e-01 : f32
    %1217 = vector.broadcast %cst_488 : f32 to vector<8x128xf32>
    %1218 = arith.mulf %1217, %1216 : vector<8x128xf32>
    %cst_489 = arith.constant 5.000000e-01 : f32
    %1219 = vector.broadcast %cst_489 : f32 to vector<8x128xf32>
    %1220 = arith.addf %1218, %1219 : vector<8x128xf32>
    %1221 = vector.extract_strided_slice %1204 {offsets = [0, 256], sizes = [8, 128], strides = [1, 1]} : vector<8x512xf32> to vector<8x128xf32>
    %1222 = math.tanh %1221 : vector<8x128xf32>
    %1223 = vector.extract_strided_slice %1204 {offsets = [0, 384], sizes = [8, 128], strides = [1, 1]} : vector<8x512xf32> to vector<8x128xf32>
    %cst_490 = arith.constant 5.000000e-01 : f32
    %1224 = vector.broadcast %cst_490 : f32 to vector<8x128xf32>
    %1225 = arith.mulf %1224, %1223 : vector<8x128xf32>
    %1226 = math.tanh %1225 : vector<8x128xf32>
    %cst_491 = arith.constant 5.000000e-01 : f32
    %1227 = vector.broadcast %cst_491 : f32 to vector<8x128xf32>
    %1228 = arith.mulf %1227, %1226 : vector<8x128xf32>
    %cst_492 = arith.constant 5.000000e-01 : f32
    %1229 = vector.broadcast %cst_492 : f32 to vector<8x128xf32>
    %1230 = arith.addf %1228, %1229 : vector<8x128xf32>
    %1231 = arith.mulf %1220, %1156 : vector<8x128xf32>
    %1232 = arith.mulf %1212, %1222 : vector<8x128xf32>
    %1233 = arith.addf %1231, %1232 : vector<8x128xf32>
    %1234 = math.tanh %1233 : vector<8x128xf32>
    %1235 = arith.mulf %1230, %1234 : vector<8x128xf32>
    %1236 = arith.index_cast %1199 : i32 to index
    %c512_493 = arith.constant 512 : index
    %1237 = vector.load %arg14[%1236, %c512_493] : memref<64x1024xf32, #tpu.memory_space<vmem>>, vector<8x512xf32>
    %c0_494 = arith.constant 0 : index
    %c0_495 = arith.constant 0 : index
    %1238 = vector.load %arg18[%c0_494, %c0_495] : memref<128x512xf32, #tpu.memory_space<vmem>>, vector<128x512xf32>
    %cst_496 = arith.constant dense<0.000000e+00> : vector<8x512xf32>
    %1239 = tpu.matmul %1194, %1238, %cst_496 {dimension_numbers = #tpu.dot_dimension_numbers<[1], [0], [0], [1], [0, 0, 1, 1], [], []>} : vector<8x128xf32>, vector<128x512xf32>, vector<8x512xf32> -> vector<8x512xf32>
    %1240 = arith.addf %1237, %1239 : vector<8x512xf32>
    %1241 = vector.extract_strided_slice %1240 {offsets = [0, 0], sizes = [8, 128], strides = [1, 1]} : vector<8x512xf32> to vector<8x128xf32>
    %cst_497 = arith.constant 5.000000e-01 : f32
    %1242 = vector.broadcast %cst_497 : f32 to vector<8x128xf32>
    %1243 = arith.mulf %1242, %1241 : vector<8x128xf32>
    %1244 = math.tanh %1243 : vector<8x128xf32>
    %cst_498 = arith.constant 5.000000e-01 : f32
    %1245 = vector.broadcast %cst_498 : f32 to vector<8x128xf32>
    %1246 = arith.mulf %1245, %1244 : vector<8x128xf32>
    %cst_499 = arith.constant 5.000000e-01 : f32
    %1247 = vector.broadcast %cst_499 : f32 to vector<8x128xf32>
    %1248 = arith.addf %1246, %1247 : vector<8x128xf32>
    %1249 = vector.extract_strided_slice %1240 {offsets = [0, 128], sizes = [8, 128], strides = [1, 1]} : vector<8x512xf32> to vector<8x128xf32>
    %cst_500 = arith.constant 5.000000e-01 : f32
    %1250 = vector.broadcast %cst_500 : f32 to vector<8x128xf32>
    %1251 = arith.mulf %1250, %1249 : vector<8x128xf32>
    %1252 = math.tanh %1251 : vector<8x128xf32>
    %cst_501 = arith.constant 5.000000e-01 : f32
    %1253 = vector.broadcast %cst_501 : f32 to vector<8x128xf32>
    %1254 = arith.mulf %1253, %1252 : vector<8x128xf32>
    %cst_502 = arith.constant 5.000000e-01 : f32
    %1255 = vector.broadcast %cst_502 : f32 to vector<8x128xf32>
    %1256 = arith.addf %1254, %1255 : vector<8x128xf32>
    %1257 = vector.extract_strided_slice %1240 {offsets = [0, 256], sizes = [8, 128], strides = [1, 1]} : vector<8x512xf32> to vector<8x128xf32>
    %1258 = math.tanh %1257 : vector<8x128xf32>
    %1259 = vector.extract_strided_slice %1240 {offsets = [0, 384], sizes = [8, 128], strides = [1, 1]} : vector<8x512xf32> to vector<8x128xf32>
    %cst_503 = arith.constant 5.000000e-01 : f32
    %1260 = vector.broadcast %cst_503 : f32 to vector<8x128xf32>
    %1261 = arith.mulf %1260, %1259 : vector<8x128xf32>
    %1262 = math.tanh %1261 : vector<8x128xf32>
    %cst_504 = arith.constant 5.000000e-01 : f32
    %1263 = vector.broadcast %cst_504 : f32 to vector<8x128xf32>
    %1264 = arith.mulf %1263, %1262 : vector<8x128xf32>
    %cst_505 = arith.constant 5.000000e-01 : f32
    %1265 = vector.broadcast %cst_505 : f32 to vector<8x128xf32>
    %1266 = arith.addf %1264, %1265 : vector<8x128xf32>
    %1267 = arith.mulf %1256, %1192 : vector<8x128xf32>
    %1268 = arith.mulf %1248, %1258 : vector<8x128xf32>
    %1269 = arith.addf %1267, %1268 : vector<8x128xf32>
    %1270 = math.tanh %1269 : vector<8x128xf32>
    %1271 = arith.mulf %1266, %1270 : vector<8x128xf32>
    %c7_i32_506 = arith.constant 7 : i32
    %c2 = arith.constant 2 : index
    %c0_507 = arith.constant 0 : index
    %c0_508 = arith.constant 0 : index
    %1272 = vector.load %arg12[%c2, %c0_507, %c0_508] : memref<4x8x128xf32, #tpu.memory_space<vmem>>, vector<1x8x128xf32>
    %1273 = vector.shape_cast %1272 : vector<1x8x128xf32> to vector<8x128xf32>
    %1274 = vector.shape_cast %1235 : vector<8x128xf32> to vector<1x8x128xf32>
    tpu.vector_store %arg12[%c2, %c0_507, %c0_508], %1274 {strides = array<i32>} : memref<4x8x128xf32, #tpu.memory_space<vmem>>, vector<1x8x128xf32>,
    %c2_509 = arith.constant 2 : index
    %c0_510 = arith.constant 0 : index
    %c0_511 = arith.constant 0 : index
    %1275 = vector.load %arg13[%c2_509, %c0_510, %c0_511] : memref<4x8x128xf32, #tpu.memory_space<vmem>>, vector<1x8x128xf32>
    %1276 = vector.shape_cast %1275 : vector<1x8x128xf32> to vector<8x128xf32>
    %1277 = vector.shape_cast %1233 : vector<8x128xf32> to vector<1x8x128xf32>
    tpu.vector_store %arg13[%c2_509, %c0_510, %c0_511], %1277 {strides = array<i32>} : memref<4x8x128xf32, #tpu.memory_space<vmem>>, vector<1x8x128xf32>,
    %c3 = arith.constant 3 : index
    %c0_512 = arith.constant 0 : index
    %c0_513 = arith.constant 0 : index
    %1278 = vector.load %arg12[%c3, %c0_512, %c0_513] : memref<4x8x128xf32, #tpu.memory_space<vmem>>, vector<1x8x128xf32>
    %1279 = vector.shape_cast %1278 : vector<1x8x128xf32> to vector<8x128xf32>
    %1280 = vector.shape_cast %1271 : vector<8x128xf32> to vector<1x8x128xf32>
    tpu.vector_store %arg12[%c3, %c0_512, %c0_513], %1280 {strides = array<i32>} : memref<4x8x128xf32, #tpu.memory_space<vmem>>, vector<1x8x128xf32>,
    %c3_514 = arith.constant 3 : index
    %c0_515 = arith.constant 0 : index
    %c0_516 = arith.constant 0 : index
    %1281 = vector.load %arg13[%c3_514, %c0_515, %c0_516] : memref<4x8x128xf32, #tpu.memory_space<vmem>>, vector<1x8x128xf32>
    %1282 = vector.shape_cast %1281 : vector<1x8x128xf32> to vector<8x128xf32>
    %1283 = vector.shape_cast %1269 : vector<8x128xf32> to vector<1x8x128xf32>
    tpu.vector_store %arg13[%c3_514, %c0_515, %c0_516], %1283 {strides = array<i32>} : memref<4x8x128xf32, #tpu.memory_space<vmem>>, vector<1x8x128xf32>,
    %c3_i32_517 = arith.constant 3 : i32
    %1284 = tpu.memref_slice %arg20[%c3_i32_517] : memref<4x!tpu.dma_semaphore, #tpu.memory_space<semaphore_mem>> -> memref<1x!tpu.dma_semaphore, #tpu.memory_space<semaphore_mem>>
    %1285 = tpu.memref_squeeze %1284 : memref<1x!tpu.dma_semaphore, #tpu.memory_space<semaphore_mem>> -> memref<!tpu.dma_semaphore, #tpu.memory_space<semaphore_mem>>
    tpu.wait_dma2 semaphore(%1285 : memref<!tpu.dma_semaphore, #tpu.memory_space<semaphore_mem>>) src(%arg9 : memref<256x128xf32, #tpu.memory_space<any>>) dst(%arg19 : memref<256x128xf32, #tpu.memory_space<vmem>>)
    %1286 = tpu.concatenate %1235, %732 in 1 : vector<8x128xf32>, vector<8x128xf32> -> vector<8x256xf32>
    %c0_518 = arith.constant 0 : index
    %c0_519 = arith.constant 0 : index
    %1287 = vector.load %arg19[%c0_518, %c0_519] : memref<256x128xf32, #tpu.memory_space<vmem>>, vector<256x128xf32>
    %cst_520 = arith.constant dense<0.000000e+00> : vector<8x128xf32>
    %1288 = tpu.matmul %1286, %1287, %cst_520 {dimension_numbers = #tpu.dot_dimension_numbers<[1], [0], [0], [1], [0, 0, 1, 1], [], []>} : vector<8x256xf32>, vector<256x128xf32>, vector<8x128xf32> -> vector<8x128xf32>
    %c0_521 = arith.constant 0 : index
    %c0_522 = arith.constant 0 : index
    %1289 = vector.load %arg10[%c0_521, %c0_522] : memref<1x128xf32, #tpu.memory_space<vmem>>, vector<1x128xf32>
    %1290 = vector.broadcast %1289 : vector<1x128xf32> to vector<8x128xf32>
    %1291 = arith.addf %1288, %1290 : vector<8x128xf32>
    %cst_523 = arith.constant dense<0xFF800000> : vector<8xf32>
    %1292 = vector.multi_reduction <maximumf>, %1291, %cst_523 [1] : vector<8x128xf32> to vector<8xf32>
    %1293 = vector.shape_cast %1292 : vector<8xf32> to vector<8x1xf32>
    %1294 = vector.broadcast %1293 : vector<8x1xf32> to vector<8x128xf32>
    %1295 = arith.subf %1291, %1294 : vector<8x128xf32>
    %1296 = math.exp %1295 : vector<8x128xf32>
    %cst_524 = arith.constant dense<0.000000e+00> : vector<8xf32>
    %1297 = vector.multi_reduction <add>, %1296, %cst_524 [1] : vector<8x128xf32> to vector<8xf32>
    %1298 = vector.shape_cast %1297 : vector<8xf32> to vector<8x1xf32>
    %1299 = tpu.reciprocal %1298 {approx = true} : vector<8x1xf32> -> vector<8x1xf32>
    %1300 = arith.mulf %1298, %1299 : vector<8x1xf32>
    %cst_525 = arith.constant 2.000000e+00 : f32
    %1301 = vector.broadcast %cst_525 : f32 to vector<8x1xf32>
    %1302 = arith.subf %1301, %1300 : vector<8x1xf32>
    %1303 = arith.mulf %1299, %1302 : vector<8x1xf32>
    %1304 = vector.broadcast %1303 : vector<8x1xf32> to vector<8x128xf32>
    %1305 = arith.mulf %1296, %1304 : vector<8x128xf32>
    %c0_526 = arith.constant 0 : index
    %c0_527 = arith.constant 0 : index
    %1306 = vector.load %arg11[%c0_526, %c0_527] : memref<8x128xf32, #tpu.memory_space<vmem>>, vector<8x128xf32>
    tpu.vector_store %arg11[%c0_526, %c0_527], %1305 {strides = array<i32>} : memref<8x128xf32, #tpu.memory_space<vmem>>, vector<8x128xf32>,
    return
  }
}

</mosaic_0001>

<bundles_post_ra>
// kernel: tpu_custom_call.1
= control target key start
LH: loop header
LB: loop body
LE: loop exit
PB: predicated region body
PF: predicated region fallthrough
CT: control target
= control target key end

     0   :  { %19 = vsyncpa [#allocation10], 0  ;;  %s13847_s0 = inlined_call_operand.hbm [shape: f32[64,128], index: 0, kind: input, shape index: {}]   ;;  %s13848_s1 = inlined_call_operand.hbm [shape: f32[128,1024], index: 1, kind: input, shape index: {}]   ;;  %s13849_s2 = inlined_call_operand.hbm [shape: f32[128,512], index: 2, kind: input, shape index: {}]   ;;  %s13850_s3 = inlined_call_operand.hbm [shape: f32[128,512], index: 3, kind: input, shape index: {}]   ;;  %s13851_s4 = inlined_call_operand.vmem [shape: f32[1,1024], index: 4, kind: input, shape index: {}]   ;;  %s13852_s5 = inlined_call_operand.hbm [shape: f32[256,1024], index: 5, kind: input, shape index: {}]   ;;  %s13853_s6 = inlined_call_operand.hbm [shape: f32[128,512], index: 6, kind: input, shape index: {}]   ;;  %s13854_s7 = inlined_call_operand.hbm [shape: f32[128,512], index: 7, kind: input, shape index: {}]   ;;  %s13855_s8 = inlined_call_operand.vmem [shape: f32[1,1024], index: 8, kind: input, shape index: {}]   ;;  %s13856_s9 = inlined_call_operand.hbm [shape: f32[256,128], index: 9, kind: input, shape index: {}]   ;;  %s13857_s10 = inlined_call_operand.vmem [shape: f32[1,128], index: 10, kind: input, shape index: {}]   ;;  %s13858_s11 = inlined_call_operand.hbm [shape: f32[8,128], index: 11, kind: output, shape index: {0}]   ;;  %s13859_s12 = inlined_call_operand.hbm [shape: f32[4,8,128], index: 12, kind: output, shape index: {1}]   ;;  %s13860_s13 = inlined_call_operand.hbm [shape: f32[4,8,128], index: 13, kind: output, shape index: {2}]  }
   0x1   :  { %20 = vsyncpa [#allocation13], 0 }
   0x2   :  { %21 = vsyncpa [#allocation16], 0 }
   0x3   :  { %22 = vsyncpa [#allocation11], 0 }
   0x4   :  { %23 = vsyncpa [#allocation19], 0  ;;  %s11399_s25 = smov [#allocation12]   ;;  %s11139_s29 = scalar_lea.hbm %s13848_s1, 16384 }
   0x5   :  { %s41_s26 = sshll.u32 %s11399_s25, 4  ;;  %p11140_p0 = scmp.ne.s32.totalorder %s13848_s1, %s11139_s29  ;;  %s42_s26 = int_to_ptr.vmem [resolvable:$true] %s41_s26 }
   0x6   :  { %p11143_p1 = scmp.lt.u32.totalorder %s11139_s29, %s13848_s1 }
   0x8   :  { %p11145_p2 = pnand %p11143_p1, %p11140_p0 }
   0xa   :  { %11148 = shalt.err (!%p11145_p2)
}
   0xb   :  { %s11149_s17 = scalar_lea.vmem %s42_s26, 16384  ;;  %p11154_p4 = scmp.lt.s32.totalorder %s42_s26, %s42_s26 }
   0xc   :  { %p11150_p3 = scmp.ne.s32.totalorder %s42_s26, %s11149_s17  ;;  %p11155_p5 = scmp.lt.s32.totalorder %s11149_s17, %s11149_s17 }
   0xe   :  { %p11156_p6 = por %p11155_p5, %p11154_p4 }
  0x10   :  { %p11157_p7 = pnand %p11156_p6, %p11150_p3 }
  0x12   :  { %11160 = shalt.err (!%p11157_p7)
}
  0x13   :  { %s11400_s18 = smov 1024   ;;  %s11401_s19 = smov 64  }
  0x14   :  { %47 = dma.hbm_to_vmem [thread:$0]  %s13848_s1, 16384, %s42_s26, [#allocation13], %s11400_s18, %s11400_s18, %s11401_s19  }
  0x15   :  { %s11402_s22 = smov [#allocation9]   ;;  %s11161_s27 = scalar_lea.hbm %s13847_s0, 1024 }
  0x16   :  { %s29_s23 = sshll.u32 %s11402_s22, 4  ;;  %p11162_p8 = scmp.ne.s32.totalorder %s13847_s0, %s11161_s27  ;;  %s30_s23 = int_to_ptr.vmem [resolvable:$true] %s29_s23 }
  0x17   :  { %p11165_p9 = scmp.lt.u32.totalorder %s11161_s27, %s13847_s0 }
  0x19   :  { %p11167_p10 = pnand %p11165_p9, %p11162_p8 }
  0x1b   :  { %11170 = shalt.err (!%p11167_p10)
}
  0x1c   :  { %s11171_s15 = scalar_lea.vmem %s30_s23, 1024  ;;  %p11176_p12 = scmp.lt.s32.totalorder %s30_s23, %s30_s23 }
  0x1d   :  { %p11172_p11 = scmp.ne.s32.totalorder %s30_s23, %s11171_s15  ;;  %p11177_p13 = scmp.lt.s32.totalorder %s11171_s15, %s11171_s15 }
  0x1f   :  { %p11178_p0 = por %p11177_p13, %p11176_p12 }
  0x21   :  { %p11179_p1 = pnand %p11178_p0, %p11172_p11 }
  0x23   :  { %11182 = shalt.err (!%p11179_p1)
}
  0x24   :  { %s11403_s1 = smov 128   ;;  %s11404_s26 = smov 8  }
  0x25   :  { %35 = dma.hbm_to_vmem [thread:$0]  %s13847_s0, 1024, %s30_s23, [#allocation10], %s11403_s1, %s11403_s1, %s11404_s26  }
  0x26   :  { %s11405_s18 = smov [#allocation14]   ;;  %s11183_s22 = scalar_lea.hbm %s13849_s2, 8192 }
  0x27   :  { %s53_s19 = sshll.u32 %s11405_s18, 4  ;;  %p11184_p2 = scmp.ne.s32.totalorder %s13849_s2, %s11183_s22  ;;  %s54_s19 = int_to_ptr.vmem [resolvable:$true] %s53_s19 }
  0x28   :  { %p11187_p3 = scmp.lt.u32.totalorder %s11183_s22, %s13849_s2 }
  0x2a   :  { %p11189_p4 = pnand %p11187_p3, %p11184_p2 }
  0x2c   :  { %11192 = shalt.err (!%p11189_p4)
}
  0x2d   :  { %s11193_s29 = scalar_lea.vmem %s54_s19, 8192  ;;  %p11198_p6 = scmp.lt.s32.totalorder %s54_s19, %s54_s19 }
  0x2e   :  { %p11194_p5 = scmp.ne.s32.totalorder %s54_s19, %s11193_s29  ;;  %p11199_p7 = scmp.lt.s32.totalorder %s11193_s29, %s11193_s29 }
  0x30   :  { %p11200_p8 = por %p11199_p7, %p11198_p6 }
  0x32   :  { %p11201_p9 = pnand %p11200_p8, %p11194_p5 }
  0x34   :  { %11204 = shalt.err (!%p11201_p9)
}
  0x35   :  { %s11406_s0 = smov 512   ;;  %s11407_s23 = smov 32  }
  0x36   :  { %59 = dma.hbm_to_vmem [thread:$0]  %s13849_s2, 8192, %s54_s19, [#allocation13], %s11406_s0, %s11406_s0, %s11407_s23  }
  0x37   :  { %s11408_s15 = smov [#allocation15]   ;;  %s11205_s20 = scalar_lea.hbm %s13850_s3, 8192 }
  0x38   :  { %s65_s16 = sshll.u32 %s11408_s15, 4  ;;  %p11206_p10 = scmp.ne.s32.totalorder %s13850_s3, %s11205_s20  ;;  %s66_s16 = int_to_ptr.vmem [resolvable:$true] %s65_s16 }
  0x39   :  { %p11209_p11 = scmp.lt.u32.totalorder %s11205_s20, %s13850_s3 }
  0x3b   :  { %p11211_p12 = pnand %p11209_p11, %p11206_p10 }
  0x3d   :  { %11214 = shalt.err (!%p11211_p12)
}
  0x3e   :  { %s11215_s27 = scalar_lea.vmem %s66_s16, 8192  ;;  %p11220_p0 = scmp.lt.s32.totalorder %s66_s16, %s66_s16 }
  0x3f   :  { %p11216_p13 = scmp.ne.s32.totalorder %s66_s16, %s11215_s27  ;;  %p11221_p1 = scmp.lt.s32.totalorder %s11215_s27, %s11215_s27 }
  0x41   :  { %p11222_p2 = por %p11221_p1, %p11220_p0 }
  0x43   :  { %p11223_p3 = pnand %p11222_p2, %p11216_p13 }
  0x45   :  { %11226 = shalt.err (!%p11223_p3)
}
  0x46   :  { %71 = dma.hbm_to_vmem [thread:$0]  %s13850_s3, 8192, %s66_s16, [#allocation16], %s11406_s0, %s11406_s0, %s11407_s23  }
  0x47   :  { %11381 = dma.done.wait [#allocation10], 1024  }
  0x48   :  { %11382 = vsyncadd [#allocation10], 4294966272 }
  0x49   :  { %11383 = dma.done.wait [#allocation13], 24576  }
  0x4a   :  { %11384 = vsyncadd [#allocation13], 4294942720 }
  0x4b   :  { %11385 = dma.done.wait [#allocation16], 8192  }
  0x4c   :  { %11386 = vsyncadd [#allocation16], 4294959104  ;;  %v13861_v0 = vmov 0.0   ;;  %v146_v1 = vld [vmem:[#allocation12 + $0x8] sm:$0xff]  ;;  %v148_v3 = vld [vmem:[#allocation12 + $0x18] sm:$0xff]  ;;  %s11411_s0 = smov [#allocation5]  }
  0x4d   :  { %379 = vmatprep.mubr.f32.mxu0 %v13861_v0  ;;  %492 = vmatprep.mubr.f32.mxu1 %v13861_v0  ;;  %v154_v2 = vld [vmem:[#allocation12 + $0x48] sm:$0xff]  ;;  %v156_v5 = vld [vmem:[#allocation12 + $0x58] sm:$0xff]  ;;  %v145_v6 = vld [vmem:[#allocation12] sm:$0xff]  ;;  %s109_s23 = sshll.u32 %s11411_s0, 4  ;;  %s11227_s15 = scalar_lea.hbm %s13852_s5, 32768  ;;  %s110_s23 = int_to_ptr.vmem [resolvable:$true] %s109_s23 }
  0x4e   :  { %v8225_v4 = vpack.c.bf16 %v154_v2, %v146_v1  ;;  %v153_v7 = vld [vmem:[#allocation12 + $0x40] sm:$0xff]  ;;  %v8257_v8 = vpack.c.bf16 %v156_v5, %v148_v3  ;;  %v147_v10 = vld [vmem:[#allocation12 + $0x10] sm:$0xff]  ;;  %v162_v12 = vld [vmem:[#allocation12 + $0x88] sm:$0xff]  ;;  %p11228_p4 = scmp.ne.s32.totalorder %s13852_s5, %s11227_s15  ;;  %p11231_p5 = scmp.lt.u32.totalorder %s11227_s15, %s13852_s5 }
  0x4f   :  { %v8227_v9 = vpack.c.bf16 %v153_v7, %v145_v6  ;;  %v155_v11 = vld [vmem:[#allocation12 + $0x50] sm:$0xff]  ;;  %v170_v14 = vld [vmem:[#allocation12 + $0xc8] sm:$0xff]  ;;  %v164_v15 = vld [vmem:[#allocation12 + $0x98] sm:$0xff] }
  0x50   :  { %8226 = vmatprep.subr.bf16.mxu0 %v8225_v4  ;;  %v8259_v13 = vpack.c.bf16 %v155_v11, %v147_v10  ;;  %v172_v16 = vld [vmem:[#allocation12 + $0xd8] sm:$0xff]  ;;  %8258 = vmatprep.subr.bf16.mxu1 %v8257_v8  ;;  %v8229_v17 = vpack.c.bf16 %v170_v14, %v162_v12  ;;  %v161_v19 = vld [vmem:[#allocation12 + $0x80] sm:$0xff]  ;;  %v163_v21 = vld [vmem:[#allocation12 + $0x90] sm:$0xff]  ;;  %p11233_p6 = pnand %p11231_p5, %p11228_p4 }
  0x51   :  { %8228 = vmatpush1.bf16.msra.mxu0 %v8227_v9  ;;  %v8261_v18 = vpack.c.bf16 %v172_v16, %v164_v15  ;;  %v169_v20 = vld [vmem:[#allocation12 + $0xc0] sm:$0xff]  ;;  %v171_v23 = vld [vmem:[#allocation12 + $0xd0] sm:$0xff]  ;;  %v178_v24 = vld [vmem:[#allocation12 + $0x108] sm:$0xff] }
  0x52   :  { %8260 = vmatpush1.bf16.msra.mxu1 %v8259_v13  ;;  %v8231_v22 = vpack.c.bf16 %v169_v20, %v161_v19  ;;  %v186_v25 = vld [vmem:[#allocation12 + $0x148] sm:$0xff]  ;;  %8230 = vmatprep.subr.bf16.mxu0 %v8229_v17  ;;  %v8263_v26 = vpack.c.bf16 %v171_v23, %v163_v21  ;;  %v180_v28 = vld [vmem:[#allocation12 + $0x118] sm:$0xff]  ;;  %v177_v30 = vld [vmem:[#allocation12 + $0x100] sm:$0xff] }
  0x53   :  { %8262 = vmatprep.subr.bf16.mxu1 %v8261_v18  ;;  %v8233_v27 = vpack.c.bf16 %v186_v25, %v178_v24  ;;  %v188_v29 = vld [vmem:[#allocation12 + $0x158] sm:$0xff]  ;;  %v185_v32 = vld [vmem:[#allocation12 + $0x140] sm:$0xff]  ;;  %v179_v33 = vld [vmem:[#allocation12 + $0x110] sm:$0xff] }
  0x54   :  { %v8265_v31 = vpack.c.bf16 %v188_v29, %v180_v28  ;;  %v187_v34 = vld [vmem:[#allocation12 + $0x150] sm:$0xff]  ;;  %v8235_v35 = vpack.c.bf16 %v185_v32, %v177_v30  ;;  %v194_v36 = vld [vmem:[#allocation12 + $0x188] sm:$0xff]  ;;  %v196_v38 = vld [vmem:[#allocation12 + $0x198] sm:$0xff] }
  0x55   :  { %8232 = vmatpush1.bf16.msra.mxu0 %v8231_v22  ;;  %v202_v37 = vld [vmem:[#allocation12 + $0x1c8] sm:$0xff]  ;;  %v8267_v39 = vpack.c.bf16 %v187_v34, %v179_v33  ;;  %v204_v41 = vld [vmem:[#allocation12 + $0x1d8] sm:$0xff]  ;;  %v193_v42 = vld [vmem:[#allocation12 + $0x180] sm:$0xff] }
  0x56   :  { %8264 = vmatpush1.bf16.msra.mxu1 %v8263_v26  ;;  %8234 = vmatprep.subr.bf16.mxu0 %v8233_v27  ;;  %v8237_v40 = vpack.c.bf16 %v202_v37, %v194_v36  ;;  %v201_v43 = vld [vmem:[#allocation12 + $0x1c0] sm:$0xff]  ;;  %v8269_v44 = vpack.c.bf16 %v204_v41, %v196_v38  ;;  %v195_v45 = vld [vmem:[#allocation12 + $0x190] sm:$0xff]  ;;  %v210_v47 = vld [vmem:[#allocation12 + $0x208] sm:$0xff] }
  0x57   :  { %8266 = vmatprep.subr.bf16.mxu1 %v8265_v31  ;;  %v203_v46 = vld [vmem:[#allocation12 + $0x1d0] sm:$0xff]  ;;  %v218_v48 = vld [vmem:[#allocation12 + $0x248] sm:$0xff]  ;;  %v212_v49 = vld [vmem:[#allocation12 + $0x218] sm:$0xff]  ;;  %v8239_v51 = vpack.c.bf16 %v201_v43, %v193_v42 }
  0x58   :  { %v220_v50 = vld [vmem:[#allocation12 + $0x258] sm:$0xff]  ;;  %v8271_v52 = vpack.c.bf16 %v203_v46, %v195_v45  ;;  %v8241_v53 = vpack.c.bf16 %v218_v48, %v210_v47  ;;  %v209_v54 = vld [vmem:[#allocation12 + $0x200] sm:$0xff]  ;;  %v211_v56 = vld [vmem:[#allocation12 + $0x210] sm:$0xff] }
  0x59   :  { %8236 = vmatpush1.bf16.msra.mxu0 %v8235_v35  ;;  %v217_v55 = vld [vmem:[#allocation12 + $0x240] sm:$0xff]  ;;  %v8273_v57 = vpack.c.bf16 %v220_v50, %v212_v49  ;;  %v219_v58 = vld [vmem:[#allocation12 + $0x250] sm:$0xff]  ;;  %v226_v59 = vld [vmem:[#allocation12 + $0x288] sm:$0xff] }
  0x5a   :  { %8268 = vmatpush1.bf16.msra.mxu1 %v8267_v39  ;;  %8238 = vmatprep.subr.bf16.mxu0 %v8237_v40  ;;  %v234_v60 = vld [vmem:[#allocation12 + $0x2c8] sm:$0xff]  ;;  %v228_v61 = vld [vmem:[#allocation12 + $0x298] sm:$0xff]  ;;  %v8243_v63 = vpack.c.bf16 %v217_v55, %v209_v54  ;;  %v8275_v1 = vpack.c.bf16 %v219_v58, %v211_v56  ;;  %v225_v3 = vld [vmem:[#allocation12 + $0x280] sm:$0xff] }
  0x5b   :  { %8270 = vmatprep.subr.bf16.mxu1 %v8269_v44  ;;  %v236_v62 = vld [vmem:[#allocation12 + $0x2d8] sm:$0xff]  ;;  %v8245_v2 = vpack.c.bf16 %v234_v60, %v226_v59  ;;  %v233_v4 = vld [vmem:[#allocation12 + $0x2c0] sm:$0xff]  ;;  %v227_v5 = vld [vmem:[#allocation12 + $0x290] sm:$0xff] }
  0x5c   :  { %v8277_v6 = vpack.c.bf16 %v236_v62, %v228_v61  ;;  %v235_v7 = vld [vmem:[#allocation12 + $0x2d0] sm:$0xff]  ;;  %v242_v8 = vld [vmem:[#allocation12 + $0x308] sm:$0xff]  ;;  %v244_v10 = vld [vmem:[#allocation12 + $0x318] sm:$0xff]  ;;  %v8247_v12 = vpack.c.bf16 %v233_v4, %v225_v3 }
  0x5d   :  { %8240 = vmatpush1.bf16.msra.mxu0 %v8239_v51  ;;  %v250_v9 = vld [vmem:[#allocation12 + $0x348] sm:$0xff]  ;;  %v252_v11 = vld [vmem:[#allocation12 + $0x358] sm:$0xff]  ;;  %v8279_v13 = vpack.c.bf16 %v235_v7, %v227_v5  ;;  %v241_v15 = vld [vmem:[#allocation12 + $0x300] sm:$0xff] }
  0x5e   :  { %8272 = vmatpush1.bf16.msra.mxu1 %v8271_v52  ;;  %8242 = vmatprep.subr.bf16.mxu0 %v8241_v53  ;;  %v8249_v14 = vpack.c.bf16 %v250_v9, %v242_v8  ;;  %v249_v16 = vld [vmem:[#allocation12 + $0x340] sm:$0xff]  ;;  %v243_v17 = vld [vmem:[#allocation12 + $0x310] sm:$0xff]  ;;  %v8281_v18 = vpack.c.bf16 %v252_v11, %v244_v10  ;;  %v258_v20 = vld [vmem:[#allocation12 + $0x388] sm:$0xff] }
  0x5f   :  { %8274 = vmatprep.subr.bf16.mxu1 %v8273_v57  ;;  %v251_v19 = vld [vmem:[#allocation12 + $0x350] sm:$0xff]  ;;  %v266_v21 = vld [vmem:[#allocation12 + $0x3c8] sm:$0xff]  ;;  %v260_v22 = vld [vmem:[#allocation12 + $0x398] sm:$0xff]  ;;  %v8251_v24 = vpack.c.bf16 %v249_v16, %v241_v15 }
  0x60   :  { %v268_v23 = vld [vmem:[#allocation12 + $0x3d8] sm:$0xff]  ;;  %v8283_v25 = vpack.c.bf16 %v251_v19, %v243_v17  ;;  %v8253_v26 = vpack.c.bf16 %v266_v21, %v258_v20  ;;  %v257_v27 = vld [vmem:[#allocation12 + $0x380] sm:$0xff]  ;;  %v259_v29 = vld [vmem:[#allocation12 + $0x390] sm:$0xff] }
  0x61   :  { %8244 = vmatpush1.bf16.msra.mxu0 %v8243_v63  ;;  %v265_v28 = vld [vmem:[#allocation12 + $0x3c0] sm:$0xff]  ;;  %v8285_v30 = vpack.c.bf16 %v268_v23, %v260_v22  ;;  %v267_v31 = vld [vmem:[#allocation12 + $0x3d0] sm:$0xff]  ;;  %v150_v32 = vld [vmem:[#allocation12 + $0x28] sm:$0xff] }
  0x62   :  { %8276 = vmatpush1.bf16.msra.mxu1 %v8275_v1  ;;  %8246 = vmatprep.subr.bf16.mxu0 %v8245_v2  ;;  %v158_v33 = vld [vmem:[#allocation12 + $0x68] sm:$0xff]  ;;  %v152_v34 = vld [vmem:[#allocation12 + $0x38] sm:$0xff]  ;;  %v8255_v36 = vpack.c.bf16 %v265_v28, %v257_v27  ;;  %v8287_v37 = vpack.c.bf16 %v267_v31, %v259_v29  ;;  %v149_v39 = vld [vmem:[#allocation12 + $0x20] sm:$0xff] }
  0x63   :  { %8278 = vmatprep.subr.bf16.mxu1 %v8277_v6  ;;  %v160_v35 = vld [vmem:[#allocation12 + $0x78] sm:$0xff]  ;;  %v8289_v38 = vpack.c.bf16 %v158_v33, %v150_v32  ;;  %v157_v40 = vld [vmem:[#allocation12 + $0x60] sm:$0xff]  ;;  %v151_v42 = vld [vmem:[#allocation12 + $0x30] sm:$0xff] }
  0x64   :  { %v8321_v41 = vpack.c.bf16 %v160_v35, %v152_v34  ;;  %v159_v43 = vld [vmem:[#allocation12 + $0x70] sm:$0xff]  ;;  %v166_v44 = vld [vmem:[#allocation12 + $0xa8] sm:$0xff]  ;;  %v11540_v46 = vld [vmem:[#allocation9] sm:$0xff]  ;;  %v8291_v47 = vpack.c.bf16 %v157_v40, %v149_v39 }
  0x65   :  { %8248 = vmatpush1.bf16.msra.mxu0 %v8247_v12  ;;  %v174_v45 = vld [vmem:[#allocation12 + $0xe8] sm:$0xff]  ;;  %v168_v48 = vld [vmem:[#allocation12 + $0xb8] sm:$0xff]  ;;  %v8323_v50 = vpack.c.bf16 %v159_v43, %v151_v42  ;;  %v165_v51 = vld [vmem:[#allocation12 + $0xa0] sm:$0xff] }
  0x66   :  { %8280 = vmatpush1.bf16.msra.mxu1 %v8279_v13  ;;  %8250 = vmatprep.subr.bf16.mxu0 %v8249_v14  ;;  %v176_v49 = vld [vmem:[#allocation12 + $0xf8] sm:$0xff]  ;;  %v173_v52 = vld [vmem:[#allocation12 + $0xe0] sm:$0xff]  ;;  %v8293_v53 = vpack.c.bf16 %v174_v45, %v166_v44  ;;  %v167_v54 = vld [vmem:[#allocation12 + $0xb0] sm:$0xff] }
  0x67   :  { %8282 = vmatprep.subr.bf16.mxu1 %v8281_v18  ;;  %v175_v55 = vld [vmem:[#allocation12 + $0xf0] sm:$0xff]  ;;  %v8325_v56 = vpack.c.bf16 %v176_v49, %v168_v48  ;;  %v182_v57 = vld [vmem:[#allocation12 + $0x128] sm:$0xff]  ;;  %v8295_v60 = vpack.c.bf16 %v173_v52, %v165_v51  ;;  %v184_v61 = vld [vmem:[#allocation12 + $0x138] sm:$0xff] }
  0x68   :  { %v190_v58 = vld [vmem:[#allocation12 + $0x168] sm:$0xff]  ;;  %v192_v62 = vld [vmem:[#allocation12 + $0x178] sm:$0xff]  ;;  %v8327_v63 = vpack.c.bf16 %v175_v55, %v167_v54  ;;  %v181_v1 = vld [vmem:[#allocation12 + $0x120] sm:$0xff] }
  0x69   :  { %8252 = vmatpush1.bf16.msra.mxu0 %v8251_v24  ;;  %v11544_v59 = vld [vmem:[#allocation9 + $0x8] sm:$0xff]  ;;  %v189_v2 = vld [vmem:[#allocation12 + $0x160] sm:$0xff]  ;;  %v8297_v3 = vpack.c.bf16 %v190_v58, %v182_v57  ;;  %v183_v4 = vld [vmem:[#allocation12 + $0x130] sm:$0xff]  ;;  %v8329_v6 = vpack.c.bf16 %v192_v62, %v184_v61 }
  0x6a   :  { %8284 = vmatpush1.bf16.msra.mxu1 %v8283_v25  ;;  %8254 = vmatprep.subr.bf16.mxu0 %v8253_v26  ;;  %v191_v5 = vld [vmem:[#allocation12 + $0x170] sm:$0xff]  ;;  %v198_v7 = vld [vmem:[#allocation12 + $0x1a8] sm:$0xff]  ;;  %v8299_v10 = vpack.c.bf16 %v189_v2, %v181_v1  ;;  %v200_v11 = vld [vmem:[#allocation12 + $0x1b8] sm:$0xff] }
  0x6b   :  { %8286 = vmatprep.subr.bf16.mxu1 %v8285_v30  ;;  %v206_v8 = vld [vmem:[#allocation12 + $0x1e8] sm:$0xff]  ;;  %v11550_v9 = vld [vmem:[#allocation9 + $0x10] sm:$0xff]  ;;  %v208_v12 = vld [vmem:[#allocation12 + $0x1f8] sm:$0xff]  ;;  %v8331_v13 = vpack.c.bf16 %v191_v5, %v183_v4 }
  0x6c   :  { %v197_v14 = vld [vmem:[#allocation12 + $0x1a0] sm:$0xff]  ;;  %v8301_v16 = vpack.c.bf16 %v206_v8, %v198_v7  ;;  %v199_v17 = vld [vmem:[#allocation12 + $0x1b0] sm:$0xff]  ;;  %v8333_v19 = vpack.c.bf16 %v208_v12, %v200_v11  ;;  %v214_v20 = vld [vmem:[#allocation12 + $0x228] sm:$0xff] }
  0x6d   :  { %8256 = vmatpush1.bf16.msra.mxu0 %v8255_v36  ;;  %v205_v15 = vld [vmem:[#allocation12 + $0x1e0] sm:$0xff]  ;;  %v207_v18 = vld [vmem:[#allocation12 + $0x1f0] sm:$0xff]  ;;  %v222_v21 = vld [vmem:[#allocation12 + $0x268] sm:$0xff] }
  0x6e   :  { %8288 = vmatpush1.bf16.msra.mxu1 %v8287_v37  ;;  %8290 = vmatprep.subr.bf16.mxu0 %v8289_v38  ;;  %v11556_v22 = vld [vmem:[#allocation9 + $0x18] sm:$0xff]  ;;  %v8303_v23 = vpack.c.bf16 %v205_v15, %v197_v14  ;;  %v8335_v26 = vpack.c.bf16 %v207_v18, %v199_v17  ;;  %v213_v27 = vld [vmem:[#allocation12 + $0x220] sm:$0xff]  ;;  %v8305_v29 = vpack.c.bf16 %v222_v21, %v214_v20  ;;  %v215_v30 = vld [vmem:[#allocation12 + $0x230] sm:$0xff] }
  0x6f   :  { %8322 = vmatprep.subr.bf16.mxu1 %v8321_v41  ;;  %v216_v24 = vld [vmem:[#allocation12 + $0x238] sm:$0xff]  ;;  %v221_v28 = vld [vmem:[#allocation12 + $0x260] sm:$0xff]  ;;  %v223_v31 = vld [vmem:[#allocation12 + $0x270] sm:$0xff] }
  0x70   :  { %380 = vmatmul.mubr.f32.vlgmr.msra.gmra.mrb[0].mxu0 %v11540_v46  ;;  %v224_v25 = vld [vmem:[#allocation12 + $0x278] sm:$0xff]  ;;  %v230_v33 = vld [vmem:[#allocation12 + $0x2a8] sm:$0xff]  ;;  %v11562_v35 = vld [vmem:[#allocation9 + $0x20] sm:$0xff]  ;;  %v8307_v36 = vpack.c.bf16 %v221_v28, %v213_v27  ;;  %v8339_v39 = vpack.c.bf16 %v223_v31, %v215_v30 }
  0x71   :  { %493 = vmatmul.mubr.f32.vlgmr.msra.gmra.mrb[0].mxu1 %v11540_v46  ;;  %8292 = vmatpush1.bf16.msra.mxu0 %v8291_v47  ;;  %v8337_v32 = vpack.c.bf16 %v224_v25, %v216_v24  ;;  %v238_v34 = vld [vmem:[#allocation12 + $0x2e8] sm:$0xff]  ;;  %v232_v37 = vld [vmem:[#allocation12 + $0x2b8] sm:$0xff]  ;;  %v229_v40 = vld [vmem:[#allocation12 + $0x2a0] sm:$0xff] }
  0x72   :  { %8324 = vmatpush1.bf16.msra.mxu1 %v8323_v50  ;;  %385 = vmatprep.mubr.f32.mxu0 %v13861_v0  ;;  %v240_v38 = vld [vmem:[#allocation12 + $0x2f8] sm:$0xff]  ;;  %v237_v41 = vld [vmem:[#allocation12 + $0x2e0] sm:$0xff]  ;;  %v8309_v42 = vpack.c.bf16 %v238_v34, %v230_v33  ;;  %v231_v43 = vld [vmem:[#allocation12 + $0x2b0] sm:$0xff] }
  0x73   :  { %498 = vmatprep.mubr.f32.mxu1 %v13861_v0  ;;  %8294 = vmatprep.subr.bf16.mxu0 %v8293_v53  ;;  %v239_v44 = vld [vmem:[#allocation12 + $0x2f0] sm:$0xff]  ;;  %v8341_v45 = vpack.c.bf16 %v240_v38, %v232_v37  ;;  %v246_v47 = vld [vmem:[#allocation12 + $0x328] sm:$0xff]  ;;  %v8311_v50 = vpack.c.bf16 %v237_v41, %v229_v40  ;;  %v248_v51 = vld [vmem:[#allocation12 + $0x338] sm:$0xff] }
  0x74   :  { %386 = vmatmul.mubr.f32.gmra.mrb[2].mxu0 %v11544_v59  ;;  %8326 = vmatprep.subr.bf16.mxu1 %v8325_v56  ;;  %v254_v48 = vld [vmem:[#allocation12 + $0x368] sm:$0xff]  ;;  %v256_v52 = vld [vmem:[#allocation12 + $0x378] sm:$0xff]  ;;  %v8343_v53 = vpack.c.bf16 %v239_v44, %v231_v43  ;;  %v245_v54 = vld [vmem:[#allocation12 + $0x320] sm:$0xff] }
  0x75   :  { %499 = vmatmul.mubr.f32.gmra.mrb[2].mxu1 %v11544_v59  ;;  %8296 = vmatpush1.bf16.msra.mxu0 %v8295_v60  ;;  %v11568_v49 = vld [vmem:[#allocation9 + $0x28] sm:$0xff]  ;;  %v253_v55 = vld [vmem:[#allocation12 + $0x360] sm:$0xff]  ;;  %v8313_v56 = vpack.c.bf16 %v254_v48, %v246_v47  ;;  %v247_v57 = vld [vmem:[#allocation12 + $0x330] sm:$0xff]  ;;  %v8345_v60 = vpack.c.bf16 %v256_v52, %v248_v51 }
  0x76   :  { %8328 = vmatpush1.bf16.msra.mxu1 %v8327_v63  ;;  %391 = vmatprep.mubr.f32.mxu0 %v13861_v0  ;;  %v255_v58 = vld [vmem:[#allocation12 + $0x370] sm:$0xff]  ;;  %v262_v61 = vld [vmem:[#allocation12 + $0x3a8] sm:$0xff]  ;;  %v8315_v1 = vpack.c.bf16 %v253_v55, %v245_v54  ;;  %v264_v2 = vld [vmem:[#allocation12 + $0x3b8] sm:$0xff] }
  0x77   :  { %504 = vmatprep.mubr.f32.mxu1 %v13861_v0  ;;  %8298 = vmatprep.subr.bf16.mxu0 %v8297_v3  ;;  %v270_v62 = vld [vmem:[#allocation12 + $0x3e8] sm:$0xff]  ;;  %v11574_v63 = vld [vmem:[#allocation9 + $0x30] sm:$0xff]  ;;  %v272_v3 = vld [vmem:[#allocation12 + $0x3f8] sm:$0xff]  ;;  %v8347_v4 = vpack.c.bf16 %v255_v58, %v247_v57 }
  0x78   :  { %392 = vmatmul.mubr.f32.gmra.mrb[4].mxu0 %v11550_v9  ;;  %8330 = vmatprep.subr.bf16.mxu1 %v8329_v6  ;;  %v261_v5 = vld [vmem:[#allocation12 + $0x3a0] sm:$0xff]  ;;  %v8317_v7 = vpack.c.bf16 %v270_v62, %v262_v61  ;;  %v263_v8 = vld [vmem:[#allocation12 + $0x3b0] sm:$0xff]  ;;  %v8349_v11 = vpack.c.bf16 %v272_v3, %v264_v2  ;;  %v839_v12 = vld [vmem:[#allocation14 + $0x8] sm:$0xff] }
  0x79   :  { %505 = vmatmul.mubr.f32.gmra.mrb[4].mxu1 %v11550_v9  ;;  %8300 = vmatpush1.bf16.msra.mxu0 %v8299_v10  ;;  %v269_v6 = vld [vmem:[#allocation12 + $0x3e0] sm:$0xff]  ;;  %v271_v10 = vld [vmem:[#allocation12 + $0x3f0] sm:$0xff]  ;;  %v11580_v14 = vld [vmem:[#allocation9 + $0x38] sm:$0xff] }
  0x7a   :  { %8332 = vmatpush1.bf16.msra.mxu1 %v8331_v13  ;;  %397 = vmatprep.mubr.f32.mxu0 %v13861_v0  ;;  %v843_v13 = vld [vmem:[#allocation14 + $0x28] sm:$0xff]  ;;  %v8319_v15 = vpack.c.bf16 %v269_v6, %v261_v5  ;;  %v845_v17 = vld [vmem:[#allocation14 + $0x38] sm:$0xff]  ;;  %v8351_v18 = vpack.c.bf16 %v271_v10, %v263_v8  ;;  %v842_v20 = vld [vmem:[#allocation14 + $0x20] sm:$0xff] }
  0x7b   :  { %510 = vmatprep.mubr.f32.mxu1 %v13861_v0  ;;  %8302 = vmatprep.subr.bf16.mxu0 %v8301_v16  ;;  %v841_v16 = vld [vmem:[#allocation14 + $0x18] sm:$0xff]  ;;  %v11584_v21 = vpack.c.bf16 %v843_v13, %v839_v12  ;;  %v844_v24 = vld [vmem:[#allocation14 + $0x30] sm:$0xff]  ;;  %v851_v27 = vld [vmem:[#allocation14 + $0x68] sm:$0xff] }
  0x7c   :  { %398 = vmatmul.mubr.f32.gmra.mrb[6].mxu0 %v11556_v22  ;;  %8334 = vmatprep.subr.bf16.mxu1 %v8333_v19  ;;  %v838_v19 = vld [vmem:[#allocation14] sm:$0xff]  ;;  %v11587_v25 = vpack.c.bf16 %v845_v17, %v841_v16  ;;  %v853_v30 = vld [vmem:[#allocation14 + $0x78] sm:$0xff]  ;;  %v852_v37 = vld [vmem:[#allocation14 + $0x70] sm:$0xff] }
  0x7d   :  { %511 = vmatmul.mubr.f32.gmra.mrb[6].mxu1 %v11556_v22  ;;  %8304 = vmatpush1.bf16.msra.mxu0 %v8303_v23  ;;  %v840_v23 = vld [vmem:[#allocation14 + $0x10] sm:$0xff]  ;;  %v11590_v28 = vpack.c.bf16 %v842_v20, %v838_v19  ;;  %v850_v33 = vld [vmem:[#allocation14 + $0x60] sm:$0xff]  ;;  %v859_v40 = vld [vmem:[#allocation14 + $0xa8] sm:$0xff] }
  0x7e   :  { %8336 = vmatpush1.bf16.msra.mxu1 %v8335_v26  ;;  %403 = vmatprep.mubr.f32.mxu0 %v13861_v0  ;;  %v847_v26 = vld [vmem:[#allocation14 + $0x48] sm:$0xff]  ;;  %v11593_v31 = vpack.c.bf16 %v844_v24, %v840_v23  ;;  %v861_v43 = vld [vmem:[#allocation14 + $0xb8] sm:$0xff]  ;;  %v858_v47 = vld [vmem:[#allocation14 + $0xa0] sm:$0xff] }
  0x7f   :  { %516 = vmatprep.mubr.f32.mxu1 %v13861_v0  ;;  %8306 = vmatprep.subr.bf16.mxu0 %v8305_v29  ;;  %v849_v29 = vld [vmem:[#allocation14 + $0x58] sm:$0xff]  ;;  %v11597_v34 = vpack.c.bf16 %v851_v27, %v847_v26  ;;  %v863_v52 = vld [vmem:[#allocation14 + $0xc8] sm:$0xff]  ;;  %v862_v58 = vld [vmem:[#allocation14 + $0xc0] sm:$0xff] }
  0x80   :  { %404 = vmatmul.mubr.f32.gmra.mrb[8].mxu0 %v11562_v35  ;;  %8338 = vmatprep.subr.bf16.mxu1 %v8337_v32  ;;  %v846_v32 = vld [vmem:[#allocation14 + $0x40] sm:$0xff]  ;;  %v11601_v38 = vpack.c.bf16 %v853_v30, %v849_v29  ;;  %v865_v55 = vld [vmem:[#allocation14 + $0xd8] sm:$0xff]  ;;  %v868_v62 = vld [vmem:[#allocation14 + $0xf0] sm:$0xff] }
  0x81   :  { %517 = vmatmul.mubr.f32.gmra.mrb[8].mxu1 %v11562_v35  ;;  %8308 = vmatpush1.bf16.msra.mxu0 %v8307_v36  ;;  %v848_v36 = vld [vmem:[#allocation14 + $0x50] sm:$0xff]  ;;  %v11605_v41 = vpack.c.bf16 %v850_v33, %v846_v32  ;;  %v871_v2 = vld [vmem:[#allocation14 + $0x108] sm:$0xff]  ;;  %v873_v5 = vld [vmem:[#allocation14 + $0x118] sm:$0xff] }
  0x82   :  { %8340 = vmatpush1.bf16.msra.mxu1 %v8339_v39  ;;  %409 = vmatprep.mubr.f32.mxu0 %v13861_v0  ;;  %v855_v39 = vld [vmem:[#allocation14 + $0x88] sm:$0xff]  ;;  %v11609_v44 = vpack.c.bf16 %v852_v37, %v848_v36  ;;  %v877_v6 = vld [vmem:[#allocation14 + $0x138] sm:$0xff]  ;;  %v870_v8 = vld [vmem:[#allocation14 + $0x100] sm:$0xff] }
  0x83   :  { %522 = vmatprep.mubr.f32.mxu1 %v13861_v0  ;;  %8310 = vmatprep.subr.bf16.mxu0 %v8309_v42  ;;  %v857_v42 = vld [vmem:[#allocation14 + $0x98] sm:$0xff]  ;;  %v11613_v48 = vpack.c.bf16 %v859_v40, %v855_v39  ;;  %v875_v3 = vld [vmem:[#allocation14 + $0x128] sm:$0xff]  ;;  %v874_v10 = vld [vmem:[#allocation14 + $0x120] sm:$0xff]  ;;  %v11649_v13 = vpack.c.bf16 %v877_v6, %v873_v5 }
  0x84   :  { %410 = vmatmul.mubr.f32.gmra.mrb[10].mxu0 %v11568_v49  ;;  %8342 = vmatprep.subr.bf16.mxu1 %v8341_v45  ;;  %v854_v45 = vld [vmem:[#allocation14 + $0x80] sm:$0xff]  ;;  %v11617_v51 = vpack.c.bf16 %v861_v43, %v857_v42  ;;  %v876_v12 = vld [vmem:[#allocation14 + $0x130] sm:$0xff]  ;;  %v883_v16 = vld [vmem:[#allocation14 + $0x168] sm:$0xff]  ;;  %v11653_v17 = vpack.c.bf16 %v874_v10, %v870_v8 }
  0x85   :  { %523 = vmatmul.mubr.f32.gmra.mrb[10].mxu1 %v11568_v49  ;;  %8312 = vmatpush1.bf16.msra.mxu0 %v8311_v50  ;;  %v860_v50 = vld [vmem:[#allocation14 + $0xb0] sm:$0xff]  ;;  %v11621_v54 = vpack.c.bf16 %v858_v47, %v854_v45  ;;  %v885_v19 = vld [vmem:[#allocation14 + $0x178] sm:$0xff]  ;;  %v878_v23 = vld [vmem:[#allocation14 + $0x140] sm:$0xff] }
  0x86   :  { %8344 = vmatpush1.bf16.msra.mxu1 %v8343_v53  ;;  %415 = vmatprep.mubr.f32.mxu0 %v13861_v0  ;;  %v867_v53 = vld [vmem:[#allocation14 + $0xe8] sm:$0xff]  ;;  %v882_v24 = vld [vmem:[#allocation14 + $0x160] sm:$0xff]  ;;  %v884_v27 = vld [vmem:[#allocation14 + $0x170] sm:$0xff] }
  0x87   :  { %528 = vmatprep.mubr.f32.mxu1 %v13861_v0  ;;  %8314 = vmatprep.subr.bf16.mxu0 %v8313_v56  ;;  %v869_v56 = vld [vmem:[#allocation14 + $0xf8] sm:$0xff]  ;;  %v11629_v61 = vpack.c.bf16 %v867_v53, %v863_v52  ;;  %v887_v30 = vld [vmem:[#allocation14 + $0x188] sm:$0xff]  ;;  %v11669_v33 = vpack.c.bf16 %v882_v24, %v878_v23  ;;  %v886_v40 = vld [vmem:[#allocation14 + $0x180] sm:$0xff] }
  0x88   :  { %416 = vmatmul.mubr.f32.gmra.mrb[12].mxu0 %v11574_v63  ;;  %8346 = vmatprep.subr.bf16.mxu1 %v8345_v60  ;;  %v866_v60 = vld [vmem:[#allocation14 + $0xe0] sm:$0xff]  ;;  %v891_v32 = vld [vmem:[#allocation14 + $0x1a8] sm:$0xff]  ;;  %v889_v36 = vld [vmem:[#allocation14 + $0x198] sm:$0xff] }
  0x89   :  { %529 = vmatmul.mubr.f32.gmra.mrb[12].mxu1 %v11574_v63  ;;  %8316 = vmatpush1.bf16.msra.mxu0 %v8315_v1  ;;  %v11633_v1 = vpack.c.bf16 %v869_v56, %v865_v55  ;;  %v893_v37 = vld [vmem:[#allocation14 + $0x1b8] sm:$0xff]  ;;  %v890_v42 = vld [vmem:[#allocation14 + $0x1a0] sm:$0xff]  ;;  %v11677_v43 = vpack.c.bf16 %v891_v32, %v887_v30  ;;  %v892_v45 = vld [vmem:[#allocation14 + $0x1b0] sm:$0xff] }
  0x8a   :  { %8348 = vmatpush1.bf16.msra.mxu1 %v8347_v4  ;;  %421 = vmatprep.mubr.f32.mxu0 %v13861_v0  ;;  %v11637_v4 = vpack.c.bf16 %v866_v60, %v862_v58  ;;  %v11681_v47 = vpack.c.bf16 %v893_v37, %v889_v36  ;;  %v11685_v52 = vpack.c.bf16 %v890_v42, %v886_v40  ;;  %v897_v53 = vld [vmem:[#allocation14 + $0x1d8] sm:$0xff]  ;;  %v894_v58 = vld [vmem:[#allocation14 + $0x1c0] sm:$0xff]  ;;  %v1078_v5 = vld [vmem:[#allocation15 + $0x28] sm:$0xff] }
  0x8b   :  { %534 = vmatprep.mubr.f32.mxu1 %v13861_v0  ;;  %8318 = vmatprep.subr.bf16.mxu0 %v8317_v7  ;;  %v901_v55 = vld [vmem:[#allocation14 + $0x1f8] sm:$0xff]  ;;  %v898_v60 = vld [vmem:[#allocation14 + $0x1e0] sm:$0xff]  ;;  %v1086_v23 = vld [vmem:[#allocation15 + $0x68] sm:$0xff] }
  0x8c   :  { %422 = vmatmul.mubr.f32.gmra.mrb[14].mxu0 %v11580_v14  ;;  %8350 = vmatprep.subr.bf16.mxu1 %v8349_v11  ;;  %v11645_v11 = vpack.c.bf16 %v875_v3, %v871_v2  ;;  %v11697_v2 = vpack.c.bf16 %v901_v55, %v897_v53  ;;  %v1074_v3 = vld [vmem:[#allocation15 + $0x8] sm:$0xff]  ;;  %v11701_v6 = vpack.c.bf16 %v898_v60, %v894_v58  ;;  %v1076_v8 = vld [vmem:[#allocation15 + $0x18] sm:$0xff]  ;;  %v1081_v37 = vld [vmem:[#allocation15 + $0x40] sm:$0xff] }
  0x8d   :  { %535 = vmatmul.mubr.f32.gmra.mrb[14].mxu1 %v11580_v14  ;;  %8320 = vmatpush1.bf16.msra.mxu0 %v8319_v15  ;;  %v879_v15 = vld [vmem:[#allocation14 + $0x148] sm:$0xff]  ;;  %v1080_v10 = vld [vmem:[#allocation15 + $0x38] sm:$0xff]  ;;  %v1085_v40 = vld [vmem:[#allocation15 + $0x60] sm:$0xff] }
  0x8e   :  { %8352 = vmatpush1.bf16.msra.mxu1 %v8351_v18  ;;  %605 = vmatprep.mubr.f32.mxu0 %v13861_v0  ;;  %v881_v18 = vld [vmem:[#allocation14 + $0x158] sm:$0xff]  ;;  %v11661_v26 = vpack.c.bf16 %v883_v16, %v879_v15  ;;  %v1077_v15 = vld [vmem:[#allocation15 + $0x20] sm:$0xff]  ;;  %v1075_v16 = vld [vmem:[#allocation15 + $0x10] sm:$0xff]  ;;  %v11713_v24 = vpack.c.bf16 %v1080_v10, %v1076_v8  ;;  %v11733_v55 = vpack.c.bf16 %v1085_v40, %v1081_v37 }
  0x8f   :  { %718 = vmatprep.mubr.f32.mxu1 %v13861_v0  ;;  %8354 = vmatprep.subr.bf16.mxu0 %v11584_v21  ;;  %v11665_v29 = vpack.c.bf16 %v885_v19, %v881_v18  ;;  %v1079_v18 = vld [vmem:[#allocation15 + $0x30] sm:$0xff]  ;;  %v1082_v19 = vld [vmem:[#allocation15 + $0x48] sm:$0xff]  ;;  %v1096_v53 = vld [vmem:[#allocation15 + $0xb8] sm:$0xff] }
  0x90   :  { %606 = vmatmul.mubr.f32.vlgmr.msra.gmra.mrb[16].mxu0 %v11540_v46  ;;  %8386 = vmatprep.subr.bf16.mxu1 %v11587_v25  ;;  %v11721_v32 = vpack.c.bf16 %v1079_v18, %v1075_v16  ;;  %v11723_v36 = vpack.c.bf16 %v1086_v23, %v1082_v19  ;;  %v1083_v42 = vld [vmem:[#allocation15 + $0x50] sm:$0xff]  ;;  %v1098_v10 = vld [vmem:[#allocation15 + $0xc8] sm:$0xff]  ;;  %v1104_v16 = vld [vmem:[#allocation15 + $0xf8] sm:$0xff] }
  0x91   :  { %719 = vmatmul.mubr.f32.vlgmr.msra.gmra.mrb[16].mxu1 %v11540_v46  ;;  %8356 = vmatpush1.bf16.msra.mxu0 %v11590_v28  ;;  %v856_v46 = vld [vmem:[#allocation14 + $0x90] sm:$0xff] }
  0x92   :  { %8388 = vmatpush1.bf16.msra.mxu1 %v11593_v31  ;;  %611 = vmatprep.mubr.f32.mxu0 %v13861_v0  ;;  %v11625_v57 = vpack.c.bf16 %v860_v50, %v856_v46  ;;  %v895_v46 = vld [vmem:[#allocation14 + $0x1c8] sm:$0xff]  ;;  %v1095_v8 = vld [vmem:[#allocation15 + $0xb0] sm:$0xff] }
  0x93   :  { %724 = vmatprep.mubr.f32.mxu1 %v13861_v0  ;;  %8358 = vmatprep.subr.bf16.mxu0 %v11597_v34  ;;  %v899_v50 = vld [vmem:[#allocation14 + $0x1e8] sm:$0xff]  ;;  %v1099_v37 = vld [vmem:[#allocation15 + $0xd0] sm:$0xff] }
  0x94   :  { %612 = vmatmul.mubr.f32.gmra.mrb[18].mxu0 %v11544_v59  ;;  %8390 = vmatprep.subr.bf16.mxu1 %v11601_v38 }
  0x95   :  { %725 = vmatmul.mubr.f32.gmra.mrb[18].mxu1 %v11544_v59  ;;  %8360 = vmatpush1.bf16.msra.mxu0 %v11605_v41  ;;  %v864_v59 = vld [vmem:[#allocation14 + $0xd0] sm:$0xff] }
  0x96   :  { %8392 = vmatpush1.bf16.msra.mxu1 %v11609_v44  ;;  %617 = vmatprep.mubr.f32.mxu0 %v13861_v0  ;;  %v11641_v7 = vpack.c.bf16 %v868_v62, %v864_v59  ;;  %v11693_v59 = vpack.c.bf16 %v899_v50, %v895_v46  ;;  %v900_v62 = vld [vmem:[#allocation14 + $0x1f0] sm:$0xff]  ;;  %v1094_v46 = vld [vmem:[#allocation15 + $0xa8] sm:$0xff]  ;;  %v1092_v50 = vld [vmem:[#allocation15 + $0x98] sm:$0xff] }
  0x97   :  { %730 = vmatprep.mubr.f32.mxu1 %v13861_v0  ;;  %8362 = vmatprep.subr.bf16.mxu0 %v11613_v48 }
  0x98   :  { %618 = vmatmul.mubr.f32.gmra.mrb[20].mxu0 %v11550_v9  ;;  %8394 = vmatprep.subr.bf16.mxu1 %v11617_v51 }
  0x99   :  { %731 = vmatmul.mubr.f32.gmra.mrb[20].mxu1 %v11550_v9  ;;  %8364 = vmatpush1.bf16.msra.mxu0 %v11621_v54  ;;  %v872_v9 = vld [vmem:[#allocation14 + $0x110] sm:$0xff] }
  0x9a   :  { %8396 = vmatpush1.bf16.msra.mxu1 %v11625_v57  ;;  %623 = vmatprep.mubr.f32.mxu0 %v13861_v0  ;;  %v11657_v20 = vpack.c.bf16 %v876_v12, %v872_v9  ;;  %v1073_v12 = vld [vmem:[#allocation15] sm:$0xff] }
  0x9b   :  { %736 = vmatprep.mubr.f32.mxu1 %v13861_v0  ;;  %8366 = vmatprep.subr.bf16.mxu0 %v11629_v61  ;;  %v11717_v30 = vpack.c.bf16 %v1077_v15, %v1073_v12  ;;  %v1102_v12 = vld [vmem:[#allocation15 + $0xe8] sm:$0xff]  ;;  %v1100_v15 = vld [vmem:[#allocation15 + $0xd8] sm:$0xff] }
  0x9c   :  { %624 = vmatmul.mubr.f32.gmra.mrb[22].mxu0 %v11556_v22  ;;  %8398 = vmatprep.subr.bf16.mxu1 %v11633_v1  ;;  %v11753_v23 = vpack.c.bf16 %v1102_v12, %v1098_v10  ;;  %v11756_v40 = vpack.c.bf16 %v1104_v16, %v1100_v15  ;;  %v1107_v10 = vld [vmem:[#allocation15 + $0x110] sm:$0xff]  ;;  %v1114_v16 = vld [vmem:[#allocation15 + $0x148] sm:$0xff] }
  0x9d   :  { %737 = vmatmul.mubr.f32.gmra.mrb[22].mxu1 %v11556_v22  ;;  %8368 = vmatpush1.bf16.msra.mxu0 %v11637_v4  ;;  %v880_v22 = vld [vmem:[#allocation14 + $0x150] sm:$0xff] }
  0x9e   :  { %8400 = vmatpush1.bf16.msra.mxu1 %v11641_v7  ;;  %629 = vmatprep.mubr.f32.mxu0 %v13861_v0  ;;  %v11673_v39 = vpack.c.bf16 %v884_v27, %v880_v22  ;;  %v1084_v22 = vld [vmem:[#allocation15 + $0x58] sm:$0xff]  ;;  %14092 = vst [vmem:[#allocation41_spill] sm:$0xff] %v11753_v23  ;;  %14093 = vst [vmem:[#allocation42_spill] sm:$0xff] %v11756_v40  ;;  %v1111_v15 = vld [vmem:[#allocation15 + $0x130] sm:$0xff] }
  0x9f   :  { %742 = vmatprep.mubr.f32.mxu1 %v13861_v0  ;;  %8370 = vmatprep.subr.bf16.mxu0 %v11645_v11  ;;  %v1088_v27 = vld [vmem:[#allocation15 + $0x78] sm:$0xff] }
  0xa0   :  { %630 = vmatmul.mubr.f32.gmra.mrb[24].mxu0 %v11562_v35  ;;  %8402 = vmatprep.subr.bf16.mxu1 %v11649_v13 }
  0xa1   :  { %743 = vmatmul.mubr.f32.gmra.mrb[24].mxu1 %v11562_v35  ;;  %8372 = vmatpush1.bf16.msra.mxu0 %v11653_v17  ;;  %v888_v35 = vld [vmem:[#allocation14 + $0x190] sm:$0xff] }
  0xa2   :  { %8404 = vmatpush1.bf16.msra.mxu1 %v11657_v20  ;;  %635 = vmatprep.mubr.f32.mxu0 %v13861_v0  ;;  %v11689_v56 = vpack.c.bf16 %v892_v45, %v888_v35  ;;  %v1087_v35 = vld [vmem:[#allocation15 + $0x70] sm:$0xff]  ;;  %v1090_v45 = vld [vmem:[#allocation15 + $0x88] sm:$0xff] }
  0xa3   :  { %748 = vmatprep.mubr.f32.mxu1 %v13861_v0  ;;  %8374 = vmatprep.subr.bf16.mxu0 %v11661_v26  ;;  %v11737_v58 = vpack.c.bf16 %v1087_v35, %v1083_v42  ;;  %v11739_v60 = vpack.c.bf16 %v1094_v46, %v1090_v45  ;;  %v1103_v42 = vld [vmem:[#allocation15 + $0xf0] sm:$0xff]  ;;  %v1106_v35 = vld [vmem:[#allocation15 + $0x108] sm:$0xff]  ;;  %v1108_v46 = vld [vmem:[#allocation15 + $0x118] sm:$0xff] }
  0xa4   :  { %636 = vmatmul.mubr.f32.gmra.mrb[26].mxu0 %v11568_v49  ;;  %8406 = vmatprep.subr.bf16.mxu1 %v11665_v29  ;;  %v1110_v45 = vld [vmem:[#allocation15 + $0x128] sm:$0xff] }
  0xa5   :  { %749 = vmatmul.mubr.f32.gmra.mrb[26].mxu1 %v11568_v49  ;;  %8376 = vmatpush1.bf16.msra.mxu0 %v11669_v33  ;;  %v896_v49 = vld [vmem:[#allocation14 + $0x1d0] sm:$0xff] }
  0xa6   :  { %8408 = vmatpush1.bf16.msra.mxu1 %v11673_v39  ;;  %641 = vmatprep.mubr.f32.mxu0 %v13861_v0  ;;  %v11705_v9 = vpack.c.bf16 %v900_v62, %v896_v49  ;;  %v1089_v49 = vld [vmem:[#allocation15 + $0x80] sm:$0xff] }
  0xa7   :  { %754 = vmatprep.mubr.f32.mxu1 %v13861_v0  ;;  %8378 = vmatprep.subr.bf16.mxu0 %v11677_v43  ;;  %v1093_v62 = vld [vmem:[#allocation15 + $0xa0] sm:$0xff] }
  0xa8   :  { %642 = vmatmul.mubr.f32.gmra.mrb[28].mxu0 %v11574_v63  ;;  %8410 = vmatprep.subr.bf16.mxu1 %v11681_v47  ;;  %v11747_v18 = vpack.c.bf16 %v1093_v62, %v1089_v49  ;;  %v11763_v49 = vpack.c.bf16 %v1103_v42, %v1099_v37  ;;  %v11765_v62 = vpack.c.bf16 %v1110_v45, %v1106_v35  ;;  %v1113_v35 = vld [vmem:[#allocation15 + $0x140] sm:$0xff] }
  0xa9   :  { %755 = vmatmul.mubr.f32.gmra.mrb[28].mxu1 %v11574_v63  ;;  %8380 = vmatpush1.bf16.msra.mxu0 %v11685_v52  ;;  %v11709_v63 = vpack.c.bf16 %v1078_v5, %v1074_v3  ;;  %v1091_v3 = vld [vmem:[#allocation15 + $0x90] sm:$0xff]  ;;  %v11742_v5 = vpack.c.bf16 %v1096_v53, %v1092_v50  ;;  %v1112_v50 = vld [vmem:[#allocation15 + $0x138] sm:$0xff]  ;;  %v11775_v37 = vpack.c.bf16 %v1111_v15, %v1107_v10  ;;  %v1117_v45 = vld [vmem:[#allocation15 + $0x160] sm:$0xff] }
  0xaa   :  { %8412 = vmatpush1.bf16.msra.mxu1 %v11689_v56  ;;  %647 = vmatprep.mubr.f32.mxu0 %v13861_v0  ;;  %v11751_v19 = vpack.c.bf16 %v1095_v8, %v1091_v3  ;;  %14095 = vst [vmem:[#allocation44_spill] sm:$0xff] %v11763_v49  ;;  %14096 = vst [vmem:[#allocation45_spill] sm:$0xff] %v11765_v62  ;;  %v1105_v3 = vld [vmem:[#allocation15 + $0x100] sm:$0xff]  ;;  %v11768_v12 = vpack.c.bf16 %v1112_v50, %v1108_v46  ;;  %v1115_v46 = vld [vmem:[#allocation15 + $0x150] sm:$0xff] }
  0xab   :  { %760 = vmatprep.mubr.f32.mxu1 %v13861_v0  ;;  %8382 = vmatprep.subr.bf16.mxu0 %v11693_v59  ;;  %v1109_v8 = vld [vmem:[#allocation15 + $0x120] sm:$0xff]  ;;  %14099 = vst [vmem:[#allocation48_spill] sm:$0xff] %v11775_v37 }
  0xac   :  { %648 = vmatmul.mubr.f32.gmra.mrb[30].mxu0 %v11580_v14  ;;  %8414 = vmatprep.subr.bf16.mxu1 %v11697_v2  ;;  %14091 = vst [vmem:[#allocation40_spill] sm:$0xff] %v11751_v19  ;;  %14097 = vst [vmem:[#allocation46_spill] sm:$0xff] %v11768_v12  ;;  %v1121_v15 = vld [vmem:[#allocation15 + $0x180] sm:$0xff] }
  0xad   :  { %761 = vmatmul.mubr.f32.gmra.mrb[30].mxu1 %v11580_v14  ;;  %8384 = vmatpush1.bf16.msra.mxu0 %v11701_v6  ;;  %v11727_v14 = vpack.c.bf16 %v1088_v27, %v1084_v22  ;;  %v1097_v22 = vld [vmem:[#allocation15 + $0xc0] sm:$0xff] }
  0xae   :  { %8416 = vmatpush1.bf16.msra.mxu1 %v11705_v9  ;;  %966 = vmatprep.mubr.f32.mxu0 %v13861_v0  ;;  %v1101_v27 = vld [vmem:[#allocation15 + $0xe0] sm:$0xff] }
  0xaf   :  { %1037 = vmatprep.mubr.f32.mxu1 %v13861_v0  ;;  %8418 = vmatprep.subr.bf16.mxu0 %v11709_v63  ;;  %v11759_v53 = vpack.c.bf16 %v1101_v27, %v1097_v22  ;;  %v1116_v22 = vld [vmem:[#allocation15 + $0x158] sm:$0xff] }
  0xb0   :  { %967 = vmatmul.mubr.f32.vlgmr.msra.gmra.mrb[0].mxu0 %v13861_v0  ;;  %8450 = vmatprep.subr.bf16.mxu1 %v11713_v24  ;;  %v1120_v27 = vld [vmem:[#allocation15 + $0x178] sm:$0xff] }
  0xb1   :  { %1038 = vmatmul.mubr.f32.vlgmr.msra.gmra.mrb[0].mxu1 %v13861_v0  ;;  %8420 = vmatpush1.bf16.msra.mxu0 %v11717_v30  ;;  %14094 = vst [vmem:[#allocation43_spill] sm:$0xff] %v11759_v53  ;;  %v11780_v50 = vpack.c.bf16 %v1120_v27, %v1116_v22  ;;  %v1123_v22 = vld [vmem:[#allocation15 + $0x190] sm:$0xff] }
  0xb2   :  { %8452 = vmatpush1.bf16.msra.mxu1 %v11721_v32  ;;  %8422 = vmatprep.subr.bf16.mxu0 %v11723_v36 }
  0xb3   :  { %8454 = vmatprep.subr.bf16.mxu1 %v11727_v14  ;;  %1201 = vmatprep.mubr.f32.mxu0 %v13861_v0  ;;  %14100 = vst [vmem:[#allocation49_spill] sm:$0xff] %v11780_v50 }
  0xb4   :  { %1272 = vmatprep.mubr.f32.mxu1 %v13861_v0  ;;  %v1118_v0 = vld [vmem:[#allocation15 + $0x168] sm:$0xff] }
  0xb5   :  { %8424 = vmatpush1.bf16.msra.mxu0 %v11733_v55  ;;  %v11777_v42 = vpack.c.bf16 %v1118_v0, %v1114_v16  ;;  %v1125_v16 = vld [vmem:[#allocation15 + $0x1a0] sm:$0xff] }
  0xb6   :  { %8456 = vmatpush1.bf16.msra.mxu1 %v11737_v58  ;;  %8426 = vmatprep.subr.bf16.mxu0 %v11739_v60 }
  0xb7   :  { %8458 = vmatprep.subr.bf16.mxu1 %v11742_v5 }
  0xb9   :  { %8428 = vmatpush1.bf16.msra.mxu0 %v11747_v18 }
  0xba   :  { %8460 = vmatpush1.bf16.msra.mxu1 %v11751_v19  ;;  %8430 = vmatprep.subr.bf16.mxu0 %v11753_v23  ;;  %v11771_v19 = vpack.c.bf16 %v1109_v8, %v1105_v3  ;;  %v1122_v23 = vld [vmem:[#allocation15 + $0x188] sm:$0xff]  ;;  %v1124_v3 = vld [vmem:[#allocation15 + $0x198] sm:$0xff] }
  0xbb   :  { %8462 = vmatprep.subr.bf16.mxu1 %v11756_v40  ;;  %v1119_v40 = vld [vmem:[#allocation15 + $0x170] sm:$0xff]  ;;  %v1128_v8 = vld [vmem:[#allocation15 + $0x1b8] sm:$0xff] }
  0xbc   :  { %14098 = vst [vmem:[#allocation47_spill] sm:$0xff] %v11771_v19  ;;  %v11787_v0 = vpack.c.bf16 %v1119_v40, %v1115_v46  ;;  %v11792_v27 = vpack.c.bf16 %v1128_v8, %v1124_v3  ;;  %v1133_v46 = vld [vmem:[#allocation15 + $0x1e0] sm:$0xff]  ;;  %v1131_v8 = vld [vmem:[#allocation15 + $0x1d0] sm:$0xff] }
  0xbd   :  { %8432 = vmatpush1.bf16.msra.mxu0 %v11759_v53  ;;  %v1126_v53 = vld [vmem:[#allocation15 + $0x1a8] sm:$0xff] }
  0xbe   :  { %8464 = vmatpush1.bf16.msra.mxu1 %v11763_v49  ;;  %8434 = vmatprep.subr.bf16.mxu0 %v11765_v62  ;;  %v11783_v49 = vpack.c.bf16 %v1117_v45, %v1113_v35  ;;  %v11789_v10 = vpack.c.bf16 %v1126_v53, %v1122_v23  ;;  %v1130_v62 = vld [vmem:[#allocation15 + $0x1c8] sm:$0xff]  ;;  %v1132_v35 = vld [vmem:[#allocation15 + $0x1d8] sm:$0xff]  ;;  %v1129_v53 = vld [vmem:[#allocation15 + $0x1c0] sm:$0xff] }
  0xbf   :  { %8466 = vmatprep.subr.bf16.mxu1 %v11768_v12  ;;  %v1127_v12 = vld [vmem:[#allocation15 + $0x1b0] sm:$0xff]  ;;  %v1136_v45 = vld [vmem:[#allocation15 + $0x1f8] sm:$0xff] }
  0xc0   :  { %v11799_v23 = vpack.c.bf16 %v1127_v12, %v1123_v22  ;;  %v11804_v3 = vpack.c.bf16 %v1136_v45, %v1132_v35 }
  0xc1   :  { %8436 = vmatpush1.bf16.msra.mxu0 %v11771_v19  ;;  %v1134_v19 = vld [vmem:[#allocation15 + $0x1e8] sm:$0xff] }
  0xc2   :  { %8468 = vmatpush1.bf16.msra.mxu1 %v11775_v37  ;;  %8438 = vmatprep.subr.bf16.mxu0 %v11777_v42  ;;  %v11795_v37 = vpack.c.bf16 %v1125_v16, %v1121_v15  ;;  %v11801_v40 = vpack.c.bf16 %v1134_v19, %v1130_v62  ;;  %v11807_v15 = vpack.c.bf16 %v1133_v46, %v1129_v53  ;;  %v14101_v19 = vmov 0.0  }
  0xc3   :  { %8470 = vmatprep.subr.bf16.mxu1 %v11780_v50  ;;  %v1135_v50 = vld [vmem:[#allocation15 + $0x1f0] sm:$0xff] }
  0xc4   :  { %v11811_v12 = vpack.c.bf16 %v1135_v50, %v1131_v8 }
  0xc5   :  { %8440 = vmatpush1.bf16.msra.mxu0 %v11783_v49 }
  0xc6   :  { %8472 = vmatpush1.bf16.msra.mxu1 %v11787_v0  ;;  %8442 = vmatprep.subr.bf16.mxu0 %v11789_v10 }
  0xc7   :  { %8474 = vmatprep.subr.bf16.mxu1 %v11792_v27 }
  0xc9   :  { %8444 = vmatpush1.bf16.msra.mxu0 %v11795_v37 }
  0xca   :  { %8476 = vmatpush1.bf16.msra.mxu1 %v11799_v23  ;;  %8446 = vmatprep.subr.bf16.mxu0 %v11801_v40 }
  0xcb   :  { %8478 = vmatprep.subr.bf16.mxu1 %v11804_v3 }
  0xcd   :  { %8448 = vmatpush1.bf16.msra.mxu0 %v11807_v15 }
  0xce   :  { %8480 = vmatpush1.bf16.msra.mxu1 %v11811_v12  ;;  %8482 = vmatprep.subr.bf16.mxu0 %v11584_v21  ;;  %v275_v21 = vlaneseq }
  0xcf   :  { %8514 = vmatprep.subr.bf16.mxu1 %v11587_v25 }
  0xd0   :  { %1202 = vmatmul.mubr.f32.vlgmr.msra.gmra.mrb[30].mxu0 %v14101_v19  ;;  %v11854_v25 = vshrl.u32 %v275_v21, 7 }
  0xd1   :  { %1273 = vmatmul.mubr.f32.vlgmr.msra.gmra.mrb[30].mxu1 %v14101_v19  ;;  %8484 = vmatpush1.bf16.msra.mxu0 %v11590_v28 }
  0xd2   :  { %8516 = vmatpush1.bf16.msra.mxu1 %v11593_v31  ;;  %8486 = vmatprep.subr.bf16.mxu0 %v11597_v34  ;;  %14102 = vst [vmem:[#allocation50_spill] sm:$0xff] %v11854_v25  ;;  %v13878_v28 = vsub.s32 0, %v11854_v25  ;;  %v273_v31 = vld [vmem:[%s13851_s4] sm:$0xff]  ;;  %v13880_v34 = vsub.s32 1, %v11854_v25  ;;  %v13874_v16 = vsub.s32 6, %v11854_v25  ;;  %s11410_s4 = smov [#allocation4]  }
  0xd3   :  { %8518 = vmatprep.subr.bf16.mxu1 %v11601_v38  ;;  %1444 = vmatprep.mubr.f32.mxu0 %v14101_v19  ;;  %s97_s29 = sshll.u32 %s11410_s4, 4  ;;  %s98_s29 = int_to_ptr.vmem [resolvable:$true] %s97_s29 }
  0xd4   :  { %1515 = vmatprep.mubr.f32.mxu1 %v14101_v19  ;;  %v11863_v38 = vrot.slane %v273_v31, %v13878_v28  ;;  %v11900_v46 = vrot.slane %v273_v31, %v13874_v16 }
  0xd5   :  { %8488 = vmatpush1.bf16.msra.mxu0 %v11605_v41  ;;  %v13877_v41 = vsub.s32 2, %v11854_v25 }
  0xd6   :  { %8520 = vmatpush1.bf16.msra.mxu1 %v11609_v44  ;;  %8490 = vmatprep.subr.bf16.mxu0 %v11613_v48  ;;  %14103 = vst [vmem:[#allocation51_spill] sm:$0xff] %v11863_v38  ;;  %v11868_v44 = vrot.slane %v273_v31, %v13880_v34 }
  0xd7   :  { %8522 = vmatprep.subr.bf16.mxu1 %v11617_v51 }
  0xd8   :  { %14104 = vst [vmem:[#allocation52_spill] sm:$0xff] %v11868_v44 }
  0xd9   :  { %8492 = vmatpush1.bf16.msra.mxu0 %v11621_v54  ;;  %v11873_v54 = vrot.slane %v273_v31, %v13877_v41 }
  0xda   :  { %8524 = vmatpush1.bf16.msra.mxu1 %v11625_v57  ;;  %8494 = vmatprep.subr.bf16.mxu0 %v11629_v61 }
  0xdb   :  { %8526 = vmatprep.subr.bf16.mxu1 %v11633_v1  ;;  %14105 = vst [vmem:[#allocation53_spill] sm:$0xff] %v11873_v54  ;;  %v13876_v1 = vsub.s32 3, %v11854_v25 }
  0xdd   :  { %8496 = vmatpush1.bf16.msra.mxu0 %v11637_v4 }
  0xde   :  { %8528 = vmatpush1.bf16.msra.mxu1 %v11641_v7  ;;  %8498 = vmatprep.subr.bf16.mxu0 %v11645_v11 }
  0xdf   :  { %8530 = vmatprep.subr.bf16.mxu1 %v11649_v13 }
  0xe1   :  { %8500 = vmatpush1.bf16.msra.mxu0 %v11653_v17 }
  0xe2   :  { %8532 = vmatpush1.bf16.msra.mxu1 %v11657_v20  ;;  %8502 = vmatprep.subr.bf16.mxu0 %v11661_v26  ;;  %v11880_v20 = vrot.slane %v273_v31, %v13876_v1 }
  0xe3   :  { %8534 = vmatprep.subr.bf16.mxu1 %v11665_v29 }
  0xe4   :  { %14106 = vst [vmem:[#allocation54_spill] sm:$0xff] %v11880_v20 }
  0xe5   :  { %8504 = vmatpush1.bf16.msra.mxu0 %v11669_v33 }
  0xe6   :  { %8536 = vmatpush1.bf16.msra.mxu1 %v11673_v39  ;;  %8506 = vmatprep.subr.bf16.mxu0 %v11677_v43 }
  0xe7   :  { %8538 = vmatprep.subr.bf16.mxu1 %v11681_v47 }
  0xe9   :  { %8508 = vmatpush1.bf16.msra.mxu0 %v11685_v52 }
  0xea   :  { %8540 = vmatpush1.bf16.msra.mxu1 %v11689_v56  ;;  %8510 = vmatprep.subr.bf16.mxu0 %v11693_v59 }
  0xeb   :  { %8542 = vmatprep.subr.bf16.mxu1 %v11697_v2 }
  0xed   :  { %8512 = vmatpush1.bf16.msra.mxu0 %v11701_v6 }
  0xee   :  { %8544 = vmatpush1.bf16.msra.mxu1 %v11705_v9  ;;  %8546 = vmatprep.subr.bf16.mxu0 %v11709_v63  ;;  %v13875_v63 = vsub.s32 4, %v11854_v25 }
  0xef   :  { %8578 = vmatprep.subr.bf16.mxu1 %v11713_v24  ;;  %v13879_v24 = vsub.s32 5, %v11854_v25 }
  0xf0   :  { %v11890_v50 = vrot.slane %v273_v31, %v13875_v63 }
  0xf1   :  { %v11895_v35 = vrot.slane %v273_v31, %v13879_v24 }
  0xf2   :  { %14107 = vst [vmem:[#allocation55_spill] sm:$0xff] %v11890_v50 }
 0x183   :  { %v968_v48 = vpop.f32.mrb[0].mxu0 }
 0x184   :  { %v10561_v51 = vadd.f32 %v968_v48, %v11863_v38  ;;  %v1039_v57 = vpop.f32.mrb[0].mxu1  ;;  %v970_v61 = vpop.f32.mrb[1].mxu0  ;;  %v13873_v48 = vsub.s32 7, %v11854_v25 }
 0x185   :  { %v10562_v4 = vadd.f32 %v970_v61, %v11868_v44  ;;  %v1041_v7 = vpop.f32.mrb[1].mxu1  ;;  %v10577_v17 = vadd.f32 %v1039_v57, %v11873_v54 }
 0x186   :  { %v1048_v11 = vmul.f32 0.5, %v10561_v51  ;;  %v10578_v26 = vadd.f32 %v1041_v7, %v11880_v20 }
 0x187   :  { %v1052_v13 = vmul.f32 0.5, %v10562_v4 }
 0x188   :  { %10819 = vtanh.f32 %v1048_v11  ;;  %v1057_v29 = vmul.f32 0.5, %v10578_v26  ;;  %v11909_v26 = vrot.slane %v273_v31, %v13873_v48 }
 0x189   :  { %10821 = vtanh.f32 %v1052_v13 }
 0x18a   :  { %10823 = vtanh.f32 %v10577_v17  ;;  %14109 = vst [vmem:[#allocation57_spill] sm:$0xff] %v11909_v26 }
 0x18b   :  { %10825 = vtanh.f32 %v1057_v29 }
 0x192   :  { %v10820_v33 = vpop.eup %10819 }
 0x193   :  { %v10822_v39 = vpop.eup %10821  ;;  %v1050_v43 = vmul.f32 0.5, %v10820_v33  ;;  %v14111_v33 = vld [vmem:[#allocation41_spill] sm:$0xff] }
 0x194   :  { %v1054_v47 = vmul.f32 0.5, %v10822_v39  ;;  %v10824_v56 = vpop.eup %10823  ;;  %v14112_v39 = vld [vmem:[#allocation42_spill] sm:$0xff] }
 0x195   :  { %v1051_v52 = vadd.f32 0.5, %v1050_v43  ;;  %v10826_v62 = vpop.eup %10825 }
 0x196   :  { %v1055_v59 = vadd.f32 0.5, %v1054_v47  ;;  %v1059_v22 = vmul.f32 0.5, %v10826_v62  ;;  %v14118_v62 = vld [vmem:[#allocation48_spill] sm:$0xff] }
 0x197   :  { %v1062_v2 = vmul.f32 %v10824_v56, %v1051_v52  ;;  %v14115_v56 = vld [vmem:[#allocation45_spill] sm:$0xff] }
 0x198   :  { %v1061_v6 = vmul.f32 0.0, %v1055_v59  ;;  %v1060_v51 = vadd.f32 0.5, %v1059_v22  ;;  %v14119_v22 = vld [vmem:[#allocation49_spill] sm:$0xff] }
 0x19a   :  { %v11883_v9 = vadd.f32 %v1062_v2, %v1061_v6  ;;  %v14117_v6 = vld [vmem:[#allocation47_spill] sm:$0xff] }
 0x19c   :  { %10827 = vtanh.f32 %v11883_v9 }
 0x1a3   :  { %v1203_v45 = vpop.f32.mrb[30].mxu0 }
 0x1a4   :  { %v10607_v53 = vadd.f32 %v1203_v45, %v11890_v50  ;;  %v1274_v8 = vpop.f32.mrb[30].mxu1  ;;  %v1205_v21 = vpop.f32.mrb[31].mxu0 }
 0x1a5   :  { %v10608_v57 = vadd.f32 %v1205_v21, %v11895_v35  ;;  %v1276_v61 = vpop.f32.mrb[31].mxu1  ;;  %v10623_v17 = vadd.f32 %v1274_v8, %v11900_v46  ;;  %v1796_v21 = vld [vmem:[#allocation14 + $0x10] sm:$0xff] }
 0x1a6   :  { %v10828_v4 = vpop.eup %10827  ;;  %v1283_v7 = vmul.f32 0.5, %v10607_v53  ;;  %v10624_v29 = vadd.f32 %v1276_v61, %v11909_v26  ;;  %v1803_v61 = vld [vmem:[#allocation14 + $0x48] sm:$0xff] }
 0x1a7   :  { %v11904_v11 = vmul.f32 %v10828_v4, %v1060_v51  ;;  %v1287_v13 = vmul.f32 0.5, %v10608_v57  ;;  %v1800_v51 = vld [vmem:[#allocation14 + $0x30] sm:$0xff]  ;;  %v1807_v4 = vld [vmem:[#allocation14 + $0x68] sm:$0xff] }
 0x1a8   :  { %10829 = vtanh.f32 %v1283_v7  ;;  %v11962_v57 = vpack.c.bf16 %v1800_v51, %v1796_v21  ;;  %v1805_v7 = vld [vmem:[#allocation14 + $0x58] sm:$0xff]  ;;  %v1827_v21 = vld [vmem:[#allocation14 + $0x108] sm:$0xff] }
 0x1a9   :  { %14108 = vst [vmem:[#allocation56_spill] sm:$0xff] %v11904_v11  ;;  %10831 = vtanh.f32 %v1287_v13  ;;  %1445 = vmatmul.mubr.f32.vlgmr.msra.gmra.mrb[2].mxu0 %v11904_v11  ;;  %1516 = vmatmul.mubr.f32.vlgmr.msra.gmra.mrb[2].mxu1 %v11904_v11  ;;  %v11967_v13 = vpack.c.bf16 %v1807_v4, %v1803_v61  ;;  %v1831_v51 = vld [vmem:[#allocation14 + $0x128] sm:$0xff]  ;;  %v1829_v61 = vld [vmem:[#allocation14 + $0x118] sm:$0xff] }
 0x1aa   :  { %8548 = vmatpush1.bf16.msra.mxu0 %v11717_v30  ;;  %8580 = vmatpush1.bf16.msra.mxu1 %v11721_v32  ;;  %10833 = vtanh.f32 %v10623_v17  ;;  %v1292_v30 = vmul.f32 0.5, %v10624_v29  ;;  %v1809_v17 = vld [vmem:[#allocation14 + $0x78] sm:$0xff]  ;;  %v1802_v29 = vld [vmem:[#allocation14 + $0x40] sm:$0xff]  ;;  %v12003_v4 = vpack.c.bf16 %v1831_v51, %v1827_v21 }
 0x1ab   :  { %8550 = vmatprep.subr.bf16.mxu0 %v11723_v36  ;;  %8582 = vmatprep.subr.bf16.mxu1 %v11727_v14  ;;  %v14110_v36 = vld [vmem:[#allocation40_spill] sm:$0xff]  ;;  %v1845_v21 = vld [vmem:[#allocation14 + $0x198] sm:$0xff] }
 0x1ac   :  { %1679 = vmatprep.mubr.f32.mxu0 %v14101_v19  ;;  %1750 = vmatprep.mubr.f32.mxu1 %v14101_v19  ;;  %10835 = vtanh.f32 %v1292_v30  ;;  %v1806_v30 = vld [vmem:[#allocation14 + $0x60] sm:$0xff] }
 0x1ae   :  { %8552 = vmatpush1.bf16.msra.mxu0 %v11733_v55  ;;  %8584 = vmatpush1.bf16.msra.mxu1 %v11737_v58 }
 0x1af   :  { %8554 = vmatprep.subr.bf16.mxu0 %v11739_v60  ;;  %8586 = vmatprep.subr.bf16.mxu1 %v11742_v5  ;;  %v14113_v60 = vld [vmem:[#allocation43_spill] sm:$0xff]  ;;  %v14114_v5 = vld [vmem:[#allocation44_spill] sm:$0xff] }
 0x1b2   :  { %v10830_v32 = vpop.eup %10829  ;;  %8556 = vmatpush1.bf16.msra.mxu0 %v11747_v18  ;;  %8588 = vmatpush1.bf16.msra.mxu1 %v14110_v36  ;;  %v14116_v18 = vld [vmem:[#allocation46_spill] sm:$0xff]  ;;  %v11971_v36 = vpack.c.bf16 %v1806_v30, %v1802_v29  ;;  %v1830_v29 = vld [vmem:[#allocation14 + $0x120] sm:$0xff] }
 0x1b3   :  { %v10832_v14 = vpop.eup %10831  ;;  %v1285_v31 = vmul.f32 0.5, %v10830_v32  ;;  %8558 = vmatprep.subr.bf16.mxu0 %v14111_v33  ;;  %8590 = vmatprep.subr.bf16.mxu1 %v14112_v39  ;;  %v11969_v32 = vpack.c.bf16 %v1809_v17, %v1805_v7  ;;  %v1811_v39 = vld [vmem:[#allocation14 + $0x88] sm:$0xff]  ;;  %v1833_v7 = vld [vmem:[#allocation14 + $0x138] sm:$0xff]  ;;  %v1826_v17 = vld [vmem:[#allocation14 + $0x100] sm:$0xff] }
 0x1b4   :  { %v1289_v43 = vmul.f32 0.5, %v10832_v14  ;;  %v10834_v58 = vpop.eup %10833  ;;  %v1804_v14 = vld [vmem:[#allocation14 + $0x50] sm:$0xff]  ;;  %v12005_v30 = vpack.c.bf16 %v1833_v7, %v1829_v61  ;;  %v1849_v61 = vld [vmem:[#allocation14 + $0x1b8] sm:$0xff]  ;;  %v1842_v7 = vld [vmem:[#allocation14 + $0x180] sm:$0xff] }
 0x1b5   :  { %v1286_v55 = vadd.f32 0.5, %v1285_v31  ;;  %v1808_v31 = vld [vmem:[#allocation14 + $0x70] sm:$0xff] }
 0x1b6   :  { %v1290_v47 = vadd.f32 0.5, %v1289_v43  ;;  %8560 = vmatpush1.bf16.msra.mxu0 %v14113_v60  ;;  %8592 = vmatpush1.bf16.msra.mxu1 %v14114_v5  ;;  %v10836_v45 = vpop.eup %10835  ;;  %v11974_v33 = vpack.c.bf16 %v1808_v31, %v1804_v14  ;;  %v1815_v43 = vld [vmem:[#allocation14 + $0xa8] sm:$0xff]  ;;  %v1810_v60 = vld [vmem:[#allocation14 + $0x80] sm:$0xff]  ;;  %v12007_v14 = vpack.c.bf16 %v1830_v29, %v1826_v17  ;;  %v1828_v31 = vld [vmem:[#allocation14 + $0x110] sm:$0xff]  ;;  %v12029_v29 = vpack.c.bf16 %v1849_v61, %v1845_v21 }
 0x1b7   :  { %v1297_v52 = vmul.f32 %v10834_v58, %v1286_v55  ;;  %8562 = vmatprep.subr.bf16.mxu0 %v14115_v56  ;;  %8594 = vmatprep.subr.bf16.mxu1 %v14116_v18  ;;  %v1294_v53 = vmul.f32 0.5, %v10836_v45  ;;  %v1813_v55 = vld [vmem:[#allocation14 + $0x98] sm:$0xff]  ;;  %v11979_v58 = vpack.c.bf16 %v1815_v43, %v1811_v39  ;;  %v1814_v5 = vld [vmem:[#allocation14 + $0xa0] sm:$0xff]  ;;  %v1812_v18 = vld [vmem:[#allocation14 + $0x90] sm:$0xff] }
 0x1b8   :  { %v1296_v59 = vmul.f32 0.0, %v1290_v47  ;;  %v1817_v47 = vld [vmem:[#allocation14 + $0xb8] sm:$0xff]  ;;  %v11983_v56 = vpack.c.bf16 %v1814_v5, %v1810_v60  ;;  %v1832_v39 = vld [vmem:[#allocation14 + $0x130] sm:$0xff]  ;;  %v1846_v17 = vld [vmem:[#allocation14 + $0x1a0] sm:$0xff] }
 0x1b9   :  { %v1821_v45 = vld [vmem:[#allocation14 + $0xd8] sm:$0xff]  ;;  %v12010_v43 = vpack.c.bf16 %v1832_v39, %v1828_v31  ;;  %v12031_v31 = vpack.c.bf16 %v1846_v17, %v1842_v7  ;;  %v1844_v39 = vld [vmem:[#allocation14 + $0x190] sm:$0xff] }
 0x1ba   :  { %v11932_v2 = vadd.f32 %v1297_v52, %v1296_v59  ;;  %8564 = vmatpush1.bf16.msra.mxu0 %v14117_v6  ;;  %8596 = vmatpush1.bf16.msra.mxu1 %v14118_v62  ;;  %v11981_v52 = vpack.c.bf16 %v1817_v47, %v1813_v55  ;;  %v1816_v59 = vld [vmem:[#allocation14 + $0xb0] sm:$0xff]  ;;  %v1819_v62 = vld [vmem:[#allocation14 + $0xc8] sm:$0xff]  ;;  %v1837_v60 = vld [vmem:[#allocation14 + $0x158] sm:$0xff] }
 0x1bb   :  { %8566 = vmatprep.subr.bf16.mxu0 %v11777_v42  ;;  %8598 = vmatprep.subr.bf16.mxu1 %v14119_v22  ;;  %v1295_v42 = vadd.f32 0.5, %v1294_v53  ;;  %v11986_v6 = vpack.c.bf16 %v1816_v59, %v1812_v18  ;;  %v1823_v22 = vld [vmem:[#allocation14 + $0xe8] sm:$0xff]  ;;  %v1841_v18 = vld [vmem:[#allocation14 + $0x178] sm:$0xff]  ;;  %v1834_v59 = vld [vmem:[#allocation14 + $0x140] sm:$0xff] }
 0x1bc   :  { %10837 = vtanh.f32 %v11932_v2  ;;  %v11991_v53 = vpack.c.bf16 %v1823_v22, %v1819_v62  ;;  %v1835_v55 = vld [vmem:[#allocation14 + $0x148] sm:$0xff]  ;;  %v1838_v62 = vld [vmem:[#allocation14 + $0x160] sm:$0xff]  ;;  %v12017_v22 = vpack.c.bf16 %v1841_v18, %v1837_v60  ;;  %v1852_v61 = vld [vmem:[#allocation14 + $0x1d0] sm:$0xff] }
 0x1bd   :  { %v1839_v47 = vld [vmem:[#allocation14 + $0x168] sm:$0xff]  ;;  %v1856_v7 = vld [vmem:[#allocation14 + $0x1f0] sm:$0xff] }
 0x1be   :  { %8568 = vmatpush1.bf16.msra.mxu0 %v11783_v49  ;;  %8600 = vmatpush1.bf16.msra.mxu1 %v11787_v0  ;;  %v1799_v0 = vld [vmem:[#allocation14 + $0x28] sm:$0xff]  ;;  %v12015_v5 = vpack.c.bf16 %v1839_v47, %v1835_v55  ;;  %v1848_v55 = vld [vmem:[#allocation14 + $0x1b0] sm:$0xff]  ;;  %v12046_v17 = vpack.c.bf16 %v1856_v7, %v1852_v61 }
 0x1bf   :  { %8570 = vmatprep.subr.bf16.mxu0 %v11789_v10  ;;  %8602 = vmatprep.subr.bf16.mxu1 %v11792_v27  ;;  %v1797_v10 = vld [vmem:[#allocation14 + $0x18] sm:$0xff]  ;;  %v12034_v47 = vpack.c.bf16 %v1848_v55, %v1844_v39  ;;  %v1851_v60 = vld [vmem:[#allocation14 + $0x1c8] sm:$0xff] }
 0x1c0   :  { %v1855_v18 = vld [vmem:[#allocation14 + $0x1e8] sm:$0xff] }
 0x1c1   :  { %v2030_v39 = vld [vmem:[#allocation15 + $0x8] sm:$0xff] }
 0x1c2   :  { %8572 = vmatpush1.bf16.msra.mxu0 %v11795_v37  ;;  %8604 = vmatpush1.bf16.msra.mxu1 %v11799_v23  ;;  %v1795_v37 = vld [vmem:[#allocation14 + $0x8] sm:$0xff]  ;;  %v1801_v23 = vld [vmem:[#allocation14 + $0x38] sm:$0xff] }
 0x1c3   :  { %8574 = vmatprep.subr.bf16.mxu0 %v11801_v40  ;;  %8606 = vmatprep.subr.bf16.mxu1 %v11804_v3  ;;  %v11955_v27 = vpack.c.bf16 %v1799_v0, %v1795_v37  ;;  %v1794_v40 = vld [vmem:[#allocation14] sm:$0xff]  ;;  %v2034_v55 = vld [vmem:[#allocation15 + $0x28] sm:$0xff] }
 0x1c4   :  { %v1798_v3 = vld [vmem:[#allocation14 + $0x20] sm:$0xff] }
 0x1c5   :  { %v1822_v37 = vld [vmem:[#allocation14 + $0xe0] sm:$0xff] }
 0x1c6   :  { %v10838_v8 = vpop.eup %10837  ;;  %8576 = vmatpush1.bf16.msra.mxu0 %v11807_v15  ;;  %8608 = vmatpush1.bf16.msra.mxu1 %v11811_v12  ;;  %v11957_v15 = vpack.c.bf16 %v1801_v23, %v1797_v10  ;;  %v11959_v12 = vpack.c.bf16 %v1798_v3, %v1794_v40  ;;  %v1820_v23 = vld [vmem:[#allocation14 + $0xd0] sm:$0xff] }
 0x1c7   :  { %v11949_v49 = vmul.f32 %v10838_v8, %v1295_v42  ;;  %8610 = vmatprep.subr.bf16.mxu0 %v11955_v27  ;;  %v1825_v42 = vld [vmem:[#allocation14 + $0xf8] sm:$0xff]  ;;  %v1818_v8 = vld [vmem:[#allocation14 + $0xc0] sm:$0xff]  ;;  %v1824_v40 = vld [vmem:[#allocation14 + $0xf0] sm:$0xff] }
 0x1c8   :  { %8642 = vmatprep.subr.bf16.mxu1 %v11957_v15  ;;  %v11993_v0 = vpack.c.bf16 %v1825_v42, %v1821_v45  ;;  %v11995_v10 = vpack.c.bf16 %v1822_v37, %v1818_v8  ;;  %v11998_v3 = vpack.c.bf16 %v1824_v40, %v1820_v23  ;;  %v12019_v45 = vpack.c.bf16 %v1838_v62, %v1834_v59  ;;  %v1836_v42 = vld [vmem:[#allocation14 + $0x150] sm:$0xff]  ;;  %v1843_v23 = vld [vmem:[#allocation14 + $0x188] sm:$0xff]  ;;  %v1853_v59 = vld [vmem:[#allocation14 + $0x1d8] sm:$0xff] }
 0x1c9   :  { %14120 = vst [vmem:[#allocation40_spill] sm:$0xff] %v11949_v49  ;;  %1680 = vmatmul.mubr.f32.vlgmr.msra.gmra.mrb[28].mxu0 %v11949_v49  ;;  %1751 = vmatmul.mubr.f32.vlgmr.msra.gmra.mrb[28].mxu1 %v11949_v49  ;;  %v1840_v8 = vld [vmem:[#allocation14 + $0x170] sm:$0xff]  ;;  %v1847_v40 = vld [vmem:[#allocation14 + $0x1a8] sm:$0xff]  ;;  %v12039_v62 = vpack.c.bf16 %v1855_v18, %v1851_v60  ;;  %v2032_v60 = vld [vmem:[#allocation15 + $0x18] sm:$0xff]  ;;  %v12051_v18 = vpack.c.bf16 %v2034_v55, %v2030_v39 }
 0x1ca   :  { %1922 = vmatprep.mubr.f32.mxu0 %v14101_v19  ;;  %1993 = vmatprep.mubr.f32.mxu1 %v14101_v19  ;;  %v12022_v37 = vpack.c.bf16 %v1840_v8, %v1836_v42  ;;  %v12027_v51 = vpack.c.bf16 %v1847_v40, %v1843_v23  ;;  %v1857_v42 = vld [vmem:[#allocation14 + $0x1f8] sm:$0xff]  ;;  %v1850_v8 = vld [vmem:[#allocation14 + $0x1c0] sm:$0xff] }
 0x1cb   :  { %8612 = vmatpush1.bf16.msra.mxu0 %v11959_v12  ;;  %8644 = vmatpush1.bf16.msra.mxu1 %v11962_v57  ;;  %v1854_v23 = vld [vmem:[#allocation14 + $0x1e0] sm:$0xff]  ;;  %v12041_v40 = vpack.c.bf16 %v1857_v42, %v1853_v59  ;;  %14121 = vst [vmem:[#allocation41_spill] sm:$0xff] %v12051_v18  ;;  %v2036_v59 = vld [vmem:[#allocation15 + $0x38] sm:$0xff] }
 0x1cc   :  { %8614 = vmatprep.subr.bf16.mxu0 %v11967_v13  ;;  %8646 = vmatprep.subr.bf16.mxu1 %v11969_v32  ;;  %v12043_v21 = vpack.c.bf16 %v1854_v23, %v1850_v8  ;;  %v12053_v42 = vpack.c.bf16 %v2036_v59, %v2032_v60 }
 0x1ce   :  { %14122 = vst [vmem:[#allocation42_spill] sm:$0xff] %v12053_v42 }
 0x1cf   :  { %8616 = vmatpush1.bf16.msra.mxu0 %v11971_v36  ;;  %8648 = vmatpush1.bf16.msra.mxu1 %v11974_v33 }
 0x1d0   :  { %8618 = vmatprep.subr.bf16.mxu0 %v11979_v58  ;;  %8650 = vmatprep.subr.bf16.mxu1 %v11981_v52 }
 0x1d3   :  { %8620 = vmatpush1.bf16.msra.mxu0 %v11983_v56  ;;  %8652 = vmatpush1.bf16.msra.mxu1 %v11986_v6 }
 0x1d4   :  { %8622 = vmatprep.subr.bf16.mxu0 %v11991_v53  ;;  %8654 = vmatprep.subr.bf16.mxu1 %v11993_v0 }
 0x1d7   :  { %8624 = vmatpush1.bf16.msra.mxu0 %v11995_v10  ;;  %8656 = vmatpush1.bf16.msra.mxu1 %v11998_v3 }
 0x1d8   :  { %8626 = vmatprep.subr.bf16.mxu0 %v12003_v4  ;;  %8658 = vmatprep.subr.bf16.mxu1 %v12005_v30 }
 0x1db   :  { %8628 = vmatpush1.bf16.msra.mxu0 %v12007_v14  ;;  %8660 = vmatpush1.bf16.msra.mxu1 %v12010_v43 }
 0x1dc   :  { %8630 = vmatprep.subr.bf16.mxu0 %v12015_v5  ;;  %8662 = vmatprep.subr.bf16.mxu1 %v12017_v22 }
 0x1df   :  { %8632 = vmatpush1.bf16.msra.mxu0 %v12019_v45  ;;  %8664 = vmatpush1.bf16.msra.mxu1 %v12022_v37 }
 0x1e0   :  { %8634 = vmatprep.subr.bf16.mxu0 %v12027_v51  ;;  %8666 = vmatprep.subr.bf16.mxu1 %v12029_v29 }
 0x1e3   :  { %8636 = vmatpush1.bf16.msra.mxu0 %v12031_v31  ;;  %8668 = vmatpush1.bf16.msra.mxu1 %v12034_v47 }
 0x1e4   :  { %8638 = vmatprep.subr.bf16.mxu0 %v12039_v62  ;;  %8670 = vmatprep.subr.bf16.mxu1 %v12041_v40 }
 0x1e7   :  { %8640 = vmatpush1.bf16.msra.mxu0 %v12043_v21  ;;  %8672 = vmatpush1.bf16.msra.mxu1 %v12046_v17 }
 0x1e8   :  { %8674 = vmatprep.subr.bf16.mxu0 %v12051_v18  ;;  %8706 = vmatprep.subr.bf16.mxu1 %v12053_v42  ;;  %v2039_v42 = vld [vmem:[#allocation15 + $0x50] sm:$0xff] }
 0x1e9   :  { %v2043_v18 = vld [vmem:[#allocation15 + $0x70] sm:$0xff] }
 0x27c   :  { %v1446_v8 = vpop.f32.mrb[2].mxu0  ;;  %v1517_v23 = vpop.f32.mrb[2].mxu1 }
 0x27d   :  { %v10563_v61 = vadd.f32 %v1446_v8, %v11863_v38  ;;  %v1448_v7 = vpop.f32.mrb[3].mxu0  ;;  %v1519_v48 = vpop.f32.mrb[3].mxu1  ;;  %v10579_v39 = vadd.f32 %v1517_v23, %v11873_v54  ;;  %v2029_v23 = vld [vmem:[#allocation15] sm:$0xff] }
 0x27e   :  { %v10564_v16 = vadd.f32 %v1448_v7, %v11868_v44  ;;  %v10580_v55 = vadd.f32 %v1519_v48, %v11880_v20  ;;  %v2033_v48 = vld [vmem:[#allocation15 + $0x20] sm:$0xff] }
 0x27f   :  { %v1526_v63 = vmul.f32 0.5, %v10563_v61  ;;  %v2037_v20 = vld [vmem:[#allocation15 + $0x40] sm:$0xff] }
 0x280   :  { %v1530_v1 = vmul.f32 0.5, %v10564_v16  ;;  %v1535_v60 = vmul.f32 0.5, %v10580_v55  ;;  %v2031_v55 = vld [vmem:[#allocation15 + $0x10] sm:$0xff]  ;;  %v2041_v54 = vld [vmem:[#allocation15 + $0x60] sm:$0xff] }
 0x281   :  { %10839 = vtanh.f32 %v1526_v63 }
 0x282   :  { %10841 = vtanh.f32 %v1530_v1 }
 0x283   :  { %10843 = vtanh.f32 %v10579_v39 }
 0x284   :  { %10845 = vtanh.f32 %v1535_v60 }
 0x28b   :  { %v10840_v59 = vpop.eup %10839 }
 0x28c   :  { %v10842_v41 = vpop.eup %10841  ;;  %v1528_v28 = vmul.f32 0.5, %v10840_v59  ;;  %v2035_v59 = vld [vmem:[#allocation15 + $0x30] sm:$0xff] }
 0x28d   :  { %v1532_v24 = vmul.f32 0.5, %v10842_v41  ;;  %v10844_v34 = vpop.eup %10843  ;;  %v2038_v41 = vld [vmem:[#allocation15 + $0x48] sm:$0xff] }
 0x28e   :  { %v1529_v8 = vadd.f32 0.5, %v1528_v28  ;;  %v10846_v1 = vpop.eup %10845 }
 0x28f   :  { %v1533_v49 = vadd.f32 0.5, %v1532_v24  ;;  %v1537_v63 = vmul.f32 0.5, %v10846_v1  ;;  %v12067_v1 = vpack.c.bf16 %v2033_v48, %v2029_v23  ;;  %v2048_v23 = vld [vmem:[#allocation15 + $0x98] sm:$0xff] }
 0x290   :  { %v1540_v25 = vmul.f32 %v10844_v34, %v1529_v8  ;;  %v2042_v34 = vld [vmem:[#allocation15 + $0x68] sm:$0xff]  ;;  %v2040_v8 = vld [vmem:[#allocation15 + $0x58] sm:$0xff] }
 0x291   :  { %v1539_v61 = vmul.f32 %v1533_v49, %v11883_v9  ;;  %v2044_v9 = vld [vmem:[#allocation15 + $0x78] sm:$0xff] }
 0x292   :  { %v2052_v48 = vld [vmem:[#allocation15 + $0xb8] sm:$0xff] }
 0x293   :  { %v12062_v16 = vadd.f32 %v1540_v25, %v1539_v61  ;;  %v1538_v25 = vadd.f32 0.5, %v1537_v63  ;;  %v2046_v63 = vld [vmem:[#allocation15 + $0x88] sm:$0xff] }
 0x295   :  { %14123 = vst [vmem:[#allocation43_spill] sm:$0xff] %v12062_v16  ;;  %10847 = vtanh.f32 %v12062_v16  ;;  %v12069_v16 = vpack.c.bf16 %v2035_v59, %v2031_v55  ;;  %v12082_v55 = vpack.c.bf16 %v2041_v54, %v2037_v20  ;;  %v12084_v59 = vpack.c.bf16 %v2043_v18, %v2039_v42  ;;  %v2058_v54 = vld [vmem:[#allocation15 + $0xe8] sm:$0xff]  ;;  %v2056_v20 = vld [vmem:[#allocation15 + $0xd8] sm:$0xff] }
 0x296   :  { %v2060_v18 = vld [vmem:[#allocation15 + $0xf8] sm:$0xff] }
 0x297   :  { %14127 = vst [vmem:[#allocation47_spill] sm:$0xff] %v12082_v55  ;;  %14128 = vst [vmem:[#allocation48_spill] sm:$0xff] %v12084_v59 }
 0x29c   :  { %v1681_v7 = vpop.f32.mrb[28].mxu0  ;;  %v1752_v39 = vpop.f32.mrb[28].mxu1 }
 0x29d   :  { %v10605_v28 = vadd.f32 %v1681_v7, %v11890_v50  ;;  %v1683_v60 = vpop.f32.mrb[29].mxu0  ;;  %v1754_v24 = vpop.f32.mrb[29].mxu1  ;;  %v12073_v7 = vpack.c.bf16 %v2042_v34, %v2038_v41  ;;  %v12075_v50 = vpack.c.bf16 %v2044_v9, %v2040_v8  ;;  %v2045_v41 = vld [vmem:[#allocation15 + $0x80] sm:$0xff]  ;;  %v2047_v34 = vld [vmem:[#allocation15 + $0x90] sm:$0xff]  ;;  %v2054_v9 = vld [vmem:[#allocation15 + $0xc8] sm:$0xff] }
 0x29e   :  { %v10606_v49 = vadd.f32 %v1683_v60, %v11895_v35  ;;  %v10621_v60 = vadd.f32 %v1752_v39, %v11900_v46  ;;  %v2051_v8 = vld [vmem:[#allocation15 + $0xb0] sm:$0xff] }
 0x29f   :  { %v10848_v61 = vpop.eup %10847  ;;  %v1761_v11 = vmul.f32 0.5, %v10605_v28  ;;  %14125 = vst [vmem:[#allocation45_spill] sm:$0xff] %v12073_v7  ;;  %14126 = vst [vmem:[#allocation46_spill] sm:$0xff] %v12075_v50  ;;  %v2050_v28 = vld [vmem:[#allocation15 + $0xa8] sm:$0xff] }
 0x2a0   :  { %v12071_v44 = vmul.f32 %v10848_v61, %v1538_v25  ;;  %v1765_v38 = vmul.f32 0.5, %v10606_v49  ;;  %v12088_v39 = vpack.c.bf16 %v2050_v28, %v2046_v63  ;;  %v10622_v25 = vadd.f32 %v1754_v24, %v11909_v26  ;;  %v2053_v61 = vld [vmem:[#allocation15 + $0xc0] sm:$0xff]  ;;  %v2055_v28 = vld [vmem:[#allocation15 + $0xd0] sm:$0xff]  ;;  %v2070_v26 = vld [vmem:[#allocation15 + $0x148] sm:$0xff] }
 0x2a1   :  { %10849 = vtanh.f32 %v1761_v11  ;;  %v2049_v11 = vld [vmem:[#allocation15 + $0xa0] sm:$0xff]  ;;  %v12099_v49 = vpack.c.bf16 %v2051_v8, %v2047_v34  ;;  %v12103_v24 = vpack.c.bf16 %v2058_v54, %v2054_v9 }
 0x2a2   :  { %14124 = vst [vmem:[#allocation44_spill] sm:$0xff] %v12071_v44  ;;  %10851 = vtanh.f32 %v1765_v38  ;;  %1923 = vmatmul.mubr.f32.vlgmr.msra.gmra.mrb[4].mxu0 %v12071_v44  ;;  %1994 = vmatmul.mubr.f32.vlgmr.msra.gmra.mrb[4].mxu1 %v12071_v44  ;;  %14129 = vst [vmem:[#allocation49_spill] sm:$0xff] %v12088_v39  ;;  %v12090_v38 = vpack.c.bf16 %v2052_v48, %v2048_v23  ;;  %v12097_v42 = vpack.c.bf16 %v2049_v11, %v2045_v41  ;;  %v2057_v63 = vld [vmem:[#allocation15 + $0xe0] sm:$0xff]  ;;  %v2059_v23 = vld [vmem:[#allocation15 + $0xf0] sm:$0xff] }
 0x2a3   :  { %8676 = vmatpush1.bf16.msra.mxu0 %v12067_v1  ;;  %8708 = vmatpush1.bf16.msra.mxu1 %v12069_v16  ;;  %10853 = vtanh.f32 %v10621_v60  ;;  %14132 = vst [vmem:[#allocation60_spill] sm:$0xff] %v12099_v49  ;;  %v12105_v60 = vpack.c.bf16 %v2060_v18, %v2056_v20  ;;  %v2062_v48 = vld [vmem:[#allocation15 + $0x108] sm:$0xff]  ;;  %v1770_v44 = vmul.f32 0.5, %v10622_v25  ;;  %v2068_v41 = vld [vmem:[#allocation15 + $0x138] sm:$0xff]  ;;  %v12109_v34 = vpack.c.bf16 %v2057_v63, %v2053_v61  ;;  %v2061_v9 = vld [vmem:[#allocation15 + $0x100] sm:$0xff] }
 0x2a4   :  { %8678 = vmatprep.subr.bf16.mxu0 %v12073_v7  ;;  %8710 = vmatprep.subr.bf16.mxu1 %v12075_v50  ;;  %14130 = vst [vmem:[#allocation58_spill] sm:$0xff] %v12090_v38  ;;  %14131 = vst [vmem:[#allocation59_spill] sm:$0xff] %v12097_v42  ;;  %v12111_v8 = vpack.c.bf16 %v2059_v23, %v2055_v28  ;;  %v2065_v54 = vld [vmem:[#allocation15 + $0x120] sm:$0xff]  ;;  %v2074_v61 = vld [vmem:[#allocation15 + $0x168] sm:$0xff] }
 0x2a5   :  { %2157 = vmatprep.mubr.f32.mxu0 %v14101_v19  ;;  %2228 = vmatprep.mubr.f32.mxu1 %v14101_v19  ;;  %14133 = vst [vmem:[#allocation61_spill] sm:$0xff] %v12109_v34  ;;  %10855 = vtanh.f32 %v1770_v44  ;;  %v2072_v63 = vld [vmem:[#allocation15 + $0x158] sm:$0xff]  ;;  %v12127_v44 = vpack.c.bf16 %v2074_v61, %v2070_v26  ;;  %v2077_v61 = vld [vmem:[#allocation15 + $0x180] sm:$0xff] }
 0x2a6   :  { %14134 = vst [vmem:[#allocation62_spill] sm:$0xff] %v12111_v8  ;;  %v2076_v28 = vld [vmem:[#allocation15 + $0x178] sm:$0xff] }
 0x2a7   :  { %8680 = vmatpush1.bf16.msra.mxu0 %v12082_v55  ;;  %8712 = vmatpush1.bf16.msra.mxu1 %v12084_v59  ;;  %v2066_v55 = vld [vmem:[#allocation15 + $0x128] sm:$0xff]  ;;  %v2064_v59 = vld [vmem:[#allocation15 + $0x118] sm:$0xff]  ;;  %14137 = vst [vmem:[#allocation65_spill] sm:$0xff] %v12127_v44 }
 0x2a8   :  { %8682 = vmatprep.subr.bf16.mxu0 %v12088_v39  ;;  %8714 = vmatprep.subr.bf16.mxu1 %v12090_v38  ;;  %v12115_v25 = vpack.c.bf16 %v2066_v55, %v2062_v48  ;;  %v12117_v38 = vpack.c.bf16 %v2068_v41, %v2064_v59  ;;  %v2063_v39 = vld [vmem:[#allocation15 + $0x110] sm:$0xff]  ;;  %v2069_v59 = vld [vmem:[#allocation15 + $0x140] sm:$0xff] }
 0x2a9   :  { %v2073_v48 = vld [vmem:[#allocation15 + $0x160] sm:$0xff] }
 0x2ab   :  { %v10850_v11 = vpop.eup %10849  ;;  %8684 = vmatpush1.bf16.msra.mxu0 %v12097_v42  ;;  %8716 = vmatpush1.bf16.msra.mxu1 %v12099_v49  ;;  %v2067_v42 = vld [vmem:[#allocation15 + $0x130] sm:$0xff] }
 0x2ac   :  { %v10852_v20 = vpop.eup %10851  ;;  %v1763_v18 = vmul.f32 0.5, %v10850_v11  ;;  %8686 = vmatprep.subr.bf16.mxu0 %v12103_v24  ;;  %8718 = vmatprep.subr.bf16.mxu1 %v12105_v60  ;;  %v12121_v11 = vpack.c.bf16 %v2065_v54, %v2061_v9  ;;  %v12123_v55 = vpack.c.bf16 %v2067_v42, %v2063_v39  ;;  %v2082_v9 = vld [vmem:[#allocation15 + $0x1a8] sm:$0xff]  ;;  %v2080_v54 = vld [vmem:[#allocation15 + $0x198] sm:$0xff] }
 0x2ad   :  { %v1767_v49 = vmul.f32 0.5, %v10852_v20  ;;  %v10854_v50 = vpop.eup %10853  ;;  %v12129_v20 = vpack.c.bf16 %v2076_v28, %v2072_v63  ;;  %v2084_v39 = vld [vmem:[#allocation15 + $0x1b8] sm:$0xff]  ;;  %v2081_v63 = vld [vmem:[#allocation15 + $0x1a0] sm:$0xff]  ;;  %v2083_v28 = vld [vmem:[#allocation15 + $0x1b0] sm:$0xff] }
 0x2ae   :  { %v1764_v23 = vadd.f32 0.5, %v1763_v18  ;;  %14135 = vst [vmem:[#allocation63_spill] sm:$0xff] %v12121_v11  ;;  %14136 = vst [vmem:[#allocation64_spill] sm:$0xff] %v12123_v55  ;;  %v2075_v18 = vld [vmem:[#allocation15 + $0x170] sm:$0xff] }
 0x2af   :  { %v1768_v7 = vadd.f32 0.5, %v1767_v49  ;;  %8688 = vmatpush1.bf16.msra.mxu0 %v12109_v34  ;;  %8720 = vmatpush1.bf16.msra.mxu1 %v12111_v8  ;;  %14138 = vst [vmem:[#allocation66_spill] sm:$0xff] %v12129_v20  ;;  %v2071_v49 = vld [vmem:[#allocation15 + $0x150] sm:$0xff]  ;;  %v2078_v34 = vld [vmem:[#allocation15 + $0x188] sm:$0xff] }
 0x2b0   :  { %v1775_v41 = vmul.f32 %v10854_v50, %v1764_v23  ;;  %8690 = vmatprep.subr.bf16.mxu0 %v12115_v25  ;;  %8722 = vmatprep.subr.bf16.mxu1 %v12117_v38  ;;  %v12136_v50 = vpack.c.bf16 %v2073_v48, %v2069_v59  ;;  %v12138_v26 = vpack.c.bf16 %v2075_v18, %v2071_v49  ;;  %v2086_v23 = vld [vmem:[#allocation15 + $0x1c8] sm:$0xff]  ;;  %v2088_v59 = vld [vmem:[#allocation15 + $0x1d8] sm:$0xff]  ;;  %v10856_v49 = vpop.eup %10855 }
 0x2b1   :  { %v1774_v8 = vmul.f32 %v1768_v7, %v11932_v2  ;;  %v12142_v2 = vpack.c.bf16 %v2082_v9, %v2078_v34  ;;  %v12144_v7 = vpack.c.bf16 %v2084_v39, %v2080_v54  ;;  %v2092_v48 = vld [vmem:[#allocation15 + $0x1f8] sm:$0xff]  ;;  %v12149_v18 = vpack.c.bf16 %v2081_v63, %v2077_v61  ;;  %v2085_v34 = vld [vmem:[#allocation15 + $0x1c0] sm:$0xff] }
 0x2b2   :  { %v12157_v54 = vpack.c.bf16 %v2092_v48, %v2088_v59  ;;  %v2089_v39 = vld [vmem:[#allocation15 + $0x1e0] sm:$0xff] }
 0x2b3   :  { %v12132_v42 = vadd.f32 %v1775_v41, %v1774_v8  ;;  %8692 = vmatpush1.bf16.msra.mxu0 %v12121_v11  ;;  %8724 = vmatpush1.bf16.msra.mxu1 %v12123_v55  ;;  %v2079_v8 = vld [vmem:[#allocation15 + $0x190] sm:$0xff]  ;;  %v2090_v41 = vld [vmem:[#allocation15 + $0x1e8] sm:$0xff]  ;;  %v1772_v11 = vmul.f32 0.5, %v10856_v49  ;;  %v12161_v61 = vpack.c.bf16 %v2089_v39, %v2085_v34 }
 0x2b4   :  { %8694 = vmatprep.subr.bf16.mxu0 %v12127_v44  ;;  %8726 = vmatprep.subr.bf16.mxu1 %v12129_v20  ;;  %v12151_v20 = vpack.c.bf16 %v2083_v28, %v2079_v8  ;;  %v12155_v9 = vpack.c.bf16 %v2090_v41, %v2086_v23  ;;  %v2087_v44 = vld [vmem:[#allocation15 + $0x1d0] sm:$0xff] }
 0x2b5   :  { %10857 = vtanh.f32 %v12132_v42  ;;  %v2091_v55 = vld [vmem:[#allocation15 + $0x1f0] sm:$0xff]  ;;  %v1773_v8 = vadd.f32 0.5, %v1772_v11  ;;  %v14147_v11 = vld [vmem:[#allocation55_spill] sm:$0xff] }
 0x2b6   :  { %v12163_v63 = vpack.c.bf16 %v2091_v55, %v2087_v44 }
 0x2b7   :  { %8696 = vmatpush1.bf16.msra.mxu0 %v12136_v50  ;;  %8728 = vmatpush1.bf16.msra.mxu1 %v12138_v26 }
 0x2b8   :  { %8698 = vmatprep.subr.bf16.mxu0 %v12142_v2  ;;  %8730 = vmatprep.subr.bf16.mxu1 %v12144_v7 }
 0x2bb   :  { %8700 = vmatpush1.bf16.msra.mxu0 %v12149_v18  ;;  %8732 = vmatpush1.bf16.msra.mxu1 %v12151_v20 }
 0x2bc   :  { %8702 = vmatprep.subr.bf16.mxu0 %v12155_v9  ;;  %8734 = vmatprep.subr.bf16.mxu1 %v12157_v54 }
 0x2bf   :  { %v10858_v28 = vpop.eup %10857  ;;  %8704 = vmatpush1.bf16.msra.mxu0 %v12161_v61  ;;  %8736 = vmatpush1.bf16.msra.mxu1 %v12163_v63 }
 0x2c0   :  { %v12169_v23 = vmul.f32 %v10858_v28, %v1773_v8  ;;  %8738 = vmatprep.subr.bf16.mxu0 %v11955_v27  ;;  %8770 = vmatprep.subr.bf16.mxu1 %v11957_v15  ;;  %v14140_v27 = vld [vmem:[#allocation41_spill] sm:$0xff]  ;;  %v14141_v15 = vld [vmem:[#allocation42_spill] sm:$0xff] }
 0x2c2   :  { %14139 = vst [vmem:[#allocation67_spill] sm:$0xff] %v12169_v23  ;;  %2158 = vmatmul.mubr.f32.vlgmr.msra.gmra.mrb[26].mxu0 %v12169_v23  ;;  %2229 = vmatmul.mubr.f32.vlgmr.msra.gmra.mrb[26].mxu1 %v12169_v23 }
 0x2c3   :  { %8740 = vmatpush1.bf16.msra.mxu0 %v11959_v12  ;;  %8772 = vmatpush1.bf16.msra.mxu1 %v11962_v57 }
 0x2c4   :  { %8742 = vmatprep.subr.bf16.mxu0 %v11967_v13  ;;  %8774 = vmatprep.subr.bf16.mxu1 %v11969_v32  ;;  %v14142_v13 = vld [vmem:[#allocation51_spill] sm:$0xff] }
 0x2c5   :  { %2400 = vmatprep.mubr.f32.mxu0 %v14101_v19  ;;  %2471 = vmatprep.mubr.f32.mxu1 %v14101_v19 }
 0x2c7   :  { %8744 = vmatpush1.bf16.msra.mxu0 %v11971_v36  ;;  %8776 = vmatpush1.bf16.msra.mxu1 %v11974_v33 }
 0x2c8   :  { %8746 = vmatprep.subr.bf16.mxu0 %v11979_v58  ;;  %8778 = vmatprep.subr.bf16.mxu1 %v11981_v52  ;;  %v14143_v58 = vld [vmem:[#allocation52_spill] sm:$0xff] }
 0x2cb   :  { %8748 = vmatpush1.bf16.msra.mxu0 %v11983_v56  ;;  %8780 = vmatpush1.bf16.msra.mxu1 %v11986_v6 }
 0x2cc   :  { %8750 = vmatprep.subr.bf16.mxu0 %v11991_v53  ;;  %8782 = vmatprep.subr.bf16.mxu1 %v11993_v0  ;;  %v14144_v53 = vld [vmem:[#allocation53_spill] sm:$0xff] }
 0x2cf   :  { %8752 = vmatpush1.bf16.msra.mxu0 %v11995_v10  ;;  %8784 = vmatpush1.bf16.msra.mxu1 %v11998_v3  ;;  %v14145_v10 = vld [vmem:[#allocation54_spill] sm:$0xff] }
 0x2d0   :  { %8754 = vmatprep.subr.bf16.mxu0 %v12003_v4  ;;  %8786 = vmatprep.subr.bf16.mxu1 %v12005_v30 }
 0x2d3   :  { %8756 = vmatpush1.bf16.msra.mxu0 %v12007_v14  ;;  %8788 = vmatpush1.bf16.msra.mxu1 %v12010_v43 }
 0x2d4   :  { %8758 = vmatprep.subr.bf16.mxu0 %v12015_v5  ;;  %8790 = vmatprep.subr.bf16.mxu1 %v12017_v22 }
 0x2d7   :  { %8760 = vmatpush1.bf16.msra.mxu0 %v12019_v45  ;;  %8792 = vmatpush1.bf16.msra.mxu1 %v12022_v37 }
 0x2d8   :  { %8762 = vmatprep.subr.bf16.mxu0 %v12027_v51  ;;  %8794 = vmatprep.subr.bf16.mxu1 %v12029_v29  ;;  %v14146_v29 = vld [vmem:[#allocation43_spill] sm:$0xff] }
 0x2db   :  { %8764 = vmatpush1.bf16.msra.mxu0 %v12031_v31  ;;  %8796 = vmatpush1.bf16.msra.mxu1 %v12034_v47 }
 0x2dc   :  { %8766 = vmatprep.subr.bf16.mxu0 %v12039_v62  ;;  %8798 = vmatprep.subr.bf16.mxu1 %v12041_v40 }
 0x2df   :  { %8768 = vmatpush1.bf16.msra.mxu0 %v12043_v21  ;;  %8800 = vmatpush1.bf16.msra.mxu1 %v12046_v17 }
 0x2e0   :  { %8802 = vmatprep.subr.bf16.mxu0 %v14140_v27  ;;  %8834 = vmatprep.subr.bf16.mxu1 %v14141_v15  ;;  %v14149_v27 = vld [vmem:[#allocation45_spill] sm:$0xff]  ;;  %v14150_v15 = vld [vmem:[#allocation46_spill] sm:$0xff] }
 0x375   :  { %v1924_v12 = vpop.f32.mrb[4].mxu0  ;;  %v1995_v57 = vpop.f32.mrb[4].mxu1 }
 0x376   :  { %v10565_v32 = vadd.f32 %v1924_v12, %v14142_v13  ;;  %v1926_v36 = vpop.f32.mrb[5].mxu0  ;;  %v1997_v33 = vpop.f32.mrb[5].mxu1  ;;  %v10581_v0 = vadd.f32 %v1995_v57, %v14144_v53  ;;  %v14151_v12 = vld [vmem:[#allocation57_spill] sm:$0xff] }
 0x377   :  { %v10566_v52 = vadd.f32 %v1926_v36, %v14143_v58  ;;  %v10582_v3 = vadd.f32 %v1997_v33, %v14145_v10  ;;  %v14153_v36 = vld [vmem:[#allocation48_spill] sm:$0xff]  ;;  %v14154_v33 = vld [vmem:[#allocation49_spill] sm:$0xff] }
 0x378   :  { %v2004_v56 = vmul.f32 0.5, %v10565_v32  ;;  %v14152_v32 = vld [vmem:[#allocation47_spill] sm:$0xff] }
 0x379   :  { %v2008_v6 = vmul.f32 0.5, %v10566_v52  ;;  %v2013_v4 = vmul.f32 0.5, %v10582_v3 }
 0x37a   :  { %10859 = vtanh.f32 %v2004_v56  ;;  %v14156_v56 = vld [vmem:[#allocation59_spill] sm:$0xff] }
 0x37b   :  { %10861 = vtanh.f32 %v2008_v6  ;;  %v14157_v6 = vld [vmem:[#allocation60_spill] sm:$0xff] }
 0x37c   :  { %10863 = vtanh.f32 %v10581_v0 }
 0x37d   :  { %10865 = vtanh.f32 %v2013_v4 }
 0x384   :  { %v10860_v30 = vpop.eup %10859 }
 0x385   :  { %v10862_v14 = vpop.eup %10861  ;;  %v2006_v43 = vmul.f32 0.5, %v10860_v30 }
 0x386   :  { %v2010_v5 = vmul.f32 0.5, %v10862_v14  ;;  %v10864_v45 = vpop.eup %10863 }
 0x387   :  { %v2007_v22 = vadd.f32 0.5, %v2006_v43  ;;  %v10866_v62 = vpop.eup %10865 }
 0x388   :  { %v2011_v37 = vadd.f32 0.5, %v2010_v5  ;;  %v2015_v40 = vmul.f32 0.5, %v10866_v62  ;;  %v14158_v5 = vld [vmem:[#allocation61_spill] sm:$0xff] }
 0x389   :  { %v2018_v51 = vmul.f32 %v10864_v45, %v2007_v22  ;;  %v14159_v22 = vld [vmem:[#allocation62_spill] sm:$0xff] }
 0x38a   :  { %v2017_v31 = vmul.f32 %v2011_v37, %v14146_v29  ;;  %v2016_v59 = vadd.f32 0.5, %v2015_v40  ;;  %v14162_v29 = vld [vmem:[#allocation65_spill] sm:$0xff] }
 0x38b   :  { %v2749_v40 = vld [vmem:[#allocation14 + $0x10] sm:$0xff] }
 0x38c   :  { %v12214_v47 = vadd.f32 %v2018_v51, %v2017_v31  ;;  %v14163_v31 = vld [vmem:[#allocation66_spill] sm:$0xff] }
 0x38e   :  { %10867 = vtanh.f32 %v12214_v47 }
 0x395   :  { %v2159_v21 = vpop.f32.mrb[26].mxu0  ;;  %v2230_v17 = vpop.f32.mrb[26].mxu1 }
 0x396   :  { %v10603_v55 = vadd.f32 %v2159_v21, %v14147_v11  ;;  %v2161_v44 = vpop.f32.mrb[27].mxu0  ;;  %v2232_v41 = vpop.f32.mrb[27].mxu1  ;;  %v10619_v28 = vadd.f32 %v2230_v17, %v11900_v46  ;;  %v2753_v21 = vld [vmem:[#allocation14 + $0x30] sm:$0xff] }
 0x397   :  { %v10604_v48 = vadd.f32 %v2161_v44, %v11895_v35  ;;  %v10620_v57 = vadd.f32 %v2232_v41, %v14151_v12  ;;  %v12274_v17 = vpack.c.bf16 %v2753_v21, %v2749_v40  ;;  %v2760_v44 = vld [vmem:[#allocation14 + $0x68] sm:$0xff]  ;;  %v2758_v41 = vld [vmem:[#allocation14 + $0x58] sm:$0xff]  ;;  %v2781_v21 = vld [vmem:[#allocation14 + $0x110] sm:$0xff] }
 0x398   :  { %v10868_v49 = vpop.eup %10867  ;;  %v2239_v34 = vmul.f32 0.5, %v10603_v55  ;;  %v2756_v55 = vld [vmem:[#allocation14 + $0x48] sm:$0xff] }
 0x399   :  { %v12219_v39 = vmul.f32 %v10868_v49, %v2016_v59  ;;  %v2243_v8 = vmul.f32 0.5, %v10604_v48  ;;  %v12279_v59 = vpack.c.bf16 %v2760_v44, %v2756_v55  ;;  %v2762_v48 = vld [vmem:[#allocation14 + $0x78] sm:$0xff]  ;;  %v2755_v49 = vld [vmem:[#allocation14 + $0x40] sm:$0xff]  ;;  %v2785_v55 = vld [vmem:[#allocation14 + $0x130] sm:$0xff] }
 0x39a   :  { %10869 = vtanh.f32 %v2239_v34  ;;  %v2759_v34 = vld [vmem:[#allocation14 + $0x60] sm:$0xff]  ;;  %v12322_v44 = vpack.c.bf16 %v2785_v55, %v2781_v21  ;;  %v2810_v21 = vld [vmem:[#allocation14 + $0x1f8] sm:$0xff] }
 0x39b   :  { %14148 = vst [vmem:[#allocation41_spill] sm:$0xff] %v12219_v39  ;;  %10871 = vtanh.f32 %v2243_v8  ;;  %2401 = vmatmul.mubr.f32.vlgmr.msra.gmra.mrb[6].mxu0 %v12219_v39  ;;  %2472 = vmatmul.mubr.f32.vlgmr.msra.gmra.mrb[6].mxu1 %v12219_v39  ;;  %v12281_v8 = vpack.c.bf16 %v2762_v48, %v2758_v41  ;;  %v2788_v41 = vld [vmem:[#allocation14 + $0x148] sm:$0xff]  ;;  %v2803_v55 = vld [vmem:[#allocation14 + $0x1c0] sm:$0xff] }
 0x39c   :  { %8804 = vmatpush1.bf16.msra.mxu0 %v12067_v1  ;;  %8836 = vmatpush1.bf16.msra.mxu1 %v12069_v16  ;;  %10873 = vtanh.f32 %v10619_v28  ;;  %v14155_v1 = vld [vmem:[#allocation58_spill] sm:$0xff]  ;;  %v2248_v16 = vmul.f32 0.5, %v10620_v57  ;;  %v12283_v28 = vpack.c.bf16 %v2759_v34, %v2755_v49  ;;  %v2792_v48 = vld [vmem:[#allocation14 + $0x168] sm:$0xff] }
 0x39d   :  { %8806 = vmatprep.subr.bf16.mxu0 %v14149_v27  ;;  %8838 = vmatprep.subr.bf16.mxu1 %v14150_v15  ;;  %v2757_v27 = vld [vmem:[#allocation14 + $0x50] sm:$0xff]  ;;  %v2790_v49 = vld [vmem:[#allocation14 + $0x158] sm:$0xff]  ;;  %v12327_v34 = vpack.c.bf16 %v2792_v48, %v2788_v41  ;;  %v2807_v41 = vld [vmem:[#allocation14 + $0x1e0] sm:$0xff] }
 0x39e   :  { %2635 = vmatprep.mubr.f32.mxu0 %v14101_v19  ;;  %2706 = vmatprep.mubr.f32.mxu1 %v14101_v19  ;;  %10875 = vtanh.f32 %v2248_v16  ;;  %v2761_v15 = vld [vmem:[#allocation14 + $0x70] sm:$0xff]  ;;  %v2770_v16 = vld [vmem:[#allocation14 + $0xb8] sm:$0xff] }
 0x39f   :  { %v12286_v57 = vpack.c.bf16 %v2761_v15, %v2757_v27  ;;  %v2794_v27 = vld [vmem:[#allocation14 + $0x178] sm:$0xff]  ;;  %v2787_v15 = vld [vmem:[#allocation14 + $0x140] sm:$0xff] }
 0x3a0   :  { %8808 = vmatpush1.bf16.msra.mxu0 %v14152_v32  ;;  %8840 = vmatpush1.bf16.msra.mxu1 %v14153_v36  ;;  %v2764_v32 = vld [vmem:[#allocation14 + $0x88] sm:$0xff] }
 0x3a1   :  { %8810 = vmatprep.subr.bf16.mxu0 %v14154_v33  ;;  %8842 = vmatprep.subr.bf16.mxu1 %v14155_v1  ;;  %v2768_v36 = vld [vmem:[#allocation14 + $0xa8] sm:$0xff]  ;;  %v2766_v33 = vld [vmem:[#allocation14 + $0x98] sm:$0xff] }
 0x3a2   :  { %v12291_v1 = vpack.c.bf16 %v2768_v36, %v2764_v32  ;;  %v2791_v32 = vld [vmem:[#allocation14 + $0x160] sm:$0xff]  ;;  %v12329_v36 = vpack.c.bf16 %v2794_v27, %v2790_v49  ;;  %v12355_v49 = vpack.c.bf16 %v2807_v41, %v2803_v55  ;;  %v2805_v27 = vld [vmem:[#allocation14 + $0x1d0] sm:$0xff] }
 0x3a4   :  { %v10870_v52 = vpop.eup %10869  ;;  %8812 = vmatpush1.bf16.msra.mxu0 %v14156_v56  ;;  %8844 = vmatpush1.bf16.msra.mxu1 %v14157_v6  ;;  %v2767_v56 = vld [vmem:[#allocation14 + $0xa0] sm:$0xff]  ;;  %v12293_v6 = vpack.c.bf16 %v2770_v16, %v2766_v33  ;;  %v12331_v33 = vpack.c.bf16 %v2791_v32, %v2787_v15  ;;  %v2789_v16 = vld [vmem:[#allocation14 + $0x150] sm:$0xff] }
 0x3a5   :  { %v10872_v0 = vpop.eup %10871  ;;  %v2241_v3 = vmul.f32 0.5, %v10870_v52  ;;  %8814 = vmatprep.subr.bf16.mxu0 %v12103_v24  ;;  %8846 = vmatprep.subr.bf16.mxu1 %v12105_v60  ;;  %v14160_v24 = vld [vmem:[#allocation63_spill] sm:$0xff]  ;;  %v14161_v60 = vld [vmem:[#allocation64_spill] sm:$0xff]  ;;  %v2809_v15 = vld [vmem:[#allocation14 + $0x1f0] sm:$0xff] }
 0x3a6   :  { %v2245_v4 = vmul.f32 0.5, %v10872_v0  ;;  %v10874_v14 = vpop.eup %10873  ;;  %v2763_v52 = vld [vmem:[#allocation14 + $0x80] sm:$0xff]  ;;  %v12358_v32 = vpack.c.bf16 %v2809_v15, %v2805_v27 }
 0x3a7   :  { %v2242_v30 = vadd.f32 0.5, %v2241_v3  ;;  %v12295_v0 = vpack.c.bf16 %v2767_v56, %v2763_v52  ;;  %v2765_v3 = vld [vmem:[#allocation14 + $0x90] sm:$0xff] }
 0x3a8   :  { %v2246_v43 = vadd.f32 0.5, %v2245_v4  ;;  %8816 = vmatpush1.bf16.msra.mxu0 %v14158_v5  ;;  %8848 = vmatpush1.bf16.msra.mxu1 %v14159_v22  ;;  %v10876_v62 = vpop.eup %10875  ;;  %v2769_v4 = vld [vmem:[#allocation14 + $0xb0] sm:$0xff]  ;;  %v2774_v5 = vld [vmem:[#allocation14 + $0xd8] sm:$0xff] }
 0x3a9   :  { %v2253_v45 = vmul.f32 %v10874_v14, %v2242_v30  ;;  %8818 = vmatprep.subr.bf16.mxu0 %v12115_v25  ;;  %8850 = vmatprep.subr.bf16.mxu1 %v12117_v38  ;;  %v2250_v38 = vmul.f32 0.5, %v10876_v62  ;;  %v12298_v30 = vpack.c.bf16 %v2769_v4, %v2765_v3  ;;  %v2772_v14 = vld [vmem:[#allocation14 + $0xc8] sm:$0xff]  ;;  %v2777_v62 = vld [vmem:[#allocation14 + $0xf0] sm:$0xff] }
 0x3aa   :  { %v2252_v37 = vmul.f32 %v2246_v43, %v12132_v42  ;;  %v2776_v43 = vld [vmem:[#allocation14 + $0xe8] sm:$0xff]  ;;  %v2793_v52 = vld [vmem:[#allocation14 + $0x170] sm:$0xff] }
 0x3ab   :  { %v2251_v25 = vadd.f32 0.5, %v2250_v38  ;;  %v12303_v22 = vpack.c.bf16 %v2776_v43, %v2772_v14  ;;  %v12334_v56 = vpack.c.bf16 %v2793_v52, %v2789_v16  ;;  %v2796_v3 = vld [vmem:[#allocation14 + $0x188] sm:$0xff]  ;;  %v2798_v14 = vld [vmem:[#allocation14 + $0x198] sm:$0xff] }
 0x3ac   :  { %v12244_v51 = vadd.f32 %v2253_v45, %v2252_v37  ;;  %8820 = vmatpush1.bf16.msra.mxu0 %v14160_v24  ;;  %8852 = vmatpush1.bf16.msra.mxu1 %v14161_v60  ;;  %v2778_v45 = vld [vmem:[#allocation14 + $0xf8] sm:$0xff]  ;;  %v2771_v37 = vld [vmem:[#allocation14 + $0xc0] sm:$0xff]  ;;  %v2800_v4 = vld [vmem:[#allocation14 + $0x1a8] sm:$0xff] }
 0x3ad   :  { %8822 = vmatprep.subr.bf16.mxu0 %v14162_v29  ;;  %8854 = vmatprep.subr.bf16.mxu1 %v14163_v31  ;;  %v2775_v24 = vld [vmem:[#allocation14 + $0xe0] sm:$0xff]  ;;  %v12305_v60 = vpack.c.bf16 %v2778_v45, %v2774_v5  ;;  %v2773_v31 = vld [vmem:[#allocation14 + $0xd0] sm:$0xff]  ;;  %v12339_v43 = vpack.c.bf16 %v2800_v4, %v2796_v3  ;;  %v2802_v5 = vld [vmem:[#allocation14 + $0x1b8] sm:$0xff] }
 0x3ae   :  { %10877 = vtanh.f32 %v12244_v51  ;;  %v12307_v29 = vpack.c.bf16 %v2775_v24, %v2771_v37  ;;  %v12310_v38 = vpack.c.bf16 %v2777_v62, %v2773_v31  ;;  %v2795_v45 = vld [vmem:[#allocation14 + $0x180] sm:$0xff]  ;;  %v12341_v24 = vpack.c.bf16 %v2802_v5, %v2798_v14  ;;  %v2797_v62 = vld [vmem:[#allocation14 + $0x190] sm:$0xff]  ;;  %v2980_v16 = vld [vmem:[#allocation15 + $0x8] sm:$0xff] }
 0x3af   :  { %v2799_v37 = vld [vmem:[#allocation14 + $0x1a0] sm:$0xff]  ;;  %v2984_v52 = vld [vmem:[#allocation15 + $0x28] sm:$0xff]  ;;  %v2982_v3 = vld [vmem:[#allocation15 + $0x18] sm:$0xff] }
 0x3b0   :  { %8824 = vmatpush1.bf16.msra.mxu0 %v12136_v50  ;;  %8856 = vmatpush1.bf16.msra.mxu1 %v12138_v26  ;;  %v2752_v26 = vld [vmem:[#allocation14 + $0x28] sm:$0xff]  ;;  %v12343_v31 = vpack.c.bf16 %v2799_v37, %v2795_v45  ;;  %v12363_v4 = vpack.c.bf16 %v2984_v52, %v2980_v16  ;;  %v2986_v14 = vld [vmem:[#allocation15 + $0x38] sm:$0xff] }
 0x3b1   :  { %8826 = vmatprep.subr.bf16.mxu0 %v12142_v2  ;;  %8858 = vmatprep.subr.bf16.mxu1 %v12144_v7  ;;  %v2750_v2 = vld [vmem:[#allocation14 + $0x18] sm:$0xff]  ;;  %v12365_v5 = vpack.c.bf16 %v2986_v14, %v2982_v3 }
 0x3b2   :  { %14165 = vst [vmem:[#allocation43_spill] sm:$0xff] %v12363_v4 }
 0x3b3   :  { %14166 = vst [vmem:[#allocation45_spill] sm:$0xff] %v12365_v5 }
 0x3b4   :  { %8828 = vmatpush1.bf16.msra.mxu0 %v12149_v18  ;;  %8860 = vmatpush1.bf16.msra.mxu1 %v12151_v20  ;;  %v2748_v20 = vld [vmem:[#allocation14 + $0x8] sm:$0xff]  ;;  %v2754_v18 = vld [vmem:[#allocation14 + $0x38] sm:$0xff] }
 0x3b5   :  { %8830 = vmatprep.subr.bf16.mxu0 %v12155_v9  ;;  %8862 = vmatprep.subr.bf16.mxu1 %v12157_v54  ;;  %v12267_v7 = vpack.c.bf16 %v2752_v26, %v2748_v20  ;;  %v2747_v9 = vld [vmem:[#allocation14] sm:$0xff]  ;;  %v2782_v20 = vld [vmem:[#allocation14 + $0x118] sm:$0xff] }
 0x3b6   :  { %v2751_v54 = vld [vmem:[#allocation14 + $0x20] sm:$0xff] }
 0x3b8   :  { %v10878_v42 = vpop.eup %10877  ;;  %8832 = vmatpush1.bf16.msra.mxu0 %v12161_v61  ;;  %8864 = vmatpush1.bf16.msra.mxu1 %v12163_v63  ;;  %v12269_v61 = vpack.c.bf16 %v2754_v18, %v2750_v2  ;;  %v12271_v63 = vpack.c.bf16 %v2751_v54, %v2747_v9  ;;  %v2786_v2 = vld [vmem:[#allocation14 + $0x138] sm:$0xff]  ;;  %v2779_v18 = vld [vmem:[#allocation14 + $0x100] sm:$0xff] }
 0x3b9   :  { %v12261_v50 = vmul.f32 %v10878_v42, %v2251_v25  ;;  %8866 = vmatprep.subr.bf16.mxu0 %v12267_v7  ;;  %v2780_v25 = vld [vmem:[#allocation14 + $0x108] sm:$0xff]  ;;  %v2783_v9 = vld [vmem:[#allocation14 + $0x120] sm:$0xff]  ;;  %v12317_v54 = vpack.c.bf16 %v2786_v2, %v2782_v20 }
 0x3ba   :  { %8898 = vmatprep.subr.bf16.mxu1 %v12269_v61  ;;  %v2784_v42 = vld [vmem:[#allocation14 + $0x128] sm:$0xff]  ;;  %v12319_v40 = vpack.c.bf16 %v2783_v9, %v2779_v18  ;;  %v2806_v18 = vld [vmem:[#allocation14 + $0x1d8] sm:$0xff] }
 0x3bb   :  { %14164 = vst [vmem:[#allocation42_spill] sm:$0xff] %v12261_v50  ;;  %2636 = vmatmul.mubr.f32.vlgmr.msra.gmra.mrb[24].mxu0 %v12261_v50  ;;  %2707 = vmatmul.mubr.f32.vlgmr.msra.gmra.mrb[24].mxu1 %v12261_v50  ;;  %v12315_v26 = vpack.c.bf16 %v2784_v42, %v2780_v25  ;;  %v2801_v25 = vld [vmem:[#allocation14 + $0x1b0] sm:$0xff]  ;;  %v2804_v20 = vld [vmem:[#allocation14 + $0x1c8] sm:$0xff]  ;;  %v12353_v48 = vpack.c.bf16 %v2810_v21, %v2806_v18 }
 0x3bc   :  { %2875 = vmatprep.mubr.f32.mxu0 %v14101_v19  ;;  %2946 = vmatprep.mubr.f32.mxu1 %v14101_v19  ;;  %v12346_v42 = vpack.c.bf16 %v2801_v25, %v2797_v62  ;;  %v2808_v2 = vld [vmem:[#allocation14 + $0x1e8] sm:$0xff] }
 0x3bd   :  { %8868 = vmatpush1.bf16.msra.mxu0 %v12271_v63  ;;  %8900 = vmatpush1.bf16.msra.mxu1 %v12274_v17  ;;  %v12351_v9 = vpack.c.bf16 %v2808_v2, %v2804_v20 }
 0x3be   :  { %8870 = vmatprep.subr.bf16.mxu0 %v12279_v59  ;;  %8902 = vmatprep.subr.bf16.mxu1 %v12281_v8 }
 0x3c1   :  { %8872 = vmatpush1.bf16.msra.mxu0 %v12283_v28  ;;  %8904 = vmatpush1.bf16.msra.mxu1 %v12286_v57 }
 0x3c2   :  { %8874 = vmatprep.subr.bf16.mxu0 %v12291_v1  ;;  %8906 = vmatprep.subr.bf16.mxu1 %v12293_v6 }
 0x3c5   :  { %8876 = vmatpush1.bf16.msra.mxu0 %v12295_v0  ;;  %8908 = vmatpush1.bf16.msra.mxu1 %v12298_v30 }
 0x3c6   :  { %8878 = vmatprep.subr.bf16.mxu0 %v12303_v22  ;;  %8910 = vmatprep.subr.bf16.mxu1 %v12305_v60 }
 0x3c9   :  { %8880 = vmatpush1.bf16.msra.mxu0 %v12307_v29  ;;  %8912 = vmatpush1.bf16.msra.mxu1 %v12310_v38 }
 0x3ca   :  { %8882 = vmatprep.subr.bf16.mxu0 %v12315_v26  ;;  %8914 = vmatprep.subr.bf16.mxu1 %v12317_v54 }
 0x3cd   :  { %8884 = vmatpush1.bf16.msra.mxu0 %v12319_v40  ;;  %8916 = vmatpush1.bf16.msra.mxu1 %v12322_v44 }
 0x3ce   :  { %8886 = vmatprep.subr.bf16.mxu0 %v12327_v34  ;;  %8918 = vmatprep.subr.bf16.mxu1 %v12329_v36 }
 0x3d1   :  { %8888 = vmatpush1.bf16.msra.mxu0 %v12331_v33  ;;  %8920 = vmatpush1.bf16.msra.mxu1 %v12334_v56 }
 0x3d2   :  { %8890 = vmatprep.subr.bf16.mxu0 %v12339_v43  ;;  %8922 = vmatprep.subr.bf16.mxu1 %v12341_v24 }
 0x3d5   :  { %8892 = vmatpush1.bf16.msra.mxu0 %v12343_v31  ;;  %8924 = vmatpush1.bf16.msra.mxu1 %v12346_v42 }
 0x3d6   :  { %8894 = vmatprep.subr.bf16.mxu0 %v12351_v9  ;;  %8926 = vmatprep.subr.bf16.mxu1 %v12353_v48 }
 0x3d9   :  { %8896 = vmatpush1.bf16.msra.mxu0 %v12355_v49  ;;  %8928 = vmatpush1.bf16.msra.mxu1 %v12358_v32 }
 0x3da   :  { %8930 = vmatprep.subr.bf16.mxu0 %v12363_v4  ;;  %8962 = vmatprep.subr.bf16.mxu1 %v12365_v5  ;;  %v2989_v5 = vld [vmem:[#allocation15 + $0x50] sm:$0xff] }
 0x3db   :  { %v2993_v4 = vld [vmem:[#allocation15 + $0x70] sm:$0xff] }
 0x46e   :  { %v2402_v45 = vpop.f32.mrb[6].mxu0  ;;  %v2473_v37 = vpop.f32.mrb[6].mxu1 }
 0x46f   :  { %v10567_v62 = vadd.f32 %v2402_v45, %v14142_v13  ;;  %v2404_v25 = vpop.f32.mrb[7].mxu0  ;;  %v2475_v20 = vpop.f32.mrb[7].mxu1  ;;  %v10583_v55 = vadd.f32 %v2473_v37, %v14144_v53  ;;  %v2991_v53 = vld [vmem:[#allocation15 + $0x60] sm:$0xff] }
 0x470   :  { %v10568_v2 = vadd.f32 %v2404_v25, %v14143_v58  ;;  %v10584_v41 = vadd.f32 %v2475_v20, %v14145_v10  ;;  %v2983_v20 = vld [vmem:[#allocation15 + $0x20] sm:$0xff] }
 0x471   :  { %v2482_v18 = vmul.f32 0.5, %v10567_v62  ;;  %v2987_v10 = vld [vmem:[#allocation15 + $0x40] sm:$0xff] }
 0x472   :  { %v2486_v21 = vmul.f32 0.5, %v10568_v2  ;;  %v2491_v27 = vmul.f32 0.5, %v10584_v41  ;;  %v2981_v41 = vld [vmem:[#allocation15 + $0x10] sm:$0xff] }
 0x473   :  { %10879 = vtanh.f32 %v2482_v18  ;;  %v2979_v18 = vld [vmem:[#allocation15] sm:$0xff] }
 0x474   :  { %10881 = vtanh.f32 %v2486_v21 }
 0x475   :  { %10883 = vtanh.f32 %v10583_v55 }
 0x476   :  { %10885 = vtanh.f32 %v2491_v27 }
 0x47d   :  { %v10880_v15 = vpop.eup %10879 }
 0x47e   :  { %v10882_v16 = vpop.eup %10881  ;;  %v2484_v52 = vmul.f32 0.5, %v10880_v15  ;;  %v2985_v15 = vld [vmem:[#allocation15 + $0x30] sm:$0xff] }
 0x47f   :  { %v2488_v3 = vmul.f32 0.5, %v10882_v16  ;;  %v10884_v45 = vpop.eup %10883  ;;  %v2988_v16 = vld [vmem:[#allocation15 + $0x48] sm:$0xff] }
 0x480   :  { %v2485_v14 = vadd.f32 0.5, %v2484_v52  ;;  %v10886_v37 = vpop.eup %10885 }
 0x481   :  { %v2489_v23 = vadd.f32 0.5, %v2488_v3  ;;  %v2493_v2 = vmul.f32 0.5, %v10886_v37  ;;  %v12379_v37 = vpack.c.bf16 %v2983_v20, %v2979_v18  ;;  %v2998_v18 = vld [vmem:[#allocation15 + $0x98] sm:$0xff] }
 0x482   :  { %v2496_v50 = vmul.f32 %v10884_v45, %v2485_v14  ;;  %v2992_v14 = vld [vmem:[#allocation15 + $0x68] sm:$0xff]  ;;  %v2990_v45 = vld [vmem:[#allocation15 + $0x58] sm:$0xff] }
 0x483   :  { %v2495_v62 = vmul.f32 %v2489_v23, %v12214_v47  ;;  %v2994_v23 = vld [vmem:[#allocation15 + $0x78] sm:$0xff]  ;;  %v2494_v47 = vadd.f32 0.5, %v2493_v2  ;;  %v2996_v2 = vld [vmem:[#allocation15 + $0x88] sm:$0xff] }
 0x484   :  { %v3002_v20 = vld [vmem:[#allocation15 + $0xb8] sm:$0xff] }
 0x485   :  { %v12374_v25 = vadd.f32 %v2496_v50, %v2495_v62 }
 0x487   :  { %14167 = vst [vmem:[#allocation46_spill] sm:$0xff] %v12374_v25  ;;  %10887 = vtanh.f32 %v12374_v25  ;;  %v12381_v25 = vpack.c.bf16 %v2985_v15, %v2981_v41  ;;  %v12394_v41 = vpack.c.bf16 %v2991_v53, %v2987_v10  ;;  %v12396_v15 = vpack.c.bf16 %v2993_v4, %v2989_v5  ;;  %v3008_v53 = vld [vmem:[#allocation15 + $0xe8] sm:$0xff]  ;;  %v3006_v10 = vld [vmem:[#allocation15 + $0xd8] sm:$0xff] }
 0x488   :  { %v3010_v4 = vld [vmem:[#allocation15 + $0xf8] sm:$0xff] }
 0x489   :  { %14171 = vst [vmem:[#allocation58_spill] sm:$0xff] %v12394_v41  ;;  %14172 = vst [vmem:[#allocation59_spill] sm:$0xff] %v12396_v15 }
 0x48e   :  { %v2637_v21 = vpop.f32.mrb[24].mxu0  ;;  %v2708_v55 = vpop.f32.mrb[24].mxu1 }
 0x48f   :  { %v10601_v27 = vadd.f32 %v2637_v21, %v14147_v11  ;;  %v2639_v52 = vpop.f32.mrb[25].mxu0  ;;  %v2710_v3 = vpop.f32.mrb[25].mxu1  ;;  %v12385_v21 = vpack.c.bf16 %v2992_v14, %v2988_v16  ;;  %v12387_v11 = vpack.c.bf16 %v2994_v23, %v2990_v45  ;;  %v2995_v16 = vld [vmem:[#allocation15 + $0x80] sm:$0xff]  ;;  %v2997_v14 = vld [vmem:[#allocation15 + $0x90] sm:$0xff]  ;;  %v3004_v23 = vld [vmem:[#allocation15 + $0xc8] sm:$0xff] }
 0x490   :  { %v10602_v50 = vadd.f32 %v2639_v52, %v11895_v35  ;;  %v10617_v52 = vadd.f32 %v2708_v55, %v11900_v46  ;;  %v3001_v45 = vld [vmem:[#allocation15 + $0xb0] sm:$0xff] }
 0x491   :  { %v10888_v62 = vpop.eup %10887  ;;  %v2717_v39 = vmul.f32 0.5, %v10601_v27  ;;  %14169 = vst [vmem:[#allocation48_spill] sm:$0xff] %v12385_v21  ;;  %14170 = vst [vmem:[#allocation49_spill] sm:$0xff] %v12387_v11  ;;  %v3000_v27 = vld [vmem:[#allocation15 + $0xa8] sm:$0xff] }
 0x492   :  { %v12383_v58 = vmul.f32 %v10888_v62, %v2494_v47  ;;  %v2721_v13 = vmul.f32 0.5, %v10602_v50  ;;  %v12400_v55 = vpack.c.bf16 %v3000_v27, %v2996_v2  ;;  %v10618_v47 = vadd.f32 %v2710_v3, %v14151_v12  ;;  %v3003_v62 = vld [vmem:[#allocation15 + $0xc0] sm:$0xff]  ;;  %v3005_v27 = vld [vmem:[#allocation15 + $0xd0] sm:$0xff]  ;;  %v3020_v12 = vld [vmem:[#allocation15 + $0x148] sm:$0xff] }
 0x493   :  { %10889 = vtanh.f32 %v2717_v39  ;;  %v2999_v39 = vld [vmem:[#allocation15 + $0xa0] sm:$0xff]  ;;  %v12411_v50 = vpack.c.bf16 %v3001_v45, %v2997_v14  ;;  %v12415_v3 = vpack.c.bf16 %v3008_v53, %v3004_v23 }
 0x494   :  { %14168 = vst [vmem:[#allocation47_spill] sm:$0xff] %v12383_v58  ;;  %10891 = vtanh.f32 %v2721_v13  ;;  %2876 = vmatmul.mubr.f32.vlgmr.msra.gmra.mrb[8].mxu0 %v12383_v58  ;;  %2947 = vmatmul.mubr.f32.vlgmr.msra.gmra.mrb[8].mxu1 %v12383_v58  ;;  %14173 = vst [vmem:[#allocation60_spill] sm:$0xff] %v12400_v55  ;;  %v12402_v13 = vpack.c.bf16 %v3002_v20, %v2998_v18  ;;  %v12409_v5 = vpack.c.bf16 %v2999_v39, %v2995_v16  ;;  %v3007_v2 = vld [vmem:[#allocation15 + $0xe0] sm:$0xff]  ;;  %v3009_v18 = vld [vmem:[#allocation15 + $0xf0] sm:$0xff] }
 0x495   :  { %8932 = vmatpush1.bf16.msra.mxu0 %v12379_v37  ;;  %8964 = vmatpush1.bf16.msra.mxu1 %v12381_v25  ;;  %10893 = vtanh.f32 %v10617_v52  ;;  %14176 = vst [vmem:[#allocation63_spill] sm:$0xff] %v12411_v50  ;;  %v12417_v52 = vpack.c.bf16 %v3010_v4, %v3006_v10  ;;  %v3012_v20 = vld [vmem:[#allocation15 + $0x108] sm:$0xff]  ;;  %v2726_v58 = vmul.f32 0.5, %v10618_v47  ;;  %v3018_v16 = vld [vmem:[#allocation15 + $0x138] sm:$0xff]  ;;  %v12421_v14 = vpack.c.bf16 %v3007_v2, %v3003_v62  ;;  %v3011_v23 = vld [vmem:[#allocation15 + $0x100] sm:$0xff] }
 0x496   :  { %8934 = vmatprep.subr.bf16.mxu0 %v12385_v21  ;;  %8966 = vmatprep.subr.bf16.mxu1 %v12387_v11  ;;  %14174 = vst [vmem:[#allocation61_spill] sm:$0xff] %v12402_v13  ;;  %14175 = vst [vmem:[#allocation62_spill] sm:$0xff] %v12409_v5  ;;  %v12423_v45 = vpack.c.bf16 %v3009_v18, %v3005_v27  ;;  %v3015_v53 = vld [vmem:[#allocation15 + $0x120] sm:$0xff]  ;;  %v3024_v62 = vld [vmem:[#allocation15 + $0x168] sm:$0xff] }
 0x497   :  { %3107 = vmatprep.mubr.f32.mxu0 %v14101_v19  ;;  %3178 = vmatprep.mubr.f32.mxu1 %v14101_v19  ;;  %14177 = vst [vmem:[#allocation64_spill] sm:$0xff] %v12421_v14  ;;  %10895 = vtanh.f32 %v2726_v58  ;;  %v3022_v2 = vld [vmem:[#allocation15 + $0x158] sm:$0xff]  ;;  %v12439_v58 = vpack.c.bf16 %v3024_v62, %v3020_v12  ;;  %v3027_v62 = vld [vmem:[#allocation15 + $0x180] sm:$0xff] }
 0x498   :  { %14178 = vst [vmem:[#allocation65_spill] sm:$0xff] %v12423_v45  ;;  %v3026_v27 = vld [vmem:[#allocation15 + $0x178] sm:$0xff] }
 0x499   :  { %8936 = vmatpush1.bf16.msra.mxu0 %v12394_v41  ;;  %8968 = vmatpush1.bf16.msra.mxu1 %v12396_v15  ;;  %v3016_v41 = vld [vmem:[#allocation15 + $0x128] sm:$0xff]  ;;  %v3014_v15 = vld [vmem:[#allocation15 + $0x118] sm:$0xff]  ;;  %14181 = vst [vmem:[#allocation69_spill] sm:$0xff] %v12439_v58 }
 0x49a   :  { %8938 = vmatprep.subr.bf16.mxu0 %v12400_v55  ;;  %8970 = vmatprep.subr.bf16.mxu1 %v12402_v13  ;;  %v12427_v47 = vpack.c.bf16 %v3016_v41, %v3012_v20  ;;  %v12429_v13 = vpack.c.bf16 %v3018_v16, %v3014_v15  ;;  %v3013_v55 = vld [vmem:[#allocation15 + $0x110] sm:$0xff]  ;;  %v3019_v15 = vld [vmem:[#allocation15 + $0x140] sm:$0xff] }
 0x49b   :  { %v3023_v20 = vld [vmem:[#allocation15 + $0x160] sm:$0xff] }
 0x49d   :  { %v10890_v39 = vpop.eup %10889  ;;  %8940 = vmatpush1.bf16.msra.mxu0 %v12409_v5  ;;  %8972 = vmatpush1.bf16.msra.mxu1 %v12411_v50  ;;  %v3017_v5 = vld [vmem:[#allocation15 + $0x130] sm:$0xff] }
 0x49e   :  { %v10892_v10 = vpop.eup %10891  ;;  %v2719_v4 = vmul.f32 0.5, %v10890_v39  ;;  %8942 = vmatprep.subr.bf16.mxu0 %v12415_v3  ;;  %8974 = vmatprep.subr.bf16.mxu1 %v12417_v52  ;;  %v12433_v39 = vpack.c.bf16 %v3015_v53, %v3011_v23  ;;  %v12435_v41 = vpack.c.bf16 %v3017_v5, %v3013_v55  ;;  %v3032_v23 = vld [vmem:[#allocation15 + $0x1a8] sm:$0xff]  ;;  %v3030_v53 = vld [vmem:[#allocation15 + $0x198] sm:$0xff] }
 0x49f   :  { %v2723_v50 = vmul.f32 0.5, %v10892_v10  ;;  %v10894_v11 = vpop.eup %10893  ;;  %v12441_v10 = vpack.c.bf16 %v3026_v27, %v3022_v2  ;;  %v3034_v55 = vld [vmem:[#allocation15 + $0x1b8] sm:$0xff]  ;;  %v3031_v2 = vld [vmem:[#allocation15 + $0x1a0] sm:$0xff]  ;;  %v3033_v27 = vld [vmem:[#allocation15 + $0x1b0] sm:$0xff] }
 0x4a0   :  { %v2720_v18 = vadd.f32 0.5, %v2719_v4  ;;  %14179 = vst [vmem:[#allocation66_spill] sm:$0xff] %v12433_v39  ;;  %14180 = vst [vmem:[#allocation68_spill] sm:$0xff] %v12435_v41  ;;  %v3025_v4 = vld [vmem:[#allocation15 + $0x170] sm:$0xff] }
 0x4a1   :  { %v2724_v21 = vadd.f32 0.5, %v2723_v50  ;;  %8944 = vmatpush1.bf16.msra.mxu0 %v12421_v14  ;;  %8976 = vmatpush1.bf16.msra.mxu1 %v12423_v45  ;;  %14182 = vst [vmem:[#allocation70_spill] sm:$0xff] %v12441_v10  ;;  %v3021_v50 = vld [vmem:[#allocation15 + $0x150] sm:$0xff]  ;;  %v3028_v14 = vld [vmem:[#allocation15 + $0x188] sm:$0xff] }
 0x4a2   :  { %v2731_v16 = vmul.f32 %v10894_v11, %v2720_v18  ;;  %8946 = vmatprep.subr.bf16.mxu0 %v12427_v47  ;;  %8978 = vmatprep.subr.bf16.mxu1 %v12429_v13  ;;  %v12448_v11 = vpack.c.bf16 %v3023_v20, %v3019_v15  ;;  %v12450_v12 = vpack.c.bf16 %v3025_v4, %v3021_v50  ;;  %v3036_v18 = vld [vmem:[#allocation15 + $0x1c8] sm:$0xff]  ;;  %v3038_v15 = vld [vmem:[#allocation15 + $0x1d8] sm:$0xff]  ;;  %v10896_v50 = vpop.eup %10895 }
 0x4a3   :  { %v2730_v45 = vmul.f32 %v2724_v21, %v12244_v51  ;;  %v12454_v51 = vpack.c.bf16 %v3032_v23, %v3028_v14  ;;  %v12456_v21 = vpack.c.bf16 %v3034_v55, %v3030_v53  ;;  %v3042_v20 = vld [vmem:[#allocation15 + $0x1f8] sm:$0xff]  ;;  %v12461_v4 = vpack.c.bf16 %v3031_v2, %v3027_v62  ;;  %v3035_v14 = vld [vmem:[#allocation15 + $0x1c0] sm:$0xff] }
 0x4a4   :  { %v12469_v53 = vpack.c.bf16 %v3042_v20, %v3038_v15  ;;  %v3039_v55 = vld [vmem:[#allocation15 + $0x1e0] sm:$0xff] }
 0x4a5   :  { %v12444_v5 = vadd.f32 %v2731_v16, %v2730_v45  ;;  %8948 = vmatpush1.bf16.msra.mxu0 %v12433_v39  ;;  %8980 = vmatpush1.bf16.msra.mxu1 %v12435_v41  ;;  %v3029_v45 = vld [vmem:[#allocation15 + $0x190] sm:$0xff]  ;;  %v3040_v16 = vld [vmem:[#allocation15 + $0x1e8] sm:$0xff]  ;;  %v2728_v39 = vmul.f32 0.5, %v10896_v50  ;;  %v12473_v62 = vpack.c.bf16 %v3039_v55, %v3035_v14 }
 0x4a6   :  { %8950 = vmatprep.subr.bf16.mxu0 %v12439_v58  ;;  %8982 = vmatprep.subr.bf16.mxu1 %v12441_v10  ;;  %v12463_v10 = vpack.c.bf16 %v3033_v27, %v3029_v45  ;;  %v12467_v23 = vpack.c.bf16 %v3040_v16, %v3036_v18  ;;  %v3037_v58 = vld [vmem:[#allocation15 + $0x1d0] sm:$0xff] }
 0x4a7   :  { %10897 = vtanh.f32 %v12444_v5  ;;  %v3041_v41 = vld [vmem:[#allocation15 + $0x1f0] sm:$0xff]  ;;  %v2729_v45 = vadd.f32 0.5, %v2728_v39  ;;  %v14191_v39 = vld [vmem:[#allocation55_spill] sm:$0xff] }
 0x4a8   :  { %v12475_v2 = vpack.c.bf16 %v3041_v41, %v3037_v58 }
 0x4a9   :  { %8952 = vmatpush1.bf16.msra.mxu0 %v12448_v11  ;;  %8984 = vmatpush1.bf16.msra.mxu1 %v12450_v12 }
 0x4aa   :  { %8954 = vmatprep.subr.bf16.mxu0 %v12454_v51  ;;  %8986 = vmatprep.subr.bf16.mxu1 %v12456_v21 }
 0x4ad   :  { %8956 = vmatpush1.bf16.msra.mxu0 %v12461_v4  ;;  %8988 = vmatpush1.bf16.msra.mxu1 %v12463_v10 }
 0x4ae   :  { %8958 = vmatprep.subr.bf16.mxu0 %v12467_v23  ;;  %8990 = vmatprep.subr.bf16.mxu1 %v12469_v53 }
 0x4b1   :  { %v10898_v27 = vpop.eup %10897  ;;  %8960 = vmatpush1.bf16.msra.mxu0 %v12473_v62  ;;  %8992 = vmatpush1.bf16.msra.mxu1 %v12475_v2 }
 0x4b2   :  { %v12481_v18 = vmul.f32 %v10898_v27, %v2729_v45  ;;  %8994 = vmatprep.subr.bf16.mxu0 %v12267_v7  ;;  %9026 = vmatprep.subr.bf16.mxu1 %v12269_v61  ;;  %v14184_v7 = vld [vmem:[#allocation43_spill] sm:$0xff]  ;;  %v14185_v61 = vld [vmem:[#allocation45_spill] sm:$0xff] }
 0x4b4   :  { %14183 = vst [vmem:[#allocation71_spill] sm:$0xff] %v12481_v18  ;;  %3108 = vmatmul.mubr.f32.vlgmr.msra.gmra.mrb[22].mxu0 %v12481_v18  ;;  %3179 = vmatmul.mubr.f32.vlgmr.msra.gmra.mrb[22].mxu1 %v12481_v18 }
 0x4b5   :  { %8996 = vmatpush1.bf16.msra.mxu0 %v12271_v63  ;;  %9028 = vmatpush1.bf16.msra.mxu1 %v12274_v17 }
 0x4b6   :  { %8998 = vmatprep.subr.bf16.mxu0 %v12279_v59  ;;  %9030 = vmatprep.subr.bf16.mxu1 %v12281_v8  ;;  %v14186_v59 = vld [vmem:[#allocation51_spill] sm:$0xff] }
 0x4b7   :  { %3341 = vmatprep.mubr.f32.mxu0 %v14101_v19  ;;  %3412 = vmatprep.mubr.f32.mxu1 %v14101_v19 }
 0x4b9   :  { %9000 = vmatpush1.bf16.msra.mxu0 %v12283_v28  ;;  %9032 = vmatpush1.bf16.msra.mxu1 %v12286_v57 }
 0x4ba   :  { %9002 = vmatprep.subr.bf16.mxu0 %v12291_v1  ;;  %9034 = vmatprep.subr.bf16.mxu1 %v12293_v6  ;;  %v14187_v1 = vld [vmem:[#allocation52_spill] sm:$0xff] }
 0x4bd   :  { %9004 = vmatpush1.bf16.msra.mxu0 %v12295_v0  ;;  %9036 = vmatpush1.bf16.msra.mxu1 %v12298_v30 }
 0x4be   :  { %9006 = vmatprep.subr.bf16.mxu0 %v12303_v22  ;;  %9038 = vmatprep.subr.bf16.mxu1 %v12305_v60  ;;  %v14188_v22 = vld [vmem:[#allocation53_spill] sm:$0xff] }
 0x4c1   :  { %9008 = vmatpush1.bf16.msra.mxu0 %v12307_v29  ;;  %9040 = vmatpush1.bf16.msra.mxu1 %v12310_v38  ;;  %v14189_v29 = vld [vmem:[#allocation54_spill] sm:$0xff] }
 0x4c2   :  { %9010 = vmatprep.subr.bf16.mxu0 %v12315_v26  ;;  %9042 = vmatprep.subr.bf16.mxu1 %v12317_v54 }
 0x4c5   :  { %9012 = vmatpush1.bf16.msra.mxu0 %v12319_v40  ;;  %9044 = vmatpush1.bf16.msra.mxu1 %v12322_v44 }
 0x4c6   :  { %9014 = vmatprep.subr.bf16.mxu0 %v12327_v34  ;;  %9046 = vmatprep.subr.bf16.mxu1 %v12329_v36 }
 0x4c9   :  { %9016 = vmatpush1.bf16.msra.mxu0 %v12331_v33  ;;  %9048 = vmatpush1.bf16.msra.mxu1 %v12334_v56 }
 0x4ca   :  { %9018 = vmatprep.subr.bf16.mxu0 %v12339_v43  ;;  %9050 = vmatprep.subr.bf16.mxu1 %v12341_v24  ;;  %v14190_v24 = vld [vmem:[#allocation46_spill] sm:$0xff] }
 0x4cd   :  { %9020 = vmatpush1.bf16.msra.mxu0 %v12343_v31  ;;  %9052 = vmatpush1.bf16.msra.mxu1 %v12346_v42 }
 0x4ce   :  { %9022 = vmatprep.subr.bf16.mxu0 %v12351_v9  ;;  %9054 = vmatprep.subr.bf16.mxu1 %v12353_v48 }
 0x4d1   :  { %9024 = vmatpush1.bf16.msra.mxu0 %v12355_v49  ;;  %9056 = vmatpush1.bf16.msra.mxu1 %v12358_v32 }
 0x4d2   :  { %9058 = vmatprep.subr.bf16.mxu0 %v14184_v7  ;;  %9090 = vmatprep.subr.bf16.mxu1 %v14185_v61  ;;  %v14193_v7 = vld [vmem:[#allocation48_spill] sm:$0xff]  ;;  %v14194_v61 = vld [vmem:[#allocation49_spill] sm:$0xff] }
 0x567   :  { %v2877_v63 = vpop.f32.mrb[8].mxu0  ;;  %v2948_v17 = vpop.f32.mrb[8].mxu1 }
 0x568   :  { %v10569_v8 = vadd.f32 %v2877_v63, %v14186_v59  ;;  %v2879_v28 = vpop.f32.mrb[9].mxu0  ;;  %v2950_v57 = vpop.f32.mrb[9].mxu1  ;;  %v10585_v60 = vadd.f32 %v2948_v17, %v14188_v22  ;;  %v14195_v63 = vld [vmem:[#allocation57_spill] sm:$0xff] }
 0x569   :  { %v10570_v6 = vadd.f32 %v2879_v28, %v14187_v1  ;;  %v10586_v38 = vadd.f32 %v2950_v57, %v14189_v29  ;;  %v14197_v28 = vld [vmem:[#allocation59_spill] sm:$0xff]  ;;  %v14198_v57 = vld [vmem:[#allocation60_spill] sm:$0xff] }
 0x56a   :  { %v2957_v0 = vmul.f32 0.5, %v10569_v8  ;;  %v14196_v8 = vld [vmem:[#allocation58_spill] sm:$0xff] }
 0x56b   :  { %v2961_v30 = vmul.f32 0.5, %v10570_v6  ;;  %v2966_v26 = vmul.f32 0.5, %v10586_v38 }
 0x56c   :  { %10899 = vtanh.f32 %v2957_v0  ;;  %v14200_v0 = vld [vmem:[#allocation62_spill] sm:$0xff] }
 0x56d   :  { %10901 = vtanh.f32 %v2961_v30  ;;  %v14201_v30 = vld [vmem:[#allocation63_spill] sm:$0xff] }
 0x56e   :  { %10903 = vtanh.f32 %v10585_v60 }
 0x56f   :  { %10905 = vtanh.f32 %v2966_v26 }
 0x576   :  { %v10900_v54 = vpop.eup %10899 }
 0x577   :  { %v10902_v40 = vpop.eup %10901  ;;  %v2959_v44 = vmul.f32 0.5, %v10900_v54 }
 0x578   :  { %v2963_v34 = vmul.f32 0.5, %v10902_v40  ;;  %v10904_v33 = vpop.eup %10903 }
 0x579   :  { %v2960_v36 = vadd.f32 0.5, %v2959_v44  ;;  %v10906_v9 = vpop.eup %10905 }
 0x57a   :  { %v2964_v56 = vadd.f32 0.5, %v2963_v34  ;;  %v2968_v48 = vmul.f32 0.5, %v10906_v9  ;;  %v14202_v34 = vld [vmem:[#allocation64_spill] sm:$0xff] }
 0x57b   :  { %v2971_v43 = vmul.f32 %v10904_v33, %v2960_v36  ;;  %v14203_v36 = vld [vmem:[#allocation65_spill] sm:$0xff] }
 0x57c   :  { %v2970_v31 = vmul.f32 %v2964_v56, %v14190_v24  ;;  %v2969_v15 = vadd.f32 0.5, %v2968_v48  ;;  %v14206_v24 = vld [vmem:[#allocation69_spill] sm:$0xff] }
 0x57d   :  { %v3681_v48 = vld [vmem:[#allocation14 + $0x10] sm:$0xff] }
 0x57e   :  { %v12526_v42 = vadd.f32 %v2971_v43, %v2970_v31  ;;  %v14207_v31 = vld [vmem:[#allocation70_spill] sm:$0xff] }
 0x580   :  { %10907 = vtanh.f32 %v12526_v42 }
 0x587   :  { %v3109_v49 = vpop.f32.mrb[22].mxu0  ;;  %v3180_v32 = vpop.f32.mrb[22].mxu1 }
 0x588   :  { %v10599_v41 = vadd.f32 %v3109_v49, %v14191_v39  ;;  %v3111_v58 = vpop.f32.mrb[23].mxu0  ;;  %v3182_v16 = vpop.f32.mrb[23].mxu1  ;;  %v10615_v27 = vadd.f32 %v3180_v32, %v11900_v46  ;;  %v3685_v49 = vld [vmem:[#allocation14 + $0x30] sm:$0xff] }
 0x589   :  { %v10600_v20 = vadd.f32 %v3111_v58, %v11895_v35  ;;  %v10616_v17 = vadd.f32 %v3182_v16, %v14195_v63  ;;  %v12586_v32 = vpack.c.bf16 %v3685_v49, %v3681_v48  ;;  %v3692_v58 = vld [vmem:[#allocation14 + $0x68] sm:$0xff]  ;;  %v3690_v16 = vld [vmem:[#allocation14 + $0x58] sm:$0xff]  ;;  %v3713_v49 = vld [vmem:[#allocation14 + $0x110] sm:$0xff] }
 0x58a   :  { %v10908_v50 = vpop.eup %10907  ;;  %v3189_v14 = vmul.f32 0.5, %v10599_v41  ;;  %v3688_v41 = vld [vmem:[#allocation14 + $0x48] sm:$0xff] }
 0x58b   :  { %v12531_v55 = vmul.f32 %v10908_v50, %v2969_v15  ;;  %v3193_v45 = vmul.f32 0.5, %v10600_v20  ;;  %v12591_v15 = vpack.c.bf16 %v3692_v58, %v3688_v41  ;;  %v3694_v20 = vld [vmem:[#allocation14 + $0x78] sm:$0xff]  ;;  %v3687_v50 = vld [vmem:[#allocation14 + $0x40] sm:$0xff]  ;;  %v3717_v41 = vld [vmem:[#allocation14 + $0x130] sm:$0xff] }
 0x58c   :  { %10909 = vtanh.f32 %v3189_v14  ;;  %v3691_v14 = vld [vmem:[#allocation14 + $0x60] sm:$0xff]  ;;  %v12634_v58 = vpack.c.bf16 %v3717_v41, %v3713_v49  ;;  %v3742_v49 = vld [vmem:[#allocation14 + $0x1f8] sm:$0xff] }
 0x58d   :  { %14192 = vst [vmem:[#allocation43_spill] sm:$0xff] %v12531_v55  ;;  %10911 = vtanh.f32 %v3193_v45  ;;  %3342 = vmatmul.mubr.f32.vlgmr.msra.gmra.mrb[10].mxu0 %v12531_v55  ;;  %3413 = vmatmul.mubr.f32.vlgmr.msra.gmra.mrb[10].mxu1 %v12531_v55  ;;  %v12593_v45 = vpack.c.bf16 %v3694_v20, %v3690_v16  ;;  %v3720_v16 = vld [vmem:[#allocation14 + $0x148] sm:$0xff]  ;;  %v3735_v41 = vld [vmem:[#allocation14 + $0x1c0] sm:$0xff] }
 0x58e   :  { %9060 = vmatpush1.bf16.msra.mxu0 %v12379_v37  ;;  %9092 = vmatpush1.bf16.msra.mxu1 %v12381_v25  ;;  %10913 = vtanh.f32 %v10615_v27  ;;  %v14199_v37 = vld [vmem:[#allocation61_spill] sm:$0xff]  ;;  %v3198_v25 = vmul.f32 0.5, %v10616_v17  ;;  %v12595_v27 = vpack.c.bf16 %v3691_v14, %v3687_v50  ;;  %v3724_v20 = vld [vmem:[#allocation14 + $0x168] sm:$0xff]  ;;  %v3722_v50 = vld [vmem:[#allocation14 + $0x158] sm:$0xff] }
 0x58f   :  { %9062 = vmatprep.subr.bf16.mxu0 %v14193_v7  ;;  %9094 = vmatprep.subr.bf16.mxu1 %v14194_v61  ;;  %v3689_v7 = vld [vmem:[#allocation14 + $0x50] sm:$0xff]  ;;  %v12639_v14 = vpack.c.bf16 %v3724_v20, %v3720_v16  ;;  %v3739_v16 = vld [vmem:[#allocation14 + $0x1e0] sm:$0xff] }
 0x590   :  { %3573 = vmatprep.mubr.f32.mxu0 %v14101_v19  ;;  %3644 = vmatprep.mubr.f32.mxu1 %v14101_v19  ;;  %10915 = vtanh.f32 %v3198_v25  ;;  %v3693_v61 = vld [vmem:[#allocation14 + $0x70] sm:$0xff]  ;;  %v3702_v25 = vld [vmem:[#allocation14 + $0xb8] sm:$0xff] }
 0x591   :  { %v12598_v17 = vpack.c.bf16 %v3693_v61, %v3689_v7  ;;  %v3726_v7 = vld [vmem:[#allocation14 + $0x178] sm:$0xff]  ;;  %v3719_v61 = vld [vmem:[#allocation14 + $0x140] sm:$0xff] }
 0x592   :  { %9064 = vmatpush1.bf16.msra.mxu0 %v14196_v8  ;;  %9096 = vmatpush1.bf16.msra.mxu1 %v14197_v28  ;;  %v3696_v8 = vld [vmem:[#allocation14 + $0x88] sm:$0xff] }
 0x593   :  { %9066 = vmatprep.subr.bf16.mxu0 %v14198_v57  ;;  %9098 = vmatprep.subr.bf16.mxu1 %v14199_v37  ;;  %v3700_v28 = vld [vmem:[#allocation14 + $0xa8] sm:$0xff]  ;;  %v3698_v57 = vld [vmem:[#allocation14 + $0x98] sm:$0xff] }
 0x594   :  { %v12603_v37 = vpack.c.bf16 %v3700_v28, %v3696_v8  ;;  %v3723_v8 = vld [vmem:[#allocation14 + $0x160] sm:$0xff]  ;;  %v12641_v28 = vpack.c.bf16 %v3726_v7, %v3722_v50  ;;  %v12667_v50 = vpack.c.bf16 %v3739_v16, %v3735_v41  ;;  %v3737_v7 = vld [vmem:[#allocation14 + $0x1d0] sm:$0xff] }
 0x596   :  { %v10910_v6 = vpop.eup %10909  ;;  %9068 = vmatpush1.bf16.msra.mxu0 %v14200_v0  ;;  %9100 = vmatpush1.bf16.msra.mxu1 %v14201_v30  ;;  %v3699_v0 = vld [vmem:[#allocation14 + $0xa0] sm:$0xff]  ;;  %v12605_v30 = vpack.c.bf16 %v3702_v25, %v3698_v57  ;;  %v12643_v57 = vpack.c.bf16 %v3723_v8, %v3719_v61  ;;  %v3721_v25 = vld [vmem:[#allocation14 + $0x150] sm:$0xff] }
 0x597   :  { %v10912_v60 = vpop.eup %10911  ;;  %v3191_v38 = vmul.f32 0.5, %v10910_v6  ;;  %9070 = vmatprep.subr.bf16.mxu0 %v12415_v3  ;;  %9102 = vmatprep.subr.bf16.mxu1 %v12417_v52  ;;  %v14204_v3 = vld [vmem:[#allocation66_spill] sm:$0xff]  ;;  %v14205_v52 = vld [vmem:[#allocation68_spill] sm:$0xff]  ;;  %v3695_v6 = vld [vmem:[#allocation14 + $0x80] sm:$0xff] }
 0x598   :  { %v3195_v26 = vmul.f32 0.5, %v10912_v60  ;;  %v10914_v40 = vpop.eup %10913  ;;  %v12607_v60 = vpack.c.bf16 %v3699_v0, %v3695_v6  ;;  %v3725_v6 = vld [vmem:[#allocation14 + $0x170] sm:$0xff] }
 0x599   :  { %v3192_v54 = vadd.f32 0.5, %v3191_v38  ;;  %v3697_v38 = vld [vmem:[#allocation14 + $0x90] sm:$0xff]  ;;  %v12646_v0 = vpack.c.bf16 %v3725_v6, %v3721_v25  ;;  %v3912_v25 = vld [vmem:[#allocation15 + $0x8] sm:$0xff] }
 0x59a   :  { %v3196_v44 = vadd.f32 0.5, %v3195_v26  ;;  %9072 = vmatpush1.bf16.msra.mxu0 %v14202_v34  ;;  %9104 = vmatpush1.bf16.msra.mxu1 %v14203_v36  ;;  %v10916_v9 = vpop.eup %10915  ;;  %v3701_v26 = vld [vmem:[#allocation14 + $0xb0] sm:$0xff]  ;;  %v3706_v34 = vld [vmem:[#allocation14 + $0xd8] sm:$0xff]  ;;  %v3916_v6 = vld [vmem:[#allocation15 + $0x28] sm:$0xff] }
 0x59b   :  { %v3203_v33 = vmul.f32 %v10914_v40, %v3192_v54  ;;  %9074 = vmatprep.subr.bf16.mxu0 %v12427_v47  ;;  %9106 = vmatprep.subr.bf16.mxu1 %v12429_v13  ;;  %v3200_v13 = vmul.f32 0.5, %v10916_v9  ;;  %v12610_v54 = vpack.c.bf16 %v3701_v26, %v3697_v38  ;;  %v3704_v40 = vld [vmem:[#allocation14 + $0xc8] sm:$0xff]  ;;  %v3709_v9 = vld [vmem:[#allocation14 + $0xf0] sm:$0xff] }
 0x59c   :  { %v3202_v56 = vmul.f32 %v3196_v44, %v12444_v5  ;;  %v3708_v44 = vld [vmem:[#allocation14 + $0xe8] sm:$0xff]  ;;  %v3741_v61 = vld [vmem:[#allocation14 + $0x1f0] sm:$0xff] }
 0x59d   :  { %v3201_v47 = vadd.f32 0.5, %v3200_v13  ;;  %v12615_v36 = vpack.c.bf16 %v3708_v44, %v3704_v40  ;;  %v3728_v38 = vld [vmem:[#allocation14 + $0x188] sm:$0xff]  ;;  %v3730_v40 = vld [vmem:[#allocation14 + $0x198] sm:$0xff]  ;;  %v12670_v8 = vpack.c.bf16 %v3741_v61, %v3737_v7 }
 0x59e   :  { %v12556_v43 = vadd.f32 %v3203_v33, %v3202_v56  ;;  %9076 = vmatpush1.bf16.msra.mxu0 %v14204_v3  ;;  %9108 = vmatpush1.bf16.msra.mxu1 %v14205_v52  ;;  %v3710_v33 = vld [vmem:[#allocation14 + $0xf8] sm:$0xff]  ;;  %v3703_v56 = vld [vmem:[#allocation14 + $0xc0] sm:$0xff]  ;;  %v3732_v26 = vld [vmem:[#allocation14 + $0x1a8] sm:$0xff] }
 0x59f   :  { %9078 = vmatprep.subr.bf16.mxu0 %v14206_v24  ;;  %9110 = vmatprep.subr.bf16.mxu1 %v14207_v31  ;;  %v3707_v3 = vld [vmem:[#allocation14 + $0xe0] sm:$0xff]  ;;  %v12617_v52 = vpack.c.bf16 %v3710_v33, %v3706_v34  ;;  %v3705_v31 = vld [vmem:[#allocation14 + $0xd0] sm:$0xff]  ;;  %v12651_v44 = vpack.c.bf16 %v3732_v26, %v3728_v38  ;;  %v3734_v34 = vld [vmem:[#allocation14 + $0x1b8] sm:$0xff]  ;;  %v12675_v26 = vpack.c.bf16 %v3916_v6, %v3912_v25 }
 0x5a0   :  { %10917 = vtanh.f32 %v12556_v43  ;;  %v12619_v24 = vpack.c.bf16 %v3707_v3, %v3703_v56  ;;  %v12622_v13 = vpack.c.bf16 %v3709_v9, %v3705_v31  ;;  %v3727_v33 = vld [vmem:[#allocation14 + $0x180] sm:$0xff]  ;;  %v12653_v3 = vpack.c.bf16 %v3734_v34, %v3730_v40  ;;  %v3729_v9 = vld [vmem:[#allocation14 + $0x190] sm:$0xff]  ;;  %v3914_v38 = vld [vmem:[#allocation15 + $0x18] sm:$0xff] }
 0x5a1   :  { %v3731_v56 = vld [vmem:[#allocation14 + $0x1a0] sm:$0xff]  ;;  %14209 = vst [vmem:[#allocation46_spill] sm:$0xff] %v12675_v26  ;;  %v3918_v40 = vld [vmem:[#allocation15 + $0x38] sm:$0xff] }
 0x5a2   :  { %9080 = vmatpush1.bf16.msra.mxu0 %v12448_v11  ;;  %9112 = vmatpush1.bf16.msra.mxu1 %v12450_v12  ;;  %v3684_v12 = vld [vmem:[#allocation14 + $0x28] sm:$0xff]  ;;  %v12655_v31 = vpack.c.bf16 %v3731_v56, %v3727_v33  ;;  %v12677_v34 = vpack.c.bf16 %v3918_v40, %v3914_v38 }
 0x5a3   :  { %9082 = vmatprep.subr.bf16.mxu0 %v12454_v51  ;;  %9114 = vmatprep.subr.bf16.mxu1 %v12456_v21  ;;  %v3682_v51 = vld [vmem:[#allocation14 + $0x18] sm:$0xff] }
 0x5a4   :  { %14210 = vst [vmem:[#allocation48_spill] sm:$0xff] %v12677_v34 }
 0x5a6   :  { %9084 = vmatpush1.bf16.msra.mxu0 %v12461_v4  ;;  %9116 = vmatpush1.bf16.msra.mxu1 %v12463_v10  ;;  %v3680_v10 = vld [vmem:[#allocation14 + $0x8] sm:$0xff]  ;;  %v3686_v4 = vld [vmem:[#allocation14 + $0x38] sm:$0xff] }
 0x5a7   :  { %9086 = vmatprep.subr.bf16.mxu0 %v12467_v23  ;;  %9118 = vmatprep.subr.bf16.mxu1 %v12469_v53  ;;  %v12579_v21 = vpack.c.bf16 %v3684_v12, %v3680_v10  ;;  %v3679_v23 = vld [vmem:[#allocation14] sm:$0xff]  ;;  %v3714_v10 = vld [vmem:[#allocation14 + $0x118] sm:$0xff] }
 0x5a8   :  { %v3683_v53 = vld [vmem:[#allocation14 + $0x20] sm:$0xff] }
 0x5aa   :  { %v10918_v5 = vpop.eup %10917  ;;  %9088 = vmatpush1.bf16.msra.mxu0 %v12473_v62  ;;  %9120 = vmatpush1.bf16.msra.mxu1 %v12475_v2  ;;  %v12581_v62 = vpack.c.bf16 %v3686_v4, %v3682_v51  ;;  %v12583_v2 = vpack.c.bf16 %v3683_v53, %v3679_v23  ;;  %v3718_v51 = vld [vmem:[#allocation14 + $0x138] sm:$0xff]  ;;  %v3711_v4 = vld [vmem:[#allocation14 + $0x100] sm:$0xff] }
 0x5ab   :  { %v12573_v11 = vmul.f32 %v10918_v5, %v3201_v47  ;;  %9122 = vmatprep.subr.bf16.mxu0 %v12579_v21  ;;  %v3712_v47 = vld [vmem:[#allocation14 + $0x108] sm:$0xff]  ;;  %v3715_v23 = vld [vmem:[#allocation14 + $0x120] sm:$0xff]  ;;  %v12629_v53 = vpack.c.bf16 %v3718_v51, %v3714_v10 }
 0x5ac   :  { %9154 = vmatprep.subr.bf16.mxu1 %v12581_v62  ;;  %v3716_v5 = vld [vmem:[#allocation14 + $0x128] sm:$0xff]  ;;  %v12631_v48 = vpack.c.bf16 %v3715_v23, %v3711_v4  ;;  %v3738_v4 = vld [vmem:[#allocation14 + $0x1d8] sm:$0xff] }
 0x5ad   :  { %14208 = vst [vmem:[#allocation45_spill] sm:$0xff] %v12573_v11  ;;  %3574 = vmatmul.mubr.f32.vlgmr.msra.gmra.mrb[20].mxu0 %v12573_v11  ;;  %3645 = vmatmul.mubr.f32.vlgmr.msra.gmra.mrb[20].mxu1 %v12573_v11  ;;  %v12627_v12 = vpack.c.bf16 %v3716_v5, %v3712_v47  ;;  %v3733_v47 = vld [vmem:[#allocation14 + $0x1b0] sm:$0xff]  ;;  %v3736_v10 = vld [vmem:[#allocation14 + $0x1c8] sm:$0xff]  ;;  %v12665_v20 = vpack.c.bf16 %v3742_v49, %v3738_v4 }
 0x5ae   :  { %3807 = vmatprep.mubr.f32.mxu0 %v14101_v19  ;;  %3878 = vmatprep.mubr.f32.mxu1 %v14101_v19  ;;  %v12658_v5 = vpack.c.bf16 %v3733_v47, %v3729_v9  ;;  %v3740_v51 = vld [vmem:[#allocation14 + $0x1e8] sm:$0xff] }
 0x5af   :  { %9124 = vmatpush1.bf16.msra.mxu0 %v12583_v2  ;;  %9156 = vmatpush1.bf16.msra.mxu1 %v12586_v32  ;;  %v12663_v23 = vpack.c.bf16 %v3740_v51, %v3736_v10 }
 0x5b0   :  { %9126 = vmatprep.subr.bf16.mxu0 %v12591_v15  ;;  %9158 = vmatprep.subr.bf16.mxu1 %v12593_v45 }
 0x5b3   :  { %9128 = vmatpush1.bf16.msra.mxu0 %v12595_v27  ;;  %9160 = vmatpush1.bf16.msra.mxu1 %v12598_v17 }
 0x5b4   :  { %9130 = vmatprep.subr.bf16.mxu0 %v12603_v37  ;;  %9162 = vmatprep.subr.bf16.mxu1 %v12605_v30 }
 0x5b7   :  { %9132 = vmatpush1.bf16.msra.mxu0 %v12607_v60  ;;  %9164 = vmatpush1.bf16.msra.mxu1 %v12610_v54 }
 0x5b8   :  { %9134 = vmatprep.subr.bf16.mxu0 %v12615_v36  ;;  %9166 = vmatprep.subr.bf16.mxu1 %v12617_v52 }
 0x5bb   :  { %9136 = vmatpush1.bf16.msra.mxu0 %v12619_v24  ;;  %9168 = vmatpush1.bf16.msra.mxu1 %v12622_v13 }
 0x5bc   :  { %9138 = vmatprep.subr.bf16.mxu0 %v12627_v12  ;;  %9170 = vmatprep.subr.bf16.mxu1 %v12629_v53 }
 0x5bf   :  { %9140 = vmatpush1.bf16.msra.mxu0 %v12631_v48  ;;  %9172 = vmatpush1.bf16.msra.mxu1 %v12634_v58 }
 0x5c0   :  { %9142 = vmatprep.subr.bf16.mxu0 %v12639_v14  ;;  %9174 = vmatprep.subr.bf16.mxu1 %v12641_v28 }
 0x5c3   :  { %9144 = vmatpush1.bf16.msra.mxu0 %v12643_v57  ;;  %9176 = vmatpush1.bf16.msra.mxu1 %v12646_v0 }
 0x5c4   :  { %9146 = vmatprep.subr.bf16.mxu0 %v12651_v44  ;;  %9178 = vmatprep.subr.bf16.mxu1 %v12653_v3 }
 0x5c7   :  { %9148 = vmatpush1.bf16.msra.mxu0 %v12655_v31  ;;  %9180 = vmatpush1.bf16.msra.mxu1 %v12658_v5 }
 0x5c8   :  { %9150 = vmatprep.subr.bf16.mxu0 %v12663_v23  ;;  %9182 = vmatprep.subr.bf16.mxu1 %v12665_v20 }
 0x5cb   :  { %9152 = vmatpush1.bf16.msra.mxu0 %v12667_v50  ;;  %9184 = vmatpush1.bf16.msra.mxu1 %v12670_v8 }
 0x5cc   :  { %9186 = vmatprep.subr.bf16.mxu0 %v12675_v26  ;;  %9218 = vmatprep.subr.bf16.mxu1 %v12677_v34  ;;  %v3921_v34 = vld [vmem:[#allocation15 + $0x50] sm:$0xff] }
 0x5cd   :  { %v3925_v26 = vld [vmem:[#allocation15 + $0x70] sm:$0xff] }
 0x660   :  { %v3343_v33 = vpop.f32.mrb[10].mxu0  ;;  %v3414_v56 = vpop.f32.mrb[10].mxu1 }
 0x661   :  { %v10571_v9 = vadd.f32 %v3343_v33, %v14186_v59  ;;  %v3345_v47 = vpop.f32.mrb[11].mxu0  ;;  %v3416_v10 = vpop.f32.mrb[11].mxu1  ;;  %v10587_v41 = vadd.f32 %v3414_v56, %v14188_v22  ;;  %v3923_v22 = vld [vmem:[#allocation15 + $0x60] sm:$0xff] }
 0x662   :  { %v10572_v51 = vadd.f32 %v3345_v47, %v14187_v1  ;;  %v10588_v16 = vadd.f32 %v3416_v10, %v14189_v29  ;;  %v3915_v10 = vld [vmem:[#allocation15 + $0x20] sm:$0xff] }
 0x663   :  { %v3423_v4 = vmul.f32 0.5, %v10571_v9  ;;  %v3919_v29 = vld [vmem:[#allocation15 + $0x40] sm:$0xff] }
 0x664   :  { %v3427_v49 = vmul.f32 0.5, %v10572_v51  ;;  %v3432_v7 = vmul.f32 0.5, %v10588_v16  ;;  %v3913_v16 = vld [vmem:[#allocation15 + $0x10] sm:$0xff] }
 0x665   :  { %10919 = vtanh.f32 %v3423_v4  ;;  %v3911_v4 = vld [vmem:[#allocation15] sm:$0xff] }
 0x666   :  { %10921 = vtanh.f32 %v3427_v49 }
 0x667   :  { %10923 = vtanh.f32 %v10587_v41 }
 0x668   :  { %10925 = vtanh.f32 %v3432_v7 }
 0x66f   :  { %v10920_v61 = vpop.eup %10919 }
 0x670   :  { %v10922_v25 = vpop.eup %10921  ;;  %v3425_v6 = vmul.f32 0.5, %v10920_v61  ;;  %v3917_v61 = vld [vmem:[#allocation15 + $0x30] sm:$0xff] }
 0x671   :  { %v3429_v38 = vmul.f32 0.5, %v10922_v25  ;;  %v10924_v33 = vpop.eup %10923  ;;  %v3920_v25 = vld [vmem:[#allocation15 + $0x48] sm:$0xff] }
 0x672   :  { %v3426_v40 = vadd.f32 0.5, %v3425_v6  ;;  %v10926_v56 = vpop.eup %10925 }
 0x673   :  { %v3430_v55 = vadd.f32 0.5, %v3429_v38  ;;  %v3434_v51 = vmul.f32 0.5, %v10926_v56  ;;  %v12691_v56 = vpack.c.bf16 %v3915_v10, %v3911_v4  ;;  %v3930_v4 = vld [vmem:[#allocation15 + $0x98] sm:$0xff] }
 0x674   :  { %v3437_v18 = vmul.f32 %v10924_v33, %v3426_v40  ;;  %v3924_v40 = vld [vmem:[#allocation15 + $0x68] sm:$0xff]  ;;  %v3922_v33 = vld [vmem:[#allocation15 + $0x58] sm:$0xff] }
 0x675   :  { %v3436_v9 = vmul.f32 %v3430_v55, %v12526_v42  ;;  %v3926_v42 = vld [vmem:[#allocation15 + $0x78] sm:$0xff] }
 0x676   :  { %v3934_v10 = vld [vmem:[#allocation15 + $0xb8] sm:$0xff] }
 0x677   :  { %v12686_v47 = vadd.f32 %v3437_v18, %v3436_v9  ;;  %v3435_v18 = vadd.f32 0.5, %v3434_v51  ;;  %v3928_v51 = vld [vmem:[#allocation15 + $0x88] sm:$0xff] }
 0x679   :  { %14211 = vst [vmem:[#allocation49_spill] sm:$0xff] %v12686_v47  ;;  %10927 = vtanh.f32 %v12686_v47  ;;  %v12693_v47 = vpack.c.bf16 %v3917_v61, %v3913_v16  ;;  %v12706_v16 = vpack.c.bf16 %v3923_v22, %v3919_v29  ;;  %v12708_v61 = vpack.c.bf16 %v3925_v26, %v3921_v34  ;;  %v3940_v22 = vld [vmem:[#allocation15 + $0xe8] sm:$0xff]  ;;  %v3938_v29 = vld [vmem:[#allocation15 + $0xd8] sm:$0xff] }
 0x67a   :  { %v3942_v26 = vld [vmem:[#allocation15 + $0xf8] sm:$0xff] }
 0x67b   :  { %14215 = vst [vmem:[#allocation61_spill] sm:$0xff] %v12706_v16  ;;  %14216 = vst [vmem:[#allocation62_spill] sm:$0xff] %v12708_v61 }
 0x680   :  { %v3575_v49 = vpop.f32.mrb[20].mxu0  ;;  %v3646_v41 = vpop.f32.mrb[20].mxu1 }
 0x681   :  { %v10597_v7 = vadd.f32 %v3575_v49, %v14191_v39  ;;  %v3577_v6 = vpop.f32.mrb[21].mxu0  ;;  %v3648_v38 = vpop.f32.mrb[21].mxu1  ;;  %v12697_v49 = vpack.c.bf16 %v3924_v40, %v3920_v25  ;;  %v12699_v39 = vpack.c.bf16 %v3926_v42, %v3922_v33  ;;  %v3927_v25 = vld [vmem:[#allocation15 + $0x80] sm:$0xff]  ;;  %v3929_v40 = vld [vmem:[#allocation15 + $0x90] sm:$0xff]  ;;  %v3936_v42 = vld [vmem:[#allocation15 + $0xc8] sm:$0xff] }
 0x682   :  { %v10598_v55 = vadd.f32 %v3577_v6, %v11895_v35  ;;  %v10613_v6 = vadd.f32 %v3646_v41, %v11900_v46  ;;  %v3933_v33 = vld [vmem:[#allocation15 + $0xb0] sm:$0xff] }
 0x683   :  { %v10928_v9 = vpop.eup %10927  ;;  %v3655_v11 = vmul.f32 0.5, %v10597_v7  ;;  %14213 = vst [vmem:[#allocation59_spill] sm:$0xff] %v12697_v49  ;;  %14214 = vst [vmem:[#allocation60_spill] sm:$0xff] %v12699_v39  ;;  %v3932_v7 = vld [vmem:[#allocation15 + $0xa8] sm:$0xff] }
 0x684   :  { %v12695_v1 = vmul.f32 %v10928_v9, %v3435_v18  ;;  %v3659_v59 = vmul.f32 0.5, %v10598_v55  ;;  %v12712_v41 = vpack.c.bf16 %v3932_v7, %v3928_v51  ;;  %v10614_v18 = vadd.f32 %v3648_v38, %v14195_v63  ;;  %v3935_v9 = vld [vmem:[#allocation15 + $0xc0] sm:$0xff]  ;;  %v3937_v7 = vld [vmem:[#allocation15 + $0xd0] sm:$0xff]  ;;  %v3952_v63 = vld [vmem:[#allocation15 + $0x148] sm:$0xff] }
 0x685   :  { %10929 = vtanh.f32 %v3655_v11  ;;  %v3931_v11 = vld [vmem:[#allocation15 + $0xa0] sm:$0xff]  ;;  %v12723_v55 = vpack.c.bf16 %v3933_v33, %v3929_v40  ;;  %v12727_v38 = vpack.c.bf16 %v3940_v22, %v3936_v42 }
 0x686   :  { %14212 = vst [vmem:[#allocation58_spill] sm:$0xff] %v12695_v1  ;;  %10931 = vtanh.f32 %v3659_v59  ;;  %3808 = vmatmul.mubr.f32.vlgmr.msra.gmra.mrb[12].mxu0 %v12695_v1  ;;  %3879 = vmatmul.mubr.f32.vlgmr.msra.gmra.mrb[12].mxu1 %v12695_v1  ;;  %14217 = vst [vmem:[#allocation63_spill] sm:$0xff] %v12712_v41  ;;  %v12714_v59 = vpack.c.bf16 %v3934_v10, %v3930_v4  ;;  %v12721_v34 = vpack.c.bf16 %v3931_v11, %v3927_v25  ;;  %v3939_v51 = vld [vmem:[#allocation15 + $0xe0] sm:$0xff]  ;;  %v3941_v4 = vld [vmem:[#allocation15 + $0xf0] sm:$0xff] }
 0x687   :  { %9188 = vmatpush1.bf16.msra.mxu0 %v12691_v56  ;;  %9220 = vmatpush1.bf16.msra.mxu1 %v12693_v47  ;;  %10933 = vtanh.f32 %v10613_v6  ;;  %14220 = vst [vmem:[#allocation66_spill] sm:$0xff] %v12723_v55  ;;  %v12729_v6 = vpack.c.bf16 %v3942_v26, %v3938_v29  ;;  %v3944_v10 = vld [vmem:[#allocation15 + $0x108] sm:$0xff]  ;;  %v3664_v1 = vmul.f32 0.5, %v10614_v18  ;;  %v3950_v25 = vld [vmem:[#allocation15 + $0x138] sm:$0xff]  ;;  %v12733_v40 = vpack.c.bf16 %v3939_v51, %v3935_v9  ;;  %v3943_v42 = vld [vmem:[#allocation15 + $0x100] sm:$0xff] }
 0x688   :  { %9190 = vmatprep.subr.bf16.mxu0 %v12697_v49  ;;  %9222 = vmatprep.subr.bf16.mxu1 %v12699_v39  ;;  %14218 = vst [vmem:[#allocation64_spill] sm:$0xff] %v12714_v59  ;;  %14219 = vst [vmem:[#allocation65_spill] sm:$0xff] %v12721_v34  ;;  %v12735_v33 = vpack.c.bf16 %v3941_v4, %v3937_v7  ;;  %v3947_v22 = vld [vmem:[#allocation15 + $0x120] sm:$0xff]  ;;  %v3956_v9 = vld [vmem:[#allocation15 + $0x168] sm:$0xff] }
 0x689   :  { %4039 = vmatprep.mubr.f32.mxu0 %v14101_v19  ;;  %4110 = vmatprep.mubr.f32.mxu1 %v14101_v19  ;;  %14221 = vst [vmem:[#allocation68_spill] sm:$0xff] %v12733_v40  ;;  %10935 = vtanh.f32 %v3664_v1  ;;  %v3954_v51 = vld [vmem:[#allocation15 + $0x158] sm:$0xff]  ;;  %v12751_v1 = vpack.c.bf16 %v3956_v9, %v3952_v63  ;;  %v3959_v9 = vld [vmem:[#allocation15 + $0x180] sm:$0xff] }
 0x68a   :  { %14222 = vst [vmem:[#allocation69_spill] sm:$0xff] %v12735_v33  ;;  %v3958_v7 = vld [vmem:[#allocation15 + $0x178] sm:$0xff] }
 0x68b   :  { %9192 = vmatpush1.bf16.msra.mxu0 %v12706_v16  ;;  %9224 = vmatpush1.bf16.msra.mxu1 %v12708_v61  ;;  %v3948_v16 = vld [vmem:[#allocation15 + $0x128] sm:$0xff]  ;;  %v3946_v61 = vld [vmem:[#allocation15 + $0x118] sm:$0xff]  ;;  %14225 = vst [vmem:[#allocation73_spill] sm:$0xff] %v12751_v1 }
 0x68c   :  { %9194 = vmatprep.subr.bf16.mxu0 %v12712_v41  ;;  %9226 = vmatprep.subr.bf16.mxu1 %v12714_v59  ;;  %v12739_v18 = vpack.c.bf16 %v3948_v16, %v3944_v10  ;;  %v12741_v59 = vpack.c.bf16 %v3950_v25, %v3946_v61  ;;  %v3945_v41 = vld [vmem:[#allocation15 + $0x110] sm:$0xff]  ;;  %v3951_v61 = vld [vmem:[#allocation15 + $0x140] sm:$0xff] }
 0x68d   :  { %v3955_v10 = vld [vmem:[#allocation15 + $0x160] sm:$0xff] }
 0x68f   :  { %v10930_v11 = vpop.eup %10929  ;;  %9196 = vmatpush1.bf16.msra.mxu0 %v12721_v34  ;;  %9228 = vmatpush1.bf16.msra.mxu1 %v12723_v55  ;;  %v3949_v34 = vld [vmem:[#allocation15 + $0x130] sm:$0xff] }
 0x690   :  { %v10932_v29 = vpop.eup %10931  ;;  %v3657_v26 = vmul.f32 0.5, %v10930_v11  ;;  %9198 = vmatprep.subr.bf16.mxu0 %v12727_v38  ;;  %9230 = vmatprep.subr.bf16.mxu1 %v12729_v6  ;;  %v12745_v11 = vpack.c.bf16 %v3947_v22, %v3943_v42  ;;  %v12747_v16 = vpack.c.bf16 %v3949_v34, %v3945_v41  ;;  %v3964_v42 = vld [vmem:[#allocation15 + $0x1a8] sm:$0xff]  ;;  %v3962_v22 = vld [vmem:[#allocation15 + $0x198] sm:$0xff] }
 0x691   :  { %v3661_v55 = vmul.f32 0.5, %v10932_v29  ;;  %v10934_v39 = vpop.eup %10933  ;;  %v12753_v29 = vpack.c.bf16 %v3958_v7, %v3954_v51  ;;  %v3966_v41 = vld [vmem:[#allocation15 + $0x1b8] sm:$0xff]  ;;  %v3963_v51 = vld [vmem:[#allocation15 + $0x1a0] sm:$0xff]  ;;  %v3965_v7 = vld [vmem:[#allocation15 + $0x1b0] sm:$0xff] }
 0x692   :  { %v3658_v4 = vadd.f32 0.5, %v3657_v26  ;;  %14223 = vst [vmem:[#allocation70_spill] sm:$0xff] %v12745_v11  ;;  %14224 = vst [vmem:[#allocation72_spill] sm:$0xff] %v12747_v16  ;;  %v3957_v26 = vld [vmem:[#allocation15 + $0x170] sm:$0xff] }
 0x693   :  { %v3662_v49 = vadd.f32 0.5, %v3661_v55  ;;  %9200 = vmatpush1.bf16.msra.mxu0 %v12733_v40  ;;  %9232 = vmatpush1.bf16.msra.mxu1 %v12735_v33  ;;  %14226 = vst [vmem:[#allocation74_spill] sm:$0xff] %v12753_v29  ;;  %v3953_v55 = vld [vmem:[#allocation15 + $0x150] sm:$0xff]  ;;  %v3960_v40 = vld [vmem:[#allocation15 + $0x188] sm:$0xff] }
 0x694   :  { %v3669_v25 = vmul.f32 %v10934_v39, %v3658_v4  ;;  %9202 = vmatprep.subr.bf16.mxu0 %v12739_v18  ;;  %9234 = vmatprep.subr.bf16.mxu1 %v12741_v59  ;;  %v12760_v39 = vpack.c.bf16 %v3955_v10, %v3951_v61  ;;  %v12762_v63 = vpack.c.bf16 %v3957_v26, %v3953_v55  ;;  %v3968_v4 = vld [vmem:[#allocation15 + $0x1c8] sm:$0xff]  ;;  %v3970_v61 = vld [vmem:[#allocation15 + $0x1d8] sm:$0xff]  ;;  %v10936_v55 = vpop.eup %10935 }
 0x695   :  { %v3668_v33 = vmul.f32 %v3662_v49, %v12556_v43  ;;  %v12766_v43 = vpack.c.bf16 %v3964_v42, %v3960_v40  ;;  %v12768_v49 = vpack.c.bf16 %v3966_v41, %v3962_v22  ;;  %v3974_v10 = vld [vmem:[#allocation15 + $0x1f8] sm:$0xff]  ;;  %v12773_v26 = vpack.c.bf16 %v3963_v51, %v3959_v9  ;;  %v3967_v40 = vld [vmem:[#allocation15 + $0x1c0] sm:$0xff] }
 0x696   :  { %v12781_v22 = vpack.c.bf16 %v3974_v10, %v3970_v61  ;;  %v3971_v41 = vld [vmem:[#allocation15 + $0x1e0] sm:$0xff] }
 0x697   :  { %v12756_v34 = vadd.f32 %v3669_v25, %v3668_v33  ;;  %9204 = vmatpush1.bf16.msra.mxu0 %v12745_v11  ;;  %9236 = vmatpush1.bf16.msra.mxu1 %v12747_v16  ;;  %v3961_v33 = vld [vmem:[#allocation15 + $0x190] sm:$0xff]  ;;  %v3972_v25 = vld [vmem:[#allocation15 + $0x1e8] sm:$0xff]  ;;  %v3666_v11 = vmul.f32 0.5, %v10936_v55  ;;  %v12785_v9 = vpack.c.bf16 %v3971_v41, %v3967_v40 }
 0x698   :  { %9206 = vmatprep.subr.bf16.mxu0 %v12751_v1  ;;  %9238 = vmatprep.subr.bf16.mxu1 %v12753_v29  ;;  %v12775_v29 = vpack.c.bf16 %v3965_v7, %v3961_v33  ;;  %v12779_v42 = vpack.c.bf16 %v3972_v25, %v3968_v4  ;;  %v3969_v1 = vld [vmem:[#allocation15 + $0x1d0] sm:$0xff] }
 0x699   :  { %10937 = vtanh.f32 %v12756_v34  ;;  %v3973_v16 = vld [vmem:[#allocation15 + $0x1f0] sm:$0xff]  ;;  %v3667_v33 = vadd.f32 0.5, %v3666_v11  ;;  %v14234_v11 = vld [vmem:[#allocation55_spill] sm:$0xff] }
 0x69a   :  { %v12787_v51 = vpack.c.bf16 %v3973_v16, %v3969_v1 }
 0x69b   :  { %9208 = vmatpush1.bf16.msra.mxu0 %v12760_v39  ;;  %9240 = vmatpush1.bf16.msra.mxu1 %v12762_v63 }
 0x69c   :  { %9210 = vmatprep.subr.bf16.mxu0 %v12766_v43  ;;  %9242 = vmatprep.subr.bf16.mxu1 %v12768_v49 }
 0x69f   :  { %9212 = vmatpush1.bf16.msra.mxu0 %v12773_v26  ;;  %9244 = vmatpush1.bf16.msra.mxu1 %v12775_v29 }
 0x6a0   :  { %9214 = vmatprep.subr.bf16.mxu0 %v12779_v42  ;;  %9246 = vmatprep.subr.bf16.mxu1 %v12781_v22 }
 0x6a3   :  { %v10938_v7 = vpop.eup %10937  ;;  %9216 = vmatpush1.bf16.msra.mxu0 %v12785_v9  ;;  %9248 = vmatpush1.bf16.msra.mxu1 %v12787_v51 }
 0x6a4   :  { %v12793_v4 = vmul.f32 %v10938_v7, %v3667_v33  ;;  %9250 = vmatprep.subr.bf16.mxu0 %v12579_v21  ;;  %9282 = vmatprep.subr.bf16.mxu1 %v12581_v62  ;;  %v14227_v21 = vld [vmem:[#allocation46_spill] sm:$0xff]  ;;  %v14228_v62 = vld [vmem:[#allocation48_spill] sm:$0xff] }
 0x6a6   :  { %4040 = vmatmul.mubr.f32.vlgmr.msra.gmra.mrb[18].mxu0 %v12793_v4  ;;  %4111 = vmatmul.mubr.f32.vlgmr.msra.gmra.mrb[18].mxu1 %v12793_v4 }
 0x6a7   :  { %9252 = vmatpush1.bf16.msra.mxu0 %v12583_v2  ;;  %9284 = vmatpush1.bf16.msra.mxu1 %v12586_v32 }
 0x6a8   :  { %9254 = vmatprep.subr.bf16.mxu0 %v12591_v15  ;;  %9286 = vmatprep.subr.bf16.mxu1 %v12593_v45  ;;  %v14229_v15 = vld [vmem:[#allocation51_spill] sm:$0xff] }
 0x6a9   :  { %4273 = vmatprep.mubr.f32.mxu0 %v14101_v19  ;;  %4344 = vmatprep.mubr.f32.mxu1 %v14101_v19 }
 0x6ab   :  { %9256 = vmatpush1.bf16.msra.mxu0 %v12595_v27  ;;  %9288 = vmatpush1.bf16.msra.mxu1 %v12598_v17 }
 0x6ac   :  { %9258 = vmatprep.subr.bf16.mxu0 %v12603_v37  ;;  %9290 = vmatprep.subr.bf16.mxu1 %v12605_v30  ;;  %v14230_v37 = vld [vmem:[#allocation52_spill] sm:$0xff] }
 0x6af   :  { %9260 = vmatpush1.bf16.msra.mxu0 %v12607_v60  ;;  %9292 = vmatpush1.bf16.msra.mxu1 %v12610_v54 }
 0x6b0   :  { %9262 = vmatprep.subr.bf16.mxu0 %v12615_v36  ;;  %9294 = vmatprep.subr.bf16.mxu1 %v12617_v52  ;;  %v14231_v36 = vld [vmem:[#allocation53_spill] sm:$0xff] }
 0x6b3   :  { %9264 = vmatpush1.bf16.msra.mxu0 %v12619_v24  ;;  %9296 = vmatpush1.bf16.msra.mxu1 %v12622_v13  ;;  %v14232_v24 = vld [vmem:[#allocation54_spill] sm:$0xff] }
 0x6b4   :  { %9266 = vmatprep.subr.bf16.mxu0 %v12627_v12  ;;  %9298 = vmatprep.subr.bf16.mxu1 %v12629_v53 }
 0x6b7   :  { %9268 = vmatpush1.bf16.msra.mxu0 %v12631_v48  ;;  %9300 = vmatpush1.bf16.msra.mxu1 %v12634_v58 }
 0x6b8   :  { %9270 = vmatprep.subr.bf16.mxu0 %v12639_v14  ;;  %9302 = vmatprep.subr.bf16.mxu1 %v12641_v28 }
 0x6bb   :  { %9272 = vmatpush1.bf16.msra.mxu0 %v12643_v57  ;;  %9304 = vmatpush1.bf16.msra.mxu1 %v12646_v0 }
 0x6bc   :  { %9274 = vmatprep.subr.bf16.mxu0 %v12651_v44  ;;  %9306 = vmatprep.subr.bf16.mxu1 %v12653_v3  ;;  %v14233_v3 = vld [vmem:[#allocation49_spill] sm:$0xff] }
 0x6bf   :  { %9276 = vmatpush1.bf16.msra.mxu0 %v12655_v31  ;;  %9308 = vmatpush1.bf16.msra.mxu1 %v12658_v5 }
 0x6c0   :  { %9278 = vmatprep.subr.bf16.mxu0 %v12663_v23  ;;  %9310 = vmatprep.subr.bf16.mxu1 %v12665_v20 }
 0x6c3   :  { %9280 = vmatpush1.bf16.msra.mxu0 %v12667_v50  ;;  %9312 = vmatpush1.bf16.msra.mxu1 %v12670_v8 }
 0x6c4   :  { %9314 = vmatprep.subr.bf16.mxu0 %v14227_v21  ;;  %9346 = vmatprep.subr.bf16.mxu1 %v14228_v62  ;;  %v14235_v21 = vld [vmem:[#allocation59_spill] sm:$0xff]  ;;  %v14236_v62 = vld [vmem:[#allocation60_spill] sm:$0xff] }
 0x759   :  { %v3809_v2 = vpop.f32.mrb[12].mxu0  ;;  %v3880_v32 = vpop.f32.mrb[12].mxu1 }
 0x75a   :  { %v10573_v45 = vadd.f32 %v3809_v2, %v14229_v15  ;;  %v3811_v27 = vpop.f32.mrb[13].mxu0  ;;  %v3882_v17 = vpop.f32.mrb[13].mxu1  ;;  %v10589_v52 = vadd.f32 %v3880_v32, %v14231_v36  ;;  %v14237_v2 = vld [vmem:[#allocation57_spill] sm:$0xff] }
 0x75b   :  { %v10574_v30 = vadd.f32 %v3811_v27, %v14230_v37  ;;  %v10590_v13 = vadd.f32 %v3882_v17, %v14232_v24  ;;  %v14239_v27 = vld [vmem:[#allocation62_spill] sm:$0xff]  ;;  %v14240_v17 = vld [vmem:[#allocation63_spill] sm:$0xff] }
 0x75c   :  { %v3889_v60 = vmul.f32 0.5, %v10573_v45  ;;  %v14238_v45 = vld [vmem:[#allocation61_spill] sm:$0xff] }
 0x75d   :  { %v3893_v54 = vmul.f32 0.5, %v10574_v30  ;;  %v3898_v12 = vmul.f32 0.5, %v10590_v13 }
 0x75e   :  { %10939 = vtanh.f32 %v3889_v60  ;;  %v14242_v60 = vld [vmem:[#allocation65_spill] sm:$0xff] }
 0x75f   :  { %10941 = vtanh.f32 %v3893_v54  ;;  %v14243_v54 = vld [vmem:[#allocation66_spill] sm:$0xff] }
 0x760   :  { %10943 = vtanh.f32 %v10589_v52 }
 0x761   :  { %10945 = vtanh.f32 %v3898_v12 }
 0x768   :  { %v10940_v53 = vpop.eup %10939 }
 0x769   :  { %v10942_v48 = vpop.eup %10941  ;;  %v3891_v58 = vmul.f32 0.5, %v10940_v53 }
 0x76a   :  { %v3895_v14 = vmul.f32 0.5, %v10942_v48  ;;  %v10944_v57 = vpop.eup %10943 }
 0x76b   :  { %v3892_v28 = vadd.f32 0.5, %v3891_v58  ;;  %v10946_v23 = vpop.eup %10945 }
 0x76c   :  { %v3896_v0 = vadd.f32 0.5, %v3895_v14  ;;  %v3900_v20 = vmul.f32 0.5, %v10946_v23  ;;  %v14244_v14 = vld [vmem:[#allocation68_spill] sm:$0xff] }
 0x76d   :  { %v3903_v44 = vmul.f32 %v10944_v57, %v3892_v28  ;;  %v14245_v28 = vld [vmem:[#allocation69_spill] sm:$0xff] }
 0x76e   :  { %v3902_v31 = vmul.f32 %v3896_v0, %v14233_v3  ;;  %v3901_v61 = vadd.f32 0.5, %v3900_v20  ;;  %v14248_v3 = vld [vmem:[#allocation73_spill] sm:$0xff] }
 0x770   :  { %v12838_v5 = vadd.f32 %v3903_v44, %v3902_v31  ;;  %v14249_v31 = vld [vmem:[#allocation74_spill] sm:$0xff] }
 0x772   :  { %10947 = vtanh.f32 %v12838_v5 }
 0x779   :  { %v4041_v50 = vpop.f32.mrb[18].mxu0  ;;  %v4112_v8 = vpop.f32.mrb[18].mxu1 }
 0x77a   :  { %v10595_v16 = vadd.f32 %v4041_v50, %v14234_v11  ;;  %v4043_v1 = vpop.f32.mrb[19].mxu0  ;;  %v4114_v25 = vpop.f32.mrb[19].mxu1  ;;  %v10611_v7 = vadd.f32 %v4112_v8, %v11900_v46 }
 0x77b   :  { %v10596_v10 = vadd.f32 %v4043_v1, %v11895_v35  ;;  %v10612_v32 = vadd.f32 %v4114_v25, %v14237_v2 }
 0x77c   :  { %v10948_v55 = vpop.eup %10947  ;;  %v4121_v40 = vmul.f32 0.5, %v10595_v16 }
 0x77d   :  { %v12843_v41 = vmul.f32 %v10948_v55, %v3901_v61  ;;  %v4125_v33 = vmul.f32 0.5, %v10596_v10 }
 0x77e   :  { %10949 = vtanh.f32 %v4121_v40 }
 0x77f   :  { %10951 = vtanh.f32 %v4125_v33  ;;  %4274 = vmatmul.mubr.f32.vlgmr.msra.gmra.mrb[14].mxu0 %v12843_v41  ;;  %4345 = vmatmul.mubr.f32.vlgmr.msra.gmra.mrb[14].mxu1 %v12843_v41 }
 0x780   :  { %9316 = vmatpush1.bf16.msra.mxu0 %v12691_v56  ;;  %9348 = vmatpush1.bf16.msra.mxu1 %v12693_v47  ;;  %10953 = vtanh.f32 %v10611_v7  ;;  %v14241_v56 = vld [vmem:[#allocation64_spill] sm:$0xff]  ;;  %v4130_v47 = vmul.f32 0.5, %v10612_v32 }
 0x781   :  { %9318 = vmatprep.subr.bf16.mxu0 %v14235_v21  ;;  %9350 = vmatprep.subr.bf16.mxu1 %v14236_v62 }
 0x782   :  { %4505 = vmatprep.mubr.f32.mxu0 %v14101_v19  ;;  %4576 = vmatprep.mubr.f32.mxu1 %v14101_v19  ;;  %10955 = vtanh.f32 %v4130_v47 }
 0x784   :  { %9320 = vmatpush1.bf16.msra.mxu0 %v14238_v45  ;;  %9352 = vmatpush1.bf16.msra.mxu1 %v14239_v27 }
 0x785   :  { %9322 = vmatprep.subr.bf16.mxu0 %v14240_v17  ;;  %9354 = vmatprep.subr.bf16.mxu1 %v14241_v56 }
 0x788   :  { %v10950_v30 = vpop.eup %10949  ;;  %9324 = vmatpush1.bf16.msra.mxu0 %v14242_v60  ;;  %9356 = vmatpush1.bf16.msra.mxu1 %v14243_v54 }
 0x789   :  { %v10952_v52 = vpop.eup %10951  ;;  %v4123_v13 = vmul.f32 0.5, %v10950_v30  ;;  %9326 = vmatprep.subr.bf16.mxu0 %v12727_v38  ;;  %9358 = vmatprep.subr.bf16.mxu1 %v12729_v6  ;;  %v14246_v38 = vld [vmem:[#allocation70_spill] sm:$0xff]  ;;  %v14247_v6 = vld [vmem:[#allocation72_spill] sm:$0xff] }
 0x78a   :  { %v4127_v12 = vmul.f32 0.5, %v10952_v52  ;;  %v10954_v48 = vpop.eup %10953 }
 0x78b   :  { %v4124_v53 = vadd.f32 0.5, %v4123_v13 }
 0x78c   :  { %v4128_v58 = vadd.f32 0.5, %v4127_v12  ;;  %9328 = vmatpush1.bf16.msra.mxu0 %v14244_v14  ;;  %9360 = vmatpush1.bf16.msra.mxu1 %v14245_v28  ;;  %v10956_v23 = vpop.eup %10955 }
 0x78d   :  { %v4135_v57 = vmul.f32 %v10954_v48, %v4124_v53  ;;  %9330 = vmatprep.subr.bf16.mxu0 %v12739_v18  ;;  %9362 = vmatprep.subr.bf16.mxu1 %v12741_v59  ;;  %v4132_v59 = vmul.f32 0.5, %v10956_v23 }
 0x78e   :  { %v4134_v0 = vmul.f32 %v4128_v58, %v12756_v34 }
 0x78f   :  { %v4133_v18 = vadd.f32 0.5, %v4132_v59 }
 0x790   :  { %v12868_v44 = vadd.f32 %v4135_v57, %v4134_v0  ;;  %9332 = vmatpush1.bf16.msra.mxu0 %v14246_v38  ;;  %9364 = vmatpush1.bf16.msra.mxu1 %v14247_v6 }
 0x791   :  { %9334 = vmatprep.subr.bf16.mxu0 %v14248_v3  ;;  %9366 = vmatprep.subr.bf16.mxu1 %v14249_v31 }
 0x792   :  { %10957 = vtanh.f32 %v12868_v44 }
 0x794   :  { %9336 = vmatpush1.bf16.msra.mxu0 %v12760_v39  ;;  %9368 = vmatpush1.bf16.msra.mxu1 %v12762_v63 }
 0x795   :  { %9338 = vmatprep.subr.bf16.mxu0 %v12766_v43  ;;  %9370 = vmatprep.subr.bf16.mxu1 %v12768_v49 }
 0x798   :  { %9340 = vmatpush1.bf16.msra.mxu0 %v12773_v26  ;;  %9372 = vmatpush1.bf16.msra.mxu1 %v12775_v29 }
 0x799   :  { %9342 = vmatprep.subr.bf16.mxu0 %v12779_v42  ;;  %9374 = vmatprep.subr.bf16.mxu1 %v12781_v22 }
 0x79c   :  { %v10958_v34 = vpop.eup %10957  ;;  %9344 = vmatpush1.bf16.msra.mxu0 %v12785_v9  ;;  %9376 = vmatpush1.bf16.msra.mxu1 %v12787_v51 }
 0x79d   :  { %v12885_v39 = vmul.f32 %v10958_v34, %v4133_v18 }
 0x79f   :  { %4506 = vmatmul.mubr.f32.vlgmr.msra.gmra.mrb[16].mxu0 %v12885_v39  ;;  %4577 = vmatmul.mubr.f32.vlgmr.msra.gmra.mrb[16].mxu1 %v12885_v39 }
 0x7a0   :  { %11236 = shalt.err (!%p11233_p6)  }
 0x7a1   :  { %s11237_s21 = scalar_lea.vmem %s98_s29, 32768  ;;  %p11242_p8 = scmp.lt.s32.totalorder %s98_s29, %s98_s29 }
 0x7a2   :  { %p11238_p7 = scmp.ne.s32.totalorder %s98_s29, %s11237_s21  ;;  %p11243_p9 = scmp.lt.s32.totalorder %s11237_s21, %s11237_s21 }
 0x7a4   :  { %p11244_p10 = por %p11243_p9, %p11242_p8 }
 0x7a6   :  { %p11245_p11 = pnand %p11244_p10, %p11238_p7 }
 0x7a8   :  { %11248 = shalt.err (!%p11245_p11)  }
 0x7a9   :  { %100 = dma.hbm_to_vmem [thread:$0]  %s13852_s5, 32768, %s98_s29, [#allocation8] }
 0x7aa   :  { %s11249_s2 = scalar_lea.hbm %s13853_s6, 8192 }
 0x7ab   :  { %p11250_p12 = scmp.ne.s32.totalorder %s13853_s6, %s11249_s2  ;;  %p11253_p13 = scmp.lt.u32.totalorder %s11249_s2, %s13853_s6 }
 0x7ad   :  { %p11255_p0 = pnand %p11253_p13, %p11250_p12 }
 0x7af   :  { %11258 = shalt.err (!%p11255_p0)  }
 0x7b0   :  { %s11259_s0 = scalar_lea.vmem %s110_s23, 8192  ;;  %p11264_p2 = scmp.lt.s32.totalorder %s110_s23, %s110_s23 }
 0x7b1   :  { %p11260_p1 = scmp.ne.s32.totalorder %s110_s23, %s11259_s0  ;;  %p11265_p3 = scmp.lt.s32.totalorder %s11259_s0, %s11259_s0 }
 0x7b3   :  { %p11266_p4 = por %p11265_p3, %p11264_p2 }
 0x7b5   :  { %p11267_p5 = pnand %p11266_p4, %p11260_p1 }
 0x7b7   :  { %11270 = shalt.err (!%p11267_p5)  }
 0x7b8   :  { %112 = dma.hbm_to_vmem [thread:$0]  %s13853_s6, 8192, %s110_s23, [#allocation8 + $0x1] }
 0x7b9   :  { %s11412_s30 = smov [#allocation6]   ;;  %s11413_s15 = smov [#allocation7]  }
 0x7ba   :  { %s121_s14 = sshll.u32 %s11412_s30, 4  ;;  %s133_s16 = sshll.u32 %s11413_s15, 4  ;;  %s122_s14 = int_to_ptr.vmem [resolvable:$true] %s121_s14  ;;  %s134_s16 = int_to_ptr.vmem [resolvable:$true] %s133_s16 }
 0x7bb   :  { %s11271_s20 = scalar_lea.hbm %s13854_s7, 8192 }
 0x7bc   :  { %p11272_p6 = scmp.ne.s32.totalorder %s13854_s7, %s11271_s20  ;;  %p11275_p7 = scmp.lt.u32.totalorder %s11271_s20, %s13854_s7 }
 0x7be   :  { %p11277_p8 = pnand %p11275_p7, %p11272_p6 }
 0x7c0   :  { %11280 = shalt.err (!%p11277_p8)  }
 0x7c1   :  { %s11281_s6 = scalar_lea.vmem %s122_s14, 8192  ;;  %p11286_p10 = scmp.lt.s32.totalorder %s122_s14, %s122_s14 }
 0x7c2   :  { %p11282_p9 = scmp.ne.s32.totalorder %s122_s14, %s11281_s6  ;;  %p11287_p11 = scmp.lt.s32.totalorder %s11281_s6, %s11281_s6 }
 0x7c4   :  { %p11288_p12 = por %p11287_p11, %p11286_p10 }
 0x7c6   :  { %p11289_p13 = pnand %p11288_p12, %p11282_p9 }
 0x7c8   :  { %11292 = shalt.err (!%p11289_p13)  }
 0x7c9   :  { %124 = dma.hbm_to_vmem [thread:$0]  %s13854_s7, 8192, %s122_s14, [#allocation8 + $0x2] }
 0x7ca   :  { %s11293_s3 = scalar_lea.hbm %s13856_s9, 4096 }
 0x7cb   :  { %p11294_p0 = scmp.ne.s32.totalorder %s13856_s9, %s11293_s3  ;;  %p11297_p1 = scmp.lt.u32.totalorder %s11293_s3, %s13856_s9 }
 0x7cd   :  { %p11299_p2 = pnand %p11297_p1, %p11294_p0 }
 0x7cf   :  { %11302 = shalt.err (!%p11299_p2)  }
 0x7d0   :  { %s11303_s29 = scalar_lea.vmem %s134_s16, 4096  ;;  %p11308_p4 = scmp.lt.s32.totalorder %s134_s16, %s134_s16 }
 0x7d1   :  { %p11304_p3 = scmp.ne.s32.totalorder %s134_s16, %s11303_s29  ;;  %p11309_p5 = scmp.lt.s32.totalorder %s11303_s29, %s11303_s29 }
 0x7d3   :  { %p11310_p6 = por %p11309_p5, %p11308_p4 }
 0x7d5   :  { %p11311_p7 = pnand %p11310_p6, %p11304_p3 }
 0x7d7   :  { %11314 = shalt.err (!%p11311_p7)  }
 0x7d8   :  { %136 = dma.hbm_to_vmem [thread:$0]  %s13856_s9, 4096, %s134_s16, [#allocation8 + $0x3] }
 0x852   :  { %v4275_v29 = vpop.f32.mrb[14].mxu0  ;;  %v4346_v63 = vpop.f32.mrb[14].mxu1 }
 0x853   :  { %v10575_v43 = vadd.f32 %v4275_v29, %v14229_v15  ;;  %v4277_v49 = vpop.f32.mrb[15].mxu0  ;;  %v4348_v26 = vpop.f32.mrb[15].mxu1  ;;  %v10591_v51 = vadd.f32 %v4346_v63, %v14231_v36 }
 0x854   :  { %v10576_v42 = vadd.f32 %v4277_v49, %v14230_v37  ;;  %v10592_v20 = vadd.f32 %v4348_v26, %v14232_v24 }
 0x855   :  { %v4355_v22 = vmul.f32 0.5, %v10575_v43 }
 0x856   :  { %v4359_v9 = vmul.f32 0.5, %v10576_v42  ;;  %v4364_v50 = vmul.f32 0.5, %v10592_v20 }
 0x857   :  { %10959 = vtanh.f32 %v4355_v22 }
 0x858   :  { %10961 = vtanh.f32 %v4359_v9 }
 0x859   :  { %10963 = vtanh.f32 %v10591_v51 }
 0x85a   :  { %10965 = vtanh.f32 %v4364_v50 }
 0x861   :  { %v10960_v8 = vpop.eup %10959 }
 0x862   :  { %v10962_v16 = vpop.eup %10961  ;;  %v4357_v1 = vmul.f32 0.5, %v10960_v8 }
 0x863   :  { %v4361_v25 = vmul.f32 0.5, %v10962_v16  ;;  %v10964_v61 = vpop.eup %10963 }
 0x864   :  { %v4358_v15 = vadd.f32 0.5, %v4357_v1  ;;  %v10966_v36 = vpop.eup %10965 }
 0x865   :  { %v4362_v10 = vadd.f32 0.5, %v4361_v25  ;;  %v4366_v33 = vmul.f32 0.5, %v10966_v36 }
 0x866   :  { %v4369_v55 = vmul.f32 %v10964_v61, %v4358_v15 }
 0x867   :  { %v4368_v37 = vmul.f32 %v4362_v10, %v12838_v5  ;;  %v4367_v45 = vadd.f32 0.5, %v4366_v33 }
 0x869   :  { %v4370_v40 = vadd.f32 %v4369_v55, %v4368_v37 }
 0x86b   :  { %10967 = vtanh.f32 %v4370_v40  ;;  %4608 = vst [vmem:[#allocation20] sm:$0xff] %v4370_v40 }
 0x872   :  { %v4507_v7 = vpop.f32.mrb[16].mxu0  ;;  %v4578_v21 = vpop.f32.mrb[16].mxu1 }
 0x873   :  { %v10593_v24 = vadd.f32 %v4507_v7, %v14234_v11  ;;  %v4509_v62 = vpop.f32.mrb[17].mxu0  ;;  %v4580_v32 = vpop.f32.mrb[17].mxu1  ;;  %v10609_v5 = vadd.f32 %v4578_v21, %v11900_v46 }
 0x874   :  { %v10594_v27 = vadd.f32 %v4509_v62, %v11895_v35  ;;  %v10610_v60 = vadd.f32 %v4580_v32, %v14237_v2 }
 0x875   :  { %v10968_v17 = vpop.eup %10967  ;;  %v4587_v56 = vmul.f32 0.5, %v10593_v24 }
 0x876   :  { %v12944_v47 = vmul.f32 %v10968_v17, %v4367_v45  ;;  %v4591_v30 = vmul.f32 0.5, %v10594_v27  ;;  %v4596_v11 = vmul.f32 0.5, %v10610_v60 }
 0x877   :  { %10969 = vtanh.f32 %v4587_v56 }
 0x878   :  { %4607 = vst [vmem:[#allocation18] sm:$0xff] %v12944_v47  ;;  %10971 = vtanh.f32 %v4591_v30 }
 0x879   :  { %10973 = vtanh.f32 %v10609_v5 }
 0x87a   :  { %10975 = vtanh.f32 %v4596_v11 }
 0x881   :  { %v10970_v54 = vpop.eup %10969 }
 0x882   :  { %v10972_v52 = vpop.eup %10971  ;;  %v4589_v13 = vmul.f32 0.5, %v10970_v54 }
 0x883   :  { %v4593_v12 = vmul.f32 0.5, %v10972_v52  ;;  %v10974_v53 = vpop.eup %10973 }
 0x884   :  { %v4590_v35 = vadd.f32 0.5, %v4589_v13  ;;  %v10976_v46 = vpop.eup %10975 }
 0x885   :  { %v4594_v48 = vadd.f32 0.5, %v4593_v12  ;;  %v4598_v57 = vmul.f32 0.5, %v10976_v46 }
 0x886   :  { %v4601_v58 = vmul.f32 %v10974_v53, %v4590_v35 }
 0x887   :  { %v4600_v14 = vmul.f32 %v4594_v48, %v12868_v44  ;;  %v4599_v0 = vadd.f32 0.5, %v4598_v57 }
 0x889   :  { %v4602_v28 = vadd.f32 %v4601_v58, %v4600_v14 }
 0x88b   :  { %10977 = vtanh.f32 %v4602_v28  ;;  %4612 = vst [vmem:[#allocation20 + $0x8] sm:$0xff] %v4602_v28 }
 0x895   :  { %v10978_v38 = vpop.eup %10977 }
 0x896   :  { %v12950_v2 = vmul.f32 %v10978_v38, %v4599_v0 }
 0x898   :  { %4610 = vst [vmem:[#allocation18 + $0x8] sm:$0xff] %v12950_v2 }
 0x899   :  { %11387 = dma.done.wait [#allocation8], 32768 }
 0x89a   :  { %11388 = vsyncadd [#allocation8], 4294934528  ;;  %5108 = vmatprep.mubr.f32.mxu1 %v12950_v2  ;;  %4995 = vmatprep.mubr.f32.mxu0 %v12950_v2  ;;  %v4634_v6 = vld [vmem:[#allocation4 + $0x8] sm:$0xff]  ;;  %v4636_v44 = vld [vmem:[#allocation4 + $0x18] sm:$0xff] }
 0x89b   :  { %v4642_v3 = vld [vmem:[#allocation4 + $0x48] sm:$0xff]  ;;  %v4644_v23 = vld [vmem:[#allocation4 + $0x58] sm:$0xff]  ;;  %v4633_v59 = vld [vmem:[#allocation4] sm:$0xff] }
 0x89c   :  { %v9377_v31 = vpack.c.bf16 %v4642_v3, %v4634_v6  ;;  %v4641_v18 = vld [vmem:[#allocation4 + $0x40] sm:$0xff]  ;;  %v9441_v34 = vpack.c.bf16 %v4644_v23, %v4636_v44  ;;  %v4635_v63 = vld [vmem:[#allocation4 + $0x10] sm:$0xff]  ;;  %v4650_v49 = vld [vmem:[#allocation4 + $0x88] sm:$0xff] }
 0x89d   :  { %v9379_v29 = vpack.c.bf16 %v4641_v18, %v4633_v59  ;;  %v4643_v43 = vld [vmem:[#allocation4 + $0x50] sm:$0xff]  ;;  %v4658_v42 = vld [vmem:[#allocation4 + $0xc8] sm:$0xff]  ;;  %v4652_v22 = vld [vmem:[#allocation4 + $0x98] sm:$0xff] }
 0x89e   :  { %9378 = vmatprep.subr.bf16.mxu0 %v9377_v31  ;;  %v9443_v26 = vpack.c.bf16 %v4643_v43, %v4635_v63  ;;  %v4660_v9 = vld [vmem:[#allocation4 + $0xd8] sm:$0xff]  ;;  %9442 = vmatprep.subr.bf16.mxu1 %v9441_v34  ;;  %v9381_v51 = vpack.c.bf16 %v4658_v42, %v4650_v49  ;;  %v4649_v50 = vld [vmem:[#allocation4 + $0x80] sm:$0xff]  ;;  %v4651_v16 = vld [vmem:[#allocation4 + $0x90] sm:$0xff] }
 0x89f   :  { %9380 = vmatpush1.bf16.msra.mxu0 %v9379_v29  ;;  %v9445_v20 = vpack.c.bf16 %v4660_v9, %v4652_v22  ;;  %v4657_v8 = vld [vmem:[#allocation4 + $0xc0] sm:$0xff]  ;;  %v4659_v25 = vld [vmem:[#allocation4 + $0xd0] sm:$0xff]  ;;  %v4666_v15 = vld [vmem:[#allocation4 + $0x108] sm:$0xff] }
 0x8a0   :  { %9444 = vmatpush1.bf16.msra.mxu1 %v9443_v26  ;;  %v9383_v1 = vpack.c.bf16 %v4657_v8, %v4649_v50  ;;  %v4674_v61 = vld [vmem:[#allocation4 + $0x148] sm:$0xff]  ;;  %9382 = vmatprep.subr.bf16.mxu0 %v9381_v51  ;;  %v9447_v10 = vpack.c.bf16 %v4659_v25, %v4651_v16  ;;  %v4668_v37 = vld [vmem:[#allocation4 + $0x118] sm:$0xff]  ;;  %v4665_v36 = vld [vmem:[#allocation4 + $0x100] sm:$0xff] }
 0x8a1   :  { %9446 = vmatprep.subr.bf16.mxu1 %v9445_v20  ;;  %v9385_v55 = vpack.c.bf16 %v4674_v61, %v4666_v15  ;;  %v4676_v40 = vld [vmem:[#allocation4 + $0x158] sm:$0xff]  ;;  %v4673_v7 = vld [vmem:[#allocation4 + $0x140] sm:$0xff]  ;;  %v4667_v21 = vld [vmem:[#allocation4 + $0x110] sm:$0xff] }
 0x8a2   :  { %v9449_v33 = vpack.c.bf16 %v4676_v40, %v4668_v37  ;;  %v4675_v24 = vld [vmem:[#allocation4 + $0x150] sm:$0xff]  ;;  %v9387_v62 = vpack.c.bf16 %v4673_v7, %v4665_v36  ;;  %v4682_v32 = vld [vmem:[#allocation4 + $0x188] sm:$0xff]  ;;  %v4684_v27 = vld [vmem:[#allocation4 + $0x198] sm:$0xff] }
 0x8a3   :  { %9384 = vmatpush1.bf16.msra.mxu0 %v9383_v1  ;;  %v4690_v45 = vld [vmem:[#allocation4 + $0x1c8] sm:$0xff]  ;;  %v9451_v17 = vpack.c.bf16 %v4675_v24, %v4667_v21  ;;  %v4692_v30 = vld [vmem:[#allocation4 + $0x1d8] sm:$0xff]  ;;  %v4681_v5 = vld [vmem:[#allocation4 + $0x180] sm:$0xff] }
 0x8a4   :  { %9448 = vmatpush1.bf16.msra.mxu1 %v9447_v10  ;;  %9386 = vmatprep.subr.bf16.mxu0 %v9385_v55  ;;  %v9389_v56 = vpack.c.bf16 %v4690_v45, %v4682_v32  ;;  %v4689_v60 = vld [vmem:[#allocation4 + $0x1c0] sm:$0xff]  ;;  %v9453_v11 = vpack.c.bf16 %v4692_v30, %v4684_v27  ;;  %v4683_v54 = vld [vmem:[#allocation4 + $0x190] sm:$0xff]  ;;  %v4698_v13 = vld [vmem:[#allocation4 + $0x208] sm:$0xff] }
 0x8a5   :  { %9450 = vmatprep.subr.bf16.mxu1 %v9449_v33  ;;  %v4691_v52 = vld [vmem:[#allocation4 + $0x1d0] sm:$0xff]  ;;  %v4706_v12 = vld [vmem:[#allocation4 + $0x248] sm:$0xff]  ;;  %v4700_v35 = vld [vmem:[#allocation4 + $0x218] sm:$0xff]  ;;  %v9391_v48 = vpack.c.bf16 %v4689_v60, %v4681_v5 }
 0x8a6   :  { %v4708_v53 = vld [vmem:[#allocation4 + $0x258] sm:$0xff]  ;;  %v9455_v58 = vpack.c.bf16 %v4691_v52, %v4683_v54  ;;  %v9393_v14 = vpack.c.bf16 %v4706_v12, %v4698_v13  ;;  %v4697_v28 = vld [vmem:[#allocation4 + $0x200] sm:$0xff]  ;;  %v4699_v57 = vld [vmem:[#allocation4 + $0x210] sm:$0xff] }
 0x8a7   :  { %9388 = vmatpush1.bf16.msra.mxu0 %v9387_v62  ;;  %v4705_v46 = vld [vmem:[#allocation4 + $0x240] sm:$0xff]  ;;  %v9457_v0 = vpack.c.bf16 %v4708_v53, %v4700_v35  ;;  %v4707_v38 = vld [vmem:[#allocation4 + $0x250] sm:$0xff]  ;;  %v4714_v6 = vld [vmem:[#allocation4 + $0x288] sm:$0xff] }
 0x8a8   :  { %9452 = vmatpush1.bf16.msra.mxu1 %v9451_v17  ;;  %9390 = vmatprep.subr.bf16.mxu0 %v9389_v56  ;;  %v4722_v3 = vld [vmem:[#allocation4 + $0x2c8] sm:$0xff]  ;;  %v4716_v44 = vld [vmem:[#allocation4 + $0x298] sm:$0xff]  ;;  %v9395_v23 = vpack.c.bf16 %v4705_v46, %v4697_v28  ;;  %v9459_v59 = vpack.c.bf16 %v4707_v38, %v4699_v57  ;;  %v4713_v34 = vld [vmem:[#allocation4 + $0x280] sm:$0xff] }
 0x8a9   :  { %9454 = vmatprep.subr.bf16.mxu1 %v9453_v11  ;;  %v4724_v31 = vld [vmem:[#allocation4 + $0x2d8] sm:$0xff]  ;;  %v9397_v18 = vpack.c.bf16 %v4722_v3, %v4714_v6  ;;  %v4721_v29 = vld [vmem:[#allocation4 + $0x2c0] sm:$0xff]  ;;  %v4715_v63 = vld [vmem:[#allocation4 + $0x290] sm:$0xff] }
 0x8aa   :  { %v9461_v43 = vpack.c.bf16 %v4724_v31, %v4716_v44  ;;  %v4723_v49 = vld [vmem:[#allocation4 + $0x2d0] sm:$0xff]  ;;  %v4730_v26 = vld [vmem:[#allocation4 + $0x308] sm:$0xff]  ;;  %v4732_v22 = vld [vmem:[#allocation4 + $0x318] sm:$0xff]  ;;  %v9399_v51 = vpack.c.bf16 %v4721_v29, %v4713_v34 }
 0x8ab   :  { %9392 = vmatpush1.bf16.msra.mxu0 %v9391_v48  ;;  %v4738_v42 = vld [vmem:[#allocation4 + $0x348] sm:$0xff]  ;;  %v4740_v9 = vld [vmem:[#allocation4 + $0x358] sm:$0xff]  ;;  %v9463_v20 = vpack.c.bf16 %v4723_v49, %v4715_v63  ;;  %v4729_v8 = vld [vmem:[#allocation4 + $0x300] sm:$0xff] }
 0x8ac   :  { %9456 = vmatpush1.bf16.msra.mxu1 %v9455_v58  ;;  %9394 = vmatprep.subr.bf16.mxu0 %v9393_v14  ;;  %v9401_v50 = vpack.c.bf16 %v4738_v42, %v4730_v26  ;;  %v4737_v16 = vld [vmem:[#allocation4 + $0x340] sm:$0xff]  ;;  %v4731_v1 = vld [vmem:[#allocation4 + $0x310] sm:$0xff]  ;;  %v9465_v25 = vpack.c.bf16 %v4740_v9, %v4732_v22  ;;  %v4746_v61 = vld [vmem:[#allocation4 + $0x388] sm:$0xff] }
 0x8ad   :  { %9458 = vmatprep.subr.bf16.mxu1 %v9457_v0  ;;  %v4739_v15 = vld [vmem:[#allocation4 + $0x350] sm:$0xff]  ;;  %v4754_v10 = vld [vmem:[#allocation4 + $0x3c8] sm:$0xff]  ;;  %v4748_v55 = vld [vmem:[#allocation4 + $0x398] sm:$0xff]  ;;  %v9403_v40 = vpack.c.bf16 %v4737_v16, %v4729_v8 }
 0x8ae   :  { %v4756_v37 = vld [vmem:[#allocation4 + $0x3d8] sm:$0xff]  ;;  %v9467_v36 = vpack.c.bf16 %v4739_v15, %v4731_v1  ;;  %v9405_v33 = vpack.c.bf16 %v4754_v10, %v4746_v61  ;;  %v4745_v7 = vld [vmem:[#allocation4 + $0x380] sm:$0xff]  ;;  %v4747_v24 = vld [vmem:[#allocation4 + $0x390] sm:$0xff] }
 0x8af   :  { %9396 = vmatpush1.bf16.msra.mxu0 %v9395_v23  ;;  %v4753_v21 = vld [vmem:[#allocation4 + $0x3c0] sm:$0xff]  ;;  %v9469_v62 = vpack.c.bf16 %v4756_v37, %v4748_v55  ;;  %v4755_v32 = vld [vmem:[#allocation4 + $0x3d0] sm:$0xff]  ;;  %v4762_v45 = vld [vmem:[#allocation4 + $0x408] sm:$0xff] }
 0x8b0   :  { %9460 = vmatpush1.bf16.msra.mxu1 %v9459_v59  ;;  %9398 = vmatprep.subr.bf16.mxu0 %v9397_v18  ;;  %v4770_v27 = vld [vmem:[#allocation4 + $0x448] sm:$0xff]  ;;  %v4764_v17 = vld [vmem:[#allocation4 + $0x418] sm:$0xff]  ;;  %v9407_v30 = vpack.c.bf16 %v4753_v21, %v4745_v7  ;;  %v9471_v5 = vpack.c.bf16 %v4755_v32, %v4747_v24  ;;  %v4761_v11 = vld [vmem:[#allocation4 + $0x400] sm:$0xff] }
 0x8b1   :  { %9462 = vmatprep.subr.bf16.mxu1 %v9461_v43  ;;  %v4772_v56 = vld [vmem:[#allocation4 + $0x458] sm:$0xff]  ;;  %v9409_v60 = vpack.c.bf16 %v4770_v27, %v4762_v45  ;;  %v4769_v54 = vld [vmem:[#allocation4 + $0x440] sm:$0xff]  ;;  %v4763_v52 = vld [vmem:[#allocation4 + $0x410] sm:$0xff] }
 0x8b2   :  { %v9473_v13 = vpack.c.bf16 %v4772_v56, %v4764_v17  ;;  %v4771_v12 = vld [vmem:[#allocation4 + $0x450] sm:$0xff]  ;;  %v4778_v35 = vld [vmem:[#allocation4 + $0x488] sm:$0xff]  ;;  %v4780_v48 = vld [vmem:[#allocation4 + $0x498] sm:$0xff]  ;;  %v9411_v14 = vpack.c.bf16 %v4769_v54, %v4761_v11 }
 0x8b3   :  { %9400 = vmatpush1.bf16.msra.mxu0 %v9399_v51  ;;  %v4786_v53 = vld [vmem:[#allocation4 + $0x4c8] sm:$0xff]  ;;  %v4788_v58 = vld [vmem:[#allocation4 + $0x4d8] sm:$0xff]  ;;  %v9475_v28 = vpack.c.bf16 %v4771_v12, %v4763_v52  ;;  %v4777_v57 = vld [vmem:[#allocation4 + $0x480] sm:$0xff] }
 0x8b4   :  { %9464 = vmatpush1.bf16.msra.mxu1 %v9463_v20  ;;  %9402 = vmatprep.subr.bf16.mxu0 %v9401_v50  ;;  %v9413_v46 = vpack.c.bf16 %v4786_v53, %v4778_v35  ;;  %v4785_v0 = vld [vmem:[#allocation4 + $0x4c0] sm:$0xff]  ;;  %v4779_v38 = vld [vmem:[#allocation4 + $0x490] sm:$0xff]  ;;  %v9477_v6 = vpack.c.bf16 %v4788_v58, %v4780_v48  ;;  %v4794_v44 = vld [vmem:[#allocation4 + $0x508] sm:$0xff] }
 0x8b5   :  { %9466 = vmatprep.subr.bf16.mxu1 %v9465_v25  ;;  %v4787_v3 = vld [vmem:[#allocation4 + $0x4d0] sm:$0xff]  ;;  %v4802_v31 = vld [vmem:[#allocation4 + $0x548] sm:$0xff]  ;;  %v4796_v23 = vld [vmem:[#allocation4 + $0x518] sm:$0xff]  ;;  %v9415_v18 = vpack.c.bf16 %v4785_v0, %v4777_v57 }
 0x8b6   :  { %v4804_v59 = vld [vmem:[#allocation4 + $0x558] sm:$0xff]  ;;  %v9479_v34 = vpack.c.bf16 %v4787_v3, %v4779_v38  ;;  %v9417_v29 = vpack.c.bf16 %v4802_v31, %v4794_v44  ;;  %v4793_v63 = vld [vmem:[#allocation4 + $0x500] sm:$0xff]  ;;  %v4795_v49 = vld [vmem:[#allocation4 + $0x510] sm:$0xff] }
 0x8b7   :  { %9404 = vmatpush1.bf16.msra.mxu0 %v9403_v40  ;;  %v4801_v43 = vld [vmem:[#allocation4 + $0x540] sm:$0xff]  ;;  %v9481_v26 = vpack.c.bf16 %v4804_v59, %v4796_v23  ;;  %v4803_v42 = vld [vmem:[#allocation4 + $0x550] sm:$0xff]  ;;  %v4810_v22 = vld [vmem:[#allocation4 + $0x588] sm:$0xff] }
 0x8b8   :  { %9468 = vmatpush1.bf16.msra.mxu1 %v9467_v36  ;;  %9406 = vmatprep.subr.bf16.mxu0 %v9405_v33  ;;  %v4818_v9 = vld [vmem:[#allocation4 + $0x5c8] sm:$0xff]  ;;  %v4812_v51 = vld [vmem:[#allocation4 + $0x598] sm:$0xff]  ;;  %v9419_v50 = vpack.c.bf16 %v4801_v43, %v4793_v63  ;;  %v9483_v8 = vpack.c.bf16 %v4803_v42, %v4795_v49  ;;  %v4809_v1 = vld [vmem:[#allocation4 + $0x580] sm:$0xff] }
 0x8b9   :  { %9470 = vmatprep.subr.bf16.mxu1 %v9469_v62  ;;  %v4820_v20 = vld [vmem:[#allocation4 + $0x5d8] sm:$0xff]  ;;  %v9421_v16 = vpack.c.bf16 %v4818_v9, %v4810_v22  ;;  %v4817_v25 = vld [vmem:[#allocation4 + $0x5c0] sm:$0xff]  ;;  %v4811_v15 = vld [vmem:[#allocation4 + $0x590] sm:$0xff] }
 0x8ba   :  { %v9485_v61 = vpack.c.bf16 %v4820_v20, %v4812_v51  ;;  %v4819_v10 = vld [vmem:[#allocation4 + $0x5d0] sm:$0xff]  ;;  %v4826_v55 = vld [vmem:[#allocation4 + $0x608] sm:$0xff]  ;;  %v4828_v40 = vld [vmem:[#allocation4 + $0x618] sm:$0xff]  ;;  %v9423_v33 = vpack.c.bf16 %v4817_v25, %v4809_v1 }
 0x8bb   :  { %9408 = vmatpush1.bf16.msra.mxu0 %v9407_v30  ;;  %v4834_v37 = vld [vmem:[#allocation4 + $0x648] sm:$0xff]  ;;  %v4836_v36 = vld [vmem:[#allocation4 + $0x658] sm:$0xff]  ;;  %v9487_v7 = vpack.c.bf16 %v4819_v10, %v4811_v15  ;;  %v4825_v24 = vld [vmem:[#allocation4 + $0x600] sm:$0xff] }
 0x8bc   :  { %9472 = vmatpush1.bf16.msra.mxu1 %v9471_v5  ;;  %9410 = vmatprep.subr.bf16.mxu0 %v9409_v60  ;;  %v9425_v21 = vpack.c.bf16 %v4834_v37, %v4826_v55  ;;  %v4833_v62 = vld [vmem:[#allocation4 + $0x640] sm:$0xff]  ;;  %v4827_v32 = vld [vmem:[#allocation4 + $0x610] sm:$0xff]  ;;  %v9489_v45 = vpack.c.bf16 %v4836_v36, %v4828_v40  ;;  %v4842_v17 = vld [vmem:[#allocation4 + $0x688] sm:$0xff] }
 0x8bd   :  { %9474 = vmatprep.subr.bf16.mxu1 %v9473_v13  ;;  %v4835_v27 = vld [vmem:[#allocation4 + $0x650] sm:$0xff]  ;;  %v4850_v56 = vld [vmem:[#allocation4 + $0x6c8] sm:$0xff]  ;;  %v4844_v30 = vld [vmem:[#allocation4 + $0x698] sm:$0xff]  ;;  %v9427_v60 = vpack.c.bf16 %v4833_v62, %v4825_v24 }
 0x8be   :  { %v4852_v5 = vld [vmem:[#allocation4 + $0x6d8] sm:$0xff]  ;;  %v9491_v11 = vpack.c.bf16 %v4835_v27, %v4827_v32  ;;  %v9429_v54 = vpack.c.bf16 %v4850_v56, %v4842_v17  ;;  %v4841_v52 = vld [vmem:[#allocation4 + $0x680] sm:$0xff]  ;;  %v4843_v12 = vld [vmem:[#allocation4 + $0x690] sm:$0xff] }
 0x8bf   :  { %9412 = vmatpush1.bf16.msra.mxu0 %v9411_v14  ;;  %v4849_v13 = vld [vmem:[#allocation4 + $0x6c0] sm:$0xff]  ;;  %v9493_v35 = vpack.c.bf16 %v4852_v5, %v4844_v30  ;;  %v4851_v53 = vld [vmem:[#allocation4 + $0x6d0] sm:$0xff]  ;;  %v4858_v48 = vld [vmem:[#allocation4 + $0x708] sm:$0xff] }
 0x8c0   :  { %9476 = vmatpush1.bf16.msra.mxu1 %v9475_v28  ;;  %9414 = vmatprep.subr.bf16.mxu0 %v9413_v46  ;;  %v4866_v58 = vld [vmem:[#allocation4 + $0x748] sm:$0xff]  ;;  %v4860_v14 = vld [vmem:[#allocation4 + $0x718] sm:$0xff]  ;;  %v9431_v46 = vpack.c.bf16 %v4849_v13, %v4841_v52  ;;  %v9495_v57 = vpack.c.bf16 %v4851_v53, %v4843_v12  ;;  %v4857_v38 = vld [vmem:[#allocation4 + $0x700] sm:$0xff] }
 0x8c1   :  { %9478 = vmatprep.subr.bf16.mxu1 %v9477_v6  ;;  %v4868_v28 = vld [vmem:[#allocation4 + $0x758] sm:$0xff]  ;;  %v9433_v0 = vpack.c.bf16 %v4866_v58, %v4858_v48  ;;  %v4865_v6 = vld [vmem:[#allocation4 + $0x740] sm:$0xff]  ;;  %v4859_v3 = vld [vmem:[#allocation4 + $0x710] sm:$0xff] }
 0x8c2   :  { %v9497_v44 = vpack.c.bf16 %v4868_v28, %v4860_v14  ;;  %v4867_v31 = vld [vmem:[#allocation4 + $0x750] sm:$0xff]  ;;  %v4874_v23 = vld [vmem:[#allocation4 + $0x788] sm:$0xff]  ;;  %v4873_v49 = vld [vmem:[#allocation4 + $0x780] sm:$0xff] }
 0x8c3   :  { %9416 = vmatpush1.bf16.msra.mxu0 %v9415_v18  ;;  %v4882_v59 = vld [vmem:[#allocation4 + $0x7c8] sm:$0xff]  ;;  %v4876_v18 = vld [vmem:[#allocation4 + $0x798] sm:$0xff]  ;;  %v9499_v63 = vpack.c.bf16 %v4867_v31, %v4859_v3  ;;  %v4875_v42 = vld [vmem:[#allocation4 + $0x790] sm:$0xff] }
 0x8c4   :  { %9480 = vmatpush1.bf16.msra.mxu1 %v9479_v34  ;;  %9418 = vmatprep.subr.bf16.mxu0 %v9417_v29  ;;  %v4884_v34 = vld [vmem:[#allocation4 + $0x7d8] sm:$0xff]  ;;  %v9435_v29 = vpack.c.bf16 %v4865_v6, %v4857_v38  ;;  %v9437_v43 = vpack.c.bf16 %v4882_v59, %v4874_v23  ;;  %v4883_v9 = vld [vmem:[#allocation4 + $0x7d0] sm:$0xff]  ;;  %v4638_v51 = vld [vmem:[#allocation4 + $0x28] sm:$0xff] }
 0x8c5   :  { %9482 = vmatprep.subr.bf16.mxu1 %v9481_v26  ;;  %v4881_v26 = vld [vmem:[#allocation4 + $0x7c0] sm:$0xff]  ;;  %v9501_v22 = vpack.c.bf16 %v4884_v34, %v4876_v18  ;;  %v4646_v20 = vld [vmem:[#allocation4 + $0x68] sm:$0xff]  ;;  %v9503_v1 = vpack.c.bf16 %v4883_v9, %v4875_v42  ;;  %v4639_v10 = vld [vmem:[#allocation4 + $0x30] sm:$0xff] }
 0x8c6   :  { %v9505_v25 = vpack.c.bf16 %v4646_v20, %v4638_v51  ;;  %v4637_v15 = vld [vmem:[#allocation4 + $0x20] sm:$0xff]  ;;  %v4647_v37 = vld [vmem:[#allocation4 + $0x70] sm:$0xff]  ;;  %v4654_v40 = vld [vmem:[#allocation4 + $0xa8] sm:$0xff] }
 0x8c7   :  { %9420 = vmatpush1.bf16.msra.mxu0 %v9419_v50  ;;  %v4640_v50 = vld [vmem:[#allocation4 + $0x38] sm:$0xff]  ;;  %v4662_v36 = vld [vmem:[#allocation4 + $0xe8] sm:$0xff]  ;;  %v9571_v24 = vpack.c.bf16 %v4647_v37, %v4639_v10  ;;  %v4653_v32 = vld [vmem:[#allocation4 + $0xa0] sm:$0xff] }
 0x8c8   :  { %9484 = vmatpush1.bf16.msra.mxu1 %v9483_v8  ;;  %9422 = vmatprep.subr.bf16.mxu0 %v9421_v16  ;;  %v4648_v8 = vld [vmem:[#allocation4 + $0x78] sm:$0xff]  ;;  %v9439_v16 = vpack.c.bf16 %v4881_v26, %v4873_v49  ;;  %v9509_v62 = vpack.c.bf16 %v4662_v36, %v4654_v40  ;;  %v4655_v27 = vld [vmem:[#allocation4 + $0xb0] sm:$0xff]  ;;  %v4670_v30 = vld [vmem:[#allocation4 + $0x128] sm:$0xff] }
 0x8c9   :  { %9486 = vmatprep.subr.bf16.mxu1 %v9485_v61  ;;  %v4645_v61 = vld [vmem:[#allocation4 + $0x60] sm:$0xff]  ;;  %v9569_v55 = vpack.c.bf16 %v4648_v8, %v4640_v50  ;;  %v4663_v56 = vld [vmem:[#allocation4 + $0xf0] sm:$0xff]  ;;  %v4678_v5 = vld [vmem:[#allocation4 + $0x168] sm:$0xff] }
 0x8ca   :  { %v9575_v13 = vpack.c.bf16 %v4663_v56, %v4655_v27  ;;  %v9513_v12 = vpack.c.bf16 %v4678_v5, %v4670_v30  ;;  %v4677_v53 = vld [vmem:[#allocation4 + $0x160] sm:$0xff]  ;;  %v4671_v48 = vld [vmem:[#allocation4 + $0x130] sm:$0xff]  ;;  %v4686_v28 = vld [vmem:[#allocation4 + $0x1a8] sm:$0xff] }
 0x8cb   :  { %9424 = vmatpush1.bf16.msra.mxu0 %v9423_v33  ;;  %v4656_v33 = vld [vmem:[#allocation4 + $0xb8] sm:$0xff]  ;;  %v4679_v14 = vld [vmem:[#allocation4 + $0x170] sm:$0xff]  ;;  %v14251_v38 = vld [vmem:[#allocation44_spill] sm:$0xff] }
 0x8cc   :  { %9488 = vmatpush1.bf16.msra.mxu1 %v9487_v7  ;;  %9426 = vmatprep.subr.bf16.mxu0 %v9425_v21  ;;  %v4664_v7 = vld [vmem:[#allocation4 + $0xf8] sm:$0xff]  ;;  %v9507_v21 = vpack.c.bf16 %v4645_v61, %v4637_v15  ;;  %v9579_v3 = vpack.c.bf16 %v4679_v14, %v4671_v48  ;;  %v4685_v31 = vld [vmem:[#allocation4 + $0x1a0] sm:$0xff]  ;;  %v4687_v59 = vld [vmem:[#allocation4 + $0x1b0] sm:$0xff] }
 0x8cd   :  { %9490 = vmatprep.subr.bf16.mxu1 %v9489_v45  ;;  %v4661_v45 = vld [vmem:[#allocation4 + $0xe0] sm:$0xff]  ;;  %v9573_v17 = vpack.c.bf16 %v4664_v7, %v4656_v33  ;;  %v4695_v34 = vld [vmem:[#allocation4 + $0x1f0] sm:$0xff]  ;;  %v4712_v49 = vld [vmem:[#allocation4 + $0x278] sm:$0xff] }
 0x8ce   :  { %v9511_v52 = vpack.c.bf16 %v4661_v45, %v4653_v32  ;;  %v4693_v23 = vld [vmem:[#allocation4 + $0x1e0] sm:$0xff]  ;;  %v14252_v26 = vld [vmem:[#allocation41_spill] sm:$0xff]  ;;  %v4720_v61 = vld [vmem:[#allocation4 + $0x2b8] sm:$0xff] }
 0x8cf   :  { %9428 = vmatpush1.bf16.msra.mxu0 %v9427_v60  ;;  %v14250_v60 = vld [vmem:[#allocation56_spill] sm:$0xff]  ;;  %v9519_v42 = vpack.c.bf16 %v4693_v23, %v4685_v31  ;;  %v4701_v51 = vld [vmem:[#allocation4 + $0x220] sm:$0xff]  ;;  %v4703_v50 = vld [vmem:[#allocation4 + $0x230] sm:$0xff] }
 0x8d0   :  { %9492 = vmatpush1.bf16.msra.mxu1 %v9491_v11  ;;  %9430 = vmatprep.subr.bf16.mxu0 %v9429_v54  ;;  %v4672_v11 = vld [vmem:[#allocation4 + $0x138] sm:$0xff]  ;;  %v4709_v20 = vld [vmem:[#allocation4 + $0x260] sm:$0xff]  ;;  %v14253_v15 = vld [vmem:[#allocation45_spill] sm:$0xff] }
 0x8d1   :  { %9494 = vmatprep.subr.bf16.mxu1 %v9493_v35  ;;  %v4680_v54 = vld [vmem:[#allocation4 + $0x178] sm:$0xff]  ;;  %v4669_v35 = vld [vmem:[#allocation4 + $0x120] sm:$0xff]  ;;  %v9523_v37 = vpack.c.bf16 %v4709_v20, %v4701_v51  ;;  %v4734_v32 = vld [vmem:[#allocation4 + $0x328] sm:$0xff] }
 0x8d2   :  { %v9577_v58 = vpack.c.bf16 %v4680_v54, %v4672_v11  ;;  %v9515_v6 = vpack.c.bf16 %v4677_v53, %v4669_v35  ;;  %v4728_v10 = vld [vmem:[#allocation4 + $0x2f8] sm:$0xff]  ;;  %v4717_v33 = vld [vmem:[#allocation4 + $0x2a0] sm:$0xff]  ;;  %v4742_v45 = vld [vmem:[#allocation4 + $0x368] sm:$0xff] }
 0x8d3   :  { %9432 = vmatpush1.bf16.msra.mxu0 %v9431_v46  ;;  %v4694_v46 = vld [vmem:[#allocation4 + $0x1e8] sm:$0xff]  ;;  %v4725_v7 = vld [vmem:[#allocation4 + $0x2e0] sm:$0xff]  ;;  %v4744_v56 = vld [vmem:[#allocation4 + $0x378] sm:$0xff] }
 0x8d4   :  { %9496 = vmatpush1.bf16.msra.mxu1 %v9495_v57  ;;  %9434 = vmatprep.subr.bf16.mxu0 %v9433_v0  ;;  %v4688_v57 = vld [vmem:[#allocation4 + $0x1b8] sm:$0xff]  ;;  %v14255_v27 = vld [vmem:[#allocation71_spill] sm:$0xff]  ;;  %v9527_v5 = vpack.c.bf16 %v4725_v7, %v4717_v33  ;;  %v4743_v48 = vld [vmem:[#allocation4 + $0x370] sm:$0xff] }
 0x8d5   :  { %9498 = vmatprep.subr.bf16.mxu1 %v9497_v44  ;;  %v4696_v0 = vld [vmem:[#allocation4 + $0x1f8] sm:$0xff]  ;;  %v9517_v44 = vpack.c.bf16 %v4694_v46, %v4686_v28  ;;  %v14256_v30 = vld [vmem:[#allocation43_spill] sm:$0xff]  ;;  %v4758_v14 = vld [vmem:[#allocation4 + $0x3e8] sm:$0xff] }
 0x8d6   :  { %v9581_v18 = vpack.c.bf16 %v4696_v0, %v4688_v57  ;;  %v4733_v11 = vld [vmem:[#allocation4 + $0x320] sm:$0xff]  ;;  %v14257_v28 = vld [vmem:[#allocation42_spill] sm:$0xff]  ;;  %v4790_v33 = vld [vmem:[#allocation4 + $0x4e8] sm:$0xff] }
 0x8d7   :  { %9436 = vmatpush1.bf16.msra.mxu0 %v9435_v29  ;;  %v4702_v29 = vld [vmem:[#allocation4 + $0x228] sm:$0xff]  ;;  %v12976_v35 = vld [vmem:[%s13855_s8] sm:$0xff]  ;;  %v14258_v46 = vld [vmem:[#allocation50_spill] sm:$0xff] }
 0x8d8   :  { %9500 = vmatpush1.bf16.msra.mxu1 %v9499_v63  ;;  %9438 = vmatprep.subr.bf16.mxu0 %v9437_v43  ;;  %v4710_v63 = vld [vmem:[#allocation4 + $0x268] sm:$0xff]  ;;  %v4704_v43 = vld [vmem:[#allocation4 + $0x238] sm:$0xff]  ;;  %v14259_v57 = vsub.s32 1, %v14258_v46  ;;  %v14262_v31 = vsub.s32 5, %v14258_v46  ;;  %v14264_v51 = vld [vmem:[#allocation67_spill] sm:$0xff] }
 0x8d9   :  { %9502 = vmatprep.subr.bf16.mxu1 %v9501_v22  ;;  %v9583_v22 = vpack.c.bf16 %v4695_v34, %v4687_v59  ;;  %v9521_v9 = vpack.c.bf16 %v4710_v63, %v4702_v29  ;;  %v9585_v8 = vpack.c.bf16 %v4712_v49, %v4704_v43  ;;  %v4749_v29 = vld [vmem:[#allocation4 + $0x3a0] sm:$0xff]  ;;  %v4751_v43 = vld [vmem:[#allocation4 + $0x3b0] sm:$0xff]  ;;  %v4768_v20 = vld [vmem:[#allocation4 + $0x438] sm:$0xff] }
 0x8da   :  { %v12982_v0 = vrot.slane %v12976_v35, %v14259_v57  ;;  %v12989_v23 = vrot.slane %v12976_v35, %v14262_v31  ;;  %v4757_v63 = vld [vmem:[#allocation4 + $0x3e0] sm:$0xff]  ;;  %v14265_v7 = vld [vmem:[#allocation40_spill] sm:$0xff] }
 0x8db   :  { %9440 = vmatpush1.bf16.msra.mxu0 %v9439_v16  ;;  %v4711_v16 = vld [vmem:[#allocation4 + $0x270] sm:$0xff]  ;;  %v4797_v57 = vld [vmem:[#allocation4 + $0x520] sm:$0xff] }
 0x8dc   :  { %9504 = vmatpush1.bf16.msra.mxu1 %v9503_v1  ;;  %9506 = vmatprep.subr.bf16.mxu0 %v9505_v25  ;;  %v4718_v1 = vld [vmem:[#allocation4 + $0x2a8] sm:$0xff]  ;;  %v9587_v40 = vpack.c.bf16 %v4711_v16, %v4703_v50  ;;  %14260 = vst [vmem:[#allocation46_spill] sm:$0xff] %v12982_v0  ;;  %14263 = vst [vmem:[#allocation48_spill] sm:$0xff] %v12989_v23  ;;  %v4776_v50 = vld [vmem:[#allocation4 + $0x478] sm:$0xff] }
 0x8dd   :  { %9570 = vmatprep.subr.bf16.mxu1 %v9569_v55  ;;  %v4726_v25 = vld [vmem:[#allocation4 + $0x2e8] sm:$0xff]  ;;  %v14254_v55 = vld [vmem:[#allocation47_spill] sm:$0xff] }
 0x8de   :  { %4996 = vmatmul.mubr.f32.vlgmr.msra.gmra.mrb[32].mxu0 %v14250_v60  ;;  %v9525_v36 = vpack.c.bf16 %v4726_v25, %v4718_v1  ;;  %v4765_v25 = vld [vmem:[#allocation4 + $0x420] sm:$0xff] }
 0x8df   :  { %5109 = vmatmul.mubr.f32.vlgmr.msra.gmra.mrb[32].mxu1 %v14250_v60  ;;  %9508 = vmatpush1.bf16.msra.mxu0 %v9507_v21  ;;  %v4719_v21 = vld [vmem:[#allocation4 + $0x2b0] sm:$0xff] }
 0x8e0   :  { %9572 = vmatpush1.bf16.msra.mxu1 %v9571_v24  ;;  %9510 = vmatprep.subr.bf16.mxu0 %v9509_v62  ;;  %v9589_v24 = vpack.c.bf16 %v4728_v10, %v4720_v61  ;;  %v4727_v62 = vld [vmem:[#allocation4 + $0x2f0] sm:$0xff]  ;;  %v4773_v61 = vld [vmem:[#allocation4 + $0x460] sm:$0xff] }
 0x8e1   :  { %9574 = vmatprep.subr.bf16.mxu1 %v9573_v17  ;;  %5001 = vmatprep.mubr.f32.mxu0 %v12885_v39  ;;  %v4736_v17 = vld [vmem:[#allocation4 + $0x338] sm:$0xff]  ;;  %v9591_v54 = vpack.c.bf16 %v4727_v62, %v4719_v21  ;;  %v4767_v10 = vld [vmem:[#allocation4 + $0x430] sm:$0xff]  ;;  %v9539_v62 = vpack.c.bf16 %v4773_v61, %v4765_v25 }
 0x8e2   :  { %5114 = vmatprep.mubr.f32.mxu1 %v12885_v39  ;;  %5002 = vmatmul.mubr.f32.gmra.mrb[34].mxu0 %v14251_v38  ;;  %v9593_v53 = vpack.c.bf16 %v4744_v56, %v4736_v17  ;;  %v4784_v21 = vld [vmem:[#allocation4 + $0x4b8] sm:$0xff]  ;;  %v4781_v17 = vld [vmem:[#allocation4 + $0x4a0] sm:$0xff] }
 0x8e3   :  { %9512 = vmatpush1.bf16.msra.mxu0 %v9511_v52  ;;  %5115 = vmatmul.mubr.f32.gmra.mrb[34].mxu1 %v14251_v38  ;;  %v9529_v52 = vpack.c.bf16 %v4742_v45, %v4734_v32  ;;  %v4789_v56 = vld [vmem:[#allocation4 + $0x4e0] sm:$0xff]  ;;  %v4840_v25 = vld [vmem:[#allocation4 + $0x678] sm:$0xff] }
 0x8e4   :  { %9576 = vmatpush1.bf16.msra.mxu1 %v9575_v13  ;;  %9514 = vmatprep.subr.bf16.mxu0 %v9513_v12  ;;  %v4741_v13 = vld [vmem:[#allocation4 + $0x360] sm:$0xff]  ;;  %v4735_v12 = vld [vmem:[#allocation4 + $0x330] sm:$0xff] }
 0x8e5   :  { %9578 = vmatprep.subr.bf16.mxu1 %v9577_v58  ;;  %5007 = vmatprep.mubr.f32.mxu0 %v12793_v4  ;;  %v4750_v58 = vld [vmem:[#allocation4 + $0x3a8] sm:$0xff]  ;;  %v9531_v59 = vpack.c.bf16 %v4741_v13, %v4733_v11 }
 0x8e6   :  { %5120 = vmatprep.mubr.f32.mxu1 %v12793_v4  ;;  %5008 = vmatmul.mubr.f32.gmra.mrb[36].mxu0 %v14252_v26  ;;  %v9533_v34 = vpack.c.bf16 %v4758_v14, %v4750_v58  ;;  %v4806_v13 = vld [vmem:[#allocation4 + $0x568] sm:$0xff] }
 0x8e7   :  { %9516 = vmatpush1.bf16.msra.mxu0 %v9515_v6  ;;  %5121 = vmatmul.mubr.f32.gmra.mrb[36].mxu1 %v14252_v26  ;;  %v4752_v6 = vld [vmem:[#allocation4 + $0x3b8] sm:$0xff] }
 0x8e8   :  { %9580 = vmatpush1.bf16.msra.mxu1 %v9579_v3  ;;  %9518 = vmatprep.subr.bf16.mxu0 %v9517_v44  ;;  %v4760_v3 = vld [vmem:[#allocation4 + $0x3f8] sm:$0xff] }
 0x8e9   :  { %9582 = vmatprep.subr.bf16.mxu1 %v9581_v18  ;;  %5013 = vmatprep.mubr.f32.mxu0 %v14253_v15  ;;  %v14261_v44 = vld [vmem:[#allocation58_spill] sm:$0xff]  ;;  %v9595_v18 = vpack.c.bf16 %v4743_v48, %v4735_v12  ;;  %v9597_v49 = vpack.c.bf16 %v4760_v3, %v4752_v6  ;;  %v9543_v48 = vpack.c.bf16 %v4789_v56, %v4781_v17  ;;  %v4805_v6 = vld [vmem:[#allocation4 + $0x560] sm:$0xff]  ;;  %v4799_v3 = vld [vmem:[#allocation4 + $0x530] sm:$0xff] }
 0x8ea   :  { %5126 = vmatprep.mubr.f32.mxu1 %v14253_v15  ;;  %5014 = vmatmul.mubr.f32.gmra.mrb[38].mxu0 %v14254_v55  ;;  %v4800_v12 = vld [vmem:[#allocation4 + $0x538] sm:$0xff] }
 0x8eb   :  { %9520 = vmatpush1.bf16.msra.mxu0 %v9519_v42  ;;  %5127 = vmatmul.mubr.f32.gmra.mrb[38].mxu1 %v14254_v55  ;;  %v4759_v42 = vld [vmem:[#allocation4 + $0x3f0] sm:$0xff]  ;;  %v4856_v17 = vld [vmem:[#allocation4 + $0x6f8] sm:$0xff] }
 0x8ec   :  { %9584 = vmatpush1.bf16.msra.mxu1 %v9583_v22  ;;  %9522 = vmatprep.subr.bf16.mxu0 %v9521_v9  ;;  %v4766_v22 = vld [vmem:[#allocation4 + $0x428] sm:$0xff]  ;;  %v9599_v16 = vpack.c.bf16 %v4759_v42, %v4751_v43  ;;  %v9547_v43 = vpack.c.bf16 %v4805_v6, %v4797_v57  ;;  %v4813_v42 = vld [vmem:[#allocation4 + $0x5a0] sm:$0xff]  ;;  %v4872_v57 = vld [vmem:[#allocation4 + $0x778] sm:$0xff] }
 0x8ed   :  { %9586 = vmatprep.subr.bf16.mxu1 %v9585_v8  ;;  %5019 = vmatprep.mubr.f32.mxu0 %v14255_v27  ;;  %v4774_v9 = vld [vmem:[#allocation4 + $0x468] sm:$0xff]  ;;  %v9535_v8 = vpack.c.bf16 %v4757_v63, %v4749_v29  ;;  %v4816_v29 = vld [vmem:[#allocation4 + $0x5b8] sm:$0xff] }
 0x8ee   :  { %5132 = vmatprep.mubr.f32.mxu1 %v14255_v27  ;;  %5020 = vmatmul.mubr.f32.gmra.mrb[40].mxu0 %v14256_v30  ;;  %v9537_v1 = vpack.c.bf16 %v4774_v9, %v4766_v22  ;;  %v4824_v63 = vld [vmem:[#allocation4 + $0x5f8] sm:$0xff]  ;;  %v4821_v22 = vld [vmem:[#allocation4 + $0x5e0] sm:$0xff]  ;;  %v4815_v9 = vld [vmem:[#allocation4 + $0x5b0] sm:$0xff] }
 0x8ef   :  { %9524 = vmatpush1.bf16.msra.mxu0 %v9523_v37  ;;  %5133 = vmatmul.mubr.f32.gmra.mrb[40].mxu1 %v14256_v30  ;;  %v9601_v37 = vpack.c.bf16 %v4776_v50, %v4768_v20  ;;  %v9613_v20 = vpack.c.bf16 %v4824_v63, %v4816_v29  ;;  %v4823_v50 = vld [vmem:[#allocation4 + $0x5f0] sm:$0xff]  ;;  %v9551_v61 = vpack.c.bf16 %v4821_v22, %v4813_v42  ;;  %v4888_v42 = vld [vmem:[#allocation4 + $0x7f8] sm:$0xff] }
 0x8f0   :  { %9588 = vmatpush1.bf16.msra.mxu1 %v9587_v40  ;;  %9526 = vmatprep.subr.bf16.mxu0 %v9525_v36  ;;  %v4775_v40 = vld [vmem:[#allocation4 + $0x470] sm:$0xff]  ;;  %v4782_v36 = vld [vmem:[#allocation4 + $0x4a8] sm:$0xff] }
 0x8f1   :  { %9590 = vmatprep.subr.bf16.mxu1 %v9589_v24  ;;  %5025 = vmatprep.mubr.f32.mxu0 %v14257_v28  ;;  %v4792_v24 = vld [vmem:[#allocation4 + $0x4f8] sm:$0xff]  ;;  %v9603_v32 = vpack.c.bf16 %v4775_v40, %v4767_v10  ;;  %v9541_v45 = vpack.c.bf16 %v4790_v33, %v4782_v36  ;;  %v9615_v10 = vpack.c.bf16 %v4823_v50, %v4815_v9  ;;  %v4829_v40 = vld [vmem:[#allocation4 + $0x620] sm:$0xff]  ;;  %v4831_v33 = vld [vmem:[#allocation4 + $0x630] sm:$0xff] }
 0x8f2   :  { %5138 = vmatprep.mubr.f32.mxu1 %v14257_v28  ;;  %5026 = vmatmul.mubr.f32.gmra.mrb[42].mxu0 %v14261_v44  ;;  %v9605_v11 = vpack.c.bf16 %v4792_v24, %v4784_v21  ;;  %v4837_v36 = vld [vmem:[#allocation4 + $0x660] sm:$0xff]  ;;  %v4839_v24 = vld [vmem:[#allocation4 + $0x670] sm:$0xff] }
 0x8f3   :  { %9528 = vmatpush1.bf16.msra.mxu0 %v9527_v5  ;;  %5139 = vmatmul.mubr.f32.gmra.mrb[42].mxu1 %v14261_v44  ;;  %v4783_v5 = vld [vmem:[#allocation4 + $0x4b0] sm:$0xff]  ;;  %v9555_v56 = vpack.c.bf16 %v4837_v36, %v4829_v40  ;;  %v4877_v50 = vld [vmem:[#allocation4 + $0x7a0] sm:$0xff]  ;;  %v14276_v36 = vsub.s32 7, %v14258_v46 }
 0x8f4   :  { %9592 = vmatpush1.bf16.msra.mxu1 %v9591_v54  ;;  %9530 = vmatprep.subr.bf16.mxu0 %v9529_v52  ;;  %v4791_v54 = vld [vmem:[#allocation4 + $0x4f0] sm:$0xff]  ;;  %v4798_v52 = vld [vmem:[#allocation4 + $0x528] sm:$0xff] }
 0x8f5   :  { %9594 = vmatprep.subr.bf16.mxu1 %v9593_v53  ;;  %5031 = vmatprep.mubr.f32.mxu0 %v14264_v51  ;;  %v4808_v53 = vld [vmem:[#allocation4 + $0x578] sm:$0xff]  ;;  %v9607_v58 = vpack.c.bf16 %v4791_v54, %v4783_v5  ;;  %v9545_v14 = vpack.c.bf16 %v4806_v13, %v4798_v52  ;;  %v9619_v5 = vpack.c.bf16 %v4839_v24, %v4831_v33  ;;  %v4845_v54 = vld [vmem:[#allocation4 + $0x6a0] sm:$0xff]  ;;  %v4847_v13 = vld [vmem:[#allocation4 + $0x6b0] sm:$0xff] }
 0x8f6   :  { %5144 = vmatprep.mubr.f32.mxu1 %v14264_v51  ;;  %5032 = vmatmul.mubr.f32.gmra.mrb[44].mxu0 %v12843_v41  ;;  %v9609_v31 = vpack.c.bf16 %v4808_v53, %v4800_v12  ;;  %v4853_v52 = vld [vmem:[#allocation4 + $0x6e0] sm:$0xff]  ;;  %v4855_v53 = vld [vmem:[#allocation4 + $0x6f0] sm:$0xff]  ;;  %v13063_v33 = vrot.slane %v12976_v35, %v14276_v36 }
 0x8f7   :  { %9532 = vmatpush1.bf16.msra.mxu0 %v9531_v59  ;;  %5145 = vmatmul.mubr.f32.gmra.mrb[44].mxu1 %v12843_v41  ;;  %v4807_v59 = vld [vmem:[#allocation4 + $0x570] sm:$0xff]  ;;  %v9559_v6 = vpack.c.bf16 %v4853_v52, %v4845_v54 }
 0x8f8   :  { %9596 = vmatpush1.bf16.msra.mxu1 %v9595_v18  ;;  %9534 = vmatprep.subr.bf16.mxu0 %v9533_v34  ;;  %v4814_v18 = vld [vmem:[#allocation4 + $0x5a8] sm:$0xff]  ;;  %v4871_v63 = vld [vmem:[#allocation4 + $0x770] sm:$0xff]  ;;  %14277 = vst [vmem:[#allocation55_spill] sm:$0xff] %v13063_v33 }
 0x8f9   :  { %9598 = vmatprep.subr.bf16.mxu1 %v9597_v49  ;;  %5037 = vmatprep.mubr.f32.mxu0 %v14265_v7  ;;  %v4822_v34 = vld [vmem:[#allocation4 + $0x5e8] sm:$0xff] }
 0x8fa   :  { %5150 = vmatprep.mubr.f32.mxu1 %v14265_v7  ;;  %5038 = vmatmul.mubr.f32.gmra.mrb[46].mxu0 %v12944_v47  ;;  %v9549_v49 = vpack.c.bf16 %v4822_v34, %v4814_v18  ;;  %v4869_v18 = vld [vmem:[#allocation4 + $0x760] sm:$0xff]  ;;  %v4863_v34 = vld [vmem:[#allocation4 + $0x730] sm:$0xff] }
 0x8fb   :  { %9536 = vmatpush1.bf16.msra.mxu0 %v9535_v8  ;;  %5151 = vmatmul.mubr.f32.gmra.mrb[46].mxu1 %v12944_v47  ;;  %v4830_v8 = vld [vmem:[#allocation4 + $0x628] sm:$0xff]  ;;  %v9627_v9 = vpack.c.bf16 %v4871_v63, %v4863_v34 }
 0x8fc   :  { %9600 = vmatpush1.bf16.msra.mxu1 %v9599_v16  ;;  %9538 = vmatprep.subr.bf16.mxu0 %v9537_v1  ;;  %v4838_v16 = vld [vmem:[#allocation4 + $0x668] sm:$0xff]  ;;  %v4832_v1 = vld [vmem:[#allocation4 + $0x638] sm:$0xff] }
 0x8fd   :  { %9602 = vmatprep.subr.bf16.mxu1 %v9601_v37  ;;  %5221 = vmatprep.mubr.f32.mxu0 %v12950_v2  ;;  %v9553_v37 = vpack.c.bf16 %v4838_v16, %v4830_v8  ;;  %v9617_v21 = vpack.c.bf16 %v4840_v25, %v4832_v1  ;;  %v4885_v8 = vld [vmem:[#allocation4 + $0x7e0] sm:$0xff]  ;;  %v4879_v1 = vld [vmem:[#allocation4 + $0x7b0] sm:$0xff] }
 0x8fe   :  { %5334 = vmatprep.mubr.f32.mxu1 %v12950_v2  ;;  %v9611_v2 = vpack.c.bf16 %v4807_v59, %v4799_v3  ;;  %v9623_v3 = vpack.c.bf16 %v4855_v53, %v4847_v13  ;;  %v4861_v59 = vld [vmem:[#allocation4 + $0x720] sm:$0xff]  ;;  %v4887_v25 = vld [vmem:[#allocation4 + $0x7f0] sm:$0xff] }
 0x8ff   :  { %9540 = vmatpush1.bf16.msra.mxu0 %v9539_v62  ;;  %v4846_v62 = vld [vmem:[#allocation4 + $0x6a8] sm:$0xff]  ;;  %v9563_v22 = vpack.c.bf16 %v4869_v18, %v4861_v59 }
 0x900   :  { %9604 = vmatpush1.bf16.msra.mxu1 %v9603_v32  ;;  %9542 = vmatprep.subr.bf16.mxu0 %v9541_v45  ;;  %v4854_v32 = vld [vmem:[#allocation4 + $0x6e8] sm:$0xff]  ;;  %v4848_v45 = vld [vmem:[#allocation4 + $0x6b8] sm:$0xff] }
 0x901   :  { %9606 = vmatprep.subr.bf16.mxu1 %v9605_v11  ;;  %v9557_v11 = vpack.c.bf16 %v4854_v32, %v4846_v62  ;;  %v9621_v12 = vpack.c.bf16 %v4856_v17, %v4848_v45 }
 0x903   :  { %9544 = vmatpush1.bf16.msra.mxu0 %v9543_v48  ;;  %v4862_v48 = vld [vmem:[#allocation4 + $0x728] sm:$0xff] }
 0x904   :  { %9608 = vmatpush1.bf16.msra.mxu1 %v9607_v58  ;;  %9546 = vmatprep.subr.bf16.mxu0 %v9545_v14  ;;  %v4870_v58 = vld [vmem:[#allocation4 + $0x768] sm:$0xff]  ;;  %v4864_v14 = vld [vmem:[#allocation4 + $0x738] sm:$0xff] }
 0x905   :  { %9610 = vmatprep.subr.bf16.mxu1 %v9609_v31  ;;  %v9561_v31 = vpack.c.bf16 %v4870_v58, %v4862_v48  ;;  %v9625_v29 = vpack.c.bf16 %v4872_v57, %v4864_v14 }
 0x907   :  { %9548 = vmatpush1.bf16.msra.mxu0 %v9547_v43  ;;  %v4878_v43 = vld [vmem:[#allocation4 + $0x7a8] sm:$0xff] }
 0x908   :  { %9612 = vmatpush1.bf16.msra.mxu1 %v9611_v2  ;;  %9550 = vmatprep.subr.bf16.mxu0 %v9549_v49  ;;  %v4886_v2 = vld [vmem:[#allocation4 + $0x7e8] sm:$0xff]  ;;  %v4880_v49 = vld [vmem:[#allocation4 + $0x7b8] sm:$0xff] }
 0x909   :  { %9614 = vmatprep.subr.bf16.mxu1 %v9613_v20  ;;  %v9565_v20 = vpack.c.bf16 %v4886_v2, %v4878_v43  ;;  %v9629_v16 = vpack.c.bf16 %v4888_v42, %v4880_v49 }
 0x90b   :  { %9552 = vmatpush1.bf16.msra.mxu0 %v9551_v61  ;;  %v9567_v61 = vpack.c.bf16 %v4885_v8, %v4877_v50 }
 0x90c   :  { %9616 = vmatpush1.bf16.msra.mxu1 %v9615_v10  ;;  %9554 = vmatprep.subr.bf16.mxu0 %v9553_v37  ;;  %v9631_v10 = vpack.c.bf16 %v4887_v25, %v4879_v1  ;;  %v14274_v37 = vsub.s32 6, %v14258_v46 }
 0x90d   :  { %9618 = vmatprep.subr.bf16.mxu1 %v9617_v21 }
 0x90e   :  { %v13058_v40 = vrot.slane %v12976_v35, %v14274_v37 }
 0x90f   :  { %9556 = vmatpush1.bf16.msra.mxu0 %v9555_v56 }
 0x910   :  { %9620 = vmatpush1.bf16.msra.mxu1 %v9619_v5  ;;  %9558 = vmatprep.subr.bf16.mxu0 %v9557_v11  ;;  %14275 = vst [vmem:[#allocation49_spill] sm:$0xff] %v13058_v40 }
 0x911   :  { %9622 = vmatprep.subr.bf16.mxu1 %v9621_v12 }
 0x913   :  { %9560 = vmatpush1.bf16.msra.mxu0 %v9559_v6 }
 0x914   :  { %9624 = vmatpush1.bf16.msra.mxu1 %v9623_v3  ;;  %9562 = vmatprep.subr.bf16.mxu0 %v9561_v31 }
 0x915   :  { %9626 = vmatprep.subr.bf16.mxu1 %v9625_v29 }
 0x917   :  { %9564 = vmatpush1.bf16.msra.mxu0 %v9563_v22 }
 0x918   :  { %9628 = vmatpush1.bf16.msra.mxu1 %v9627_v9  ;;  %9566 = vmatprep.subr.bf16.mxu0 %v9565_v20 }
 0x919   :  { %9630 = vmatprep.subr.bf16.mxu1 %v9629_v16 }
 0x91b   :  { %9568 = vmatpush1.bf16.msra.mxu0 %v9567_v61 }
 0x91c   :  { %9632 = vmatpush1.bf16.msra.mxu1 %v9631_v10 }
 0x91e   :  { %5222 = vmatmul.mubr.f32.vlgmr.msra.gmra.mrb[48].mxu0 %v14250_v60 }
 0x91f   :  { %5335 = vmatmul.mubr.f32.vlgmr.msra.gmra.mrb[48].mxu1 %v14250_v60  ;;  %5227 = vmatprep.mubr.f32.mxu0 %v12885_v39  ;;  %v14268_v60 = vsub.s32 2, %v14258_v46 }
 0x920   :  { %5340 = vmatprep.mubr.f32.mxu1 %v12885_v39 }
 0x922   :  { %5228 = vmatmul.mubr.f32.gmra.mrb[50].mxu0 %v14251_v38 }
 0x923   :  { %5341 = vmatmul.mubr.f32.gmra.mrb[50].mxu1 %v14251_v38  ;;  %5233 = vmatprep.mubr.f32.mxu0 %v12793_v4  ;;  %v13040_v38 = vrot.slane %v12976_v35, %v14268_v60 }
 0x924   :  { %5346 = vmatprep.mubr.f32.mxu1 %v12793_v4  ;;  %v14266_v4 = vsub.s32 0, %v14258_v46 }
 0x925   :  { %14269 = vst [vmem:[#allocation52_spill] sm:$0xff] %v13040_v38 }
 0x926   :  { %5234 = vmatmul.mubr.f32.gmra.mrb[52].mxu0 %v14252_v26  ;;  %v13035_v39 = vrot.slane %v12976_v35, %v14266_v4 }
 0x927   :  { %5347 = vmatmul.mubr.f32.gmra.mrb[52].mxu1 %v14252_v26  ;;  %5239 = vmatprep.mubr.f32.mxu0 %v14253_v15 }
 0x928   :  { %5352 = vmatprep.mubr.f32.mxu1 %v14253_v15  ;;  %14267 = vst [vmem:[#allocation51_spill] sm:$0xff] %v13035_v39 }
 0x92a   :  { %5240 = vmatmul.mubr.f32.gmra.mrb[54].mxu0 %v14254_v55 }
 0x92b   :  { %5353 = vmatmul.mubr.f32.gmra.mrb[54].mxu1 %v14254_v55  ;;  %5245 = vmatprep.mubr.f32.mxu0 %v14255_v27 }
 0x92c   :  { %5358 = vmatprep.mubr.f32.mxu1 %v14255_v27 }
 0x92e   :  { %5246 = vmatmul.mubr.f32.gmra.mrb[56].mxu0 %v14256_v30 }
 0x92f   :  { %5359 = vmatmul.mubr.f32.gmra.mrb[56].mxu1 %v14256_v30  ;;  %5251 = vmatprep.mubr.f32.mxu0 %v14257_v28 }
 0x930   :  { %5364 = vmatprep.mubr.f32.mxu1 %v14257_v28 }
 0x932   :  { %5252 = vmatmul.mubr.f32.gmra.mrb[58].mxu0 %v14261_v44 }
 0x933   :  { %5365 = vmatmul.mubr.f32.gmra.mrb[58].mxu1 %v14261_v44  ;;  %5257 = vmatprep.mubr.f32.mxu0 %v14264_v51 }
 0x934   :  { %5370 = vmatprep.mubr.f32.mxu1 %v14264_v51  ;;  %v14272_v51 = vsub.s32 4, %v14258_v46 }
 0x936   :  { %5258 = vmatmul.mubr.f32.gmra.mrb[60].mxu0 %v12843_v41 }
 0x937   :  { %5371 = vmatmul.mubr.f32.gmra.mrb[60].mxu1 %v12843_v41  ;;  %5263 = vmatprep.mubr.f32.mxu0 %v14265_v7  ;;  %v14270_v41 = vsub.s32 3, %v14258_v46 }
 0x938   :  { %5376 = vmatprep.mubr.f32.mxu1 %v14265_v7  ;;  %v13053_v7 = vrot.slane %v12976_v35, %v14272_v51 }
 0x939   :  { %v13045_v26 = vrot.slane %v12976_v35, %v14270_v41 }
 0x93a   :  { %5264 = vmatmul.mubr.f32.gmra.mrb[62].mxu0 %v12944_v47  ;;  %14273 = vst [vmem:[#allocation54_spill] sm:$0xff] %v13053_v7 }
 0x93b   :  { %5377 = vmatmul.mubr.f32.gmra.mrb[62].mxu1 %v12944_v47  ;;  %14271 = vst [vmem:[#allocation53_spill] sm:$0xff] %v13045_v26 }
 0x9b1   :  { %v4997_v15 = vpop.f32.mrb[32].mxu0 }
 0x9b2   :  { %v5110_v55 = vpop.f32.mrb[32].mxu1  ;;  %v4998_v27 = vadd.f32 %v4997_v15, %v13035_v39  ;;  %v4999_v47 = vpop.f32.mrb[33].mxu0 }
 0x9b3   :  { %v5111_v30 = vadd.f32 %v5110_v55, %v13040_v38  ;;  %v5112_v28 = vpop.f32.mrb[33].mxu1 }
 0x9b4   :  { %v5113_v44 = vadd.f32 %v5112_v28, %v13045_v26 }
 0xa0d   :  { %v5265_v21 = vpop.f32.mrb[62].mxu0 }
 0xa0e   :  { %v13066_v24 = vadd.f32 %v5265_v21, %v13053_v7  ;;  %v5378_v62 = vpop.f32.mrb[62].mxu1  ;;  %v5267_v32 = vpop.f32.mrb[63].mxu0 }
 0xa0f   :  { %v13069_v45 = vadd.f32 %v5378_v62, %v13058_v40  ;;  %v5380_v17 = vpop.f32.mrb[63].mxu1 }
 0xa10   :  { %v13072_v56 = vadd.f32 %v5380_v17, %v13063_v33 }
 0xa11   :  { %11389 = dma.done.wait [#allocation8 + $0x1], 8192 }
 0xa12   :  { %11390 = vsyncadd [#allocation8 + $0x1], 4294959104 }
 0xa13   :  { %11391 = dma.done.wait [#allocation8 + $0x2], 8192 }
 0xa14   :  { %11392 = vsyncadd [#allocation8 + $0x2], 4294959104  ;;  %5615 = vmatprep.mubr.f32.mxu0 %v14101_v19  ;;  %v5456_v35 = vmul.f32 0.5, %v4998_v27  ;;  %5686 = vmatprep.mubr.f32.mxu1 %v14101_v19  ;;  %v5488_v46 = vld [vmem:[#allocation5 + $0x8] sm:$0xff]  ;;  %v5487_v11 = vld [vmem:[#allocation5] sm:$0xff]  ;;  %v5461_v25 = vmul.f32 0.5, %v5113_v44 }
 0xa15   :  { %v5492_v5 = vld [vmem:[#allocation5 + $0x28] sm:$0xff]  ;;  %v5491_v52 = vld [vmem:[#allocation5 + $0x20] sm:$0xff]  ;;  %v5490_v57 = vld [vmem:[#allocation5 + $0x18] sm:$0xff] }
 0xa16   :  { %10979 = vtanh.f32 %v5456_v35  ;;  %v13076_v54 = vpack.c.bf16 %v5492_v5, %v5488_v46  ;;  %v5496_v13 = vld [vmem:[#allocation5 + $0x48] sm:$0xff]  ;;  %v13078_v53 = vpack.c.bf16 %v5491_v52, %v5487_v11  ;;  %v5495_v58 = vld [vmem:[#allocation5 + $0x40] sm:$0xff]  ;;  %v5494_v6 = vld [vmem:[#allocation5 + $0x38] sm:$0xff] }
 0xa17   :  { %v5500_v12 = vld [vmem:[#allocation5 + $0x68] sm:$0xff]  ;;  %10981 = vtanh.f32 %v5111_v30  ;;  %v5499_v14 = vld [vmem:[#allocation5 + $0x60] sm:$0xff]  ;;  %v5489_v3 = vld [vmem:[#allocation5 + $0x10] sm:$0xff]  ;;  %v13086_v18 = vpack.c.bf16 %v5494_v6, %v5490_v57 }
 0xa18   :  { %v13080_v48 = vpack.c.bf16 %v5500_v12, %v5496_v13  ;;  %9634 = vmatprep.subr.bf16.mxu0 %v13076_v54  ;;  %v5493_v31 = vld [vmem:[#allocation5 + $0x30] sm:$0xff]  ;;  %v13084_v59 = vpack.c.bf16 %v5499_v14, %v5495_v58  ;;  %v5504_v29 = vld [vmem:[#allocation5 + $0x88] sm:$0xff]  ;;  %v5503_v43 = vld [vmem:[#allocation5 + $0x80] sm:$0xff]  ;;  %10983 = vtanh.f32 %v5461_v25 }
 0xa19   :  { %9636 = vmatpush1.bf16.msra.mxu0 %v13078_v53  ;;  %v13088_v34 = vpack.c.bf16 %v5493_v31, %v5489_v3  ;;  %v5508_v63 = vld [vmem:[#allocation5 + $0xa8] sm:$0xff]  ;;  %v5507_v42 = vld [vmem:[#allocation5 + $0xa0] sm:$0xff]  ;;  %v5498_v22 = vld [vmem:[#allocation5 + $0x58] sm:$0xff]  ;;  %9666 = vmatprep.subr.bf16.mxu1 %v13086_v18 }
 0xa1a   :  { %14278 = vst [vmem:[#allocation59_spill] sm:$0xff] %v13084_v59  ;;  %9638 = vmatprep.subr.bf16.mxu0 %v13080_v48  ;;  %v13091_v49 = vpack.c.bf16 %v5508_v63, %v5504_v29  ;;  %v5502_v9 = vld [vmem:[#allocation5 + $0x78] sm:$0xff]  ;;  %v5497_v50 = vld [vmem:[#allocation5 + $0x50] sm:$0xff]  ;;  %v5512_v16 = vld [vmem:[#allocation5 + $0xc8] sm:$0xff]  ;;  %v13100_v4 = vpack.c.bf16 %v5507_v42, %v5503_v43 }
 0xa1b   :  { %v13094_v20 = vpack.c.bf16 %v5502_v9, %v5498_v22  ;;  %v5501_v8 = vld [vmem:[#allocation5 + $0x70] sm:$0xff]  ;;  %9668 = vmatpush1.bf16.msra.mxu1 %v13088_v34  ;;  %v5516_v10 = vld [vmem:[#allocation5 + $0xe8] sm:$0xff]  ;;  %v5506_v60 = vld [vmem:[#allocation5 + $0x98] sm:$0xff] }
 0xa1c   :  { %14279 = vst [vmem:[#allocation60_spill] sm:$0xff] %v13091_v49  ;;  %v13097_v61 = vpack.c.bf16 %v5501_v8, %v5497_v50  ;;  %14281 = vst [vmem:[#allocation61_spill] sm:$0xff] %v13100_v4  ;;  %v5510_v41 = vld [vmem:[#allocation5 + $0xb8] sm:$0xff]  ;;  %v5505_v15 = vld [vmem:[#allocation5 + $0x90] sm:$0xff]  ;;  %v13104_v55 = vpack.c.bf16 %v5516_v10, %v5512_v16 }
 0xa1d   :  { %9640 = vmatpush1.bf16.msra.mxu0 %v13084_v59  ;;  %9670 = vmatprep.subr.bf16.mxu1 %v13094_v20  ;;  %v5511_v27 = vld [vmem:[#allocation5 + $0xc0] sm:$0xff]  ;;  %v13106_v30 = vpack.c.bf16 %v5510_v41, %v5506_v60  ;;  %v5509_v28 = vld [vmem:[#allocation5 + $0xb0] sm:$0xff]  ;;  %v5520_v44 = vld [vmem:[#allocation5 + $0x108] sm:$0xff] }
 0xa1e   :  { %14280 = vst [vmem:[#allocation57_spill] sm:$0xff] %v13097_v61  ;;  %9642 = vmatprep.subr.bf16.mxu0 %v13091_v49  ;;  %14282 = vst [vmem:[#allocation62_spill] sm:$0xff] %v13104_v55  ;;  %v5515_v47 = vld [vmem:[#allocation5 + $0xe0] sm:$0xff]  ;;  %v5524_v51 = vld [vmem:[#allocation5 + $0x128] sm:$0xff]  ;;  %v13109_v62 = vpack.c.bf16 %v5509_v28, %v5505_v15 }
 0xa1f   :  { %14283 = vst [vmem:[#allocation63_spill] sm:$0xff] %v13106_v30  ;;  %v5514_v37 = vld [vmem:[#allocation5 + $0xd8] sm:$0xff]  ;;  %9672 = vmatpush1.bf16.msra.mxu1 %v13097_v61  ;;  %v13112_v17 = vpack.c.bf16 %v5515_v47, %v5511_v27  ;;  %v5519_v35 = vld [vmem:[#allocation5 + $0x100] sm:$0xff]  ;;  %v5513_v5 = vld [vmem:[#allocation5 + $0xd0] sm:$0xff]  ;;  %v13118_v52 = vpack.c.bf16 %v5524_v51, %v5520_v44 }
 0xa20   :  { %v10980_v2 = vpop.eup %10979  ;;  %14284 = vst [vmem:[#allocation64_spill] sm:$0xff] %v13109_v62  ;;  %v5518_v32 = vld [vmem:[#allocation5 + $0xf8] sm:$0xff]  ;;  %9674 = vmatprep.subr.bf16.mxu1 %v13106_v30  ;;  %v5517_v11 = vld [vmem:[#allocation5 + $0xf0] sm:$0xff]  ;;  %v5523_v13 = vld [vmem:[#allocation5 + $0x120] sm:$0xff] }
 0xa21   :  { %v5458_v1 = vmul.f32 0.5, %v10980_v2  ;;  %v10982_v21 = vpop.eup %10981  ;;  %9644 = vmatpush1.bf16.msra.mxu0 %v13100_v4  ;;  %14285 = vst [vmem:[#allocation65_spill] sm:$0xff] %v13112_v17  ;;  %v13115_v46 = vpack.c.bf16 %v5518_v32, %v5514_v37  ;;  %14287 = vst [vmem:[#allocation68_spill] sm:$0xff] %v13118_v52  ;;  %v5522_v12 = vld [vmem:[#allocation5 + $0x118] sm:$0xff]  ;;  %v5528_v14 = vld [vmem:[#allocation5 + $0x148] sm:$0xff]  ;;  %v13123_v3 = vpack.c.bf16 %v5517_v11, %v5513_v5  ;;  %v5471_v37 = vmul.f32 0.5, %v13066_v24 }
 0xa22   :  { %9646 = vmatprep.subr.bf16.mxu0 %v13104_v55  ;;  %v5526_v58 = vld [vmem:[#allocation5 + $0x138] sm:$0xff]  ;;  %v5532_v57 = vld [vmem:[#allocation5 + $0x168] sm:$0xff]  ;;  %v13126_v31 = vpack.c.bf16 %v5523_v13, %v5519_v35  ;;  %v5527_v29 = vld [vmem:[#allocation5 + $0x140] sm:$0xff]  ;;  %v10984_v25 = vpop.eup %10983 }
 0xa23   :  { %v5459_v36 = vadd.f32 0.5, %v5458_v1  ;;  %14286 = vst [vmem:[#allocation66_spill] sm:$0xff] %v13115_v46  ;;  %9676 = vmatpush1.bf16.msra.mxu1 %v13109_v62  ;;  %14288 = vst [vmem:[#allocation69_spill] sm:$0xff] %v13123_v3  ;;  %v13129_v63 = vpack.c.bf16 %v5526_v58, %v5522_v12  ;;  %v5521_v43 = vld [vmem:[#allocation5 + $0x110] sm:$0xff]  ;;  %v13132_v42 = vpack.c.bf16 %v5532_v57, %v5528_v14  ;;  %v5531_v22 = vld [vmem:[#allocation5 + $0x160] sm:$0xff]  ;;  %v5463_v35 = vmul.f32 0.5, %v10984_v25 }
 0xa24   :  { %14289 = vst [vmem:[#allocation70_spill] sm:$0xff] %v13126_v31  ;;  %9678 = vmatprep.subr.bf16.mxu1 %v13115_v46  ;;  %v5525_v2 = vld [vmem:[#allocation5 + $0x130] sm:$0xff]  ;;  %v5530_v9 = vld [vmem:[#allocation5 + $0x158] sm:$0xff]  ;;  %v5536_v8 = vld [vmem:[#allocation5 + $0x188] sm:$0xff]  ;;  %v13139_v10 = vpack.c.bf16 %v5531_v22, %v5527_v29 }
 0xa25   :  { %v13120_v6 = vmul.f32 %v10982_v21, %v5459_v36  ;;  %9648 = vmatpush1.bf16.msra.mxu0 %v13112_v17  ;;  %14290 = vst [vmem:[#allocation72_spill] sm:$0xff] %v13129_v63  ;;  %14291 = vst [vmem:[#allocation73_spill] sm:$0xff] %v13132_v42  ;;  %v5534_v50 = vld [vmem:[#allocation5 + $0x178] sm:$0xff]  ;;  %v5540_v16 = vld [vmem:[#allocation5 + $0x1a8] sm:$0xff]  ;;  %v13136_v1 = vpack.c.bf16 %v5525_v2, %v5521_v43 }
 0xa26   :  { %9650 = vmatprep.subr.bf16.mxu0 %v13118_v52  ;;  %14293 = vst [vmem:[#allocation56_spill] sm:$0xff] %v13139_v10  ;;  %v5535_v60 = vld [vmem:[#allocation5 + $0x180] sm:$0xff]  ;;  %v13142_v41 = vpack.c.bf16 %v5534_v50, %v5530_v9  ;;  %v5529_v15 = vld [vmem:[#allocation5 + $0x150] sm:$0xff]  ;;  %v13145_v47 = vpack.c.bf16 %v5540_v16, %v5536_v8  ;;  %v5538_v44 = vld [vmem:[#allocation5 + $0x198] sm:$0xff]  ;;  %v5464_v9 = vadd.f32 0.5, %v5463_v35 }
 0xa27   :  { %10985 = vtanh.f32 %v13120_v6  ;;  %9680 = vmatpush1.bf16.msra.mxu1 %v13123_v3  ;;  %14292 = vst [vmem:[#allocation74_spill] sm:$0xff] %v13136_v1  ;;  %v5533_v27 = vld [vmem:[#allocation5 + $0x170] sm:$0xff]  ;;  %v5539_v28 = vld [vmem:[#allocation5 + $0x1a0] sm:$0xff]  ;;  %v5542_v51 = vld [vmem:[#allocation5 + $0x1b8] sm:$0xff] }
 0xa28   :  { %9682 = vmatprep.subr.bf16.mxu1 %v13129_v63  ;;  %14294 = vst [vmem:[#allocation44_spill] sm:$0xff] %v13142_v41  ;;  %14295 = vst [vmem:[#allocation41_spill] sm:$0xff] %v13145_v47  ;;  %v5544_v36 = vld [vmem:[#allocation5 + $0x1c8] sm:$0xff]  ;;  %v13149_v32 = vpack.c.bf16 %v5533_v27, %v5529_v15  ;;  %v13152_v5 = vpack.c.bf16 %v5539_v28, %v5535_v60  ;;  %v5543_v11 = vld [vmem:[#allocation5 + $0x1c0] sm:$0xff]  ;;  %v13155_v13 = vpack.c.bf16 %v5542_v51, %v5538_v44 }
 0xa29   :  { %9652 = vmatpush1.bf16.msra.mxu0 %v13126_v31  ;;  %v5548_v21 = vld [vmem:[#allocation5 + $0x1e8] sm:$0xff]  ;;  %v5537_v12 = vld [vmem:[#allocation5 + $0x190] sm:$0xff]  ;;  %v5547_v14 = vld [vmem:[#allocation5 + $0x1e0] sm:$0xff]  ;;  %10987 = vtanh.f32 %v5471_v37 }
 0xa2a   :  { %9654 = vmatprep.subr.bf16.mxu0 %v13132_v42  ;;  %14296 = vst [vmem:[#allocation45_spill] sm:$0xff] %v13149_v32  ;;  %14297 = vst [vmem:[#allocation47_spill] sm:$0xff] %v13152_v5  ;;  %v5541_v58 = vld [vmem:[#allocation5 + $0x1b0] sm:$0xff]  ;;  %v13158_v24 = vpack.c.bf16 %v5548_v21, %v5544_v36  ;;  %v5546_v57 = vld [vmem:[#allocation5 + $0x1d8] sm:$0xff]  ;;  %v13164_v8 = vpack.c.bf16 %v5547_v14, %v5543_v11  ;;  %10989 = vtanh.f32 %v13069_v45 }
 0xa2b   :  { %9684 = vmatpush1.bf16.msra.mxu1 %v13136_v1  ;;  %14298 = vst [vmem:[#allocation71_spill] sm:$0xff] %v13155_v13  ;;  %v5550_v29 = vld [vmem:[#allocation5 + $0x1f8] sm:$0xff]  ;;  %v5720_v43 = vld [vmem:[#allocation6 + $0x8] sm:$0xff]  ;;  %v13161_v22 = vpack.c.bf16 %v5541_v58, %v5537_v12  ;;  %v5719_v16 = vld [vmem:[#allocation6] sm:$0xff] }
 0xa2c   :  { %9686 = vmatprep.subr.bf16.mxu1 %v13142_v41  ;;  %14299 = vst [vmem:[#allocation43_spill] sm:$0xff] %v13158_v24  ;;  %v5724_v2 = vld [vmem:[#allocation6 + $0x28] sm:$0xff]  ;;  %14301 = vst [vmem:[#allocation50_spill] sm:$0xff] %v13164_v8  ;;  %v13167_v25 = vpack.c.bf16 %v5550_v29, %v5546_v57  ;;  %v5545_v60 = vld [vmem:[#allocation5 + $0x1d0] sm:$0xff] }
 0xa2d   :  { %9656 = vmatpush1.bf16.msra.mxu0 %v13139_v10  ;;  %14300 = vst [vmem:[#allocation42_spill] sm:$0xff] %v13161_v22  ;;  %v5549_v15 = vld [vmem:[#allocation5 + $0x1f0] sm:$0xff]  ;;  %v13170_v27 = vpack.c.bf16 %v5724_v2, %v5720_v43  ;;  %v5723_v28 = vld [vmem:[#allocation6 + $0x20] sm:$0xff]  ;;  %v5722_v44 = vld [vmem:[#allocation6 + $0x18] sm:$0xff] }
 0xa2e   :  { %9658 = vmatprep.subr.bf16.mxu0 %v13145_v47  ;;  %14302 = vst [vmem:[#allocation58_spill] sm:$0xff] %v13167_v25  ;;  %v5726_v51 = vld [vmem:[#allocation6 + $0x38] sm:$0xff]  ;;  %v5728_v37 = vld [vmem:[#allocation6 + $0x48] sm:$0xff]  ;;  %v13173_v35 = vpack.c.bf16 %v5549_v15, %v5545_v60  ;;  %v13176_v11 = vpack.c.bf16 %v5723_v28, %v5719_v16  ;;  %v5727_v12 = vld [vmem:[#allocation6 + $0x40] sm:$0xff] }
 0xa2f   :  { %9688 = vmatpush1.bf16.msra.mxu1 %v13149_v32  ;;  %14303 = vst [vmem:[#allocation67_spill] sm:$0xff] %v13170_v27  ;;  %v5732_v36 = vld [vmem:[#allocation6 + $0x68] sm:$0xff]  ;;  %v13179_v58 = vpack.c.bf16 %v5726_v51, %v5722_v44  ;;  %v5721_v14 = vld [vmem:[#allocation6 + $0x10] sm:$0xff]  ;;  %v5731_v43 = vld [vmem:[#allocation6 + $0x60] sm:$0xff] }
 0xa30   :  { %9690 = vmatprep.subr.bf16.mxu1 %v13155_v13  ;;  %14304 = vst [vmem:[#allocation40_spill] sm:$0xff] %v13173_v35  ;;  %14305 = vst [vmem:[#allocation75_spill] sm:$0xff] %v13176_v11  ;;  %v5725_v57 = vld [vmem:[#allocation6 + $0x30] sm:$0xff]  ;;  %v13182_v29 = vpack.c.bf16 %v5732_v36, %v5728_v37  ;;  %v5730_v2 = vld [vmem:[#allocation6 + $0x58] sm:$0xff]  ;;  %v13189_v28 = vpack.c.bf16 %v5731_v43, %v5727_v12  ;;  %v5476_v43 = vmul.f32 0.5, %v13072_v56 }
 0xa31   :  { %v10986_v50 = vpop.eup %10985  ;;  %9660 = vmatpush1.bf16.msra.mxu0 %v13152_v5  ;;  %14306 = vst [vmem:[#allocation76_spill] sm:$0xff] %v13179_v58  ;;  %v5740_v60 = vld [vmem:[#allocation6 + $0xa8] sm:$0xff]  ;;  %v13186_v15 = vpack.c.bf16 %v5725_v57, %v5721_v14  ;;  %v5735_v44 = vld [vmem:[#allocation6 + $0x80] sm:$0xff]  ;;  %v5729_v37 = vld [vmem:[#allocation6 + $0x50] sm:$0xff] }
 0xa32   :  { %9662 = vmatprep.subr.bf16.mxu0 %v13158_v24  ;;  %v5467_v21 = vmul.f32 %v10986_v50, %v5464_v9  ;;  %14307 = vst [vmem:[#allocation77_spill] sm:$0xff] %v13182_v29  ;;  %v5734_v9 = vld [vmem:[#allocation6 + $0x78] sm:$0xff]  ;;  %v5736_v50 = vld [vmem:[#allocation6 + $0x88] sm:$0xff]  ;;  %14309 = vst [vmem:[#allocation79_spill] sm:$0xff] %v13189_v28  ;;  %10991 = vtanh.f32 %v5476_v43 }
 0xa33   :  { %9692 = vmatpush1.bf16.msra.mxu1 %v13161_v22  ;;  %v10988_v16 = vpop.eup %10987  ;;  %14308 = vst [vmem:[#allocation78_spill] sm:$0xff] %v13186_v15  ;;  %v13192_v51 = vpack.c.bf16 %v5734_v9, %v5730_v2  ;;  %v5733_v36 = vld [vmem:[#allocation6 + $0x70] sm:$0xff]  ;;  %v13195_v45 = vpack.c.bf16 %v5740_v60, %v5736_v50  ;;  %v5739_v33 = vld [vmem:[#allocation6 + $0xa0] sm:$0xff]  ;;  %v5738_v40 = vld [vmem:[#allocation6 + $0x98] sm:$0xff] }
 0xa34   :  { %9694 = vmatprep.subr.bf16.mxu1 %v13167_v25  ;;  %v5742_v23 = vld [vmem:[#allocation6 + $0xb8] sm:$0xff]  ;;  %v5744_v14 = vld [vmem:[#allocation6 + $0xc8] sm:$0xff]  ;;  %v5473_v57 = vmul.f32 0.5, %v10988_v16  ;;  %v13200_v2 = vpack.c.bf16 %v5733_v36, %v5729_v37  ;;  %v13204_v9 = vpack.c.bf16 %v5739_v33, %v5735_v44  ;;  %v5743_v50 = vld [vmem:[#allocation6 + $0xc0] sm:$0xff]  ;;  %v10990_v33 = vpop.eup %10989 }
 0xa35   :  { %9664 = vmatpush1.bf16.msra.mxu0 %v13164_v8  ;;  %14310 = vst [vmem:[#allocation80_spill] sm:$0xff] %v13192_v51  ;;  %14311 = vst [vmem:[#allocation81_spill] sm:$0xff] %v13195_v45  ;;  %v5748_v12 = vld [vmem:[#allocation6 + $0xe8] sm:$0xff]  ;;  %v13207_v60 = vpack.c.bf16 %v5742_v23, %v5738_v40  ;;  %v5747_v16 = vld [vmem:[#allocation6 + $0xe0] sm:$0xff] }
 0xa36   :  { %9698 = vmatprep.subr.bf16.mxu0 %v13170_v27  ;;  %14312 = vst [vmem:[#allocation82_spill] sm:$0xff] %v13200_v2  ;;  %14313 = vst [vmem:[#allocation83_spill] sm:$0xff] %v13204_v9  ;;  %v13210_v56 = vpack.c.bf16 %v5748_v12, %v5744_v14  ;;  %v5746_v37 = vld [vmem:[#allocation6 + $0xd8] sm:$0xff]  ;;  %v5474_v7 = vadd.f32 0.5, %v5473_v57  ;;  %v13216_v23 = vpack.c.bf16 %v5747_v16, %v5743_v50  ;;  %v5751_v40 = vld [vmem:[#allocation6 + $0x100] sm:$0xff] }
 0xa37   :  { %9696 = vmatpush1.bf16.msra.mxu1 %v13173_v35  ;;  %14314 = vst [vmem:[#allocation84_spill] sm:$0xff] %v13207_v60  ;;  %v5750_v36 = vld [vmem:[#allocation6 + $0xf8] sm:$0xff]  ;;  %v5745_v12 = vld [vmem:[#allocation6 + $0xd0] sm:$0xff]  ;;  %v5755_v43 = vld [vmem:[#allocation6 + $0x120] sm:$0xff] }
 0xa38   :  { %5616 = vmatmul.mubr.f32.vlgmr.msra.gmra.mrb[34].mxu0 %v5467_v21  ;;  %9730 = vmatprep.subr.bf16.mxu1 %v13179_v58  ;;  %14315 = vst [vmem:[#allocation85_spill] sm:$0xff] %v13210_v56  ;;  %14317 = vst [vmem:[#allocation87_spill] sm:$0xff] %v13216_v23  ;;  %v13219_v14 = vpack.c.bf16 %v5750_v36, %v5746_v37  ;;  %v13230_v16 = vpack.c.bf16 %v5755_v43, %v5751_v40  ;;  %v5759_v37 = vld [vmem:[#allocation6 + $0x140] sm:$0xff]  ;;  %v5757_v36 = vld [vmem:[#allocation6 + $0x130] sm:$0xff] }
 0xa39   :  { %9700 = vmatpush1.bf16.msra.mxu0 %v13176_v11  ;;  %5847 = vmatprep.mubr.f32.mxu0 %v14101_v19  ;;  %v5756_v11 = vld [vmem:[#allocation6 + $0x128] sm:$0xff] }
 0xa3a   :  { %9702 = vmatprep.subr.bf16.mxu0 %v13182_v29  ;;  %5687 = vmatmul.mubr.f32.vlgmr.msra.gmra.mrb[34].mxu1 %v5467_v21  ;;  %v5737_v21 = vld [vmem:[#allocation6 + $0x90] sm:$0xff]  ;;  %14318 = vst [vmem:[#allocation88_spill] sm:$0xff] %v13219_v14  ;;  %14322 = vst [vmem:[#allocation92_spill] sm:$0xff] %v13230_v16 }
 0xa3b   :  { %9732 = vmatpush1.bf16.msra.mxu1 %v13186_v15  ;;  %5918 = vmatprep.mubr.f32.mxu1 %v14101_v19  ;;  %v5741_v29 = vld [vmem:[#allocation6 + $0xb0] sm:$0xff]  ;;  %v5752_v15 = vld [vmem:[#allocation6 + $0x108] sm:$0xff] }
 0xa3c   :  { %9734 = vmatprep.subr.bf16.mxu1 %v13192_v51  ;;  %v13213_v44 = vpack.c.bf16 %v5741_v29, %v5737_v21  ;;  %v13222_v57 = vpack.c.bf16 %v5756_v11, %v5752_v15  ;;  %v5760_v29 = vld [vmem:[#allocation6 + $0x148] sm:$0xff]  ;;  %v13224_v51 = vmul.f32 %v10990_v33, %v5474_v7  ;;  %v5753_v15 = vld [vmem:[#allocation6 + $0x110] sm:$0xff]  ;;  %v5763_v7 = vld [vmem:[#allocation6 + $0x160] sm:$0xff]  ;;  %v10992_v43 = vpop.eup %10991 }
 0xa3d   :  { %9704 = vmatpush1.bf16.msra.mxu0 %v13189_v28  ;;  %v5754_v28 = vld [vmem:[#allocation6 + $0x118] sm:$0xff]  ;;  %v5764_v21 = vld [vmem:[#allocation6 + $0x168] sm:$0xff]  ;;  %v13240_v40 = vpack.c.bf16 %v5757_v36, %v5753_v15 }
 0xa3e   :  { %9706 = vmatprep.subr.bf16.mxu0 %v13195_v45  ;;  %14316 = vst [vmem:[#allocation86_spill] sm:$0xff] %v13213_v44  ;;  %v5749_v45 = vld [vmem:[#allocation6 + $0xf0] sm:$0xff]  ;;  %14319 = vst [vmem:[#allocation89_spill] sm:$0xff] %v13222_v57  ;;  %v5762_v33 = vld [vmem:[#allocation6 + $0x158] sm:$0xff]  ;;  %10993 = vtanh.f32 %v13224_v51 }
 0xa3f   :  { %9736 = vmatpush1.bf16.msra.mxu1 %v13200_v2  ;;  %v5758_v2 = vld [vmem:[#allocation6 + $0x138] sm:$0xff]  ;;  %14320 = vst [vmem:[#allocation90_spill] sm:$0xff] %v13224_v51  ;;  %v13227_v50 = vpack.c.bf16 %v5749_v45, %v5745_v12  ;;  %v5768_v45 = vld [vmem:[#allocation6 + $0x188] sm:$0xff]  ;;  %14325 = vst [vmem:[#allocation95_spill] sm:$0xff] %v13240_v40 }
 0xa40   :  { %9738 = vmatprep.subr.bf16.mxu1 %v13207_v60  ;;  %v13233_v11 = vpack.c.bf16 %v5758_v2, %v5754_v28  ;;  %v5772_v12 = vld [vmem:[#allocation6 + $0x1a8] sm:$0xff]  ;;  %v13243_v28 = vpack.c.bf16 %v5763_v7, %v5759_v37  ;;  %v5767_v2 = vld [vmem:[#allocation6 + $0x180] sm:$0xff]  ;;  %v5774_v15 = vld [vmem:[#allocation6 + $0x1b8] sm:$0xff]  ;;  %v5478_v7 = vmul.f32 0.5, %v10992_v43 }
 0xa41   :  { %9708 = vmatpush1.bf16.msra.mxu0 %v13204_v9  ;;  %14321 = vst [vmem:[#allocation91_spill] sm:$0xff] %v13227_v50  ;;  %v5771_v51 = vld [vmem:[#allocation6 + $0x1a0] sm:$0xff]  ;;  %v5776_v36 = vld [vmem:[#allocation6 + $0x1c8] sm:$0xff] }
 0xa42   :  { %9710 = vmatprep.subr.bf16.mxu0 %v13210_v56  ;;  %14323 = vst [vmem:[#allocation93_spill] sm:$0xff] %v13233_v11  ;;  %v13236_v56 = vpack.c.bf16 %v5764_v21, %v5760_v29  ;;  %v5761_v21 = vld [vmem:[#allocation6 + $0x150] sm:$0xff] }
 0xa43   :  { %9740 = vmatpush1.bf16.msra.mxu1 %v13213_v44  ;;  %v5766_v44 = vld [vmem:[#allocation6 + $0x178] sm:$0xff] }
 0xa44   :  { %9742 = vmatprep.subr.bf16.mxu1 %v13219_v14  ;;  %14324 = vst [vmem:[#allocation94_spill] sm:$0xff] %v13236_v56  ;;  %v13246_v29 = vpack.c.bf16 %v5766_v44, %v5762_v33  ;;  %v5780_v14 = vld [vmem:[#allocation6 + $0x1e8] sm:$0xff]  ;;  %v13255_v44 = vpack.c.bf16 %v5771_v51, %v5767_v2  ;;  %v5775_v33 = vld [vmem:[#allocation6 + $0x1c0] sm:$0xff]  ;;  %v5479_v51 = vadd.f32 0.5, %v5478_v7 }
 0xa45   :  { %9712 = vmatpush1.bf16.msra.mxu0 %v13216_v23  ;;  %v13249_v23 = vpack.c.bf16 %v5772_v12, %v5768_v45  ;;  %v5769_v45 = vld [vmem:[#allocation6 + $0x190] sm:$0xff] }
 0xa46   :  { %9714 = vmatprep.subr.bf16.mxu0 %v13222_v57  ;;  %v5765_v57 = vld [vmem:[#allocation6 + $0x170] sm:$0xff] }
 0xa47   :  { %9744 = vmatpush1.bf16.msra.mxu1 %v13227_v50  ;;  %v5770_v50 = vld [vmem:[#allocation6 + $0x198] sm:$0xff]  ;;  %v13252_v37 = vpack.c.bf16 %v5765_v57, %v5761_v21  ;;  %v5773_v12 = vld [vmem:[#allocation6 + $0x1b0] sm:$0xff] }
 0xa48   :  { %9746 = vmatprep.subr.bf16.mxu1 %v13233_v11  ;;  %v5779_v11 = vld [vmem:[#allocation6 + $0x1e0] sm:$0xff]  ;;  %v5782_v57 = vld [vmem:[#allocation6 + $0x1f8] sm:$0xff]  ;;  %v13264_v43 = vpack.c.bf16 %v5773_v12, %v5769_v45  ;;  %v10994_v2 = vpop.eup %10993 }
 0xa49   :  { %9716 = vmatpush1.bf16.msra.mxu0 %v13230_v16  ;;  %v13261_v16 = vpack.c.bf16 %v5780_v14, %v5776_v36  ;;  %v13267_v21 = vpack.c.bf16 %v5779_v11, %v5775_v33  ;;  %v5781_v14 = vld [vmem:[#allocation6 + $0x1f0] sm:$0xff]  ;;  %v13274_v36 = vmul.f32 %v10994_v2, %v5479_v51 }
 0xa4a   :  { %9718 = vmatprep.subr.bf16.mxu0 %v13236_v56  ;;  %v13258_v56 = vpack.c.bf16 %v5774_v15, %v5770_v50  ;;  %v5777_v15 = vld [vmem:[#allocation6 + $0x1d0] sm:$0xff] }
 0xa4b   :  { %9748 = vmatpush1.bf16.msra.mxu1 %v13240_v40  ;;  %v5778_v40 = vld [vmem:[#allocation6 + $0x1d8] sm:$0xff]  ;;  %14326 = vst [vmem:[#allocation96_spill] sm:$0xff] %v13274_v36  ;;  %v13276_v45 = vpack.c.bf16 %v5781_v14, %v5777_v15 }
 0xa4c   :  { %9750 = vmatprep.subr.bf16.mxu1 %v13246_v29  ;;  %v13270_v50 = vpack.c.bf16 %v5782_v57, %v5778_v40 }
 0xa4d   :  { %9720 = vmatpush1.bf16.msra.mxu0 %v13243_v28 }
 0xa4e   :  { %9722 = vmatprep.subr.bf16.mxu0 %v13249_v23 }
 0xa4f   :  { %9752 = vmatpush1.bf16.msra.mxu1 %v13252_v37 }
 0xa50   :  { %9754 = vmatprep.subr.bf16.mxu1 %v13258_v56 }
 0xa51   :  { %9724 = vmatpush1.bf16.msra.mxu0 %v13255_v44 }
 0xa52   :  { %9726 = vmatprep.subr.bf16.mxu0 %v13261_v16 }
 0xa53   :  { %9756 = vmatpush1.bf16.msra.mxu1 %v13264_v43 }
 0xa54   :  { %9758 = vmatprep.subr.bf16.mxu1 %v13270_v50 }
 0xa55   :  { %9728 = vmatpush1.bf16.msra.mxu0 %v13267_v21 }
 0xa56   :  { %9762 = vmatprep.subr.bf16.mxu0 %v13076_v54 }
 0xa57   :  { %9760 = vmatpush1.bf16.msra.mxu1 %v13276_v45 }
 0xa58   :  { %5848 = vmatmul.mubr.f32.vlgmr.msra.gmra.mrb[60].mxu0 %v13274_v36  ;;  %9794 = vmatprep.subr.bf16.mxu1 %v13086_v18 }
 0xa59   :  { %9764 = vmatpush1.bf16.msra.mxu0 %v13078_v53  ;;  %6015 = vmatprep.mubr.f32.mxu0 %v14101_v19 }
 0xa5a   :  { %9766 = vmatprep.subr.bf16.mxu0 %v13080_v48  ;;  %5919 = vmatmul.mubr.f32.vlgmr.msra.gmra.mrb[60].mxu1 %v13274_v36 }
 0xa5b   :  { %9796 = vmatpush1.bf16.msra.mxu1 %v13088_v34  ;;  %6086 = vmatprep.mubr.f32.mxu1 %v14101_v19 }
 0xa5c   :  { %9798 = vmatprep.subr.bf16.mxu1 %v13094_v20 }
 0xa5d   :  { %9768 = vmatpush1.bf16.msra.mxu0 %v13084_v59 }
 0xa5e   :  { %9770 = vmatprep.subr.bf16.mxu0 %v13091_v49 }
 0xa5f   :  { %9800 = vmatpush1.bf16.msra.mxu1 %v13097_v61 }
 0xa60   :  { %9802 = vmatprep.subr.bf16.mxu1 %v13106_v30 }
 0xa61   :  { %9772 = vmatpush1.bf16.msra.mxu0 %v13100_v4 }
 0xa62   :  { %9774 = vmatprep.subr.bf16.mxu0 %v13104_v55 }
 0xa63   :  { %9804 = vmatpush1.bf16.msra.mxu1 %v13109_v62 }
 0xa64   :  { %9806 = vmatprep.subr.bf16.mxu1 %v13115_v46 }
 0xa65   :  { %9776 = vmatpush1.bf16.msra.mxu0 %v13112_v17 }
 0xa66   :  { %9778 = vmatprep.subr.bf16.mxu0 %v13118_v52 }
 0xa67   :  { %9808 = vmatpush1.bf16.msra.mxu1 %v13123_v3 }
 0xa68   :  { %9810 = vmatprep.subr.bf16.mxu1 %v13129_v63 }
 0xa69   :  { %9780 = vmatpush1.bf16.msra.mxu0 %v13126_v31 }
 0xa6a   :  { %9782 = vmatprep.subr.bf16.mxu0 %v13132_v42 }
 0xa6b   :  { %9812 = vmatpush1.bf16.msra.mxu1 %v13136_v1 }
 0xa6c   :  { %9814 = vmatprep.subr.bf16.mxu1 %v13142_v41 }
 0xa6d   :  { %9784 = vmatpush1.bf16.msra.mxu0 %v13139_v10 }
 0xa6e   :  { %9786 = vmatprep.subr.bf16.mxu0 %v13145_v47 }
 0xa6f   :  { %9816 = vmatpush1.bf16.msra.mxu1 %v13149_v32 }
 0xa70   :  { %9818 = vmatprep.subr.bf16.mxu1 %v13155_v13 }
 0xa71   :  { %9788 = vmatpush1.bf16.msra.mxu0 %v13152_v5 }
 0xa72   :  { %9790 = vmatprep.subr.bf16.mxu0 %v13158_v24 }
 0xa73   :  { %9820 = vmatpush1.bf16.msra.mxu1 %v13161_v22 }
 0xa74   :  { %9822 = vmatprep.subr.bf16.mxu1 %v13167_v25 }
 0xa75   :  { %9792 = vmatpush1.bf16.msra.mxu0 %v13164_v8 }
 0xa76   :  { %9826 = vmatprep.subr.bf16.mxu0 %v13170_v27 }
 0xa77   :  { %9824 = vmatpush1.bf16.msra.mxu1 %v13173_v35 }
 0xa78   :  { %9858 = vmatprep.subr.bf16.mxu1 %v13179_v58 }
 0xb0b   :  { %v5617_v11 = vpop.f32.mrb[34].mxu0 }
 0xb0c   :  { %v10625_v40 = vadd.f32 %v5617_v11, %v13035_v39  ;;  %v5619_v7 = vpop.f32.mrb[35].mxu0 }
 0xb0d   :  { %v10626_v33 = vadd.f32 %v5619_v7, %v12982_v0  ;;  %v5688_v57 = vpop.f32.mrb[34].mxu1 }
 0xb0e   :  { %v5697_v12 = vmul.f32 0.5, %v10625_v40  ;;  %v10639_v2 = vadd.f32 %v5688_v57, %v13040_v38  ;;  %v5690_v15 = vpop.f32.mrb[35].mxu1 }
 0xb0f   :  { %v5701_v51 = vmul.f32 0.5, %v10626_v33  ;;  %v10640_v14 = vadd.f32 %v5690_v15, %v13045_v26 }
 0xb10   :  { %10995 = vtanh.f32 %v5697_v12 }
 0xb11   :  { %10997 = vtanh.f32 %v5701_v51  ;;  %v5706_v36 = vmul.f32 0.5, %v10640_v14 }
 0xb12   :  { %10999 = vtanh.f32 %v10639_v2  ;;  %v14327_v2 = vld [vmem:[#allocation54_spill] sm:$0xff] }
 0xb13   :  { %11001 = vtanh.f32 %v5706_v36 }
 0xb1a   :  { %v10996_v27 = vpop.eup %10995 }
 0xb1b   :  { %v10998_v58 = vpop.eup %10997  ;;  %v5699_v35 = vmul.f32 0.5, %v10996_v27  ;;  %v14328_v27 = vld [vmem:[#allocation48_spill] sm:$0xff] }
 0xb1c   :  { %v11000_v8 = vpop.eup %10999  ;;  %v5703_v11 = vmul.f32 0.5, %v10998_v58 }
 0xb1d   :  { %v5700_v39 = vadd.f32 0.5, %v5699_v35  ;;  %v11002_v12 = vpop.eup %11001 }
 0xb1e   :  { %v5704_v7 = vadd.f32 0.5, %v5703_v11  ;;  %v5708_v57 = vmul.f32 0.5, %v11002_v12  ;;  %v14332_v12 = vld [vmem:[#allocation77_spill] sm:$0xff] }
 0xb1f   :  { %v5711_v40 = vmul.f32 %v11000_v8, %v5700_v39  ;;  %v14329_v8 = vld [vmem:[#allocation49_spill] sm:$0xff] }
 0xb20   :  { %v5710_v33 = vmul.f32 %v5704_v7, %v13120_v6  ;;  %v5709_v26 = vadd.f32 0.5, %v5708_v57  ;;  %v14333_v57 = vld [vmem:[#allocation80_spill] sm:$0xff] }
 0xb22   :  { %v13324_v0 = vadd.f32 %v5711_v40, %v5710_v33  ;;  %v14330_v40 = vld [vmem:[#allocation75_spill] sm:$0xff]  ;;  %v14331_v33 = vld [vmem:[#allocation78_spill] sm:$0xff] }
 0xb24   :  { %11003 = vtanh.f32 %v13324_v0 }
 0xb2b   :  { %v5849_v51 = vpop.f32.mrb[60].mxu0 }
 0xb2c   :  { %v10665_v15 = vadd.f32 %v5849_v51, %v14327_v2  ;;  %v5851_v14 = vpop.f32.mrb[61].mxu0  ;;  %v14334_v51 = vld [vmem:[#allocation55_spill] sm:$0xff] }
 0xb2d   :  { %v10666_v38 = vadd.f32 %v5851_v14, %v14328_v27  ;;  %v5920_v35 = vpop.f32.mrb[60].mxu1  ;;  %v14337_v14 = vld [vmem:[#allocation81_spill] sm:$0xff] }
 0xb2e   :  { %v11004_v58 = vpop.eup %11003  ;;  %v5929_v36 = vmul.f32 0.5, %v10665_v15  ;;  %v10679_v6 = vadd.f32 %v5920_v35, %v14329_v8  ;;  %v5922_v7 = vpop.f32.mrb[61].mxu1  ;;  %v14338_v35 = vld [vmem:[#allocation86_spill] sm:$0xff] }
 0xb2f   :  { %v5714_v11 = vmul.f32 %v11004_v58, %v5709_v26  ;;  %v5933_v39 = vmul.f32 0.5, %v10666_v38  ;;  %v10680_v15 = vadd.f32 %v5922_v7, %v14334_v51  ;;  %v14335_v38 = vld [vmem:[#allocation79_spill] sm:$0xff]  ;;  %v14336_v26 = vld [vmem:[#allocation82_spill] sm:$0xff]  ;;  %v14340_v7 = vld [vmem:[#allocation88_spill] sm:$0xff] }
 0xb30   :  { %11005 = vtanh.f32 %v5929_v36 }
 0xb31   :  { %11007 = vtanh.f32 %v5933_v39  ;;  %6016 = vmatmul.mubr.f32.vlgmr.msra.gmra.mrb[36].mxu0 %v5714_v11  ;;  %6087 = vmatmul.mubr.f32.vlgmr.msra.gmra.mrb[36].mxu1 %v5714_v11  ;;  %v5938_v58 = vmul.f32 0.5, %v10680_v15 }
 0xb32   :  { %11009 = vtanh.f32 %v10679_v6  ;;  %9828 = vmatpush1.bf16.msra.mxu0 %v14330_v40  ;;  %9860 = vmatpush1.bf16.msra.mxu1 %v14331_v33  ;;  %v14339_v6 = vld [vmem:[#allocation85_spill] sm:$0xff] }
 0xb33   :  { %9830 = vmatprep.subr.bf16.mxu0 %v14332_v12  ;;  %9862 = vmatprep.subr.bf16.mxu1 %v14333_v57  ;;  %11011 = vtanh.f32 %v5938_v58  ;;  %v14343_v12 = vld [vmem:[#allocation89_spill] sm:$0xff]  ;;  %v14348_v58 = vld [vmem:[#allocation94_spill] sm:$0xff] }
 0xb34   :  { %6183 = vmatprep.mubr.f32.mxu0 %v14101_v19  ;;  %6254 = vmatprep.mubr.f32.mxu1 %v14101_v19 }
 0xb36   :  { %9832 = vmatpush1.bf16.msra.mxu0 %v14335_v38  ;;  %9864 = vmatpush1.bf16.msra.mxu1 %v14336_v26 }
 0xb37   :  { %9834 = vmatprep.subr.bf16.mxu0 %v14337_v14  ;;  %9866 = vmatprep.subr.bf16.mxu1 %v13207_v60  ;;  %v14341_v14 = vld [vmem:[#allocation87_spill] sm:$0xff] }
 0xb38   :  { %v14342_v60 = vld [vmem:[#allocation91_spill] sm:$0xff] }
 0xb3a   :  { %v11006_v36 = vpop.eup %11005  ;;  %9836 = vmatpush1.bf16.msra.mxu0 %v13204_v9  ;;  %9868 = vmatpush1.bf16.msra.mxu1 %v14338_v35  ;;  %v14344_v9 = vld [vmem:[#allocation93_spill] sm:$0xff]  ;;  %v14345_v35 = vld [vmem:[#allocation90_spill] sm:$0xff] }
 0xb3b   :  { %v11008_v11 = vpop.eup %11007  ;;  %v5931_v39 = vmul.f32 0.5, %v11006_v36  ;;  %9838 = vmatprep.subr.bf16.mxu0 %v14339_v6  ;;  %9870 = vmatprep.subr.bf16.mxu1 %v14340_v7  ;;  %v14346_v6 = vld [vmem:[#allocation92_spill] sm:$0xff]  ;;  %v14347_v7 = vld [vmem:[#allocation95_spill] sm:$0xff] }
 0xb3c   :  { %v11010_v51 = vpop.eup %11009  ;;  %v5935_v38 = vmul.f32 0.5, %v11008_v11  ;;  %v14349_v11 = vld [vmem:[#allocation50_spill] sm:$0xff] }
 0xb3d   :  { %v5932_v26 = vadd.f32 0.5, %v5931_v39  ;;  %v14350_v39 = vld [vmem:[#allocation40_spill] sm:$0xff] }
 0xb3e   :  { %v5936_v57 = vadd.f32 0.5, %v5935_v38  ;;  %9840 = vmatpush1.bf16.msra.mxu0 %v14341_v14  ;;  %9872 = vmatpush1.bf16.msra.mxu1 %v14342_v60  ;;  %v11012_v38 = vpop.eup %11011 }
 0xb3f   :  { %v5943_v15 = vmul.f32 %v11010_v51, %v5932_v26  ;;  %9842 = vmatprep.subr.bf16.mxu0 %v14343_v12  ;;  %9874 = vmatprep.subr.bf16.mxu1 %v14344_v9 }
 0xb40   :  { %v5942_v36 = vmul.f32 %v5936_v57, %v14345_v35  ;;  %v5940_v57 = vmul.f32 0.5, %v11012_v38 }
 0xb42   :  { %v13350_v33 = vadd.f32 %v5943_v15, %v5942_v36  ;;  %9844 = vmatpush1.bf16.msra.mxu0 %v14346_v6  ;;  %9876 = vmatpush1.bf16.msra.mxu1 %v14347_v7  ;;  %v5941_v51 = vadd.f32 0.5, %v5940_v57  ;;  %v14351_v15 = vld [vmem:[#allocation67_spill] sm:$0xff]  ;;  %v14352_v36 = vld [vmem:[#allocation76_spill] sm:$0xff] }
 0xb43   :  { %9846 = vmatprep.subr.bf16.mxu0 %v14348_v58  ;;  %9878 = vmatprep.subr.bf16.mxu1 %v13246_v29 }
 0xb44   :  { %11013 = vtanh.f32 %v13350_v33 }
 0xb46   :  { %9848 = vmatpush1.bf16.msra.mxu0 %v13243_v28  ;;  %9880 = vmatpush1.bf16.msra.mxu1 %v13252_v37 }
 0xb47   :  { %9850 = vmatprep.subr.bf16.mxu0 %v13249_v23  ;;  %9882 = vmatprep.subr.bf16.mxu1 %v13258_v56 }
 0xb4a   :  { %9852 = vmatpush1.bf16.msra.mxu0 %v13255_v44  ;;  %9884 = vmatpush1.bf16.msra.mxu1 %v13264_v43 }
 0xb4b   :  { %9854 = vmatprep.subr.bf16.mxu0 %v13261_v16  ;;  %9886 = vmatprep.subr.bf16.mxu1 %v13270_v50 }
 0xb4e   :  { %v11014_v26 = vpop.eup %11013  ;;  %9856 = vmatpush1.bf16.msra.mxu0 %v13267_v21  ;;  %9888 = vmatpush1.bf16.msra.mxu1 %v13276_v45 }
 0xb4f   :  { %v5946_v35 = vmul.f32 %v11014_v26, %v5941_v51  ;;  %9890 = vmatprep.subr.bf16.mxu0 %v13076_v54  ;;  %9922 = vmatprep.subr.bf16.mxu1 %v13086_v18  ;;  %v14353_v51 = vld [vmem:[#allocation51_spill] sm:$0xff] }
 0xb51   :  { %6184 = vmatmul.mubr.f32.vlgmr.msra.gmra.mrb[58].mxu0 %v5946_v35  ;;  %6255 = vmatmul.mubr.f32.vlgmr.msra.gmra.mrb[58].mxu1 %v5946_v35 }
 0xb52   :  { %9892 = vmatpush1.bf16.msra.mxu0 %v13078_v53  ;;  %9924 = vmatpush1.bf16.msra.mxu1 %v13088_v34 }
 0xb53   :  { %9894 = vmatprep.subr.bf16.mxu0 %v13080_v48  ;;  %9926 = vmatprep.subr.bf16.mxu1 %v13094_v20 }
 0xb54   :  { %6351 = vmatprep.mubr.f32.mxu0 %v14101_v19  ;;  %6422 = vmatprep.mubr.f32.mxu1 %v14101_v19 }
 0xb56   :  { %9896 = vmatpush1.bf16.msra.mxu0 %v13084_v59  ;;  %9928 = vmatpush1.bf16.msra.mxu1 %v13097_v61 }
 0xb57   :  { %9898 = vmatprep.subr.bf16.mxu0 %v13091_v49  ;;  %9930 = vmatprep.subr.bf16.mxu1 %v13106_v30 }
 0xb5a   :  { %9900 = vmatpush1.bf16.msra.mxu0 %v13100_v4  ;;  %9932 = vmatpush1.bf16.msra.mxu1 %v13109_v62 }
 0xb5b   :  { %9902 = vmatprep.subr.bf16.mxu0 %v13104_v55  ;;  %9934 = vmatprep.subr.bf16.mxu1 %v13115_v46 }
 0xb5e   :  { %9904 = vmatpush1.bf16.msra.mxu0 %v13112_v17  ;;  %9936 = vmatpush1.bf16.msra.mxu1 %v13123_v3 }
 0xb5f   :  { %9906 = vmatprep.subr.bf16.mxu0 %v13118_v52  ;;  %9938 = vmatprep.subr.bf16.mxu1 %v13129_v63 }
 0xb62   :  { %9908 = vmatpush1.bf16.msra.mxu0 %v13126_v31  ;;  %9940 = vmatpush1.bf16.msra.mxu1 %v13136_v1 }
 0xb63   :  { %9910 = vmatprep.subr.bf16.mxu0 %v13132_v42  ;;  %9942 = vmatprep.subr.bf16.mxu1 %v13142_v41 }
 0xb66   :  { %9912 = vmatpush1.bf16.msra.mxu0 %v13139_v10  ;;  %9944 = vmatpush1.bf16.msra.mxu1 %v13149_v32 }
 0xb67   :  { %9914 = vmatprep.subr.bf16.mxu0 %v13145_v47  ;;  %9946 = vmatprep.subr.bf16.mxu1 %v13155_v13  ;;  %v14354_v13 = vld [vmem:[#allocation46_spill] sm:$0xff] }
 0xb6a   :  { %9916 = vmatpush1.bf16.msra.mxu0 %v13152_v5  ;;  %9948 = vmatpush1.bf16.msra.mxu1 %v13161_v22 }
 0xb6b   :  { %9918 = vmatprep.subr.bf16.mxu0 %v13158_v24  ;;  %9950 = vmatprep.subr.bf16.mxu1 %v13167_v25  ;;  %v14355_v25 = vld [vmem:[#allocation52_spill] sm:$0xff] }
 0xb6e   :  { %9920 = vmatpush1.bf16.msra.mxu0 %v14349_v11  ;;  %9952 = vmatpush1.bf16.msra.mxu1 %v14350_v39  ;;  %v14356_v39 = vld [vmem:[#allocation53_spill] sm:$0xff] }
 0xb6f   :  { %9954 = vmatprep.subr.bf16.mxu0 %v14351_v15  ;;  %9986 = vmatprep.subr.bf16.mxu1 %v14352_v36 }
 0xc04   :  { %v6017_v38 = vpop.f32.mrb[36].mxu0  ;;  %v6088_v57 = vpop.f32.mrb[36].mxu1 }
 0xc05   :  { %v10627_v26 = vadd.f32 %v6017_v38, %v14353_v51  ;;  %v6019_v35 = vpop.f32.mrb[37].mxu0  ;;  %v6090_v5 = vpop.f32.mrb[37].mxu1  ;;  %v10641_v32 = vadd.f32 %v6088_v57, %v14355_v25 }
 0xc06   :  { %v10628_v22 = vadd.f32 %v6019_v35, %v14354_v13  ;;  %v10642_v11 = vadd.f32 %v6090_v5, %v14356_v39 }
 0xc07   :  { %v6097_v47 = vmul.f32 0.5, %v10627_v26 }
 0xc08   :  { %v6101_v24 = vmul.f32 0.5, %v10628_v22  ;;  %v6106_v15 = vmul.f32 0.5, %v10642_v11 }
 0xc09   :  { %11015 = vtanh.f32 %v6097_v47 }
 0xc0a   :  { %11017 = vtanh.f32 %v6101_v24 }
 0xc0b   :  { %11019 = vtanh.f32 %v10641_v32 }
 0xc0c   :  { %11021 = vtanh.f32 %v6106_v15 }
 0xc13   :  { %v11016_v10 = vpop.eup %11015 }
 0xc14   :  { %v11018_v36 = vpop.eup %11017  ;;  %v6099_v41 = vmul.f32 0.5, %v11016_v10 }
 0xc15   :  { %v6103_v42 = vmul.f32 0.5, %v11018_v36  ;;  %v11020_v51 = vpop.eup %11019 }
 0xc16   :  { %v6100_v38 = vadd.f32 0.5, %v6099_v41  ;;  %v11022_v47 = vpop.eup %11021 }
 0xc17   :  { %v6104_v1 = vadd.f32 0.5, %v6103_v42  ;;  %v6108_v32 = vmul.f32 0.5, %v11022_v47 }
 0xc18   :  { %v6111_v31 = vmul.f32 %v11020_v51, %v6100_v38  ;;  %v14359_v38 = vld [vmem:[#allocation80_spill] sm:$0xff] }
 0xc19   :  { %v6110_v26 = vmul.f32 %v6104_v1, %v13324_v0  ;;  %v6109_v36 = vadd.f32 0.5, %v6108_v32  ;;  %v14358_v1 = vld [vmem:[#allocation77_spill] sm:$0xff]  ;;  %v14361_v32 = vld [vmem:[#allocation79_spill] sm:$0xff] }
 0xc1b   :  { %v13408_v22 = vadd.f32 %v6111_v31, %v6110_v26  ;;  %v14357_v31 = vld [vmem:[#allocation78_spill] sm:$0xff]  ;;  %v14360_v26 = vld [vmem:[#allocation55_spill] sm:$0xff] }
 0xc1d   :  { %11023 = vtanh.f32 %v13408_v22 }
 0xc24   :  { %v6185_v24 = vpop.f32.mrb[58].mxu0  ;;  %v6256_v5 = vpop.f32.mrb[58].mxu1 }
 0xc25   :  { %v10663_v11 = vadd.f32 %v6185_v24, %v14327_v2  ;;  %v6187_v57 = vpop.f32.mrb[59].mxu0  ;;  %v6258_v10 = vpop.f32.mrb[59].mxu1  ;;  %v10677_v0 = vadd.f32 %v6256_v5, %v14329_v8  ;;  %v14362_v24 = vld [vmem:[#allocation82_spill] sm:$0xff]  ;;  %v14363_v5 = vld [vmem:[#allocation81_spill] sm:$0xff] }
 0xc26   :  { %v10664_v41 = vadd.f32 %v6187_v57, %v14328_v27  ;;  %v10678_v47 = vadd.f32 %v6258_v10, %v14360_v26 }
 0xc27   :  { %v11024_v15 = vpop.eup %11023  ;;  %v6265_v42 = vmul.f32 0.5, %v10663_v11  ;;  %v14364_v11 = vld [vmem:[#allocation84_spill] sm:$0xff] }
 0xc28   :  { %v6114_v51 = vmul.f32 %v11024_v15, %v6109_v36  ;;  %v6269_v35 = vmul.f32 0.5, %v10664_v41  ;;  %v6274_v57 = vmul.f32 0.5, %v10678_v47  ;;  %v14365_v41 = vld [vmem:[#allocation83_spill] sm:$0xff]  ;;  %v14366_v15 = vld [vmem:[#allocation86_spill] sm:$0xff] }
 0xc29   :  { %11025 = vtanh.f32 %v6265_v42 }
 0xc2a   :  { %11027 = vtanh.f32 %v6269_v35  ;;  %6352 = vmatmul.mubr.f32.vlgmr.msra.gmra.mrb[38].mxu0 %v6114_v51  ;;  %6423 = vmatmul.mubr.f32.vlgmr.msra.gmra.mrb[38].mxu1 %v6114_v51  ;;  %v14367_v51 = vld [vmem:[#allocation85_spill] sm:$0xff]  ;;  %v14368_v35 = vld [vmem:[#allocation88_spill] sm:$0xff] }
 0xc2b   :  { %9956 = vmatpush1.bf16.msra.mxu0 %v14330_v40  ;;  %9988 = vmatpush1.bf16.msra.mxu1 %v14357_v31  ;;  %11029 = vtanh.f32 %v10677_v0 }
 0xc2c   :  { %9958 = vmatprep.subr.bf16.mxu0 %v14358_v1  ;;  %9990 = vmatprep.subr.bf16.mxu1 %v14359_v38  ;;  %11031 = vtanh.f32 %v6274_v57 }
 0xc2d   :  { %6519 = vmatprep.mubr.f32.mxu0 %v14101_v19  ;;  %6590 = vmatprep.mubr.f32.mxu1 %v14101_v19 }
 0xc2f   :  { %9960 = vmatpush1.bf16.msra.mxu0 %v14361_v32  ;;  %9992 = vmatpush1.bf16.msra.mxu1 %v14362_v24 }
 0xc30   :  { %9962 = vmatprep.subr.bf16.mxu0 %v14363_v5  ;;  %9994 = vmatprep.subr.bf16.mxu1 %v14364_v11 }
 0xc33   :  { %v11026_v36 = vpop.eup %11025  ;;  %9964 = vmatpush1.bf16.msra.mxu0 %v14365_v41  ;;  %9996 = vmatpush1.bf16.msra.mxu1 %v14366_v15 }
 0xc34   :  { %v11028_v42 = vpop.eup %11027  ;;  %v6267_v10 = vmul.f32 0.5, %v11026_v36  ;;  %9966 = vmatprep.subr.bf16.mxu0 %v14367_v51  ;;  %9998 = vmatprep.subr.bf16.mxu1 %v14368_v35 }
 0xc35   :  { %v6271_v0 = vmul.f32 0.5, %v11028_v42  ;;  %v11030_v24 = vpop.eup %11029  ;;  %v14369_v42 = vld [vmem:[#allocation70_spill] sm:$0xff] }
 0xc36   :  { %v6268_v32 = vadd.f32 0.5, %v6267_v10  ;;  %v11032_v57 = vpop.eup %11031  ;;  %v14370_v10 = vld [vmem:[#allocation74_spill] sm:$0xff] }
 0xc37   :  { %v6272_v26 = vadd.f32 0.5, %v6271_v0  ;;  %9968 = vmatpush1.bf16.msra.mxu0 %v14341_v14  ;;  %10000 = vmatpush1.bf16.msra.mxu1 %v14342_v60  ;;  %v14371_v0 = vld [vmem:[#allocation73_spill] sm:$0xff] }
 0xc38   :  { %v6279_v47 = vmul.f32 %v11030_v24, %v6268_v32  ;;  %9970 = vmatprep.subr.bf16.mxu0 %v14343_v12  ;;  %10002 = vmatprep.subr.bf16.mxu1 %v14344_v9 }
 0xc39   :  { %v6278_v36 = vmul.f32 %v6272_v26, %v13350_v33  ;;  %v6276_v33 = vmul.f32 0.5, %v11032_v57  ;;  %v14374_v57 = vld [vmem:[#allocation45_spill] sm:$0xff] }
 0xc3b   :  { %v13434_v15 = vadd.f32 %v6279_v47, %v6278_v36  ;;  %9972 = vmatpush1.bf16.msra.mxu0 %v14346_v6  ;;  %10004 = vmatpush1.bf16.msra.mxu1 %v14347_v7  ;;  %v6277_v26 = vadd.f32 0.5, %v6276_v33  ;;  %v14372_v47 = vld [vmem:[#allocation44_spill] sm:$0xff]  ;;  %v14375_v33 = vld [vmem:[#allocation41_spill] sm:$0xff] }
 0xc3c   :  { %9974 = vmatprep.subr.bf16.mxu0 %v14348_v58  ;;  %10006 = vmatprep.subr.bf16.mxu1 %v13246_v29  ;;  %v14373_v36 = vld [vmem:[#allocation56_spill] sm:$0xff] }
 0xc3d   :  { %11033 = vtanh.f32 %v13434_v15 }
 0xc3f   :  { %9976 = vmatpush1.bf16.msra.mxu0 %v13243_v28  ;;  %10008 = vmatpush1.bf16.msra.mxu1 %v13252_v37 }
 0xc40   :  { %9978 = vmatprep.subr.bf16.mxu0 %v13249_v23  ;;  %10010 = vmatprep.subr.bf16.mxu1 %v13258_v56 }
 0xc43   :  { %9980 = vmatpush1.bf16.msra.mxu0 %v13255_v44  ;;  %10012 = vmatpush1.bf16.msra.mxu1 %v13264_v43 }
 0xc44   :  { %9982 = vmatprep.subr.bf16.mxu0 %v13261_v16  ;;  %10014 = vmatprep.subr.bf16.mxu1 %v13270_v50 }
 0xc47   :  { %v11034_v32 = vpop.eup %11033  ;;  %9984 = vmatpush1.bf16.msra.mxu0 %v13267_v21  ;;  %10016 = vmatpush1.bf16.msra.mxu1 %v13276_v45 }
 0xc48   :  { %v6282_v24 = vmul.f32 %v11034_v32, %v6277_v26  ;;  %10018 = vmatprep.subr.bf16.mxu0 %v13076_v54  ;;  %10050 = vmatprep.subr.bf16.mxu1 %v13086_v18  ;;  %v14376_v26 = vld [vmem:[#allocation71_spill] sm:$0xff] }
 0xc49   :  { %v14377_v32 = vld [vmem:[#allocation47_spill] sm:$0xff] }
 0xc4a   :  { %6520 = vmatmul.mubr.f32.vlgmr.msra.gmra.mrb[56].mxu0 %v6282_v24  ;;  %6591 = vmatmul.mubr.f32.vlgmr.msra.gmra.mrb[56].mxu1 %v6282_v24  ;;  %v14378_v24 = vld [vmem:[#allocation42_spill] sm:$0xff] }
 0xc4b   :  { %10020 = vmatpush1.bf16.msra.mxu0 %v13078_v53  ;;  %10052 = vmatpush1.bf16.msra.mxu1 %v13088_v34 }
 0xc4c   :  { %10022 = vmatprep.subr.bf16.mxu0 %v13080_v48  ;;  %10054 = vmatprep.subr.bf16.mxu1 %v13094_v20 }
 0xc4d   :  { %6687 = vmatprep.mubr.f32.mxu0 %v14101_v19  ;;  %6758 = vmatprep.mubr.f32.mxu1 %v14101_v19 }
 0xc4f   :  { %10024 = vmatpush1.bf16.msra.mxu0 %v13084_v59  ;;  %10056 = vmatpush1.bf16.msra.mxu1 %v13097_v61 }
 0xc50   :  { %10026 = vmatprep.subr.bf16.mxu0 %v13091_v49  ;;  %10058 = vmatprep.subr.bf16.mxu1 %v13106_v30 }
 0xc53   :  { %10028 = vmatpush1.bf16.msra.mxu0 %v13100_v4  ;;  %10060 = vmatpush1.bf16.msra.mxu1 %v13109_v62 }
 0xc54   :  { %10030 = vmatprep.subr.bf16.mxu0 %v13104_v55  ;;  %10062 = vmatprep.subr.bf16.mxu1 %v13115_v46 }
 0xc57   :  { %10032 = vmatpush1.bf16.msra.mxu0 %v13112_v17  ;;  %10064 = vmatpush1.bf16.msra.mxu1 %v13123_v3 }
 0xc58   :  { %10034 = vmatprep.subr.bf16.mxu0 %v13118_v52  ;;  %10066 = vmatprep.subr.bf16.mxu1 %v13129_v63  ;;  %v14379_v63 = vld [vmem:[#allocation43_spill] sm:$0xff] }
 0xc59   :  { %v14385_v52 = vld [vmem:[#allocation51_spill] sm:$0xff] }
 0xc5b   :  { %10036 = vmatpush1.bf16.msra.mxu0 %v14369_v42  ;;  %10068 = vmatpush1.bf16.msra.mxu1 %v14370_v10  ;;  %v14380_v42 = vld [vmem:[#allocation58_spill] sm:$0xff] }
 0xc5c   :  { %10038 = vmatprep.subr.bf16.mxu0 %v14371_v0  ;;  %10070 = vmatprep.subr.bf16.mxu1 %v14372_v47  ;;  %v14381_v10 = vld [vmem:[#allocation50_spill] sm:$0xff]  ;;  %v14382_v0 = vld [vmem:[#allocation40_spill] sm:$0xff]  ;;  %v14383_v47 = vld [vmem:[#allocation67_spill] sm:$0xff] }
 0xc5f   :  { %10040 = vmatpush1.bf16.msra.mxu0 %v14373_v36  ;;  %10072 = vmatpush1.bf16.msra.mxu1 %v14374_v57  ;;  %v14384_v36 = vld [vmem:[#allocation76_spill] sm:$0xff] }
 0xc60   :  { %10042 = vmatprep.subr.bf16.mxu0 %v14375_v33  ;;  %10074 = vmatprep.subr.bf16.mxu1 %v14376_v26 }
 0xc63   :  { %10044 = vmatpush1.bf16.msra.mxu0 %v14377_v32  ;;  %10076 = vmatpush1.bf16.msra.mxu1 %v14378_v24 }
 0xc64   :  { %10046 = vmatprep.subr.bf16.mxu0 %v14379_v63  ;;  %10078 = vmatprep.subr.bf16.mxu1 %v14380_v42 }
 0xc67   :  { %10048 = vmatpush1.bf16.msra.mxu0 %v14381_v10  ;;  %10080 = vmatpush1.bf16.msra.mxu1 %v14382_v0 }
 0xc68   :  { %10082 = vmatprep.subr.bf16.mxu0 %v14383_v47  ;;  %10114 = vmatprep.subr.bf16.mxu1 %v14384_v36 }
 0xcfd   :  { %v6353_v57 = vpop.f32.mrb[38].mxu0  ;;  %v6424_v33 = vpop.f32.mrb[38].mxu1 }
 0xcfe   :  { %v10629_v26 = vadd.f32 %v6353_v57, %v14385_v52  ;;  %v6355_v3 = vpop.f32.mrb[39].mxu0  ;;  %v6426_v32 = vpop.f32.mrb[39].mxu1  ;;  %v10643_v42 = vadd.f32 %v6424_v33, %v14355_v25 }
 0xcff   :  { %v10630_v24 = vadd.f32 %v6355_v3, %v14354_v13  ;;  %v10644_v0 = vadd.f32 %v6426_v32, %v14356_v39 }
 0xd00   :  { %v6433_v17 = vmul.f32 0.5, %v10629_v26 }
 0xd01   :  { %v6437_v63 = vmul.f32 0.5, %v10630_v24  ;;  %v6442_v47 = vmul.f32 0.5, %v10644_v0 }
 0xd02   :  { %11035 = vtanh.f32 %v6433_v17 }
 0xd03   :  { %11037 = vtanh.f32 %v6437_v63 }
 0xd04   :  { %11039 = vtanh.f32 %v10643_v42 }
 0xd05   :  { %11041 = vtanh.f32 %v6442_v47 }
 0xd0c   :  { %v11036_v10 = vpop.eup %11035 }
 0xd0d   :  { %v11038_v36 = vpop.eup %11037  ;;  %v6435_v46 = vmul.f32 0.5, %v11036_v10 }
 0xd0e   :  { %v6439_v55 = vmul.f32 0.5, %v11038_v36  ;;  %v11040_v52 = vpop.eup %11039 }
 0xd0f   :  { %v6436_v57 = vadd.f32 0.5, %v6435_v46  ;;  %v11042_v17 = vpop.eup %11041 }
 0xd10   :  { %v6440_v62 = vadd.f32 0.5, %v6439_v55  ;;  %v6444_v63 = vmul.f32 0.5, %v11042_v17 }
 0xd11   :  { %v6447_v4 = vmul.f32 %v11040_v52, %v6436_v57  ;;  %v14387_v57 = vld [vmem:[#allocation79_spill] sm:$0xff] }
 0xd12   :  { %v6446_v3 = vmul.f32 %v6440_v62, %v13408_v22  ;;  %v6445_v36 = vadd.f32 0.5, %v6444_v63  ;;  %v14386_v62 = vld [vmem:[#allocation55_spill] sm:$0xff] }
 0xd14   :  { %v13492_v26 = vadd.f32 %v6447_v4, %v6446_v3  ;;  %v14388_v3 = vld [vmem:[#allocation82_spill] sm:$0xff] }
 0xd16   :  { %11043 = vtanh.f32 %v13492_v26 }
 0xd1d   :  { %v6521_v42 = vpop.f32.mrb[56].mxu0  ;;  %v6592_v33 = vpop.f32.mrb[56].mxu1 }
 0xd1e   :  { %v10661_v0 = vadd.f32 %v6521_v42, %v14327_v2  ;;  %v6523_v32 = vpop.f32.mrb[57].mxu0  ;;  %v6594_v10 = vpop.f32.mrb[57].mxu1  ;;  %v10675_v4 = vadd.f32 %v6592_v33, %v14329_v8  ;;  %v14389_v42 = vld [vmem:[#allocation86_spill] sm:$0xff] }
 0xd1f   :  { %v10662_v46 = vadd.f32 %v6523_v32, %v14328_v27  ;;  %v10676_v22 = vadd.f32 %v6594_v10, %v14386_v62 }
 0xd20   :  { %v11044_v47 = vpop.eup %11043  ;;  %v6601_v55 = vmul.f32 0.5, %v10661_v0 }
 0xd21   :  { %v6450_v52 = vmul.f32 %v11044_v47, %v6445_v36  ;;  %v6605_v24 = vmul.f32 0.5, %v10662_v46  ;;  %v6610_v17 = vmul.f32 0.5, %v10676_v22 }
 0xd22   :  { %11045 = vtanh.f32 %v6601_v55 }
 0xd23   :  { %11047 = vtanh.f32 %v6605_v24  ;;  %6688 = vmatmul.mubr.f32.vlgmr.msra.gmra.mrb[40].mxu0 %v6450_v52  ;;  %6759 = vmatmul.mubr.f32.vlgmr.msra.gmra.mrb[40].mxu1 %v6450_v52 }
 0xd24   :  { %10084 = vmatpush1.bf16.msra.mxu0 %v14330_v40  ;;  %10116 = vmatpush1.bf16.msra.mxu1 %v14357_v31  ;;  %11049 = vtanh.f32 %v10675_v4 }
 0xd25   :  { %10086 = vmatprep.subr.bf16.mxu0 %v14358_v1  ;;  %10118 = vmatprep.subr.bf16.mxu1 %v14359_v38  ;;  %11051 = vtanh.f32 %v6610_v17 }
 0xd26   :  { %6855 = vmatprep.mubr.f32.mxu0 %v14101_v19  ;;  %6926 = vmatprep.mubr.f32.mxu1 %v14101_v19 }
 0xd28   :  { %10088 = vmatpush1.bf16.msra.mxu0 %v14387_v57  ;;  %10120 = vmatpush1.bf16.msra.mxu1 %v14388_v3 }
 0xd29   :  { %10090 = vmatprep.subr.bf16.mxu0 %v14363_v5  ;;  %10122 = vmatprep.subr.bf16.mxu1 %v14364_v11 }
 0xd2c   :  { %v11046_v63 = vpop.eup %11045  ;;  %10092 = vmatpush1.bf16.msra.mxu0 %v14365_v41  ;;  %10124 = vmatpush1.bf16.msra.mxu1 %v14389_v42 }
 0xd2d   :  { %v11048_v33 = vpop.eup %11047  ;;  %v6603_v0 = vmul.f32 0.5, %v11046_v63  ;;  %10094 = vmatprep.subr.bf16.mxu0 %v14367_v51  ;;  %10126 = vmatprep.subr.bf16.mxu1 %v14368_v35  ;;  %v14390_v63 = vld [vmem:[#allocation61_spill] sm:$0xff] }
 0xd2e   :  { %v6607_v32 = vmul.f32 0.5, %v11048_v33  ;;  %v11050_v36 = vpop.eup %11049  ;;  %v14391_v33 = vld [vmem:[#allocation64_spill] sm:$0xff] }
 0xd2f   :  { %v6604_v10 = vadd.f32 0.5, %v6603_v0  ;;  %v11052_v24 = vpop.eup %11051  ;;  %v14392_v0 = vld [vmem:[#allocation62_spill] sm:$0xff] }
 0xd30   :  { %v6608_v46 = vadd.f32 0.5, %v6607_v32  ;;  %10096 = vmatpush1.bf16.msra.mxu0 %v14341_v14  ;;  %10128 = vmatpush1.bf16.msra.mxu1 %v14342_v60  ;;  %v14393_v32 = vld [vmem:[#allocation66_spill] sm:$0xff] }
 0xd31   :  { %v6615_v47 = vmul.f32 %v11050_v36, %v6604_v10  ;;  %10098 = vmatprep.subr.bf16.mxu0 %v14343_v12  ;;  %10130 = vmatprep.subr.bf16.mxu1 %v14344_v9  ;;  %v14394_v10 = vld [vmem:[#allocation65_spill] sm:$0xff] }
 0xd32   :  { %v6614_v55 = vmul.f32 %v6608_v46, %v13434_v15  ;;  %v6612_v15 = vmul.f32 0.5, %v11052_v24  ;;  %v14395_v36 = vld [vmem:[#allocation69_spill] sm:$0xff]  ;;  %v14396_v46 = vld [vmem:[#allocation68_spill] sm:$0xff]  ;;  %v14399_v24 = vld [vmem:[#allocation74_spill] sm:$0xff] }
 0xd34   :  { %v13518_v52 = vadd.f32 %v6615_v47, %v6614_v55  ;;  %10100 = vmatpush1.bf16.msra.mxu0 %v14346_v6  ;;  %10132 = vmatpush1.bf16.msra.mxu1 %v14347_v7  ;;  %v6613_v4 = vadd.f32 0.5, %v6612_v15  ;;  %v14397_v47 = vld [vmem:[#allocation72_spill] sm:$0xff]  ;;  %v14398_v55 = vld [vmem:[#allocation70_spill] sm:$0xff]  ;;  %v14400_v15 = vld [vmem:[#allocation73_spill] sm:$0xff] }
 0xd35   :  { %10102 = vmatprep.subr.bf16.mxu0 %v14348_v58  ;;  %10134 = vmatprep.subr.bf16.mxu1 %v13246_v29 }
 0xd36   :  { %11053 = vtanh.f32 %v13518_v52 }
 0xd38   :  { %10104 = vmatpush1.bf16.msra.mxu0 %v13243_v28  ;;  %10136 = vmatpush1.bf16.msra.mxu1 %v13252_v37 }
 0xd39   :  { %10106 = vmatprep.subr.bf16.mxu0 %v13249_v23  ;;  %10138 = vmatprep.subr.bf16.mxu1 %v13258_v56 }
 0xd3c   :  { %10108 = vmatpush1.bf16.msra.mxu0 %v13255_v44  ;;  %10140 = vmatpush1.bf16.msra.mxu1 %v13264_v43 }
 0xd3d   :  { %10110 = vmatprep.subr.bf16.mxu0 %v13261_v16  ;;  %10142 = vmatprep.subr.bf16.mxu1 %v13270_v50 }
 0xd40   :  { %v11054_v22 = vpop.eup %11053  ;;  %10112 = vmatpush1.bf16.msra.mxu0 %v13267_v21  ;;  %10144 = vmatpush1.bf16.msra.mxu1 %v13276_v45 }
 0xd41   :  { %v6618_v17 = vmul.f32 %v11054_v22, %v6613_v4  ;;  %10146 = vmatprep.subr.bf16.mxu0 %v13076_v54  ;;  %10178 = vmatprep.subr.bf16.mxu1 %v13086_v18  ;;  %v14401_v4 = vld [vmem:[#allocation44_spill] sm:$0xff] }
 0xd42   :  { %v14402_v22 = vld [vmem:[#allocation56_spill] sm:$0xff] }
 0xd43   :  { %6856 = vmatmul.mubr.f32.vlgmr.msra.gmra.mrb[54].mxu0 %v6618_v17  ;;  %6927 = vmatmul.mubr.f32.vlgmr.msra.gmra.mrb[54].mxu1 %v6618_v17  ;;  %v14403_v17 = vld [vmem:[#allocation45_spill] sm:$0xff] }
 0xd44   :  { %10148 = vmatpush1.bf16.msra.mxu0 %v13078_v53  ;;  %10180 = vmatpush1.bf16.msra.mxu1 %v13088_v34 }
 0xd45   :  { %10150 = vmatprep.subr.bf16.mxu0 %v13080_v48  ;;  %10182 = vmatprep.subr.bf16.mxu1 %v13094_v20 }
 0xd46   :  { %7023 = vmatprep.mubr.f32.mxu0 %v14101_v19  ;;  %7094 = vmatprep.mubr.f32.mxu1 %v14101_v19 }
 0xd48   :  { %10152 = vmatpush1.bf16.msra.mxu0 %v13084_v59  ;;  %10184 = vmatpush1.bf16.msra.mxu1 %v13097_v61 }
 0xd49   :  { %10154 = vmatprep.subr.bf16.mxu0 %v13091_v49  ;;  %10186 = vmatprep.subr.bf16.mxu1 %v13106_v30 }
 0xd4c   :  { %10156 = vmatpush1.bf16.msra.mxu0 %v14390_v63  ;;  %10188 = vmatpush1.bf16.msra.mxu1 %v14391_v33 }
 0xd4d   :  { %10158 = vmatprep.subr.bf16.mxu0 %v14392_v0  ;;  %10190 = vmatprep.subr.bf16.mxu1 %v14393_v32  ;;  %v14404_v32 = vld [vmem:[#allocation41_spill] sm:$0xff]  ;;  %v14414_v0 = vld [vmem:[#allocation51_spill] sm:$0xff] }
 0xd50   :  { %10160 = vmatpush1.bf16.msra.mxu0 %v14394_v10  ;;  %10192 = vmatpush1.bf16.msra.mxu1 %v14395_v36  ;;  %v14405_v10 = vld [vmem:[#allocation71_spill] sm:$0xff] }
 0xd51   :  { %10162 = vmatprep.subr.bf16.mxu0 %v14396_v46  ;;  %10194 = vmatprep.subr.bf16.mxu1 %v14397_v47  ;;  %v14406_v36 = vld [vmem:[#allocation47_spill] sm:$0xff]  ;;  %v14407_v46 = vld [vmem:[#allocation42_spill] sm:$0xff] }
 0xd52   :  { %v14408_v47 = vld [vmem:[#allocation43_spill] sm:$0xff] }
 0xd54   :  { %10164 = vmatpush1.bf16.msra.mxu0 %v14398_v55  ;;  %10196 = vmatpush1.bf16.msra.mxu1 %v14399_v24  ;;  %v14409_v55 = vld [vmem:[#allocation58_spill] sm:$0xff] }
 0xd55   :  { %10166 = vmatprep.subr.bf16.mxu0 %v14400_v15  ;;  %10198 = vmatprep.subr.bf16.mxu1 %v14401_v4  ;;  %v14410_v24 = vld [vmem:[#allocation50_spill] sm:$0xff]  ;;  %v14411_v15 = vld [vmem:[#allocation40_spill] sm:$0xff]  ;;  %v14412_v4 = vld [vmem:[#allocation67_spill] sm:$0xff] }
 0xd58   :  { %10168 = vmatpush1.bf16.msra.mxu0 %v14402_v22  ;;  %10200 = vmatpush1.bf16.msra.mxu1 %v14403_v17  ;;  %v14413_v22 = vld [vmem:[#allocation76_spill] sm:$0xff] }
 0xd59   :  { %10170 = vmatprep.subr.bf16.mxu0 %v14404_v32  ;;  %10202 = vmatprep.subr.bf16.mxu1 %v14405_v10 }
 0xd5c   :  { %10172 = vmatpush1.bf16.msra.mxu0 %v14406_v36  ;;  %10204 = vmatpush1.bf16.msra.mxu1 %v14407_v46 }
 0xd5d   :  { %10174 = vmatprep.subr.bf16.mxu0 %v14408_v47  ;;  %10206 = vmatprep.subr.bf16.mxu1 %v14409_v55 }
 0xd60   :  { %10176 = vmatpush1.bf16.msra.mxu0 %v14410_v24  ;;  %10208 = vmatpush1.bf16.msra.mxu1 %v14411_v15 }
 0xd61   :  { %10210 = vmatprep.subr.bf16.mxu0 %v14412_v4  ;;  %10242 = vmatprep.subr.bf16.mxu1 %v14413_v22 }
 0xdf6   :  { %v6689_v17 = vpop.f32.mrb[40].mxu0  ;;  %v6760_v32 = vpop.f32.mrb[40].mxu1 }
 0xdf7   :  { %v10631_v10 = vadd.f32 %v6689_v17, %v14414_v0  ;;  %v6691_v33 = vpop.f32.mrb[41].mxu0  ;;  %v6762_v36 = vpop.f32.mrb[41].mxu1  ;;  %v10645_v55 = vadd.f32 %v6760_v32, %v14355_v25 }
 0xdf8   :  { %v10632_v46 = vadd.f32 %v6691_v33, %v14354_v13  ;;  %v10646_v15 = vadd.f32 %v6762_v36, %v14356_v39 }
 0xdf9   :  { %v6769_v63 = vmul.f32 0.5, %v10631_v10 }
 0xdfa   :  { %v6773_v47 = vmul.f32 0.5, %v10632_v46  ;;  %v6778_v4 = vmul.f32 0.5, %v10646_v15 }
 0xdfb   :  { %11055 = vtanh.f32 %v6769_v63 }
 0xdfc   :  { %11057 = vtanh.f32 %v6773_v47 }
 0xdfd   :  { %11059 = vtanh.f32 %v10645_v55 }
 0xdfe   :  { %11061 = vtanh.f32 %v6778_v4 }
 0xe05   :  { %v11056_v24 = vpop.eup %11055 }
 0xe06   :  { %v11058_v22 = vpop.eup %11057  ;;  %v6771_v30 = vmul.f32 0.5, %v11056_v24 }
 0xe07   :  { %v6775_v49 = vmul.f32 0.5, %v11058_v22  ;;  %v11060_v0 = vpop.eup %11059 }
 0xe08   :  { %v6772_v17 = vadd.f32 0.5, %v6771_v30  ;;  %v11062_v63 = vpop.eup %11061 }
 0xe09   :  { %v6776_v61 = vadd.f32 0.5, %v6775_v49  ;;  %v6780_v32 = vmul.f32 0.5, %v11062_v63 }
 0xe0a   :  { %v6783_v59 = vmul.f32 %v11060_v0, %v6772_v17 }
 0xe0b   :  { %v6782_v33 = vmul.f32 %v6776_v61, %v13492_v26  ;;  %v6781_v15 = vadd.f32 0.5, %v6780_v32 }
 0xe0d   :  { %v13576_v10 = vadd.f32 %v6783_v59, %v6782_v33 }
 0xe0f   :  { %11063 = vtanh.f32 %v13576_v10 }
 0xe16   :  { %v6857_v46 = vpop.f32.mrb[54].mxu0  ;;  %v6928_v36 = vpop.f32.mrb[54].mxu1 }
 0xe17   :  { %v10659_v47 = vadd.f32 %v6857_v46, %v14327_v2  ;;  %v6859_v55 = vpop.f32.mrb[55].mxu0  ;;  %v6930_v24 = vpop.f32.mrb[55].mxu1  ;;  %v10673_v59 = vadd.f32 %v6928_v36, %v14329_v8 }
 0xe18   :  { %v10660_v30 = vadd.f32 %v6859_v55, %v14328_v27  ;;  %v10674_v61 = vadd.f32 %v6930_v24, %v14386_v62 }
 0xe19   :  { %v11064_v4 = vpop.eup %11063  ;;  %v6937_v49 = vmul.f32 0.5, %v10659_v47 }
 0xe1a   :  { %v6786_v0 = vmul.f32 %v11064_v4, %v6781_v15  ;;  %v6941_v22 = vmul.f32 0.5, %v10660_v30  ;;  %v6946_v26 = vmul.f32 0.5, %v10674_v61  ;;  %v14417_v61 = vld [vmem:[#allocation60_spill] sm:$0xff] }
 0xe1b   :  { %11065 = vtanh.f32 %v6937_v49 }
 0xe1c   :  { %11067 = vtanh.f32 %v6941_v22  ;;  %7024 = vmatmul.mubr.f32.vlgmr.msra.gmra.mrb[42].mxu0 %v6786_v0  ;;  %7095 = vmatmul.mubr.f32.vlgmr.msra.gmra.mrb[42].mxu1 %v6786_v0  ;;  %v14415_v22 = vld [vmem:[#allocation59_spill] sm:$0xff] }
 0xe1d   :  { %10212 = vmatpush1.bf16.msra.mxu0 %v14330_v40  ;;  %10244 = vmatpush1.bf16.msra.mxu1 %v14357_v31  ;;  %11069 = vtanh.f32 %v10673_v59  ;;  %v14416_v59 = vld [vmem:[#allocation57_spill] sm:$0xff] }
 0xe1e   :  { %10214 = vmatprep.subr.bf16.mxu0 %v14358_v1  ;;  %10246 = vmatprep.subr.bf16.mxu1 %v14359_v38  ;;  %11071 = vtanh.f32 %v6946_v26  ;;  %v14418_v26 = vld [vmem:[#allocation63_spill] sm:$0xff] }
 0xe1f   :  { %7191 = vmatprep.mubr.f32.mxu0 %v14101_v19  ;;  %7262 = vmatprep.mubr.f32.mxu1 %v14101_v19 }
 0xe21   :  { %10216 = vmatpush1.bf16.msra.mxu0 %v14387_v57  ;;  %10248 = vmatpush1.bf16.msra.mxu1 %v14388_v3 }
 0xe22   :  { %10218 = vmatprep.subr.bf16.mxu0 %v14363_v5  ;;  %10250 = vmatprep.subr.bf16.mxu1 %v14364_v11 }
 0xe25   :  { %v11066_v17 = vpop.eup %11065  ;;  %10220 = vmatpush1.bf16.msra.mxu0 %v14365_v41  ;;  %10252 = vmatpush1.bf16.msra.mxu1 %v14389_v42 }
 0xe26   :  { %v11068_v33 = vpop.eup %11067  ;;  %v6939_v63 = vmul.f32 0.5, %v11066_v17  ;;  %10222 = vmatprep.subr.bf16.mxu0 %v14367_v51  ;;  %10254 = vmatprep.subr.bf16.mxu1 %v14368_v35  ;;  %v14419_v17 = vld [vmem:[#allocation61_spill] sm:$0xff] }
 0xe27   :  { %v6943_v32 = vmul.f32 0.5, %v11068_v33  ;;  %v11070_v36 = vpop.eup %11069  ;;  %v14420_v33 = vld [vmem:[#allocation64_spill] sm:$0xff] }
 0xe28   :  { %v6940_v46 = vadd.f32 0.5, %v6939_v63  ;;  %v11072_v30 = vpop.eup %11071  ;;  %v14421_v63 = vld [vmem:[#allocation62_spill] sm:$0xff] }
 0xe29   :  { %v6944_v47 = vadd.f32 0.5, %v6943_v32  ;;  %10224 = vmatpush1.bf16.msra.mxu0 %v14341_v14  ;;  %10256 = vmatpush1.bf16.msra.mxu1 %v14342_v60  ;;  %v14422_v32 = vld [vmem:[#allocation66_spill] sm:$0xff] }
 0xe2a   :  { %v6951_v55 = vmul.f32 %v11070_v36, %v6940_v46  ;;  %10226 = vmatprep.subr.bf16.mxu0 %v14343_v12  ;;  %10258 = vmatprep.subr.bf16.mxu1 %v14344_v9  ;;  %v14423_v46 = vld [vmem:[#allocation65_spill] sm:$0xff] }
 0xe2b   :  { %v6950_v24 = vmul.f32 %v6944_v47, %v13518_v52  ;;  %v6948_v52 = vmul.f32 0.5, %v11072_v30  ;;  %v14424_v36 = vld [vmem:[#allocation69_spill] sm:$0xff]  ;;  %v14425_v47 = vld [vmem:[#allocation68_spill] sm:$0xff]  ;;  %v14428_v30 = vld [vmem:[#allocation74_spill] sm:$0xff] }
 0xe2d   :  { %v13602_v15 = vadd.f32 %v6951_v55, %v6950_v24  ;;  %10228 = vmatpush1.bf16.msra.mxu0 %v14346_v6  ;;  %10260 = vmatpush1.bf16.msra.mxu1 %v14347_v7  ;;  %v6949_v4 = vadd.f32 0.5, %v6948_v52  ;;  %v14426_v55 = vld [vmem:[#allocation72_spill] sm:$0xff]  ;;  %v14427_v24 = vld [vmem:[#allocation70_spill] sm:$0xff]  ;;  %v14429_v52 = vld [vmem:[#allocation73_spill] sm:$0xff] }
 0xe2e   :  { %10230 = vmatprep.subr.bf16.mxu0 %v14348_v58  ;;  %10262 = vmatprep.subr.bf16.mxu1 %v13246_v29 }
 0xe2f   :  { %11073 = vtanh.f32 %v13602_v15 }
 0xe31   :  { %10232 = vmatpush1.bf16.msra.mxu0 %v13243_v28  ;;  %10264 = vmatpush1.bf16.msra.mxu1 %v13252_v37 }
 0xe32   :  { %10234 = vmatprep.subr.bf16.mxu0 %v13249_v23  ;;  %10266 = vmatprep.subr.bf16.mxu1 %v13258_v56 }
 0xe35   :  { %10236 = vmatpush1.bf16.msra.mxu0 %v13255_v44  ;;  %10268 = vmatpush1.bf16.msra.mxu1 %v13264_v43 }
 0xe36   :  { %10238 = vmatprep.subr.bf16.mxu0 %v13261_v16  ;;  %10270 = vmatprep.subr.bf16.mxu1 %v13270_v50 }
 0xe39   :  { %v11074_v49 = vpop.eup %11073  ;;  %10240 = vmatpush1.bf16.msra.mxu0 %v13267_v21  ;;  %10272 = vmatpush1.bf16.msra.mxu1 %v13276_v45 }
 0xe3a   :  { %v6954_v0 = vmul.f32 %v11074_v49, %v6949_v4  ;;  %10274 = vmatprep.subr.bf16.mxu0 %v13076_v54  ;;  %10306 = vmatprep.subr.bf16.mxu1 %v13086_v18  ;;  %v14430_v4 = vld [vmem:[#allocation44_spill] sm:$0xff] }
 0xe3b   :  { %v14431_v49 = vld [vmem:[#allocation56_spill] sm:$0xff] }
 0xe3c   :  { %7192 = vmatmul.mubr.f32.vlgmr.msra.gmra.mrb[52].mxu0 %v6954_v0  ;;  %7263 = vmatmul.mubr.f32.vlgmr.msra.gmra.mrb[52].mxu1 %v6954_v0  ;;  %v14432_v0 = vld [vmem:[#allocation45_spill] sm:$0xff] }
 0xe3d   :  { %10276 = vmatpush1.bf16.msra.mxu0 %v13078_v53  ;;  %10308 = vmatpush1.bf16.msra.mxu1 %v13088_v34 }
 0xe3e   :  { %10278 = vmatprep.subr.bf16.mxu0 %v13080_v48  ;;  %10310 = vmatprep.subr.bf16.mxu1 %v13094_v20 }
 0xe3f   :  { %7359 = vmatprep.mubr.f32.mxu0 %v14101_v19  ;;  %7430 = vmatprep.mubr.f32.mxu1 %v14101_v19 }
 0xe41   :  { %10280 = vmatpush1.bf16.msra.mxu0 %v14415_v22  ;;  %10312 = vmatpush1.bf16.msra.mxu1 %v14416_v59 }
 0xe42   :  { %10282 = vmatprep.subr.bf16.mxu0 %v14417_v61  ;;  %10314 = vmatprep.subr.bf16.mxu1 %v14418_v26 }
 0xe45   :  { %10284 = vmatpush1.bf16.msra.mxu0 %v14419_v17  ;;  %10316 = vmatpush1.bf16.msra.mxu1 %v14420_v33 }
 0xe46   :  { %10286 = vmatprep.subr.bf16.mxu0 %v14421_v63  ;;  %10318 = vmatprep.subr.bf16.mxu1 %v14422_v32  ;;  %v14433_v32 = vld [vmem:[#allocation41_spill] sm:$0xff]  ;;  %v14443_v63 = vld [vmem:[#allocation51_spill] sm:$0xff] }
 0xe49   :  { %10288 = vmatpush1.bf16.msra.mxu0 %v14423_v46  ;;  %10320 = vmatpush1.bf16.msra.mxu1 %v14424_v36  ;;  %v14434_v46 = vld [vmem:[#allocation71_spill] sm:$0xff] }
 0xe4a   :  { %10290 = vmatprep.subr.bf16.mxu0 %v14425_v47  ;;  %10322 = vmatprep.subr.bf16.mxu1 %v14426_v55  ;;  %v14435_v36 = vld [vmem:[#allocation47_spill] sm:$0xff]  ;;  %v14436_v47 = vld [vmem:[#allocation42_spill] sm:$0xff] }
 0xe4b   :  { %v14437_v55 = vld [vmem:[#allocation43_spill] sm:$0xff] }
 0xe4d   :  { %10292 = vmatpush1.bf16.msra.mxu0 %v14427_v24  ;;  %10324 = vmatpush1.bf16.msra.mxu1 %v14428_v30  ;;  %v14438_v24 = vld [vmem:[#allocation58_spill] sm:$0xff] }
 0xe4e   :  { %10294 = vmatprep.subr.bf16.mxu0 %v14429_v52  ;;  %10326 = vmatprep.subr.bf16.mxu1 %v14430_v4  ;;  %v14439_v30 = vld [vmem:[#allocation50_spill] sm:$0xff]  ;;  %v14440_v52 = vld [vmem:[#allocation40_spill] sm:$0xff]  ;;  %v14441_v4 = vld [vmem:[#allocation67_spill] sm:$0xff] }
 0xe51   :  { %10296 = vmatpush1.bf16.msra.mxu0 %v14431_v49  ;;  %10328 = vmatpush1.bf16.msra.mxu1 %v14432_v0  ;;  %v14442_v49 = vld [vmem:[#allocation76_spill] sm:$0xff] }
 0xe52   :  { %10298 = vmatprep.subr.bf16.mxu0 %v14433_v32  ;;  %10330 = vmatprep.subr.bf16.mxu1 %v14434_v46 }
 0xe55   :  { %10300 = vmatpush1.bf16.msra.mxu0 %v14435_v36  ;;  %10332 = vmatpush1.bf16.msra.mxu1 %v14436_v47 }
 0xe56   :  { %10302 = vmatprep.subr.bf16.mxu0 %v14437_v55  ;;  %10334 = vmatprep.subr.bf16.mxu1 %v14438_v24 }
 0xe59   :  { %10304 = vmatpush1.bf16.msra.mxu0 %v14439_v30  ;;  %10336 = vmatpush1.bf16.msra.mxu1 %v14440_v52 }
 0xe5a   :  { %10338 = vmatprep.subr.bf16.mxu0 %v14441_v4  ;;  %10370 = vmatprep.subr.bf16.mxu1 %v14442_v49 }
 0xeef   :  { %v7025_v0 = vpop.f32.mrb[42].mxu0  ;;  %v7096_v32 = vpop.f32.mrb[42].mxu1 }
 0xef0   :  { %v10633_v46 = vadd.f32 %v7025_v0, %v14443_v63  ;;  %v7027_v33 = vpop.f32.mrb[43].mxu0  ;;  %v7098_v36 = vpop.f32.mrb[43].mxu1  ;;  %v10647_v24 = vadd.f32 %v7096_v32, %v14355_v25 }
 0xef1   :  { %v10634_v47 = vadd.f32 %v7027_v33, %v14354_v13  ;;  %v10648_v52 = vadd.f32 %v7098_v36, %v14356_v39 }
 0xef2   :  { %v7105_v17 = vmul.f32 0.5, %v10633_v46 }
 0xef3   :  { %v7109_v55 = vmul.f32 0.5, %v10634_v47  ;;  %v7114_v4 = vmul.f32 0.5, %v10648_v52 }
 0xef4   :  { %11075 = vtanh.f32 %v7105_v17 }
 0xef5   :  { %11077 = vtanh.f32 %v7109_v55 }
 0xef6   :  { %11079 = vtanh.f32 %v10647_v24 }
 0xef7   :  { %11081 = vtanh.f32 %v7114_v4 }
 0xefe   :  { %v11076_v30 = vpop.eup %11075 }
 0xeff   :  { %v11078_v49 = vpop.eup %11077  ;;  %v7107_v26 = vmul.f32 0.5, %v11076_v30 }
 0xf00   :  { %v7111_v61 = vmul.f32 0.5, %v11078_v49  ;;  %v11080_v63 = vpop.eup %11079 }
 0xf01   :  { %v7108_v0 = vadd.f32 0.5, %v7107_v26  ;;  %v11082_v17 = vpop.eup %11081 }
 0xf02   :  { %v7112_v59 = vadd.f32 0.5, %v7111_v61  ;;  %v7116_v32 = vmul.f32 0.5, %v11082_v17 }
 0xf03   :  { %v7119_v22 = vmul.f32 %v11080_v63, %v7108_v0 }
 0xf04   :  { %v7118_v33 = vmul.f32 %v7112_v59, %v13576_v10  ;;  %v7117_v52 = vadd.f32 0.5, %v7116_v32 }
 0xf06   :  { %v13660_v46 = vadd.f32 %v7119_v22, %v7118_v33 }
 0xf08   :  { %11083 = vtanh.f32 %v13660_v46 }
 0xf0f   :  { %v7193_v47 = vpop.f32.mrb[52].mxu0  ;;  %v7264_v36 = vpop.f32.mrb[52].mxu1 }
 0xf10   :  { %v10657_v55 = vadd.f32 %v7193_v47, %v14327_v2  ;;  %v7195_v24 = vpop.f32.mrb[53].mxu0  ;;  %v7266_v30 = vpop.f32.mrb[53].mxu1  ;;  %v10671_v10 = vadd.f32 %v7264_v36, %v14329_v8 }
 0xf11   :  { %v10658_v26 = vadd.f32 %v7195_v24, %v14328_v27  ;;  %v10672_v22 = vadd.f32 %v7266_v30, %v14386_v62 }
 0xf12   :  { %v11084_v4 = vpop.eup %11083  ;;  %v7273_v61 = vmul.f32 0.5, %v10657_v55 }
 0xf13   :  { %v7122_v63 = vmul.f32 %v11084_v4, %v7117_v52  ;;  %v7277_v49 = vmul.f32 0.5, %v10658_v26  ;;  %v7282_v59 = vmul.f32 0.5, %v10672_v22  ;;  %v14448_v22 = vld [vmem:[#allocation61_spill] sm:$0xff] }
 0xf14   :  { %11085 = vtanh.f32 %v7273_v61 }
 0xf15   :  { %11087 = vtanh.f32 %v7277_v49  ;;  %7360 = vmatmul.mubr.f32.vlgmr.msra.gmra.mrb[44].mxu0 %v7122_v63  ;;  %7431 = vmatmul.mubr.f32.vlgmr.msra.gmra.mrb[44].mxu1 %v7122_v63  ;;  %v14444_v49 = vld [vmem:[#allocation59_spill] sm:$0xff] }
 0xf16   :  { %10340 = vmatpush1.bf16.msra.mxu0 %v14330_v40  ;;  %10372 = vmatpush1.bf16.msra.mxu1 %v14357_v31  ;;  %11089 = vtanh.f32 %v10671_v10  ;;  %v14445_v10 = vld [vmem:[#allocation57_spill] sm:$0xff] }
 0xf17   :  { %10342 = vmatprep.subr.bf16.mxu0 %v14358_v1  ;;  %10374 = vmatprep.subr.bf16.mxu1 %v14359_v38  ;;  %11091 = vtanh.f32 %v7282_v59  ;;  %v14453_v59 = vld [vmem:[#allocation69_spill] sm:$0xff] }
 0xf18   :  { %7527 = vmatprep.mubr.f32.mxu0 %v14101_v19  ;;  %7598 = vmatprep.mubr.f32.mxu1 %v14101_v19 }
 0xf1a   :  { %10344 = vmatpush1.bf16.msra.mxu0 %v14387_v57  ;;  %10376 = vmatpush1.bf16.msra.mxu1 %v14388_v3 }
 0xf1b   :  { %10346 = vmatprep.subr.bf16.mxu0 %v14363_v5  ;;  %10378 = vmatprep.subr.bf16.mxu1 %v14364_v11 }
 0xf1e   :  { %v11086_v0 = vpop.eup %11085  ;;  %10348 = vmatpush1.bf16.msra.mxu0 %v14365_v41  ;;  %10380 = vmatpush1.bf16.msra.mxu1 %v14389_v42 }
 0xf1f   :  { %v11088_v33 = vpop.eup %11087  ;;  %v7275_v17 = vmul.f32 0.5, %v11086_v0  ;;  %10350 = vmatprep.subr.bf16.mxu0 %v14367_v51  ;;  %10382 = vmatprep.subr.bf16.mxu1 %v14368_v35  ;;  %v14454_v0 = vld [vmem:[#allocation68_spill] sm:$0xff] }
 0xf20   :  { %v7279_v32 = vmul.f32 0.5, %v11088_v33  ;;  %v11090_v36 = vpop.eup %11089  ;;  %v14455_v33 = vld [vmem:[#allocation72_spill] sm:$0xff] }
 0xf21   :  { %v7276_v47 = vadd.f32 0.5, %v7275_v17  ;;  %v11092_v26 = vpop.eup %11091  ;;  %v14456_v17 = vld [vmem:[#allocation70_spill] sm:$0xff] }
 0xf22   :  { %v7280_v55 = vadd.f32 0.5, %v7279_v32  ;;  %10352 = vmatpush1.bf16.msra.mxu0 %v14341_v14  ;;  %10384 = vmatpush1.bf16.msra.mxu1 %v14342_v60  ;;  %v14457_v32 = vld [vmem:[#allocation74_spill] sm:$0xff] }
 0xf23   :  { %v7287_v24 = vmul.f32 %v11090_v36, %v7276_v47  ;;  %10354 = vmatprep.subr.bf16.mxu0 %v14343_v12  ;;  %10386 = vmatprep.subr.bf16.mxu1 %v14344_v9  ;;  %v14458_v47 = vld [vmem:[#allocation73_spill] sm:$0xff]  ;;  %v14459_v36 = vld [vmem:[#allocation44_spill] sm:$0xff] }
 0xf24   :  { %v7286_v30 = vmul.f32 %v7280_v55, %v13602_v15  ;;  %v7284_v15 = vmul.f32 0.5, %v11092_v26  ;;  %v14460_v55 = vld [vmem:[#allocation56_spill] sm:$0xff]  ;;  %v14463_v26 = vld [vmem:[#allocation71_spill] sm:$0xff] }
 0xf26   :  { %v13686_v52 = vadd.f32 %v7287_v24, %v7286_v30  ;;  %10356 = vmatpush1.bf16.msra.mxu0 %v14346_v6  ;;  %10388 = vmatpush1.bf16.msra.mxu1 %v14347_v7  ;;  %v7285_v4 = vadd.f32 0.5, %v7284_v15  ;;  %v14461_v24 = vld [vmem:[#allocation45_spill] sm:$0xff]  ;;  %v14464_v15 = vld [vmem:[#allocation47_spill] sm:$0xff] }
 0xf27   :  { %10358 = vmatprep.subr.bf16.mxu0 %v14348_v58  ;;  %10390 = vmatprep.subr.bf16.mxu1 %v13246_v29  ;;  %v14462_v30 = vld [vmem:[#allocation41_spill] sm:$0xff] }
 0xf28   :  { %11093 = vtanh.f32 %v13686_v52 }
 0xf2a   :  { %10360 = vmatpush1.bf16.msra.mxu0 %v13243_v28  ;;  %10392 = vmatpush1.bf16.msra.mxu1 %v13252_v37 }
 0xf2b   :  { %10362 = vmatprep.subr.bf16.mxu0 %v13249_v23  ;;  %10394 = vmatprep.subr.bf16.mxu1 %v13258_v56 }
 0xf2e   :  { %10364 = vmatpush1.bf16.msra.mxu0 %v13255_v44  ;;  %10396 = vmatpush1.bf16.msra.mxu1 %v13264_v43 }
 0xf2f   :  { %10366 = vmatprep.subr.bf16.mxu0 %v13261_v16  ;;  %10398 = vmatprep.subr.bf16.mxu1 %v13270_v50 }
 0xf32   :  { %v11094_v61 = vpop.eup %11093  ;;  %10368 = vmatpush1.bf16.msra.mxu0 %v13267_v21  ;;  %10400 = vmatpush1.bf16.msra.mxu1 %v13276_v45 }
 0xf33   :  { %v7290_v63 = vmul.f32 %v11094_v61, %v7285_v4  ;;  %10402 = vmatprep.subr.bf16.mxu0 %v13076_v54  ;;  %10434 = vmatprep.subr.bf16.mxu1 %v13086_v18  ;;  %v14446_v54 = vld [vmem:[#allocation60_spill] sm:$0xff]  ;;  %v14447_v18 = vld [vmem:[#allocation63_spill] sm:$0xff]  ;;  %v14465_v4 = vld [vmem:[#allocation42_spill] sm:$0xff] }
 0xf34   :  { %v14466_v61 = vld [vmem:[#allocation43_spill] sm:$0xff] }
 0xf35   :  { %7528 = vmatmul.mubr.f32.vlgmr.msra.gmra.mrb[50].mxu0 %v7290_v63  ;;  %7599 = vmatmul.mubr.f32.vlgmr.msra.gmra.mrb[50].mxu1 %v7290_v63  ;;  %v14467_v63 = vld [vmem:[#allocation58_spill] sm:$0xff] }
 0xf36   :  { %10404 = vmatpush1.bf16.msra.mxu0 %v13078_v53  ;;  %10436 = vmatpush1.bf16.msra.mxu1 %v13088_v34  ;;  %v14449_v53 = vld [vmem:[#allocation64_spill] sm:$0xff]  ;;  %v14450_v34 = vld [vmem:[#allocation62_spill] sm:$0xff] }
 0xf37   :  { %10406 = vmatprep.subr.bf16.mxu0 %v13080_v48  ;;  %10438 = vmatprep.subr.bf16.mxu1 %v13094_v20  ;;  %v14451_v48 = vld [vmem:[#allocation66_spill] sm:$0xff]  ;;  %v14452_v20 = vld [vmem:[#allocation65_spill] sm:$0xff] }
 0xf38   :  { %7695 = vmatprep.mubr.f32.mxu0 %v14101_v19  ;;  %7766 = vmatprep.mubr.f32.mxu1 %v14101_v19 }
 0xf3a   :  { %10408 = vmatpush1.bf16.msra.mxu0 %v14444_v49  ;;  %10440 = vmatpush1.bf16.msra.mxu1 %v14445_v10  ;;  %v14468_v49 = vld [vmem:[#allocation50_spill] sm:$0xff]  ;;  %v14469_v10 = vld [vmem:[#allocation40_spill] sm:$0xff] }
 0xf3b   :  { %10410 = vmatprep.subr.bf16.mxu0 %v14446_v54  ;;  %10442 = vmatprep.subr.bf16.mxu1 %v14447_v18  ;;  %v14470_v54 = vld [vmem:[#allocation67_spill] sm:$0xff]  ;;  %v14471_v18 = vld [vmem:[#allocation76_spill] sm:$0xff] }
 0xf3e   :  { %10412 = vmatpush1.bf16.msra.mxu0 %v14448_v22  ;;  %10444 = vmatpush1.bf16.msra.mxu1 %v14449_v53 }
 0xf3f   :  { %10414 = vmatprep.subr.bf16.mxu0 %v14450_v34  ;;  %10446 = vmatprep.subr.bf16.mxu1 %v14451_v48  ;;  %v14472_v34 = vld [vmem:[#allocation51_spill] sm:$0xff] }
 0xf42   :  { %10416 = vmatpush1.bf16.msra.mxu0 %v14452_v20  ;;  %10448 = vmatpush1.bf16.msra.mxu1 %v14453_v59 }
 0xf43   :  { %10418 = vmatprep.subr.bf16.mxu0 %v14454_v0  ;;  %10450 = vmatprep.subr.bf16.mxu1 %v14455_v33 }
 0xf46   :  { %10420 = vmatpush1.bf16.msra.mxu0 %v14456_v17  ;;  %10452 = vmatpush1.bf16.msra.mxu1 %v14457_v32 }
 0xf47   :  { %10422 = vmatprep.subr.bf16.mxu0 %v14458_v47  ;;  %10454 = vmatprep.subr.bf16.mxu1 %v14459_v36 }
 0xf4a   :  { %10424 = vmatpush1.bf16.msra.mxu0 %v14460_v55  ;;  %10456 = vmatpush1.bf16.msra.mxu1 %v14461_v24 }
 0xf4b   :  { %10426 = vmatprep.subr.bf16.mxu0 %v14462_v30  ;;  %10458 = vmatprep.subr.bf16.mxu1 %v14463_v26 }
 0xf4e   :  { %10428 = vmatpush1.bf16.msra.mxu0 %v14464_v15  ;;  %10460 = vmatpush1.bf16.msra.mxu1 %v14465_v4 }
 0xf4f   :  { %10430 = vmatprep.subr.bf16.mxu0 %v14466_v61  ;;  %10462 = vmatprep.subr.bf16.mxu1 %v14467_v63 }
 0xf52   :  { %10432 = vmatpush1.bf16.msra.mxu0 %v14468_v49  ;;  %10464 = vmatpush1.bf16.msra.mxu1 %v14469_v10 }
 0xf53   :  { %10466 = vmatprep.subr.bf16.mxu0 %v14470_v54  ;;  %10498 = vmatprep.subr.bf16.mxu1 %v14471_v18 }
 0xfe8   :  { %v7361_v22 = vpop.f32.mrb[44].mxu0  ;;  %v7432_v53 = vpop.f32.mrb[44].mxu1 }
 0xfe9   :  { %v10635_v48 = vadd.f32 %v7361_v22, %v14472_v34  ;;  %v7363_v20 = vpop.f32.mrb[45].mxu0  ;;  %v7434_v59 = vpop.f32.mrb[45].mxu1  ;;  %v10649_v32 = vadd.f32 %v7432_v53, %v14355_v25 }
 0xfea   :  { %v10636_v0 = vadd.f32 %v7363_v20, %v14354_v13  ;;  %v10650_v47 = vadd.f32 %v7434_v59, %v14356_v39 }
 0xfeb   :  { %v7441_v33 = vmul.f32 0.5, %v10635_v48 }
 0xfec   :  { %v7445_v17 = vmul.f32 0.5, %v10636_v0  ;;  %v7450_v36 = vmul.f32 0.5, %v10650_v47 }
 0xfed   :  { %11095 = vtanh.f32 %v7441_v33 }
 0xfee   :  { %11097 = vtanh.f32 %v7445_v17 }
 0xfef   :  { %11099 = vtanh.f32 %v10649_v32 }
 0xff0   :  { %11101 = vtanh.f32 %v7450_v36 }
 0xff7   :  { %v11096_v55 = vpop.eup %11095 }
 0xff8   :  { %v11098_v24 = vpop.eup %11097  ;;  %v7443_v30 = vmul.f32 0.5, %v11096_v55 }
 0xff9   :  { %v7447_v26 = vmul.f32 0.5, %v11098_v24  ;;  %v11100_v4 = vpop.eup %11099 }
 0xffa   :  { %v7444_v15 = vadd.f32 0.5, %v7443_v30  ;;  %v11102_v54 = vpop.eup %11101 }
 0xffb   :  { %v7448_v61 = vadd.f32 0.5, %v7447_v26  ;;  %v7452_v18 = vmul.f32 0.5, %v11102_v54 }
 0xffc   :  { %v7455_v63 = vmul.f32 %v11100_v4, %v7444_v15 }
 0xffd   :  { %v7454_v49 = vmul.f32 %v7448_v61, %v13660_v46  ;;  %v7453_v0 = vadd.f32 0.5, %v7452_v18 }
 0xfff   :  { %v13744_v10 = vadd.f32 %v7455_v63, %v7454_v49 }
0x1001   :  { %11103 = vtanh.f32 %v13744_v10 }
0x1008   :  { %v7529_v22 = vpop.f32.mrb[50].mxu0  ;;  %v7600_v53 = vpop.f32.mrb[50].mxu1 }
0x1009   :  { %v10655_v48 = vadd.f32 %v7529_v22, %v14327_v2  ;;  %v7531_v20 = vpop.f32.mrb[51].mxu0  ;;  %v7602_v59 = vpop.f32.mrb[51].mxu1  ;;  %v10669_v46 = vadd.f32 %v7600_v53, %v14329_v8 }
0x100a   :  { %v10656_v33 = vadd.f32 %v7531_v20, %v14328_v27  ;;  %v10670_v55 = vadd.f32 %v7602_v59, %v14386_v62 }
0x100b   :  { %v11104_v17 = vpop.eup %11103  ;;  %v7609_v32 = vmul.f32 0.5, %v10655_v48 }
0x100c   :  { %v7458_v47 = vmul.f32 %v11104_v17, %v7453_v0  ;;  %v7613_v36 = vmul.f32 0.5, %v10656_v33 }
0x100d   :  { %11105 = vtanh.f32 %v7609_v32 }
0x100e   :  { %11107 = vtanh.f32 %v7613_v36  ;;  %7696 = vmatmul.mubr.f32.vlgmr.msra.gmra.mrb[46].mxu0 %v7458_v47  ;;  %7767 = vmatmul.mubr.f32.vlgmr.msra.gmra.mrb[46].mxu1 %v7458_v47 }
0x100f   :  { %10468 = vmatpush1.bf16.msra.mxu0 %v14330_v40  ;;  %10500 = vmatpush1.bf16.msra.mxu1 %v14357_v31  ;;  %11109 = vtanh.f32 %v10669_v46  ;;  %v7618_v40 = vmul.f32 0.5, %v10670_v55 }
0x1010   :  { %10470 = vmatprep.subr.bf16.mxu0 %v14358_v1  ;;  %10502 = vmatprep.subr.bf16.mxu1 %v14359_v38 }
0x1011   :  { %7863 = vmatprep.mubr.f32.mxu0 %v14101_v19  ;;  %7934 = vmatprep.mubr.f32.mxu1 %v14101_v19  ;;  %11111 = vtanh.f32 %v7618_v40 }
0x1013   :  { %10472 = vmatpush1.bf16.msra.mxu0 %v14387_v57  ;;  %10504 = vmatpush1.bf16.msra.mxu1 %v14388_v3 }
0x1014   :  { %10474 = vmatprep.subr.bf16.mxu0 %v14363_v5  ;;  %10506 = vmatprep.subr.bf16.mxu1 %v14364_v11 }
0x1017   :  { %v11106_v31 = vpop.eup %11105  ;;  %10476 = vmatpush1.bf16.msra.mxu0 %v14365_v41  ;;  %10508 = vmatpush1.bf16.msra.mxu1 %v14389_v42 }
0x1018   :  { %v11108_v1 = vpop.eup %11107  ;;  %v7611_v38 = vmul.f32 0.5, %v11106_v31  ;;  %10478 = vmatprep.subr.bf16.mxu0 %v14367_v51  ;;  %10510 = vmatprep.subr.bf16.mxu1 %v14368_v35 }
0x1019   :  { %v7615_v19 = vmul.f32 0.5, %v11108_v1  ;;  %v11110_v3 = vpop.eup %11109 }
0x101a   :  { %v7612_v57 = vadd.f32 0.5, %v7611_v38 }
0x101b   :  { %v7616_v24 = vadd.f32 0.5, %v7615_v19  ;;  %10480 = vmatpush1.bf16.msra.mxu0 %v14341_v14  ;;  %10512 = vmatpush1.bf16.msra.mxu1 %v14342_v60  ;;  %v11112_v60 = vpop.eup %11111 }
0x101c   :  { %v7623_v5 = vmul.f32 %v11110_v3, %v7612_v57  ;;  %10482 = vmatprep.subr.bf16.mxu0 %v14343_v12  ;;  %10514 = vmatprep.subr.bf16.mxu1 %v14344_v9  ;;  %v7620_v9 = vmul.f32 0.5, %v11112_v60 }
0x101d   :  { %v7622_v11 = vmul.f32 %v7616_v24, %v13686_v52 }
0x101f   :  { %v13770_v41 = vadd.f32 %v7623_v5, %v7622_v11  ;;  %10484 = vmatpush1.bf16.msra.mxu0 %v14346_v6  ;;  %10516 = vmatpush1.bf16.msra.mxu1 %v14347_v7 }
0x1020   :  { %10486 = vmatprep.subr.bf16.mxu0 %v14348_v58  ;;  %10518 = vmatprep.subr.bf16.mxu1 %v13246_v29  ;;  %v7621_v29 = vadd.f32 0.5, %v7620_v9 }
0x1021   :  { %11113 = vtanh.f32 %v13770_v41 }
0x1023   :  { %10488 = vmatpush1.bf16.msra.mxu0 %v13243_v28  ;;  %10520 = vmatpush1.bf16.msra.mxu1 %v13252_v37 }
0x1024   :  { %10490 = vmatprep.subr.bf16.mxu0 %v13249_v23  ;;  %10522 = vmatprep.subr.bf16.mxu1 %v13258_v56 }
0x1027   :  { %10492 = vmatpush1.bf16.msra.mxu0 %v13255_v44  ;;  %10524 = vmatpush1.bf16.msra.mxu1 %v13264_v43 }
0x1028   :  { %10494 = vmatprep.subr.bf16.mxu0 %v13261_v16  ;;  %10526 = vmatprep.subr.bf16.mxu1 %v13270_v50 }
0x102b   :  { %v11114_v12 = vpop.eup %11113  ;;  %10496 = vmatpush1.bf16.msra.mxu0 %v13267_v21  ;;  %10528 = vmatpush1.bf16.msra.mxu1 %v13276_v45 }
0x102c   :  { %v7626_v28 = vmul.f32 %v11114_v12, %v7621_v29 }
0x102e   :  { %7864 = vmatmul.mubr.f32.vlgmr.msra.gmra.mrb[48].mxu0 %v7626_v28  ;;  %7935 = vmatmul.mubr.f32.vlgmr.msra.gmra.mrb[48].mxu1 %v7626_v28 }
0x10e1   :  { %v7697_v23 = vpop.f32.mrb[46].mxu0  ;;  %v7768_v56 = vpop.f32.mrb[46].mxu1 }
0x10e2   :  { %v10637_v37 = vadd.f32 %v7697_v23, %v14472_v34  ;;  %v7699_v44 = vpop.f32.mrb[47].mxu0  ;;  %v7770_v14 = vpop.f32.mrb[47].mxu1  ;;  %v10651_v50 = vadd.f32 %v7768_v56, %v14355_v25 }
0x10e3   :  { %v10638_v43 = vadd.f32 %v7699_v44, %v14354_v13  ;;  %v10652_v21 = vadd.f32 %v7770_v14, %v14356_v39 }
0x10e4   :  { %v7777_v16 = vmul.f32 0.5, %v10637_v37 }
0x10e5   :  { %v7781_v6 = vmul.f32 0.5, %v10638_v43  ;;  %v7786_v45 = vmul.f32 0.5, %v10652_v21 }
0x10e6   :  { %11115 = vtanh.f32 %v7777_v16 }
0x10e7   :  { %11117 = vtanh.f32 %v7781_v6 }
0x10e8   :  { %11119 = vtanh.f32 %v10651_v50 }
0x10e9   :  { %11121 = vtanh.f32 %v7786_v45 }
0x10f0   :  { %v11116_v7 = vpop.eup %11115 }
0x10f1   :  { %v11118_v58 = vpop.eup %11117  ;;  %v7779_v51 = vmul.f32 0.5, %v11116_v7 }
0x10f2   :  { %v7783_v35 = vmul.f32 0.5, %v11118_v58  ;;  %v11120_v52 = vpop.eup %11119 }
0x10f3   :  { %v7780_v42 = vadd.f32 0.5, %v7779_v51  ;;  %v11122_v25 = vpop.eup %11121 }
0x10f4   :  { %v7784_v34 = vadd.f32 0.5, %v7783_v35  ;;  %v7788_v15 = vmul.f32 0.5, %v11122_v25 }
0x10f5   :  { %v7791_v30 = vmul.f32 %v11120_v52, %v7780_v42 }
0x10f6   :  { %v7790_v13 = vmul.f32 %v7784_v34, %v13744_v10  ;;  %v7789_v54 = vadd.f32 0.5, %v7788_v15 }
0x10f8   :  { %v7792_v26 = vadd.f32 %v7791_v30, %v7790_v13 }
0x10fa   :  { %11123 = vtanh.f32 %v7792_v26  ;;  %7966 = vst [vmem:[#allocation20 + $0x10] sm:$0xff] %v7792_v26 }
0x1101   :  { %v7865_v4 = vpop.f32.mrb[48].mxu0  ;;  %v7936_v61 = vpop.f32.mrb[48].mxu1 }
0x1102   :  { %v10653_v39 = vadd.f32 %v7865_v4, %v14327_v2  ;;  %v7867_v63 = vpop.f32.mrb[49].mxu0  ;;  %v7938_v49 = vpop.f32.mrb[49].mxu1  ;;  %v10667_v10 = vadd.f32 %v7936_v61, %v14329_v8 }
0x1103   :  { %v10654_v18 = vadd.f32 %v7867_v63, %v14328_v27  ;;  %v10668_v59 = vadd.f32 %v7938_v49, %v14386_v62 }
0x1104   :  { %v11124_v22 = vpop.eup %11123  ;;  %v7945_v53 = vmul.f32 0.5, %v10653_v39 }
0x1105   :  { %v13794_v48 = vmul.f32 %v11124_v22, %v7789_v54  ;;  %v7949_v20 = vmul.f32 0.5, %v10654_v18  ;;  %v7954_v2 = vmul.f32 0.5, %v10668_v59 }
0x1106   :  { %11125 = vtanh.f32 %v7945_v53 }
0x1107   :  { %7964 = vst [vmem:[#allocation18 + $0x10] sm:$0xff] %v13794_v48  ;;  %11127 = vtanh.f32 %v7949_v20 }
0x1108   :  { %11129 = vtanh.f32 %v10667_v10 }
0x1109   :  { %11131 = vtanh.f32 %v7954_v2 }
0x1110   :  { %v11126_v0 = vpop.eup %11125 }
0x1111   :  { %v11128_v33 = vpop.eup %11127  ;;  %v7947_v17 = vmul.f32 0.5, %v11126_v0 }
0x1112   :  { %v7951_v32 = vmul.f32 0.5, %v11128_v33  ;;  %v11130_v47 = vpop.eup %11129 }
0x1113   :  { %v7948_v27 = vadd.f32 0.5, %v7947_v17  ;;  %v11132_v8 = vpop.eup %11131 }
0x1114   :  { %v7952_v36 = vadd.f32 0.5, %v7951_v32  ;;  %v7956_v31 = vmul.f32 0.5, %v11132_v8 }
0x1115   :  { %v7959_v46 = vmul.f32 %v11130_v47, %v7948_v27 }
0x1116   :  { %v7958_v55 = vmul.f32 %v7952_v36, %v13770_v41  ;;  %v7957_v1 = vadd.f32 0.5, %v7956_v31 }
0x1118   :  { %v7960_v40 = vadd.f32 %v7959_v46, %v7958_v55 }
0x111a   :  { %11133 = vtanh.f32 %v7960_v40  ;;  %7970 = vst [vmem:[#allocation20 + $0x18] sm:$0xff] %v7960_v40 }
0x1124   :  { %v11134_v38 = vpop.eup %11133 }
0x1125   :  { %v7962_v62 = vmul.f32 %v11134_v38, %v7957_v1 }
0x1127   :  { %7968 = vst [vmem:[#allocation18 + $0x18] sm:$0xff] %v7962_v62 }
0x1128   :  { %11393 = dma.done.wait [#allocation8 + $0x3], 4096 }
0x1129   :  { %11394 = vsyncadd [#allocation8 + $0x3], 4294963200  ;;  %v14473_v19 = vld [vmem:[#allocation96_spill] sm:$0xff]  ;;  %v7990_v57 = vld [vmem:[#allocation7 + $0x80] sm:$0xff]  ;;  %s11414_s16 = smov [#allocation18]  }
0x112a   :  { %8077 = vmatprep.mubr.f32.mxu0 %v14473_v19  ;;  %v7991_v3 = vld [vmem:[#allocation7 + $0x88] sm:$0xff]  ;;  %v7974_v24 = vld [vmem:[#allocation7] sm:$0xff]  ;;  %v7992_v60 = vld [vmem:[#allocation7 + $0x90] sm:$0xff]  ;;  %s8111_s17 = sshll.u32 %s11414_s16, 4  ;;  %s8112_s17 = int_to_ptr.vmem [resolvable:$true] %s8111_s17 }
0x112b   :  { %v10529_v5 = vpack.c.bf16 %v7991_v3, %v7990_v57  ;;  %v7975_v11 = vld [vmem:[#allocation7 + $0x8] sm:$0xff]  ;;  %v7993_v41 = vld [vmem:[#allocation7 + $0x98] sm:$0xff]  ;;  %v7976_v12 = vld [vmem:[#allocation7 + $0x10] sm:$0xff]  ;;  %s11315_s18 = scalar_lea.vmem %s8112_s17, 512  ;;  %p11320_p9 = scmp.lt.s32.totalorder %s8112_s17, %s8112_s17 }
0x112c   :  { %v10531_v9 = vpack.c.bf16 %v7975_v11, %v7974_v24  ;;  %v10533_v29 = vpack.c.bf16 %v7993_v41, %v7992_v60  ;;  %v7977_v28 = vld [vmem:[#allocation7 + $0x18] sm:$0xff]  ;;  %v7994_v23 = vld [vmem:[#allocation7 + $0xa0] sm:$0xff]  ;;  %v7995_v56 = vld [vmem:[#allocation7 + $0xa8] sm:$0xff]  ;;  %p11316_p8 = scmp.ne.s32.totalorder %s8112_s17, %s11315_s18  ;;  %p11321_p10 = scmp.lt.s32.totalorder %s11315_s18, %s11315_s18 }
0x112d   :  { %10530 = vmatprep.subr.bf16.mxu0 %v10529_v5  ;;  %v10535_v37 = vpack.c.bf16 %v7977_v28, %v7976_v12  ;;  %v10537_v44 = vpack.c.bf16 %v7995_v56, %v7994_v23  ;;  %v7978_v14 = vld [vmem:[#allocation7 + $0x20] sm:$0xff]  ;;  %v7979_v43 = vld [vmem:[#allocation7 + $0x28] sm:$0xff]  ;;  %v7996_v16 = vld [vmem:[#allocation7 + $0xb0] sm:$0xff] }
0x112e   :  { %10532 = vmatpush3.bf16.msra.mxu0 %v10531_v9  ;;  %v7997_v6 = vld [vmem:[#allocation7 + $0xb8] sm:$0xff]  ;;  %v10539_v50 = vpack.c.bf16 %v7979_v43, %v7978_v14  ;;  %v7980_v45 = vld [vmem:[#allocation7 + $0x30] sm:$0xff]  ;;  %v7998_v58 = vld [vmem:[#allocation7 + $0xc0] sm:$0xff]  ;;  %p11322_p11 = por %p11321_p10, %p11320_p9 }
0x112f   :  { %10534 = vmatprep.subr.bf16.mxu0 %v10533_v29  ;;  %v10541_v21 = vpack.c.bf16 %v7997_v6, %v7996_v16  ;;  %v7981_v7 = vld [vmem:[#allocation7 + $0x38] sm:$0xff]  ;;  %v7999_v51 = vld [vmem:[#allocation7 + $0xc8] sm:$0xff]  ;;  %v7982_v52 = vld [vmem:[#allocation7 + $0x40] sm:$0xff] }
0x1130   :  { %v10543_v35 = vpack.c.bf16 %v7981_v7, %v7980_v45  ;;  %v10545_v42 = vpack.c.bf16 %v7999_v51, %v7998_v58  ;;  %v7983_v34 = vld [vmem:[#allocation7 + $0x48] sm:$0xff]  ;;  %v8000_v30 = vld [vmem:[#allocation7 + $0xd0] sm:$0xff]  ;;  %v8001_v13 = vld [vmem:[#allocation7 + $0xd8] sm:$0xff]  ;;  %p11323_p12 = pnand %p11322_p11, %p11316_p8 }
0x1131   :  { %v10547_v26 = vpack.c.bf16 %v7983_v34, %v7982_v52  ;;  %v10549_v25 = vpack.c.bf16 %v8001_v13, %v8000_v30  ;;  %v7984_v15 = vld [vmem:[#allocation7 + $0x50] sm:$0xff]  ;;  %v7985_v4 = vld [vmem:[#allocation7 + $0x58] sm:$0xff]  ;;  %v8002_v61 = vld [vmem:[#allocation7 + $0xe0] sm:$0xff] }
0x1132   :  { %10536 = vmatpush3.bf16.msra.mxu0 %v10535_v37  ;;  %v8003_v39 = vld [vmem:[#allocation7 + $0xe8] sm:$0xff]  ;;  %v10551_v63 = vpack.c.bf16 %v7985_v4, %v7984_v15  ;;  %v7986_v54 = vld [vmem:[#allocation7 + $0x60] sm:$0xff]  ;;  %v8004_v22 = vld [vmem:[#allocation7 + $0xf0] sm:$0xff] }
0x1133   :  { %10538 = vmatprep.subr.bf16.mxu0 %v10537_v44  ;;  %v10553_v49 = vpack.c.bf16 %v8003_v39, %v8002_v61  ;;  %v7987_v18 = vld [vmem:[#allocation7 + $0x68] sm:$0xff]  ;;  %v8005_v53 = vld [vmem:[#allocation7 + $0xf8] sm:$0xff]  ;;  %v7988_v59 = vld [vmem:[#allocation7 + $0x70] sm:$0xff] }
0x1134   :  { %v10555_v20 = vpack.c.bf16 %v7987_v18, %v7986_v54  ;;  %v10557_v10 = vpack.c.bf16 %v8005_v53, %v8004_v22  ;;  %v7989_v2 = vld [vmem:[#allocation7 + $0x78] sm:$0xff]  ;;  %v8185_v32 = vld [vmem:[%s13857_s10] ss:$0 sm:$0xff] }
0x1135   :  { %v10559_v0 = vpack.c.bf16 %v7989_v2, %v7988_v59 }
0x1136   :  { %10540 = vmatpush3.bf16.msra.mxu0 %v10539_v50 }
0x1137   :  { %10542 = vmatprep.subr.bf16.mxu0 %v10541_v21 }
0x113a   :  { %10544 = vmatpush3.bf16.msra.mxu0 %v10543_v35 }
0x113b   :  { %10546 = vmatprep.subr.bf16.mxu0 %v10545_v42 }
0x113e   :  { %10548 = vmatpush3.bf16.msra.mxu0 %v10547_v26 }
0x113f   :  { %10550 = vmatprep.subr.bf16.mxu0 %v10549_v25 }
0x1142   :  { %10552 = vmatpush3.bf16.msra.mxu0 %v10551_v63 }
0x1143   :  { %10554 = vmatprep.subr.bf16.mxu0 %v10553_v49 }
0x1146   :  { %10556 = vmatpush3.bf16.msra.mxu0 %v10555_v20 }
0x1147   :  { %10558 = vmatprep.subr.bf16.mxu0 %v10557_v10 }
0x114a   :  { %10560 = vmatpush3.bf16.msra.mxu0 %v10559_v0 }
0x114d   :  { %8078 = vmatmul.mubr.f32.vlgmr.msra.gmra.mrb[64].mxu0 %v13794_v48 }
0x1220   :  { %v8222_v33 = vpop.f32.mrb[64].mxu0 }
0x1221   :  { %v8223_v17 = vpop.f32.mrb[65].mxu0 }
0x1222   :  { %v8224_v27 = vadd.f32 %v8223_v17, %v8222_v33 }
0x1224   :  { %v8080_v47 = vadd.f32 %v8224_v27, %v8185_v32 }
0x1226   :  { %8083 = vmax.xlane.f32.xlu0 %v8080_v47 }
0x12b3   :  { %v8084_v36 = vpop.xlane.xlu0 %8083 }
0x12b4   :  { %v8085_v46 = vsub.f32 %v8080_v47, %v8084_v36 }
0x12b6   :  { %v8086_v55 = vmul.f32 1.442695, %v8085_v46 }
0x12b8   :  { %11135 = vpow2.f32 %v8086_v55 }
0x12c2   :  { %v11136_v40 = vpop.eup %11135 }
0x12c3   :  { %8088 = vadd.xlane.f32.xlu0 %v11136_v40 }
0x12c4   :  { %11326 = shalt.err (!%p11323_p12)
}
0x12c5   :  { %s11327_s21 = scalar_lea.hbm %s13859_s12, 512 }
0x12c6   :  { %p11328_p13 = scmp.ne.s32.totalorder %s13859_s12, %s11327_s21  ;;  %p11331_p0 = scmp.lt.u32.totalorder %s11327_s21, %s13859_s12 }
0x12c8   :  { %p11333_p1 = pnand %p11331_p0, %p11328_p13 }
0x12ca   :  { %11336 = shalt.err (!%p11333_p1)
}
0x12cb   :  { %8117 = dma.vmem_to_hbm [thread:$0]  %s8112_s17, 512, %s13859_s12, [#allocation19], %s11403_s1, %s11403_s1, %s11404_s26  }
0x12cc   :  { %s11415_s2 = smov [#allocation20]  }
0x12cd   :  { %s8123_s19 = sshll.u32 %s11415_s2, 4  ;;  %s8124_s19 = int_to_ptr.vmem [resolvable:$true] %s8123_s19 }
0x12ce   :  { %s11337_s3 = scalar_lea.vmem %s8124_s19, 512  ;;  %p11342_p3 = scmp.lt.s32.totalorder %s8124_s19, %s8124_s19 }
0x12cf   :  { %p11338_p2 = scmp.ne.s32.totalorder %s8124_s19, %s11337_s3  ;;  %p11343_p4 = scmp.lt.s32.totalorder %s11337_s3, %s11337_s3 }
0x12d1   :  { %p11344_p5 = por %p11343_p4, %p11342_p3 }
0x12d3   :  { %p11345_p6 = pnand %p11344_p5, %p11338_p2 }
0x12d5   :  { %11348 = shalt.err (!%p11345_p6)
}
0x12d6   :  { %s11349_s0 = scalar_lea.hbm %s13860_s13, 512 }
0x12d7   :  { %p11350_p7 = scmp.ne.s32.totalorder %s13860_s13, %s11349_s0  ;;  %p11353_p8 = scmp.lt.u32.totalorder %s11349_s0, %s13860_s13 }
0x12d9   :  { %p11355_p9 = pnand %p11353_p8, %p11350_p7 }
0x12db   :  { %11358 = shalt.err (!%p11355_p9)
}
0x12dc   :  { %8129 = dma.vmem_to_hbm [thread:$0]  %s8124_s19, 512, %s13860_s13, [#allocation19], %s11403_s1, %s11403_s1, %s11404_s26  }
0x12dd   :  { %s11416_s14 = smov [#allocation17]  }
0x12de   :  { %s8102_s8 = sshll.u32 %s11416_s14, 4  ;;  %s8103_s8 = int_to_ptr.vmem [resolvable:$true] %s8102_s8 }
0x12df   :  { %s11359_s15 = scalar_lea.vmem %s8103_s8, 128  ;;  %p11364_p11 = scmp.lt.s32.totalorder %s8103_s8, %s8103_s8 }
0x12e0   :  { %p11360_p10 = scmp.ne.s32.totalorder %s8103_s8, %s11359_s15  ;;  %p11365_p12 = scmp.lt.s32.totalorder %s11359_s15, %s11359_s15 }
0x12e2   :  { %p11366_p13 = por %p11365_p12, %p11364_p11 }
0x12e4   :  { %p11367_p0 = pnand %p11366_p13, %p11360_p10 }
0x1350   :  { %v8089_v48 = vpop.xlane.xlu0 %8088 }
0x1351   :  { %11137 = vrcp.f32 %v8089_v48 }
0x135b   :  { %v11138_v8 = vpop.eup %11137 }
0x135c   :  { %v8091_v31 = vmul.f32 %v11138_v8, %v8089_v48 }
0x135e   :  { %v8092_v1 = vsub.f32 2.0, %v8091_v31 }
0x1360   :  { %v8093_v38 = vmul.f32 %v11138_v8, %v8092_v1 }
0x1362   :  { %v8094_v62 = vmul.f32 %v11136_v40, %v8093_v38 }
0x1364   :  { %8095 = vst [vmem:[#allocation17] sm:$0xff] %v8094_v62 }
0x1365   :  { %11370 = shalt.err (!%p11367_p0)
}
0x1366   :  { %s11371_s1 = scalar_lea.hbm %s13858_s11, 128 }
0x1367   :  { %p11372_p1 = scmp.ne.s32.totalorder %s13858_s11, %s11371_s1  ;;  %p11375_p2 = scmp.lt.u32.totalorder %s11371_s1, %s13858_s11 }
0x1369   :  { %p11377_p3 = pnand %p11375_p2, %p11372_p1 }
0x136b   :  { %11380 = shalt.err (!%p11377_p3)
}
0x136c   :  { %8105 = dma.vmem_to_hbm [thread:$0]  %s8103_s8, 128, %s13858_s11, [#allocation11]  }
0x136d   :  { %11395 = dma.done.wait [#allocation11], 128  }
0x136e   :  { %11396 = vsyncadd [#allocation11], 4294967168 }
0x136f   :  { %11397 = dma.done.wait [#allocation19], 1024  }
0x1370   :  { %11398 = vsyncadd [#allocation19], 4294966272 }
0x1371   :  { %8139 = vsyncpa [#allocation10], 1 }
0x1372   :  { %8140 = vsyncpa [#allocation13], 1 }
0x1373   :  { %8141 = vsyncpa [#allocation16], 1 }
0x1374   :  { %8142 = vsyncpa [#allocation11], 1 }
0x1375   :  { %8143 = vsyncpa [#allocation19], 1 }
0x1376   :  { %8144 = vsyncmov [#allocation8] }
0x1379   :  { %s8145_s22 = vpop.sfrf %8144 }
0x137a   :  { %p8186_p4 = scmp.ne.s32.totalorder %s8145_s22, 0 }
0x137c   :  { %8149 = shalt.err (%p8186_p4)  }
0x137d   :  { %8151 = vsyncmov [#allocation8 + $0x1] }
0x1380   :  { %s8152_s24 = vpop.sfrf %8151 }
0x1381   :  { %p8187_p5 = scmp.ne.s32.totalorder %s8152_s24, 0 }
0x1383   :  { %8156 = shalt.err (%p8187_p5)  }
0x1384   :  { %8158 = vsyncmov [#allocation8 + $0x2] }
0x1387   :  { %s8159_s25 = vpop.sfrf %8158 }
0x1388   :  { %p8188_p6 = scmp.ne.s32.totalorder %s8159_s25, 0 }
0x138a   :  { %8163 = shalt.err (%p8188_p6)  }
0x138b   :  { %8165 = vsyncmov [#allocation8 + $0x3] }
0x138e   :  { %s8166_s11 = vpop.sfrf %8165 }
0x138f   :  { %p8189_p7 = scmp.ne.s32.totalorder %s8166_s11, 0 }
0x1391   :  { %8170 = shalt.err (%p8189_p7)  }

</bundles_post_ra>
